<compile_context>
chip_gen: v6e
topology: v6e:2x2x1
jax: 0.10.0
libtpu: 0.0.40
codegen_flags: <defaults>
</compile_context>

<pallas_src>
import functools

import jax
import jax.numpy as jnp
from jax import lax
from jax.experimental import pallas as pl
from jax.experimental.pallas import tpu as pltpu

EPS = 1e-5            # PyTorch BatchNorm2d default
LANES = 128           # TPU lane width
SUBLANES_BF16 = 16    # bf16 sublane tile


def _round_up(x, m):
    return (x + m - 1) // m * m


def _vmem_limit_bytes():
    cap = 64 * 1024 * 1024
    try:
        cap = int(getattr(pltpu.get_tpu_info(), "vmem_capacity_bytes", cap))
    except Exception:
        pass
    # 3/4 of physical, capped at 64 MiB (safe on v7x's 64 MiB VMEM).
    return int(min(cap * 3 // 4, 64 * 1024 * 1024))


# ---------------------------------------------------------------------------
# Kernel A: (optional affine+ReLU prologue) -> 3x3 conv -> per-tile BN partials
# ---------------------------------------------------------------------------
def conv3x3_stats_kernel(x_ref, w3_ref, *args, prologue):
    # x_ref:     (1, H, W, Cp) bf16   activation tile (one image)
    # w3_ref:    (3, 3*Cp, Cp) bf16   weights, kw-major, kh folded into K
    # scale_ref: (1, Cp) f32          [only if prologue] affine applied pre-conv
    # shift_ref: (1, Cp) f32
    # y_ref:     (1, H, W, Cp) bf16   pre-BN conv output
    # stats_ref: (1, 2, Cp) f32       per-tile [sum, centered sum-of-squares]
    # xpad_ref:  (H+2, Wp, Cp) bf16   VMEM scratch holding the zero-padded tile
    if prologue:
        scale_ref, shift_ref, y_ref, stats_ref, xpad_ref = args
    else:
        y_ref, stats_ref, xpad_ref = args

    _, H, W, Cp = x_ref.shape
    Wp = xpad_ref.shape[1]

    # Prologue (previous stage's BN affine + ReLU), cast to bf16 exactly once.
    if prologue:
        a = x_ref[0].astype(jnp.float32) * scale_ref[...] + shift_ref[...]
        a = jnp.maximum(a, 0.0).astype(jnp.bfloat16)
    else:
        a = x_ref[0]                                      # already bf16

    # Zero halo + interior store into the padded bf16 scratch.  The halo is
    # re-zeroed every step (instead of a program_id==0 init) so the batch axis
    # can be sharded across TensorCores safely.
    zrow = jnp.zeros((1, Wp, Cp), jnp.bfloat16)
    zcol = jnp.zeros((H, 1, Cp), jnp.bfloat16)
    xpad_ref[0:1, :, :] = zrow
    xpad_ref[H + 1:H + 2, :, :] = zrow
    xpad_ref[1:H + 1, 0:1, :] = zcol
    xpad_ref[1:H + 1, W + 1:W + 2, :] = zcol
    xpad_ref[1:H + 1, 1:W + 1, :] = a

    # 3x3 conv as 3 MXU matmuls: one sublane-shifted tap load per kw, the 3 kh
    # taps folded into the contraction dim (K = 3*Cp).  Accumulator is a value
    # (no VMEM read-modify-write), initialized from the first matmul.
    acc = None
    for kw in range(3):
        xs = xpad_ref[:, kw:kw + W, :]                    # (H+2, W, Cp) bf16
        patch = jnp.concatenate(
            [xs[0:H], xs[1:H + 1], xs[2:H + 2]], axis=-1)  # (H, W, 3*Cp)
        patch = patch.reshape(H * W, 3 * Cp)
        part = jnp.dot(patch, w3_ref[kw],
                       preferred_element_type=jnp.float32)  # (H*W, Cp) f32
        acc = part if acc is None else acc + part

    # Store pre-BN activations in bf16 (halves inter-stage HBM traffic).  BN
    # partials are computed from the *stored* (bf16-rounded) values so the
    # statistics match exactly what the consuming kernel reads back.
    y_bf = acc.astype(jnp.bfloat16)
    y_ref[0] = y_bf.reshape(H, W, Cp)
    yf = y_bf.astype(jnp.float32)
    s = jnp.sum(yf, axis=0, keepdims=True)                # (1, Cp)
    mean = s * (1.0 / (H * W))
    d = yf - mean
    m2 = jnp.sum(d * d, axis=0, keepdims=True)            # centered sum-sq
    stats_ref[0] = jnp.concatenate([s, m2], axis=0)       # (2, Cp)


# ---------------------------------------------------------------------------
# Kernel B: BN (precomputed scale/shift) -> + residual -> ReLU
# ---------------------------------------------------------------------------
def bn_add_relu_kernel(y_ref, r_ref, scale_ref, shift_ref, o_ref):
    y = y_ref[...].astype(jnp.float32) * scale_ref[...] + shift_ref[...]
    o_ref[...] = jnp.maximum(y + r_ref[...].astype(jnp.float32), 0.0)


# ---------------------------------------------------------------------------
# Wrappers
# ---------------------------------------------------------------------------
def _conv_stage(a, w3, scale, shift, *, prologue, c_real):
    """conv3x3(prologue(a)), stride 1 / pad 1, plus per-tile BN partials."""
    N, H, W, Cp = a.shape
    Wp = _round_up(W + 2, SUBLANES_BF16)
    kern = functools.partial(conv3x3_stats_kernel, prologue=prologue)

    flops = 2 * N * H * W * 9 * c_real * c_real           # real C, not padded
    bytes_accessed = (a.size * 2 + w3.size * 2             # bf16 in
                      + N * H * W * Cp * 2                  # bf16 y out
                      + N * 2 * Cp * 4)                     # f32 stats out

    operands = [a, w3]
    in_specs = [
        pl.BlockSpec((1, H, W, Cp), lambda n: (n, 0, 0, 0)),
        pl.BlockSpec((3, 3 * Cp, Cp), lambda n: (0, 0, 0)),
    ]
    if prologue:
        operands += [scale, shift]
        in_specs += [pl.BlockSpec((1, Cp), lambda n: (0, 0)),
                     pl.BlockSpec((1, Cp), lambda n: (0, 0))]

    y, stats = pl.pallas_call(
        kern,
        out_shape=(jax.ShapeDtypeStruct((N, H, W, Cp), jnp.bfloat16),
                   jax.ShapeDtypeStruct((N, 2, Cp), jnp.float32)),
        grid=(N,),
        in_specs=in_specs,
        out_specs=(
            pl.BlockSpec((1, H, W, Cp), lambda n: (n, 0, 0, 0)),
            pl.BlockSpec((1, 2, Cp), lambda n: (n, 0, 0)),
        ),
        scratch_shapes=[pltpu.VMEM((H + 2, Wp, Cp), jnp.bfloat16)],
        compiler_params=pltpu.CompilerParams(
            dimension_semantics=("parallel",),
            vmem_limit_bytes=_vmem_limit_bytes()),
        cost_estimate=pl.CostEstimate(flops=int(flops), transcendentals=0,
                                      bytes_accessed=int(bytes_accessed)),
    )(*operands)
    return y, stats


def _bn_add_relu(y, resid, scale, shift):
    """BN affine -> + residual -> ReLU, flattened to lane-dense row tiles."""
    N, H, W, Cp = y.shape
    M = N * H * W
    tm = M
    for cand in (2048, 1024, 512, 256, 128, 64, 32, 16, 8):
        if M % cand == 0:
            tm = cand
            break
    out = pl.pallas_call(
        bn_add_relu_kernel,
        out_shape=jax.ShapeDtypeStruct((M, Cp), jnp.float32),
        grid=(M // tm,),
        in_specs=[
            pl.BlockSpec((tm, Cp), lambda i: (i, 0)),
            pl.BlockSpec((tm, Cp), lambda i: (i, 0)),
            pl.BlockSpec((1, Cp), lambda i: (0, 0)),
            pl.BlockSpec((1, Cp), lambda i: (0, 0)),
        ],
        out_specs=pl.BlockSpec((tm, Cp), lambda i: (i, 0)),
        compiler_params=pltpu.CompilerParams(
            dimension_semantics=("parallel",),
            vmem_limit_bytes=_vmem_limit_bytes()),
    )(y.reshape(M, Cp), resid.reshape(M, Cp), scale, shift)
    return out.reshape(N, H, W, Cp)


def _bn_affine(stats, gamma, beta, n_per_tile):
    """Training-mode BN (biased var) from per-tile [sum, centered sum-sq].

    Welford-style combine over equal-size tiles -> per-channel scale/shift.
    Padded channels: sum = m2 = 0 and gamma = 0 -> scale = shift = 0, so the
    padded lanes stay exactly zero (guarded by zero-padded gamma/beta below).
    """
    t = stats.shape[0]
    means = stats[:, 0, :] / n_per_tile                    # (T, Cp)
    mean = jnp.mean(means, axis=0)                         # (Cp,)
    m2 = (jnp.sum(stats[:, 1, :], axis=0)
          + n_per_tile * jnp.sum((means - mean) ** 2, axis=0))
    var = m2 / (t * n_per_tile)
    scale = gamma * lax.rsqrt(var + EPS)
    shift = beta - mean * scale
    return scale.reshape(1, -1), shift.reshape(1, -1)


@jax.jit
def basic_block_forward(x_nchw, params):
    """BasicBlock forward (stride=1, no downsample), training-mode BN.

    x_nchw: (N, C, H, W) float32. Returns (N, C, H, W) float32.
    """
    w1, g1, b1, w2, g2, b2 = params                        # w*: (3,3,Cin,Cout) HWIO
    N, C, H, W = x_nchw.shape
    assert w1.shape[-1] == C and w2.shape[-1] == C
    Cp = _round_up(max(C, LANES), LANES)                   # pad channels to lanes
    n_tile = H * W                                         # elements per stat tile

    x = jnp.transpose(x_nchw, (0, 2, 3, 1))                # NHWC
    xb = jnp.pad(x, ((0, 0), (0, 0), (0, 0), (0, Cp - C))).astype(jnp.bfloat16)

    def pack_w(w):
        # HWIO (3,3,C,C) -> channel-padded, kw-major (3, 3*Cp, Cp) bf16 so the
        # kh taps fold into the matmul contraction dim.
        wp = jnp.pad(w, ((0, 0), (0, 0), (0, Cp - C), (0, Cp - C)))
        return (jnp.transpose(wp, (1, 0, 2, 3))
                .reshape(3, 3 * Cp, Cp).astype(jnp.bfloat16))

    def pad_c(v):   # padded channels get gamma=0 / beta=0 -> outputs stay 0
        return jnp.pad(v.astype(jnp.float32), (0, Cp - C))

    w1p, w2p = pack_w(w1), pack_w(w2)

    # Stage 1: conv1 (no prologue) + BN1 partials.
    y1, s1 = _conv_stage(xb, w1p, None, None, prologue=False, c_real=C)
    scale1, shift1 = _bn_affine(s1, pad_c(g1), pad_c(b1), n_tile)

    # Stage 2: BN1+ReLU fused as conv2's prologue; conv2 + BN2 partials.
    y2, s2 = _conv_stage(y1, w2p, scale1, shift1, prologue=True, c_real=C)
    scale2, shift2 = _bn_affine(s2, pad_c(g2), pad_c(b2), n_tile)

    # Epilogue: BN2 -> + residual -> ReLU.
    out = _bn_add_relu(y2, xb, scale2, shift2)

    return jnp.transpose(out[..., :C], (0, 3, 1, 2))


# ---------------------------------------------------------------------------
# Pure-JAX reference (PyTorch BasicBlock, training-mode BN), mirroring the
# kernel's mixed precision: conv operands bf16, f32 accumulation/BN, and the
# bf16 rounding of the stored inter-stage pre-BN activations.
# ---------------------------------------------------------------------------
def reference_forward(x_nchw, params):
    w1, g1, b1, w2, g2, b2 = params
    x = jnp.transpose(x_nchw, (0, 2, 3, 1))
    xb = x.astype(jnp.bfloat16).astype(jnp.float32)

    def conv(v, w):
        return lax.conv_general_dilated(
            v.astype(jnp.bfloat16), w.astype(jnp.bfloat16),
            window_strides=(1, 1), padding=((1, 1), (1, 1)),
            dimension_numbers=("NHWC", "HWIO", "NHWC"),
            preferred_element_type=jnp.float32)

    def bn(v, g, b):
        mean = v.mean(axis=(0, 1, 2), keepdims=True)
        var = ((v - mean) ** 2).mean(axis=(0, 1, 2), keepdims=True)
        return (v - mean) * lax.rsqrt(var + EPS) * g + b

    y1 = conv(xb, w1).astype(jnp.bfloat16).astype(jnp.float32)
    a1 = jax.nn.relu(bn(y1, g1, b1))
    y2 = conv(a1, w2).astype(jnp.bfloat16).astype(jnp.float32)
    out = jax.nn.relu(bn(y2, g2, b2) + xb)
    return jnp.transpose(out, (0, 3, 1, 2))


def init_params(key, inplanes, planes):
    k = jax.random.split(key, 6)
    # PyTorch conv weight layout is OIHW; generate there, convert to HWIO.
    w1_oihw = jax.random.normal(k[0], (planes, inplanes, 3, 3), jnp.float32) * 0.1
    w2_oihw = jax.random.normal(k[1], (planes, planes, 3, 3), jnp.float32) * 0.1
    w1 = jnp.transpose(w1_oihw, (2, 3, 1, 0))  # HWIO
    w2 = jnp.transpose(w2_oihw, (2, 3, 1, 0))  # HWIO
    g1 = 1.0 + 0.1 * jax.random.normal(k[2], (planes,), jnp.float32)
    b1 = 0.1 * jax.random.normal(k[3], (planes,), jnp.float32)
    g2 = 1.0 + 0.1 * jax.random.normal(k[4], (planes,), jnp.float32)
    b2 = 0.1 * jax.random.normal(k[5], (planes,), jnp.float32)
    return (w1, g1, b1, w2, g2, b2)


if __name__ == "__main__":
    key = jax.random.PRNGKey(0)
    kx, kp = jax.random.split(key)

    # BasicBlock of ResNet layer1: inplanes = planes = 64, stride = 1.
    N, C, H, W = 2, 64, 16, 16
    x = jax.random.normal(kx, (N, C, H, W), jnp.float32)
    params = init_params(kp, C, C)

    out = jax.block_until_ready(basic_block_forward(x, params))
    ref = jax.block_until_ready(reference_forward(x, params))

    assert out.shape == (N, C, H, W)
    err = float(jnp.max(jnp.abs(out - ref)))
    # bf16 inter-stage activations on both sides -> 1% tolerance.
    assert jnp.allclose(out, ref, atol=1e-2, rtol=1e-2), f"max abs diff {err}"
    print("KERNEL_OK")
</pallas_src>

<mosaic_0001>
module attributes {stable_mosaic.version = 11 : i64} {
  func.func @bn_add_relu_kernel(%arg0: i32, %arg1: memref<512x128xbf16, #tpu.memory_space<vmem>>, %arg2: memref<512x128xbf16, #tpu.memory_space<vmem>>, %arg3: memref<1x128xf32, #tpu.memory_space<vmem>>, %arg4: memref<1x128xf32, #tpu.memory_space<vmem>>, %arg5: memref<512x128xf32, #tpu.memory_space<vmem>>) attributes {dimension_semantics = [#tpu.dimension_semantics<parallel>], iteration_bounds = array<i64: 1>, scalar_prefetch = 0 : i64, scratch_operands = 0 : i64, tpu.core_type = #tpu.core_type<tc>, window_params = [{transform_indices = @transform_0, window_bounds = array<i64: 512, 128>}, {transform_indices = @transform_1, window_bounds = array<i64: 512, 128>}, {pipeline_mode = #tpu.pipeline_mode<synchronous>, transform_indices = @transform_2, window_bounds = array<i64: 1, 128>}, {pipeline_mode = #tpu.pipeline_mode<synchronous>, transform_indices = @transform_3, window_bounds = array<i64: 1, 128>}, {transform_indices = @transform_4, window_bounds = array<i64: 512, 128>}]} {
    %c0 = arith.constant 0 : index
    %c0_0 = arith.constant 0 : index
    %0 = vector.load %arg1[%c0, %c0_0] : memref<512x128xbf16, #tpu.memory_space<vmem>>, vector<512x128xbf16>
    %1 = arith.extf %0 : vector<512x128xbf16> to vector<512x128xf32>
    %c0_1 = arith.constant 0 : index
    %c0_2 = arith.constant 0 : index
    %2 = vector.load %arg3[%c0_1, %c0_2] : memref<1x128xf32, #tpu.memory_space<vmem>>, vector<1x128xf32>
    %3 = vector.broadcast %2 : vector<1x128xf32> to vector<512x128xf32>
    %4 = arith.mulf %1, %3 : vector<512x128xf32>
    %c0_3 = arith.constant 0 : index
    %c0_4 = arith.constant 0 : index
    %5 = vector.load %arg4[%c0_3, %c0_4] : memref<1x128xf32, #tpu.memory_space<vmem>>, vector<1x128xf32>
    %6 = vector.broadcast %5 : vector<1x128xf32> to vector<512x128xf32>
    %7 = arith.addf %4, %6 : vector<512x128xf32>
    %c0_5 = arith.constant 0 : index
    %c0_6 = arith.constant 0 : index
    %8 = vector.load %arg2[%c0_5, %c0_6] : memref<512x128xbf16, #tpu.memory_space<vmem>>, vector<512x128xbf16>
    %9 = arith.extf %8 : vector<512x128xbf16> to vector<512x128xf32>
    %10 = arith.addf %7, %9 : vector<512x128xf32>
    %cst = arith.constant 0.000000e+00 : f32
    %11 = vector.broadcast %cst : f32 to vector<512x128xf32>
    %12 = arith.maximumf %10, %11 : vector<512x128xf32>
    %c0_7 = arith.constant 0 : index
    %c0_8 = arith.constant 0 : index
    %13 = vector.load %arg5[%c0_7, %c0_8] : memref<512x128xf32, #tpu.memory_space<vmem>>, vector<512x128xf32>
    tpu.vector_store %arg5[%c0_7, %c0_8], %12 {strides = array<i32>} : memref<512x128xf32, #tpu.memory_space<vmem>>, vector<512x128xf32>,
    return
  }
  func.func @transform_0(%arg0: i32) -> (i32, i32) {
    %c0_i32 = arith.constant 0 : i32
    %c0_i32_0 = arith.constant 0 : i32
    return %arg0, %c0_i32 : i32, i32
  }
  func.func @transform_1(%arg0: i32) -> (i32, i32) {
    %c0_i32 = arith.constant 0 : i32
    %c0_i32_0 = arith.constant 0 : i32
    return %arg0, %c0_i32 : i32, i32
  }
  func.func @transform_2(%arg0: i32) -> (i32, i32) {
    %c0_i32 = arith.constant 0 : i32
    %c0_i32_0 = arith.constant 0 : i32
    %c0_i32_1 = arith.constant 0 : i32
    return %c0_i32, %c0_i32_0 : i32, i32
  }
  func.func @transform_3(%arg0: i32) -> (i32, i32) {
    %c0_i32 = arith.constant 0 : i32
    %c0_i32_0 = arith.constant 0 : i32
    %c0_i32_1 = arith.constant 0 : i32
    return %c0_i32, %c0_i32_0 : i32, i32
  }
  func.func @transform_4(%arg0: i32) -> (i32, i32) {
    %c0_i32 = arith.constant 0 : i32
    %c0_i32_0 = arith.constant 0 : i32
    return %arg0, %c0_i32 : i32, i32
  }
}

module attributes {stable_mosaic.version = 11 : i64} {
  func.func @conv3x3_stats_kernel(%arg0: i32, %arg1: memref<1x16x16x128xbf16, #tpu.memory_space<vmem>>, %arg2: memref<3x384x128xbf16, #tpu.memory_space<vmem>>, %arg3: memref<1x16x16x128xbf16, #tpu.memory_space<vmem>>, %arg4: memref<1x2x128xf32, #tpu.memory_space<vmem>>, %arg5: memref<18x32x128xbf16, #tpu.memory_space<vmem>>) attributes {dimension_semantics = [#tpu.dimension_semantics<parallel>], iteration_bounds = array<i64: 2>, scalar_prefetch = 0 : i64, scratch_operands = 1 : i64, tpu.core_type = #tpu.core_type<tc>, window_params = [{transform_indices = @transform_0, window_bounds = array<i64: 1, 16, 16, 128>}, {pipeline_mode = #tpu.pipeline_mode<synchronous>, transform_indices = @transform_1, window_bounds = array<i64: 3, 384, 128>}, {transform_indices = @transform_2, window_bounds = array<i64: 1, 16, 16, 128>}, {transform_indices = @transform_3, window_bounds = array<i64: 1, 2, 128>}]} {
    %c0 = arith.constant 0 : index
    %c0_0 = arith.constant 0 : index
    %c0_1 = arith.constant 0 : index
    %c0_2 = arith.constant 0 : index
    %0 = vector.load %arg1[%c0, %c0_0, %c0_1, %c0_2] : memref<1x16x16x128xbf16, #tpu.memory_space<vmem>>, vector<1x16x16x128xbf16>
    %1 = vector.shape_cast %0 : vector<1x16x16x128xbf16> to vector<16x16x128xbf16>
    %cst = arith.constant 0.000000e+00 : bf16
    %2 = vector.broadcast %cst : bf16 to vector<1x32x128xbf16>
    %cst_3 = arith.constant 0.000000e+00 : bf16
    %3 = vector.broadcast %cst_3 : bf16 to vector<16x1x128xbf16>
    %c0_4 = arith.constant 0 : index
    %c0_5 = arith.constant 0 : index
    %c0_6 = arith.constant 0 : index
    %4 = vector.load %arg5[%c0_4, %c0_5, %c0_6] : memref<18x32x128xbf16, #tpu.memory_space<vmem>>, vector<1x32x128xbf16>
    tpu.vector_store %arg5[%c0_4, %c0_5, %c0_6], %2 {strides = array<i32>} : memref<18x32x128xbf16, #tpu.memory_space<vmem>>, vector<1x32x128xbf16>,
    %c17 = arith.constant 17 : index
    %c0_7 = arith.constant 0 : index
    %c0_8 = arith.constant 0 : index
    %5 = vector.load %arg5[%c17, %c0_7, %c0_8] : memref<18x32x128xbf16, #tpu.memory_space<vmem>>, vector<1x32x128xbf16>
    tpu.vector_store %arg5[%c17, %c0_7, %c0_8], %2 {strides = array<i32>} : memref<18x32x128xbf16, #tpu.memory_space<vmem>>, vector<1x32x128xbf16>,
    %c1 = arith.constant 1 : index
    %c0_9 = arith.constant 0 : index
    %c0_10 = arith.constant 0 : index
    %6 = vector.load %arg5[%c1, %c0_9, %c0_10] : memref<18x32x128xbf16, #tpu.memory_space<vmem>>, vector<16x1x128xbf16>
    tpu.vector_store %arg5[%c1, %c0_9, %c0_10], %3 {strides = array<i32>} : memref<18x32x128xbf16, #tpu.memory_space<vmem>>, vector<16x1x128xbf16>,
    %c1_11 = arith.constant 1 : index
    %c17_12 = arith.constant 17 : index
    %c0_13 = arith.constant 0 : index
    %7 = vector.load %arg5[%c1_11, %c17_12, %c0_13] : memref<18x32x128xbf16, #tpu.memory_space<vmem>>, vector<16x1x128xbf16>
    tpu.vector_store %arg5[%c1_11, %c17_12, %c0_13], %3 {strides = array<i32>} : memref<18x32x128xbf16, #tpu.memory_space<vmem>>, vector<16x1x128xbf16>,
    %c1_14 = arith.constant 1 : index
    %c1_15 = arith.constant 1 : index
    %c0_16 = arith.constant 0 : index
    %8 = vector.load %arg5[%c1_14, %c1_15, %c0_16] : memref<18x32x128xbf16, #tpu.memory_space<vmem>>, vector<16x16x128xbf16>
    tpu.vector_store %arg5[%c1_14, %c1_15, %c0_16], %1 {strides = array<i32>} : memref<18x32x128xbf16, #tpu.memory_space<vmem>>, vector<16x16x128xbf16>,
    %c0_17 = arith.constant 0 : index
    %c0_18 = arith.constant 0 : index
    %c0_19 = arith.constant 0 : index
    %9 = vector.load %arg5[%c0_17, %c0_18, %c0_19] : memref<18x32x128xbf16, #tpu.memory_space<vmem>>, vector<18x16x128xbf16>
    %10 = vector.extract_strided_slice %9 {offsets = [0, 0, 0], sizes = [16, 16, 128], strides = [1, 1, 1]} : vector<18x16x128xbf16> to vector<16x16x128xbf16>
    %11 = vector.extract_strided_slice %9 {offsets = [1, 0, 0], sizes = [16, 16, 128], strides = [1, 1, 1]} : vector<18x16x128xbf16> to vector<16x16x128xbf16>
    %12 = vector.extract_strided_slice %9 {offsets = [2, 0, 0], sizes = [16, 16, 128], strides = [1, 1, 1]} : vector<18x16x128xbf16> to vector<16x16x128xbf16>
    %13 = tpu.concatenate %10, %11, %12 in 2 : vector<16x16x128xbf16>, vector<16x16x128xbf16>, vector<16x16x128xbf16> -> vector<16x16x384xbf16>
    %14 = vector.shape_cast %13 : vector<16x16x384xbf16> to vector<256x384xbf16>
    %c0_20 = arith.constant 0 : index
    %c0_21 = arith.constant 0 : index
    %c0_22 = arith.constant 0 : index
    %15 = vector.load %arg2[%c0_20, %c0_21, %c0_22] : memref<3x384x128xbf16, #tpu.memory_space<vmem>>, vector<1x384x128xbf16>
    %16 = vector.shape_cast %15 : vector<1x384x128xbf16> to vector<384x128xbf16>
    %cst_23 = arith.constant dense<0.000000e+00> : vector<256x128xf32>
    %17 = tpu.matmul %14, %16, %cst_23 {dimension_numbers = #tpu.dot_dimension_numbers<[1], [0], [0], [1], [0, 0, 1, 1], [], []>} : vector<256x384xbf16>, vector<384x128xbf16>, vector<256x128xf32> -> vector<256x128xf32>
    %c0_24 = arith.constant 0 : index
    %c1_25 = arith.constant 1 : index
    %c0_26 = arith.constant 0 : index
    %18 = vector.load %arg5[%c0_24, %c1_25, %c0_26] : memref<18x32x128xbf16, #tpu.memory_space<vmem>>, vector<18x16x128xbf16>
    %19 = vector.extract_strided_slice %18 {offsets = [0, 0, 0], sizes = [16, 16, 128], strides = [1, 1, 1]} : vector<18x16x128xbf16> to vector<16x16x128xbf16>
    %20 = vector.extract_strided_slice %18 {offsets = [1, 0, 0], sizes = [16, 16, 128], strides = [1, 1, 1]} : vector<18x16x128xbf16> to vector<16x16x128xbf16>
    %21 = vector.extract_strided_slice %18 {offsets = [2, 0, 0], sizes = [16, 16, 128], strides = [1, 1, 1]} : vector<18x16x128xbf16> to vector<16x16x128xbf16>
    %22 = tpu.concatenate %19, %20, %21 in 2 : vector<16x16x128xbf16>, vector<16x16x128xbf16>, vector<16x16x128xbf16> -> vector<16x16x384xbf16>
    %23 = vector.shape_cast %22 : vector<16x16x384xbf16> to vector<256x384xbf16>
    %c1_27 = arith.constant 1 : index
    %c0_28 = arith.constant 0 : index
    %c0_29 = arith.constant 0 : index
    %24 = vector.load %arg2[%c1_27, %c0_28, %c0_29] : memref<3x384x128xbf16, #tpu.memory_space<vmem>>, vector<1x384x128xbf16>
    %25 = vector.shape_cast %24 : vector<1x384x128xbf16> to vector<384x128xbf16>
    %cst_30 = arith.constant dense<0.000000e+00> : vector<256x128xf32>
    %26 = tpu.matmul %23, %25, %cst_30 {dimension_numbers = #tpu.dot_dimension_numbers<[1], [0], [0], [1], [0, 0, 1, 1], [], []>} : vector<256x384xbf16>, vector<384x128xbf16>, vector<256x128xf32> -> vector<256x128xf32>
    %27 = arith.addf %17, %26 : vector<256x128xf32>
    %c0_31 = arith.constant 0 : index
    %c2 = arith.constant 2 : index
    %c0_32 = arith.constant 0 : index
    %28 = vector.load %arg5[%c0_31, %c2, %c0_32] : memref<18x32x128xbf16, #tpu.memory_space<vmem>>, vector<18x16x128xbf16>
    %29 = vector.extract_strided_slice %28 {offsets = [0, 0, 0], sizes = [16, 16, 128], strides = [1, 1, 1]} : vector<18x16x128xbf16> to vector<16x16x128xbf16>
    %30 = vector.extract_strided_slice %28 {offsets = [1, 0, 0], sizes = [16, 16, 128], strides = [1, 1, 1]} : vector<18x16x128xbf16> to vector<16x16x128xbf16>
    %31 = vector.extract_strided_slice %28 {offsets = [2, 0, 0], sizes = [16, 16, 128], strides = [1, 1, 1]} : vector<18x16x128xbf16> to vector<16x16x128xbf16>
    %32 = tpu.concatenate %29, %30, %31 in 2 : vector<16x16x128xbf16>, vector<16x16x128xbf16>, vector<16x16x128xbf16> -> vector<16x16x384xbf16>
    %33 = vector.shape_cast %32 : vector<16x16x384xbf16> to vector<256x384xbf16>
    %c2_33 = arith.constant 2 : index
    %c0_34 = arith.constant 0 : index
    %c0_35 = arith.constant 0 : index
    %34 = vector.load %arg2[%c2_33, %c0_34, %c0_35] : memref<3x384x128xbf16, #tpu.memory_space<vmem>>, vector<1x384x128xbf16>
    %35 = vector.shape_cast %34 : vector<1x384x128xbf16> to vector<384x128xbf16>
    %cst_36 = arith.constant dense<0.000000e+00> : vector<256x128xf32>
    %36 = tpu.matmul %33, %35, %cst_36 {dimension_numbers = #tpu.dot_dimension_numbers<[1], [0], [0], [1], [0, 0, 1, 1], [], []>} : vector<256x384xbf16>, vector<384x128xbf16>, vector<256x128xf32> -> vector<256x128xf32>
    %37 = arith.addf %27, %36 : vector<256x128xf32>
    %38 = arith.truncf %37 : vector<256x128xf32> to vector<256x128xbf16>
    %39 = vector.shape_cast %38 : vector<256x128xbf16> to vector<16x16x128xbf16>
    %c0_37 = arith.constant 0 : index
    %c0_38 = arith.constant 0 : index
    %c0_39 = arith.constant 0 : index
    %c0_40 = arith.constant 0 : index
    %40 = vector.load %arg3[%c0_37, %c0_38, %c0_39, %c0_40] : memref<1x16x16x128xbf16, #tpu.memory_space<vmem>>, vector<1x16x16x128xbf16>
    %41 = vector.shape_cast %40 : vector<1x16x16x128xbf16> to vector<16x16x128xbf16>
    %42 = vector.shape_cast %39 : vector<16x16x128xbf16> to vector<1x16x16x128xbf16>
    tpu.vector_store %arg3[%c0_37, %c0_38, %c0_39, %c0_40], %42 {strides = array<i32>} : memref<1x16x16x128xbf16, #tpu.memory_space<vmem>>, vector<1x16x16x128xbf16>,
    %43 = arith.extf %38 : vector<256x128xbf16> to vector<256x128xf32>
    %cst_41 = arith.constant dense<0.000000e+00> : vector<128xf32>
    %44 = vector.multi_reduction <add>, %43, %cst_41 [0] : vector<256x128xf32> to vector<128xf32>
    %45 = vector.shape_cast %44 : vector<128xf32> to vector<1x128xf32>
    %cst_42 = arith.constant 3.906250e-03 : f32
    %46 = vector.broadcast %cst_42 : f32 to vector<1x128xf32>
    %47 = arith.mulf %45, %46 : vector<1x128xf32>
    %48 = vector.broadcast %47 : vector<1x128xf32> to vector<256x128xf32>
    %49 = arith.subf %43, %48 : vector<256x128xf32>
    %50 = arith.mulf %49, %49 : vector<256x128xf32>
    %cst_43 = arith.constant dense<0.000000e+00> : vector<128xf32>
    %51 = vector.multi_reduction <add>, %50, %cst_43 [0] : vector<256x128xf32> to vector<128xf32>
    %52 = vector.shape_cast %51 : vector<128xf32> to vector<1x128xf32>
    %53 = tpu.concatenate %45, %52 in 0 : vector<1x128xf32>, vector<1x128xf32> -> vector<2x128xf32>
    %c0_44 = arith.constant 0 : index
    %c0_45 = arith.constant 0 : index
    %c0_46 = arith.constant 0 : index
    %54 = vector.load %arg4[%c0_44, %c0_45, %c0_46] : memref<1x2x128xf32, #tpu.memory_space<vmem>>, vector<1x2x128xf32>
    %55 = vector.shape_cast %54 : vector<1x2x128xf32> to vector<2x128xf32>
    %56 = vector.shape_cast %53 : vector<2x128xf32> to vector<1x2x128xf32>
    tpu.vector_store %arg4[%c0_44, %c0_45, %c0_46], %56 {strides = array<i32>} : memref<1x2x128xf32, #tpu.memory_space<vmem>>, vector<1x2x128xf32>,
    return
  }
  func.func @transform_0(%arg0: i32) -> (i32, i32, i32, i32) {
    %c0_i32 = arith.constant 0 : i32
    %c0_i32_0 = arith.constant 0 : i32
    %c0_i32_1 = arith.constant 0 : i32
    %c0_i32_2 = arith.constant 0 : i32
    return %arg0, %c0_i32, %c0_i32_0, %c0_i32_1 : i32, i32, i32, i32
  }
  func.func @transform_1(%arg0: i32) -> (i32, i32, i32) {
    %c0_i32 = arith.constant 0 : i32
    %c0_i32_0 = arith.constant 0 : i32
    %c0_i32_1 = arith.constant 0 : i32
    %c0_i32_2 = arith.constant 0 : i32
    return %c0_i32, %c0_i32_0, %c0_i32_1 : i32, i32, i32
  }
  func.func @transform_2(%arg0: i32) -> (i32, i32, i32, i32) {
    %c0_i32 = arith.constant 0 : i32
    %c0_i32_0 = arith.constant 0 : i32
    %c0_i32_1 = arith.constant 0 : i32
    %c0_i32_2 = arith.constant 0 : i32
    return %arg0, %c0_i32, %c0_i32_0, %c0_i32_1 : i32, i32, i32, i32
  }
  func.func @transform_3(%arg0: i32) -> (i32, i32, i32) {
    %c0_i32 = arith.constant 0 : i32
    %c0_i32_0 = arith.constant 0 : i32
    %c0_i32_1 = arith.constant 0 : i32
    return %arg0, %c0_i32, %c0_i32_0 : i32, i32, i32
  }
}

module attributes {stable_mosaic.version = 11 : i64} {
  func.func @conv3x3_stats_kernel(%arg0: i32, %arg1: memref<1x16x16x128xbf16, #tpu.memory_space<vmem>>, %arg2: memref<3x384x128xbf16, #tpu.memory_space<vmem>>, %arg3: memref<1x128xf32, #tpu.memory_space<vmem>>, %arg4: memref<1x128xf32, #tpu.memory_space<vmem>>, %arg5: memref<1x16x16x128xbf16, #tpu.memory_space<vmem>>, %arg6: memref<1x2x128xf32, #tpu.memory_space<vmem>>, %arg7: memref<18x32x128xbf16, #tpu.memory_space<vmem>>) attributes {dimension_semantics = [#tpu.dimension_semantics<parallel>], iteration_bounds = array<i64: 2>, scalar_prefetch = 0 : i64, scratch_operands = 1 : i64, tpu.core_type = #tpu.core_type<tc>, window_params = [{transform_indices = @transform_0, window_bounds = array<i64: 1, 16, 16, 128>}, {pipeline_mode = #tpu.pipeline_mode<synchronous>, transform_indices = @transform_1, window_bounds = array<i64: 3, 384, 128>}, {pipeline_mode = #tpu.pipeline_mode<synchronous>, transform_indices = @transform_2, window_bounds = array<i64: 1, 128>}, {pipeline_mode = #tpu.pipeline_mode<synchronous>, transform_indices = @transform_3, window_bounds = array<i64: 1, 128>}, {transform_indices = @transform_4, window_bounds = array<i64: 1, 16, 16, 128>}, {transform_indices = @transform_5, window_bounds = array<i64: 1, 2, 128>}]} {
    %c0 = arith.constant 0 : index
    %c0_0 = arith.constant 0 : index
    %c0_1 = arith.constant 0 : index
    %c0_2 = arith.constant 0 : index
    %0 = vector.load %arg1[%c0, %c0_0, %c0_1, %c0_2] : memref<1x16x16x128xbf16, #tpu.memory_space<vmem>>, vector<1x16x16x128xbf16>
    %1 = vector.shape_cast %0 : vector<1x16x16x128xbf16> to vector<16x16x128xbf16>
    %2 = arith.extf %1 : vector<16x16x128xbf16> to vector<16x16x128xf32>
    %c0_3 = arith.constant 0 : index
    %c0_4 = arith.constant 0 : index
    %3 = vector.load %arg3[%c0_3, %c0_4] : memref<1x128xf32, #tpu.memory_space<vmem>>, vector<1x128xf32>
    %4 = vector.shape_cast %3 : vector<1x128xf32> to vector<1x1x128xf32>
    %5 = vector.broadcast %4 : vector<1x1x128xf32> to vector<16x16x128xf32>
    %6 = arith.mulf %2, %5 : vector<16x16x128xf32>
    %c0_5 = arith.constant 0 : index
    %c0_6 = arith.constant 0 : index
    %7 = vector.load %arg4[%c0_5, %c0_6] : memref<1x128xf32, #tpu.memory_space<vmem>>, vector<1x128xf32>
    %8 = vector.shape_cast %7 : vector<1x128xf32> to vector<1x1x128xf32>
    %9 = vector.broadcast %8 : vector<1x1x128xf32> to vector<16x16x128xf32>
    %10 = arith.addf %6, %9 : vector<16x16x128xf32>
    %cst = arith.constant 0.000000e+00 : f32
    %11 = vector.broadcast %cst : f32 to vector<16x16x128xf32>
    %12 = arith.maximumf %10, %11 : vector<16x16x128xf32>
    %13 = arith.truncf %12 : vector<16x16x128xf32> to vector<16x16x128xbf16>
    %cst_7 = arith.constant 0.000000e+00 : bf16
    %14 = vector.broadcast %cst_7 : bf16 to vector<1x32x128xbf16>
    %cst_8 = arith.constant 0.000000e+00 : bf16
    %15 = vector.broadcast %cst_8 : bf16 to vector<16x1x128xbf16>
    %c0_9 = arith.constant 0 : index
    %c0_10 = arith.constant 0 : index
    %c0_11 = arith.constant 0 : index
    %16 = vector.load %arg7[%c0_9, %c0_10, %c0_11] : memref<18x32x128xbf16, #tpu.memory_space<vmem>>, vector<1x32x128xbf16>
    tpu.vector_store %arg7[%c0_9, %c0_10, %c0_11], %14 {strides = array<i32>} : memref<18x32x128xbf16, #tpu.memory_space<vmem>>, vector<1x32x128xbf16>,
    %c17 = arith.constant 17 : index
    %c0_12 = arith.constant 0 : index
    %c0_13 = arith.constant 0 : index
    %17 = vector.load %arg7[%c17, %c0_12, %c0_13] : memref<18x32x128xbf16, #tpu.memory_space<vmem>>, vector<1x32x128xbf16>
    tpu.vector_store %arg7[%c17, %c0_12, %c0_13], %14 {strides = array<i32>} : memref<18x32x128xbf16, #tpu.memory_space<vmem>>, vector<1x32x128xbf16>,
    %c1 = arith.constant 1 : index
    %c0_14 = arith.constant 0 : index
    %c0_15 = arith.constant 0 : index
    %18 = vector.load %arg7[%c1, %c0_14, %c0_15] : memref<18x32x128xbf16, #tpu.memory_space<vmem>>, vector<16x1x128xbf16>
    tpu.vector_store %arg7[%c1, %c0_14, %c0_15], %15 {strides = array<i32>} : memref<18x32x128xbf16, #tpu.memory_space<vmem>>, vector<16x1x128xbf16>,
    %c1_16 = arith.constant 1 : index
    %c17_17 = arith.constant 17 : index
    %c0_18 = arith.constant 0 : index
    %19 = vector.load %arg7[%c1_16, %c17_17, %c0_18] : memref<18x32x128xbf16, #tpu.memory_space<vmem>>, vector<16x1x128xbf16>
    tpu.vector_store %arg7[%c1_16, %c17_17, %c0_18], %15 {strides = array<i32>} : memref<18x32x128xbf16, #tpu.memory_space<vmem>>, vector<16x1x128xbf16>,
    %c1_19 = arith.constant 1 : index
    %c1_20 = arith.constant 1 : index
    %c0_21 = arith.constant 0 : index
    %20 = vector.load %arg7[%c1_19, %c1_20, %c0_21] : memref<18x32x128xbf16, #tpu.memory_space<vmem>>, vector<16x16x128xbf16>
    tpu.vector_store %arg7[%c1_19, %c1_20, %c0_21], %13 {strides = array<i32>} : memref<18x32x128xbf16, #tpu.memory_space<vmem>>, vector<16x16x128xbf16>,
    %c0_22 = arith.constant 0 : index
    %c0_23 = arith.constant 0 : index
    %c0_24 = arith.constant 0 : index
    %21 = vector.load %arg7[%c0_22, %c0_23, %c0_24] : memref<18x32x128xbf16, #tpu.memory_space<vmem>>, vector<18x16x128xbf16>
    %22 = vector.extract_strided_slice %21 {offsets = [0, 0, 0], sizes = [16, 16, 128], strides = [1, 1, 1]} : vector<18x16x128xbf16> to vector<16x16x128xbf16>
    %23 = vector.extract_strided_slice %21 {offsets = [1, 0, 0], sizes = [16, 16, 128], strides = [1, 1, 1]} : vector<18x16x128xbf16> to vector<16x16x128xbf16>
    %24 = vector.extract_strided_slice %21 {offsets = [2, 0, 0], sizes = [16, 16, 128], strides = [1, 1, 1]} : vector<18x16x128xbf16> to vector<16x16x128xbf16>
    %25 = tpu.concatenate %22, %23, %24 in 2 : vector<16x16x128xbf16>, vector<16x16x128xbf16>, vector<16x16x128xbf16> -> vector<16x16x384xbf16>
    %26 = vector.shape_cast %25 : vector<16x16x384xbf16> to vector<256x384xbf16>
    %c0_25 = arith.constant 0 : index
    %c0_26 = arith.constant 0 : index
    %c0_27 = arith.constant 0 : index
    %27 = vector.load %arg2[%c0_25, %c0_26, %c0_27] : memref<3x384x128xbf16, #tpu.memory_space<vmem>>, vector<1x384x128xbf16>
    %28 = vector.shape_cast %27 : vector<1x384x128xbf16> to vector<384x128xbf16>
    %cst_28 = arith.constant dense<0.000000e+00> : vector<256x128xf32>
    %29 = tpu.matmul %26, %28, %cst_28 {dimension_numbers = #tpu.dot_dimension_numbers<[1], [0], [0], [1], [0, 0, 1, 1], [], []>} : vector<256x384xbf16>, vector<384x128xbf16>, vector<256x128xf32> -> vector<256x128xf32>
    %c0_29 = arith.constant 0 : index
    %c1_30 = arith.constant 1 : index
    %c0_31 = arith.constant 0 : index
    %30 = vector.load %arg7[%c0_29, %c1_30, %c0_31] : memref<18x32x128xbf16, #tpu.memory_space<vmem>>, vector<18x16x128xbf16>
    %31 = vector.extract_strided_slice %30 {offsets = [0, 0, 0], sizes = [16, 16, 128], strides = [1, 1, 1]} : vector<18x16x128xbf16> to vector<16x16x128xbf16>
    %32 = vector.extract_strided_slice %30 {offsets = [1, 0, 0], sizes = [16, 16, 128], strides = [1, 1, 1]} : vector<18x16x128xbf16> to vector<16x16x128xbf16>
    %33 = vector.extract_strided_slice %30 {offsets = [2, 0, 0], sizes = [16, 16, 128], strides = [1, 1, 1]} : vector<18x16x128xbf16> to vector<16x16x128xbf16>
    %34 = tpu.concatenate %31, %32, %33 in 2 : vector<16x16x128xbf16>, vector<16x16x128xbf16>, vector<16x16x128xbf16> -> vector<16x16x384xbf16>
    %35 = vector.shape_cast %34 : vector<16x16x384xbf16> to vector<256x384xbf16>
    %c1_32 = arith.constant 1 : index
    %c0_33 = arith.constant 0 : index
    %c0_34 = arith.constant 0 : index
    %36 = vector.load %arg2[%c1_32, %c0_33, %c0_34] : memref<3x384x128xbf16, #tpu.memory_space<vmem>>, vector<1x384x128xbf16>
    %37 = vector.shape_cast %36 : vector<1x384x128xbf16> to vector<384x128xbf16>
    %cst_35 = arith.constant dense<0.000000e+00> : vector<256x128xf32>
    %38 = tpu.matmul %35, %37, %cst_35 {dimension_numbers = #tpu.dot_dimension_numbers<[1], [0], [0], [1], [0, 0, 1, 1], [], []>} : vector<256x384xbf16>, vector<384x128xbf16>, vector<256x128xf32> -> vector<256x128xf32>
    %39 = arith.addf %29, %38 : vector<256x128xf32>
    %c0_36 = arith.constant 0 : index
    %c2 = arith.constant 2 : index
    %c0_37 = arith.constant 0 : index
    %40 = vector.load %arg7[%c0_36, %c2, %c0_37] : memref<18x32x128xbf16, #tpu.memory_space<vmem>>, vector<18x16x128xbf16>
    %41 = vector.extract_strided_slice %40 {offsets = [0, 0, 0], sizes = [16, 16, 128], strides = [1, 1, 1]} : vector<18x16x128xbf16> to vector<16x16x128xbf16>
    %42 = vector.extract_strided_slice %40 {offsets = [1, 0, 0], sizes = [16, 16, 128], strides = [1, 1, 1]} : vector<18x16x128xbf16> to vector<16x16x128xbf16>
    %43 = vector.extract_strided_slice %40 {offsets = [2, 0, 0], sizes = [16, 16, 128], strides = [1, 1, 1]} : vector<18x16x128xbf16> to vector<16x16x128xbf16>
    %44 = tpu.concatenate %41, %42, %43 in 2 : vector<16x16x128xbf16>, vector<16x16x128xbf16>, vector<16x16x128xbf16> -> vector<16x16x384xbf16>
    %45 = vector.shape_cast %44 : vector<16x16x384xbf16> to vector<256x384xbf16>
    %c2_38 = arith.constant 2 : index
    %c0_39 = arith.constant 0 : index
    %c0_40 = arith.constant 0 : index
    %46 = vector.load %arg2[%c2_38, %c0_39, %c0_40] : memref<3x384x128xbf16, #tpu.memory_space<vmem>>, vector<1x384x128xbf16>
    %47 = vector.shape_cast %46 : vector<1x384x128xbf16> to vector<384x128xbf16>
    %cst_41 = arith.constant dense<0.000000e+00> : vector<256x128xf32>
    %48 = tpu.matmul %45, %47, %cst_41 {dimension_numbers = #tpu.dot_dimension_numbers<[1], [0], [0], [1], [0, 0, 1, 1], [], []>} : vector<256x384xbf16>, vector<384x128xbf16>, vector<256x128xf32> -> vector<256x128xf32>
    %49 = arith.addf %39, %48 : vector<256x128xf32>
    %50 = arith.truncf %49 : vector<256x128xf32> to vector<256x128xbf16>
    %51 = vector.shape_cast %50 : vector<256x128xbf16> to vector<16x16x128xbf16>
    %c0_42 = arith.constant 0 : index
    %c0_43 = arith.constant 0 : index
    %c0_44 = arith.constant 0 : index
    %c0_45 = arith.constant 0 : index
    %52 = vector.load %arg5[%c0_42, %c0_43, %c0_44, %c0_45] : memref<1x16x16x128xbf16, #tpu.memory_space<vmem>>, vector<1x16x16x128xbf16>
    %53 = vector.shape_cast %52 : vector<1x16x16x128xbf16> to vector<16x16x128xbf16>
    %54 = vector.shape_cast %51 : vector<16x16x128xbf16> to vector<1x16x16x128xbf16>
    tpu.vector_store %arg5[%c0_42, %c0_43, %c0_44, %c0_45], %54 {strides = array<i32>} : memref<1x16x16x128xbf16, #tpu.memory_space<vmem>>, vector<1x16x16x128xbf16>,
    %55 = arith.extf %50 : vector<256x128xbf16> to vector<256x128xf32>
    %cst_46 = arith.constant dense<0.000000e+00> : vector<128xf32>
    %56 = vector.multi_reduction <add>, %55, %cst_46 [0] : vector<256x128xf32> to vector<128xf32>
    %57 = vector.shape_cast %56 : vector<128xf32> to vector<1x128xf32>
    %cst_47 = arith.constant 3.906250e-03 : f32
    %58 = vector.broadcast %cst_47 : f32 to vector<1x128xf32>
    %59 = arith.mulf %57, %58 : vector<1x128xf32>
    %60 = vector.broadcast %59 : vector<1x128xf32> to vector<256x128xf32>
    %61 = arith.subf %55, %60 : vector<256x128xf32>
    %62 = arith.mulf %61, %61 : vector<256x128xf32>
    %cst_48 = arith.constant dense<0.000000e+00> : vector<128xf32>
    %63 = vector.multi_reduction <add>, %62, %cst_48 [0] : vector<256x128xf32> to vector<128xf32>
    %64 = vector.shape_cast %63 : vector<128xf32> to vector<1x128xf32>
    %65 = tpu.concatenate %57, %64 in 0 : vector<1x128xf32>, vector<1x128xf32> -> vector<2x128xf32>
    %c0_49 = arith.constant 0 : index
    %c0_50 = arith.constant 0 : index
    %c0_51 = arith.constant 0 : index
    %66 = vector.load %arg6[%c0_49, %c0_50, %c0_51] : memref<1x2x128xf32, #tpu.memory_space<vmem>>, vector<1x2x128xf32>
    %67 = vector.shape_cast %66 : vector<1x2x128xf32> to vector<2x128xf32>
    %68 = vector.shape_cast %65 : vector<2x128xf32> to vector<1x2x128xf32>
    tpu.vector_store %arg6[%c0_49, %c0_50, %c0_51], %68 {strides = array<i32>} : memref<1x2x128xf32, #tpu.memory_space<vmem>>, vector<1x2x128xf32>,
    return
  }
  func.func @transform_0(%arg0: i32) -> (i32, i32, i32, i32) {
    %c0_i32 = arith.constant 0 : i32
    %c0_i32_0 = arith.constant 0 : i32
    %c0_i32_1 = arith.constant 0 : i32
    %c0_i32_2 = arith.constant 0 : i32
    return %arg0, %c0_i32, %c0_i32_0, %c0_i32_1 : i32, i32, i32, i32
  }
  func.func @transform_1(%arg0: i32) -> (i32, i32, i32) {
    %c0_i32 = arith.constant 0 : i32
    %c0_i32_0 = arith.constant 0 : i32
    %c0_i32_1 = arith.constant 0 : i32
    %c0_i32_2 = arith.constant 0 : i32
    return %c0_i32, %c0_i32_0, %c0_i32_1 : i32, i32, i32
  }
  func.func @transform_2(%arg0: i32) -> (i32, i32) {
    %c0_i32 = arith.constant 0 : i32
    %c0_i32_0 = arith.constant 0 : i32
    %c0_i32_1 = arith.constant 0 : i32
    return %c0_i32, %c0_i32_0 : i32, i32
  }
  func.func @transform_3(%arg0: i32) -> (i32, i32) {
    %c0_i32 = arith.constant 0 : i32
    %c0_i32_0 = arith.constant 0 : i32
    %c0_i32_1 = arith.constant 0 : i32
    return %c0_i32, %c0_i32_0 : i32, i32
  }
  func.func @transform_4(%arg0: i32) -> (i32, i32, i32, i32) {
    %c0_i32 = arith.constant 0 : i32
    %c0_i32_0 = arith.constant 0 : i32
    %c0_i32_1 = arith.constant 0 : i32
    %c0_i32_2 = arith.constant 0 : i32
    return %arg0, %c0_i32, %c0_i32_0, %c0_i32_1 : i32, i32, i32, i32
  }
  func.func @transform_5(%arg0: i32) -> (i32, i32, i32) {
    %c0_i32 = arith.constant 0 : i32
    %c0_i32_0 = arith.constant 0 : i32
    %c0_i32_1 = arith.constant 0 : i32
    return %arg0, %c0_i32, %c0_i32_0 : i32, i32, i32
  }
}

</mosaic_0001>

<bundles_post_ra>
// kernel: basic_block_forward.5
= control target key start
LH: loop header
LB: loop body
LE: loop exit
PB: predicated region body
PF: predicated region fallthrough
CT: control target
= control target key end

     0   :  { %s1478_s0 = inlined_call_operand.vmem [shape: bf16[512,128], index: 0, kind: input, shape index: {}]   ;;  %s1479_s1 = inlined_call_operand.vmem [shape: bf16[512,128], index: 1, kind: input, shape index: {}]   ;;  %s1480_s2 = inlined_call_operand.vmem [shape: f32[1,128], index: 2, kind: input, shape index: {}]   ;;  %s1481_s3 = inlined_call_operand.vmem [shape: f32[1,128], index: 3, kind: input, shape index: {}]   ;;  %s1482_s4 = inlined_call_operand.vmem [shape: f32[512,128], index: 4, kind: output, shape index: {}]  }
   0x1   :  { %v614_v0 = vld [vmem:[%s1478_s0] sm:$0xff]   ;;  %v869_v5 = vld [vmem:[%s1478_s0 + $0x8] sm:$0xff]   ;;  %v870_v12 = vld [vmem:[%s1478_s0 + $0x10] sm:$0xff]  }
   0x2   :  { %v962_v1 = vld [vmem:[%s1480_s2] ss:$0 sm:$0xff]  ;;  %v615_v2 = vunpack.c.l.bf16 %v614_v0  ;;  %v616_v4 = vunpack.c.h.bf16 %v614_v0  ;;  %v900_v6 = vld [vmem:[%s1479_s1 + $0x8] sm:$0xff]   ;;  %v619_v10 = vunpack.c.l.bf16 %v869_v5  ;;  %v901_v13 = vld [vmem:[%s1479_s1 + $0x10] sm:$0xff]   ;;  %v620_v16 = vunpack.c.h.bf16 %v869_v5 }
   0x3   :  { %v742_v3 = vld [vmem:[%s1479_s1] sm:$0xff]   ;;  %v747_v11 = vunpack.c.l.bf16 %v900_v6  ;;  %v748_v17 = vunpack.c.h.bf16 %v900_v6  ;;  %v871_v18 = vld [vmem:[%s1478_s0 + $0x18] sm:$0xff]   ;;  %v623_v20 = vunpack.c.l.bf16 %v870_v12  ;;  %v751_v21 = vunpack.c.l.bf16 %v901_v13  ;;  %v873_v54 = vld [vmem:[%s1478_s0 + $0x28] sm:$0xff]  }
   0x4   :  { %v976_v7 = vld [vmem:[%s1481_s3] ss:$0 sm:$0xff]  ;;  %v743_v8 = vunpack.c.l.bf16 %v742_v3  ;;  %v744_v9 = vunpack.c.h.bf16 %v742_v3  ;;  %v152_v14 = vmul.f32 %v615_v2, %v962_v1  ;;  %v153_v15 = vmul.f32 %v616_v4, %v962_v1  ;;  %v902_v23 = vld [vmem:[%s1479_s1 + $0x18] sm:$0xff]   ;;  %v904_v55 = vld [vmem:[%s1479_s1 + $0x28] sm:$0xff]  }
   0x5   :  { %v154_v19 = vmul.f32 %v619_v10, %v962_v1  ;;  %v624_v22 = vunpack.c.h.bf16 %v870_v12  ;;  %v155_v26 = vmul.f32 %v620_v16, %v962_v1  ;;  %v752_v27 = vunpack.c.h.bf16 %v901_v13  ;;  %v872_v40 = vld [vmem:[%s1478_s0 + $0x20] sm:$0xff]   ;;  %v874_v0 = vld [vmem:[%s1478_s0 + $0x30] sm:$0xff]   ;;  %v875_v16 = vld [vmem:[%s1478_s0 + $0x38] sm:$0xff]  }
   0x6   :  { %v223_v24 = vadd.f32 %v976_v7, %v152_v14  ;;  %v224_v25 = vadd.f32 %v976_v7, %v153_v15  ;;  %v156_v29 = vmul.f32 %v623_v20, %v962_v1  ;;  %v627_v31 = vunpack.c.l.bf16 %v871_v18  ;;  %v903_v45 = vld [vmem:[%s1479_s1 + $0x20] sm:$0xff]   ;;  %v905_v2 = vld [vmem:[%s1479_s1 + $0x30] sm:$0xff]  }
   0x7   :  { %v225_v28 = vadd.f32 %v976_v7, %v154_v19  ;;  %v157_v30 = vmul.f32 %v624_v22, %v962_v1  ;;  %v226_v34 = vadd.f32 %v976_v7, %v155_v26  ;;  %v755_v35 = vunpack.c.l.bf16 %v902_v23 }
   0x8   :  { %v415_v32 = vadd.f32 %v743_v8, %v223_v24  ;;  %v416_v33 = vadd.f32 %v744_v9, %v224_v25  ;;  %v227_v37 = vadd.f32 %v976_v7, %v156_v29  ;;  %v158_v39 = vmul.f32 %v627_v31, %v962_v1 }
   0x9   :  { %v417_v36 = vadd.f32 %v747_v11, %v225_v28  ;;  %v228_v38 = vadd.f32 %v976_v7, %v157_v30  ;;  %v418_v43 = vadd.f32 %v748_v17, %v226_v34  ;;  %v628_v44 = vunpack.c.h.bf16 %v871_v18  ;;  %v876_v34 = vld [vmem:[%s1478_s0 + $0x40] sm:$0xff]  }
   0xa   :  { %v479_v41 = vmax.f32 %v415_v32, 0.0  ;;  %v480_v42 = vmax.f32 %v416_v33, 0.0  ;;  %v419_v47 = vadd.f32 %v751_v21, %v227_v37  ;;  %v229_v49 = vadd.f32 %v976_v7, %v158_v39  ;;  %v906_v21 = vld [vmem:[%s1479_s1 + $0x38] sm:$0xff]   ;;  %v907_v39 = vld [vmem:[%s1479_s1 + $0x40] sm:$0xff]  }
   0xb   :  { %v481_v46 = vmax.f32 %v417_v36, 0.0  ;;  %v420_v48 = vadd.f32 %v752_v27, %v228_v38  ;;  %v482_v50 = vmax.f32 %v418_v43, 0.0  ;;  %v159_v51 = vmul.f32 %v628_v44, %v962_v1 }
   0xc   :  { %543 = vst [vmem:[%s1482_s4] sm:$0xff] %v479_v41  ;;  %544 = vst [vmem:[%s1482_s4 + $0x8] sm:$0xff] %v480_v42  ;;  %v756_v52 = vunpack.c.h.bf16 %v902_v23  ;;  %v631_v53 = vunpack.c.l.bf16 %v872_v40  ;;  %v483_v56 = vmax.f32 %v419_v47, 0.0  ;;  %v421_v58 = vadd.f32 %v755_v35, %v229_v49  ;;  %v908_v49 = vld [vmem:[%s1479_s1 + $0x48] sm:$0xff]  }
   0xd   :  { %545 = vst [vmem:[%s1482_s4 + $0x10] sm:$0xff] %v481_v46  ;;  %v484_v57 = vmax.f32 %v420_v48, 0.0  ;;  %v759_v59 = vunpack.c.l.bf16 %v903_v45  ;;  %546 = vst [vmem:[%s1482_s4 + $0x18] sm:$0xff] %v482_v50  ;;  %v230_v60 = vadd.f32 %v976_v7, %v159_v51  ;;  %v632_v62 = vunpack.c.h.bf16 %v872_v40  ;;  %v877_v48 = vld [vmem:[%s1478_s0 + $0x48] sm:$0xff]  }
   0xe   :  { %v160_v61 = vmul.f32 %v631_v53, %v962_v1  ;;  %v760_v63 = vunpack.c.h.bf16 %v903_v45  ;;  %547 = vst [vmem:[%s1482_s4 + $0x20] sm:$0xff] %v483_v56  ;;  %v485_v3 = vmax.f32 %v421_v58, 0.0  ;;  %v635_v4 = vunpack.c.l.bf16 %v873_v54  ;;  %v878_v58 = vld [vmem:[%s1478_s0 + $0x50] sm:$0xff]  }
   0xf   :  { %548 = vst [vmem:[%s1482_s4 + $0x28] sm:$0xff] %v484_v57  ;;  %v763_v5 = vunpack.c.l.bf16 %v904_v55  ;;  %v636_v6 = vunpack.c.h.bf16 %v873_v54  ;;  %v422_v8 = vadd.f32 %v756_v52, %v230_v60  ;;  %v161_v10 = vmul.f32 %v632_v62, %v962_v1 }
  0x10   :  { %v231_v9 = vadd.f32 %v976_v7, %v160_v61  ;;  %v764_v11 = vunpack.c.h.bf16 %v904_v55  ;;  %549 = vst [vmem:[%s1482_s4 + $0x30] sm:$0xff] %v485_v3  ;;  %v162_v12 = vmul.f32 %v635_v4, %v962_v1  ;;  %v639_v14 = vunpack.c.l.bf16 %v874_v0 }
  0x11   :  { %v163_v13 = vmul.f32 %v636_v6, %v962_v1  ;;  %v767_v15 = vunpack.c.l.bf16 %v905_v2  ;;  %v486_v17 = vmax.f32 %v422_v8, 0.0  ;;  %v232_v19 = vadd.f32 %v976_v7, %v161_v10  ;;  %v879_v10 = vld [vmem:[%s1478_s0 + $0x58] sm:$0xff]  }
  0x12   :  { %v423_v18 = vadd.f32 %v759_v59, %v231_v9  ;;  %v640_v20 = vunpack.c.h.bf16 %v874_v0  ;;  %v233_v22 = vadd.f32 %v976_v7, %v162_v12  ;;  %v164_v24 = vmul.f32 %v639_v14, %v962_v1 }
  0x13   :  { %v234_v23 = vadd.f32 %v976_v7, %v163_v13  ;;  %v768_v25 = vunpack.c.h.bf16 %v905_v2  ;;  %550 = vst [vmem:[%s1482_s4 + $0x38] sm:$0xff] %v486_v17  ;;  %v424_v27 = vadd.f32 %v760_v63, %v232_v19  ;;  %v643_v29 = vunpack.c.l.bf16 %v875_v16  ;;  %v909_v63 = vld [vmem:[%s1479_s1 + $0x50] sm:$0xff]   ;;  %v910_v19 = vld [vmem:[%s1479_s1 + $0x58] sm:$0xff]  }
  0x14   :  { %v487_v26 = vmax.f32 %v423_v18, 0.0  ;;  %v165_v28 = vmul.f32 %v640_v20, %v962_v1  ;;  %v425_v30 = vadd.f32 %v763_v5, %v233_v22  ;;  %v235_v32 = vadd.f32 %v976_v7, %v164_v24 }
  0x15   :  { %v426_v31 = vadd.f32 %v764_v11, %v234_v23  ;;  %v771_v33 = vunpack.c.l.bf16 %v906_v21  ;;  %v488_v35 = vmax.f32 %v424_v27, 0.0  ;;  %v166_v37 = vmul.f32 %v643_v29, %v962_v1 }
  0x16   :  { %551 = vst [vmem:[%s1482_s4 + $0x40] sm:$0xff] %v487_v26  ;;  %v236_v36 = vadd.f32 %v976_v7, %v165_v28  ;;  %v644_v38 = vunpack.c.h.bf16 %v875_v16  ;;  %v489_v40 = vmax.f32 %v425_v30, 0.0  ;;  %v427_v42 = vadd.f32 %v767_v15, %v235_v32  ;;  %v880_v28 = vld [vmem:[%s1478_s0 + $0x60] sm:$0xff]  }
  0x17   :  { %v490_v41 = vmax.f32 %v426_v31, 0.0  ;;  %v772_v43 = vunpack.c.h.bf16 %v906_v21  ;;  %552 = vst [vmem:[%s1482_s4 + $0x48] sm:$0xff] %v488_v35  ;;  %v237_v45 = vadd.f32 %v976_v7, %v166_v37  ;;  %v647_v47 = vunpack.c.l.bf16 %v876_v34 }
  0x18   :  { %v428_v44 = vadd.f32 %v768_v25, %v236_v36  ;;  %v167_v46 = vmul.f32 %v644_v38, %v962_v1  ;;  %553 = vst [vmem:[%s1482_s4 + $0x50] sm:$0xff] %v489_v40  ;;  %v491_v50 = vmax.f32 %v427_v42, 0.0  ;;  %v775_v51 = vunpack.c.l.bf16 %v907_v39  ;;  %v881_v42 = vld [vmem:[%s1478_s0 + $0x68] sm:$0xff]  }
  0x19   :  { %554 = vst [vmem:[%s1482_s4 + $0x58] sm:$0xff] %v490_v41  ;;  %v648_v52 = vunpack.c.h.bf16 %v876_v34  ;;  %v776_v53 = vunpack.c.h.bf16 %v907_v39  ;;  %v429_v55 = vadd.f32 %v771_v33, %v237_v45  ;;  %v168_v57 = vmul.f32 %v647_v47, %v962_v1  ;;  %v911_v33 = vld [vmem:[%s1479_s1 + $0x60] sm:$0xff]  }
  0x1a   :  { %v492_v54 = vmax.f32 %v428_v44, 0.0  ;;  %v238_v56 = vadd.f32 %v976_v7, %v167_v46  ;;  %555 = vst [vmem:[%s1482_s4 + $0x60] sm:$0xff] %v491_v50  ;;  %v651_v60 = vunpack.c.l.bf16 %v877_v48  ;;  %v779_v61 = vunpack.c.l.bf16 %v908_v49 }
  0x1b   :  { %v169_v59 = vmul.f32 %v648_v52, %v962_v1  ;;  %v652_v62 = vunpack.c.h.bf16 %v877_v48  ;;  %v493_v0 = vmax.f32 %v429_v55, 0.0  ;;  %v239_v3 = vadd.f32 %v976_v7, %v168_v57  ;;  %v882_v52 = vld [vmem:[%s1478_s0 + $0x70] sm:$0xff]  }
  0x1c   :  { %556 = vst [vmem:[%s1482_s4 + $0x68] sm:$0xff] %v492_v54  ;;  %v430_v2 = vadd.f32 %v772_v43, %v238_v56  ;;  %v780_v4 = vunpack.c.h.bf16 %v908_v49  ;;  %v170_v6 = vmul.f32 %v651_v60, %v962_v1  ;;  %v655_v9 = vunpack.c.l.bf16 %v878_v58  ;;  %v912_v43 = vld [vmem:[%s1479_s1 + $0x68] sm:$0xff]   ;;  %v913_v57 = vld [vmem:[%s1479_s1 + $0x70] sm:$0xff]  }
  0x1d   :  { %v240_v5 = vadd.f32 %v976_v7, %v169_v59  ;;  %v171_v8 = vmul.f32 %v652_v62, %v962_v1  ;;  %557 = vst [vmem:[%s1482_s4 + $0x70] sm:$0xff] %v493_v0  ;;  %v431_v12 = vadd.f32 %v775_v51, %v239_v3  ;;  %v783_v13 = vunpack.c.l.bf16 %v909_v63  ;;  %v883_v3 = vld [vmem:[%s1478_s0 + $0x78] sm:$0xff]  }
  0x1e   :  { %v494_v11 = vmax.f32 %v430_v2, 0.0  ;;  %v656_v14 = vunpack.c.h.bf16 %v878_v58  ;;  %v241_v16 = vadd.f32 %v976_v7, %v170_v6  ;;  %v172_v18 = vmul.f32 %v655_v9, %v962_v1 }
  0x1f   :  { %v432_v15 = vadd.f32 %v776_v53, %v240_v5  ;;  %v242_v17 = vadd.f32 %v976_v7, %v171_v8  ;;  %v495_v20 = vmax.f32 %v431_v12, 0.0  ;;  %v784_v22 = vunpack.c.h.bf16 %v909_v63 }
  0x20   :  { %558 = vst [vmem:[%s1482_s4 + $0x78] sm:$0xff] %v494_v11  ;;  %v173_v21 = vmul.f32 %v656_v14, %v962_v1  ;;  %v659_v23 = vunpack.c.l.bf16 %v879_v10  ;;  %v433_v25 = vadd.f32 %v779_v61, %v241_v16  ;;  %v243_v27 = vadd.f32 %v976_v7, %v172_v18 }
  0x21   :  { %v496_v24 = vmax.f32 %v432_v15, 0.0  ;;  %v434_v26 = vadd.f32 %v780_v4, %v242_v17  ;;  %559 = vst [vmem:[%s1482_s4 + $0x80] sm:$0xff] %v495_v20  ;;  %v787_v31 = vunpack.c.l.bf16 %v910_v19  ;;  %v660_v32 = vunpack.c.h.bf16 %v879_v10 }
  0x22   :  { %v244_v29 = vadd.f32 %v976_v7, %v173_v21  ;;  %v174_v30 = vmul.f32 %v659_v23, %v962_v1  ;;  %v497_v34 = vmax.f32 %v433_v25, 0.0  ;;  %v435_v36 = vadd.f32 %v783_v13, %v243_v27  ;;  %v914_v13 = vld [vmem:[%s1479_s1 + $0x78] sm:$0xff]   ;;  %v915_v27 = vld [vmem:[%s1479_s1 + $0x80] sm:$0xff]  }
  0x23   :  { %560 = vst [vmem:[%s1482_s4 + $0x88] sm:$0xff] %v496_v24  ;;  %v498_v35 = vmax.f32 %v434_v26, 0.0  ;;  %v788_v37 = vunpack.c.h.bf16 %v910_v19  ;;  %v175_v40 = vmul.f32 %v660_v32, %v962_v1  ;;  %v663_v41 = vunpack.c.l.bf16 %v880_v28 }
  0x24   :  { %v436_v38 = vadd.f32 %v784_v22, %v244_v29  ;;  %v245_v39 = vadd.f32 %v976_v7, %v174_v30  ;;  %561 = vst [vmem:[%s1482_s4 + $0x90] sm:$0xff] %v497_v34  ;;  %v499_v44 = vmax.f32 %v435_v36, 0.0  ;;  %v791_v45 = vunpack.c.l.bf16 %v911_v33  ;;  %v884_v22 = vld [vmem:[%s1478_s0 + $0x80] sm:$0xff]   ;;  %v885_v36 = vld [vmem:[%s1478_s0 + $0x88] sm:$0xff]  }
  0x25   :  { %562 = vst [vmem:[%s1482_s4 + $0x98] sm:$0xff] %v498_v35  ;;  %v664_v46 = vunpack.c.h.bf16 %v880_v28  ;;  %v792_v47 = vunpack.c.h.bf16 %v911_v33  ;;  %v246_v50 = vadd.f32 %v976_v7, %v175_v40  ;;  %v176_v51 = vmul.f32 %v663_v41, %v962_v1 }
  0x26   :  { %v500_v48 = vmax.f32 %v436_v38, 0.0  ;;  %v437_v49 = vadd.f32 %v787_v31, %v245_v39  ;;  %563 = vst [vmem:[%s1482_s4 + $0xa0] sm:$0xff] %v499_v44  ;;  %v667_v54 = vunpack.c.l.bf16 %v881_v42  ;;  %v795_v55 = vunpack.c.l.bf16 %v912_v43 }
  0x27   :  { %v177_v53 = vmul.f32 %v664_v46, %v962_v1  ;;  %v668_v56 = vunpack.c.h.bf16 %v881_v42  ;;  %v438_v59 = vadd.f32 %v788_v37, %v246_v50  ;;  %v247_v60 = vadd.f32 %v976_v7, %v176_v51  ;;  %v916_v37 = vld [vmem:[%s1479_s1 + $0x88] sm:$0xff]   ;;  %v886_v46 = vld [vmem:[%s1478_s0 + $0x90] sm:$0xff]  }
  0x28   :  { %564 = vst [vmem:[%s1482_s4 + $0xa8] sm:$0xff] %v500_v48  ;;  %v501_v58 = vmax.f32 %v437_v49, 0.0  ;;  %v796_v61 = vunpack.c.h.bf16 %v912_v43  ;;  %v178_v63 = vmul.f32 %v667_v54, %v962_v1  ;;  %v671_v2 = vunpack.c.l.bf16 %v882_v52  ;;  %v917_v51 = vld [vmem:[%s1479_s1 + $0x90] sm:$0xff]  }
  0x29   :  { %v248_v62 = vadd.f32 %v976_v7, %v177_v53  ;;  %v179_v0 = vmul.f32 %v668_v56, %v962_v1  ;;  %v502_v4 = vmax.f32 %v438_v59, 0.0  ;;  %v439_v5 = vadd.f32 %v791_v45, %v247_v60  ;;  %v887_v60 = vld [vmem:[%s1478_s0 + $0x98] sm:$0xff]  }
  0x2a   :  { %565 = vst [vmem:[%s1482_s4 + $0xb0] sm:$0xff] %v501_v58  ;;  %v799_v6 = vunpack.c.l.bf16 %v913_v57  ;;  %v672_v8 = vunpack.c.h.bf16 %v882_v52  ;;  %v249_v10 = vadd.f32 %v976_v7, %v178_v63  ;;  %v180_v12 = vmul.f32 %v671_v2, %v962_v1 }
  0x2b   :  { %v440_v9 = vadd.f32 %v792_v47, %v248_v62  ;;  %v250_v11 = vadd.f32 %v976_v7, %v179_v0  ;;  %566 = vst [vmem:[%s1482_s4 + $0xb8] sm:$0xff] %v502_v4  ;;  %v503_v14 = vmax.f32 %v439_v5, 0.0  ;;  %v800_v16 = vunpack.c.h.bf16 %v913_v57 }
  0x2c   :  { %v181_v15 = vmul.f32 %v672_v8, %v962_v1  ;;  %v675_v17 = vunpack.c.l.bf16 %v883_v3  ;;  %v441_v19 = vadd.f32 %v795_v55, %v249_v10  ;;  %v251_v21 = vadd.f32 %v976_v7, %v180_v12 }
  0x2d   :  { %v504_v18 = vmax.f32 %v440_v9, 0.0  ;;  %v442_v20 = vadd.f32 %v796_v61, %v250_v11  ;;  %567 = vst [vmem:[%s1482_s4 + $0xc0] sm:$0xff] %v503_v14  ;;  %v803_v25 = vunpack.c.l.bf16 %v914_v13  ;;  %v676_v26 = vunpack.c.h.bf16 %v883_v3 }
  0x2e   :  { %v252_v23 = vadd.f32 %v976_v7, %v181_v15  ;;  %v182_v24 = vmul.f32 %v675_v17, %v962_v1  ;;  %v505_v28 = vmax.f32 %v441_v19, 0.0  ;;  %v443_v30 = vadd.f32 %v799_v6, %v251_v21  ;;  %v918_v6 = vld [vmem:[%s1479_s1 + $0x98] sm:$0xff]   ;;  %v919_v21 = vld [vmem:[%s1479_s1 + $0xa0] sm:$0xff]  }
  0x2f   :  { %568 = vst [vmem:[%s1482_s4 + $0xc8] sm:$0xff] %v504_v18  ;;  %v506_v29 = vmax.f32 %v442_v20, 0.0  ;;  %v804_v31 = vunpack.c.h.bf16 %v914_v13  ;;  %v183_v34 = vmul.f32 %v676_v26, %v962_v1  ;;  %v679_v35 = vunpack.c.l.bf16 %v884_v22 }
  0x30   :  { %v444_v32 = vadd.f32 %v800_v16, %v252_v23  ;;  %v253_v33 = vadd.f32 %v976_v7, %v182_v24  ;;  %569 = vst [vmem:[%s1482_s4 + $0xd0] sm:$0xff] %v505_v28  ;;  %v507_v38 = vmax.f32 %v443_v30, 0.0  ;;  %v807_v39 = vunpack.c.l.bf16 %v915_v27  ;;  %v888_v16 = vld [vmem:[%s1478_s0 + $0xa0] sm:$0xff]   ;;  %v889_v30 = vld [vmem:[%s1478_s0 + $0xa8] sm:$0xff]  }
  0x31   :  { %570 = vst [vmem:[%s1482_s4 + $0xd8] sm:$0xff] %v506_v29  ;;  %v680_v40 = vunpack.c.h.bf16 %v884_v22  ;;  %v808_v41 = vunpack.c.h.bf16 %v915_v27  ;;  %v254_v44 = vadd.f32 %v976_v7, %v183_v34  ;;  %v184_v45 = vmul.f32 %v679_v35, %v962_v1 }
  0x32   :  { %v508_v42 = vmax.f32 %v444_v32, 0.0  ;;  %v445_v43 = vadd.f32 %v803_v25, %v253_v33  ;;  %571 = vst [vmem:[%s1482_s4 + $0xe0] sm:$0xff] %v507_v38  ;;  %v683_v48 = vunpack.c.l.bf16 %v885_v36  ;;  %v811_v49 = vunpack.c.l.bf16 %v916_v37 }
  0x33   :  { %v185_v47 = vmul.f32 %v680_v40, %v962_v1  ;;  %v684_v50 = vunpack.c.h.bf16 %v885_v36  ;;  %v446_v53 = vadd.f32 %v804_v31, %v254_v44  ;;  %v255_v54 = vadd.f32 %v976_v7, %v184_v45  ;;  %v920_v31 = vld [vmem:[%s1479_s1 + $0xa8] sm:$0xff]   ;;  %v890_v40 = vld [vmem:[%s1478_s0 + $0xb0] sm:$0xff]  }
  0x34   :  { %572 = vst [vmem:[%s1482_s4 + $0xe8] sm:$0xff] %v508_v42  ;;  %v509_v52 = vmax.f32 %v445_v43, 0.0  ;;  %v812_v55 = vunpack.c.h.bf16 %v916_v37  ;;  %v186_v57 = vmul.f32 %v683_v48, %v962_v1  ;;  %v687_v59 = vunpack.c.l.bf16 %v886_v46  ;;  %v921_v45 = vld [vmem:[%s1479_s1 + $0xb0] sm:$0xff]  }
  0x35   :  { %v256_v56 = vadd.f32 %v976_v7, %v185_v47  ;;  %v187_v58 = vmul.f32 %v684_v50, %v962_v1  ;;  %v510_v61 = vmax.f32 %v446_v53, 0.0  ;;  %v447_v62 = vadd.f32 %v807_v39, %v255_v54  ;;  %v891_v54 = vld [vmem:[%s1478_s0 + $0xb8] sm:$0xff]  }
  0x36   :  { %573 = vst [vmem:[%s1482_s4 + $0xf0] sm:$0xff] %v509_v52  ;;  %v815_v63 = vunpack.c.l.bf16 %v917_v51  ;;  %v688_v0 = vunpack.c.h.bf16 %v886_v46  ;;  %v257_v3 = vadd.f32 %v976_v7, %v186_v57  ;;  %v188_v5 = vmul.f32 %v687_v59, %v962_v1 }
  0x37   :  { %v448_v2 = vadd.f32 %v808_v41, %v256_v56  ;;  %v258_v4 = vadd.f32 %v976_v7, %v187_v58  ;;  %574 = vst [vmem:[%s1482_s4 + $0xf8] sm:$0xff] %v510_v61  ;;  %v511_v8 = vmax.f32 %v447_v62, 0.0  ;;  %v816_v10 = vunpack.c.h.bf16 %v917_v51 }
  0x38   :  { %v189_v9 = vmul.f32 %v688_v0, %v962_v1  ;;  %v691_v11 = vunpack.c.l.bf16 %v887_v60  ;;  %v449_v13 = vadd.f32 %v811_v49, %v257_v3  ;;  %v259_v15 = vadd.f32 %v976_v7, %v188_v5 }
  0x39   :  { %v512_v12 = vmax.f32 %v448_v2, 0.0  ;;  %v450_v14 = vadd.f32 %v812_v55, %v258_v4  ;;  %575 = vst [vmem:[%s1482_s4 + $0x100] sm:$0xff] %v511_v8  ;;  %v819_v19 = vunpack.c.l.bf16 %v918_v6  ;;  %v692_v20 = vunpack.c.h.bf16 %v887_v60 }
  0x3a   :  { %v260_v17 = vadd.f32 %v976_v7, %v189_v9  ;;  %v190_v18 = vmul.f32 %v691_v11, %v962_v1  ;;  %v513_v22 = vmax.f32 %v449_v13, 0.0  ;;  %v451_v24 = vadd.f32 %v815_v63, %v259_v15  ;;  %v922_v63 = vld [vmem:[%s1479_s1 + $0xb8] sm:$0xff]   ;;  %v923_v15 = vld [vmem:[%s1479_s1 + $0xc0] sm:$0xff]  }
  0x3b   :  { %576 = vst [vmem:[%s1482_s4 + $0x108] sm:$0xff] %v512_v12  ;;  %v514_v23 = vmax.f32 %v450_v14, 0.0  ;;  %v820_v25 = vunpack.c.h.bf16 %v918_v6  ;;  %v191_v28 = vmul.f32 %v692_v20, %v962_v1  ;;  %v695_v29 = vunpack.c.l.bf16 %v888_v16 }
  0x3c   :  { %v452_v26 = vadd.f32 %v816_v10, %v260_v17  ;;  %v261_v27 = vadd.f32 %v976_v7, %v190_v18  ;;  %577 = vst [vmem:[%s1482_s4 + $0x110] sm:$0xff] %v513_v22  ;;  %v515_v32 = vmax.f32 %v451_v24, 0.0  ;;  %v823_v33 = vunpack.c.l.bf16 %v919_v21  ;;  %v892_v10 = vld [vmem:[%s1478_s0 + $0xc0] sm:$0xff]   ;;  %v893_v24 = vld [vmem:[%s1478_s0 + $0xc8] sm:$0xff]  }
  0x3d   :  { %578 = vst [vmem:[%s1482_s4 + $0x118] sm:$0xff] %v514_v23  ;;  %v696_v34 = vunpack.c.h.bf16 %v888_v16  ;;  %v824_v35 = vunpack.c.h.bf16 %v919_v21  ;;  %v262_v38 = vadd.f32 %v976_v7, %v191_v28  ;;  %v192_v39 = vmul.f32 %v695_v29, %v962_v1 }
  0x3e   :  { %v516_v36 = vmax.f32 %v452_v26, 0.0  ;;  %v453_v37 = vadd.f32 %v819_v19, %v261_v27  ;;  %579 = vst [vmem:[%s1482_s4 + $0x120] sm:$0xff] %v515_v32  ;;  %v699_v42 = vunpack.c.l.bf16 %v889_v30  ;;  %v827_v43 = vunpack.c.l.bf16 %v920_v31 }
  0x3f   :  { %v193_v41 = vmul.f32 %v696_v34, %v962_v1  ;;  %v700_v44 = vunpack.c.h.bf16 %v889_v30  ;;  %v454_v47 = vadd.f32 %v820_v25, %v262_v38  ;;  %v263_v48 = vadd.f32 %v976_v7, %v192_v39  ;;  %v924_v25 = vld [vmem:[%s1479_s1 + $0xc8] sm:$0xff]   ;;  %v894_v34 = vld [vmem:[%s1478_s0 + $0xd0] sm:$0xff]  }
  0x40   :  { %580 = vst [vmem:[%s1482_s4 + $0x128] sm:$0xff] %v516_v36  ;;  %v517_v46 = vmax.f32 %v453_v37, 0.0  ;;  %v828_v49 = vunpack.c.h.bf16 %v920_v31  ;;  %v194_v51 = vmul.f32 %v699_v42, %v962_v1  ;;  %v703_v53 = vunpack.c.l.bf16 %v890_v40  ;;  %v925_v39 = vld [vmem:[%s1479_s1 + $0xd0] sm:$0xff]  }
  0x41   :  { %v264_v50 = vadd.f32 %v976_v7, %v193_v41  ;;  %v195_v52 = vmul.f32 %v700_v44, %v962_v1  ;;  %v518_v55 = vmax.f32 %v454_v47, 0.0  ;;  %v455_v56 = vadd.f32 %v823_v33, %v263_v48  ;;  %v895_v48 = vld [vmem:[%s1478_s0 + $0xd8] sm:$0xff]  }
  0x42   :  { %581 = vst [vmem:[%s1482_s4 + $0x130] sm:$0xff] %v517_v46  ;;  %v831_v57 = vunpack.c.l.bf16 %v921_v45  ;;  %v704_v58 = vunpack.c.h.bf16 %v890_v40  ;;  %v265_v60 = vadd.f32 %v976_v7, %v194_v51  ;;  %v196_v62 = vmul.f32 %v703_v53, %v962_v1 }
  0x43   :  { %v456_v59 = vadd.f32 %v824_v35, %v264_v50  ;;  %v266_v61 = vadd.f32 %v976_v7, %v195_v52  ;;  %582 = vst [vmem:[%s1482_s4 + $0x138] sm:$0xff] %v518_v55  ;;  %v519_v0 = vmax.f32 %v455_v56, 0.0  ;;  %v832_v3 = vunpack.c.h.bf16 %v921_v45 }
  0x44   :  { %v197_v2 = vmul.f32 %v704_v58, %v962_v1  ;;  %v707_v4 = vunpack.c.l.bf16 %v891_v54  ;;  %v457_v6 = vadd.f32 %v827_v43, %v265_v60  ;;  %v267_v9 = vadd.f32 %v976_v7, %v196_v62 }
  0x45   :  { %v520_v5 = vmax.f32 %v456_v59, 0.0  ;;  %v458_v8 = vadd.f32 %v828_v49, %v266_v61  ;;  %583 = vst [vmem:[%s1482_s4 + $0x140] sm:$0xff] %v519_v0  ;;  %v835_v13 = vunpack.c.l.bf16 %v922_v63  ;;  %v708_v14 = vunpack.c.h.bf16 %v891_v54 }
  0x46   :  { %v268_v11 = vadd.f32 %v976_v7, %v197_v2  ;;  %v198_v12 = vmul.f32 %v707_v4, %v962_v1  ;;  %v521_v16 = vmax.f32 %v457_v6, 0.0  ;;  %v459_v18 = vadd.f32 %v831_v57, %v267_v9  ;;  %v926_v57 = vld [vmem:[%s1479_s1 + $0xd8] sm:$0xff]   ;;  %v927_v9 = vld [vmem:[%s1479_s1 + $0xe0] sm:$0xff]  }
  0x47   :  { %584 = vst [vmem:[%s1482_s4 + $0x148] sm:$0xff] %v520_v5  ;;  %v522_v17 = vmax.f32 %v458_v8, 0.0  ;;  %v836_v19 = vunpack.c.h.bf16 %v922_v63  ;;  %v199_v22 = vmul.f32 %v708_v14, %v962_v1  ;;  %v711_v23 = vunpack.c.l.bf16 %v892_v10 }
  0x48   :  { %v460_v20 = vadd.f32 %v832_v3, %v268_v11  ;;  %v269_v21 = vadd.f32 %v976_v7, %v198_v12  ;;  %585 = vst [vmem:[%s1482_s4 + $0x150] sm:$0xff] %v521_v16  ;;  %v523_v26 = vmax.f32 %v459_v18, 0.0  ;;  %v839_v27 = vunpack.c.l.bf16 %v923_v15  ;;  %v896_v3 = vld [vmem:[%s1478_s0 + $0xe0] sm:$0xff]   ;;  %v897_v18 = vld [vmem:[%s1478_s0 + $0xe8] sm:$0xff]  }
  0x49   :  { %586 = vst [vmem:[%s1482_s4 + $0x158] sm:$0xff] %v522_v17  ;;  %v712_v28 = vunpack.c.h.bf16 %v892_v10  ;;  %v840_v29 = vunpack.c.h.bf16 %v923_v15  ;;  %v270_v32 = vadd.f32 %v976_v7, %v199_v22  ;;  %v200_v33 = vmul.f32 %v711_v23, %v962_v1 }
  0x4a   :  { %v524_v30 = vmax.f32 %v460_v20, 0.0  ;;  %v461_v31 = vadd.f32 %v835_v13, %v269_v21  ;;  %587 = vst [vmem:[%s1482_s4 + $0x160] sm:$0xff] %v523_v26  ;;  %v715_v36 = vunpack.c.l.bf16 %v893_v24  ;;  %v843_v37 = vunpack.c.l.bf16 %v924_v25 }
  0x4b   :  { %v201_v35 = vmul.f32 %v712_v28, %v962_v1  ;;  %v716_v38 = vunpack.c.h.bf16 %v893_v24  ;;  %v462_v41 = vadd.f32 %v836_v19, %v270_v32  ;;  %v271_v42 = vadd.f32 %v976_v7, %v200_v33  ;;  %v928_v19 = vld [vmem:[%s1479_s1 + $0xe8] sm:$0xff]   ;;  %v898_v28 = vld [vmem:[%s1478_s0 + $0xf0] sm:$0xff]  }
  0x4c   :  { %588 = vst [vmem:[%s1482_s4 + $0x168] sm:$0xff] %v524_v30  ;;  %v525_v40 = vmax.f32 %v461_v31, 0.0  ;;  %v844_v43 = vunpack.c.h.bf16 %v924_v25  ;;  %v202_v45 = vmul.f32 %v715_v36, %v962_v1  ;;  %v719_v47 = vunpack.c.l.bf16 %v894_v34  ;;  %v929_v33 = vld [vmem:[%s1479_s1 + $0xf0] sm:$0xff]  }
  0x4d   :  { %v272_v44 = vadd.f32 %v976_v7, %v201_v35  ;;  %v203_v46 = vmul.f32 %v716_v38, %v962_v1  ;;  %v526_v49 = vmax.f32 %v462_v41, 0.0  ;;  %v463_v50 = vadd.f32 %v839_v27, %v271_v42  ;;  %v899_v42 = vld [vmem:[%s1478_s0 + $0xf8] sm:$0xff]  }
  0x4e   :  { %589 = vst [vmem:[%s1482_s4 + $0x170] sm:$0xff] %v525_v40  ;;  %v847_v51 = vunpack.c.l.bf16 %v925_v39  ;;  %v720_v52 = vunpack.c.h.bf16 %v894_v34  ;;  %v273_v54 = vadd.f32 %v976_v7, %v202_v45  ;;  %v204_v56 = vmul.f32 %v719_v47, %v962_v1 }
  0x4f   :  { %v464_v53 = vadd.f32 %v840_v29, %v272_v44  ;;  %v274_v55 = vadd.f32 %v976_v7, %v203_v46  ;;  %590 = vst [vmem:[%s1482_s4 + $0x178] sm:$0xff] %v526_v49  ;;  %v527_v58 = vmax.f32 %v463_v50, 0.0  ;;  %v848_v60 = vunpack.c.h.bf16 %v925_v39 }
  0x50   :  { %v205_v59 = vmul.f32 %v720_v52, %v962_v1  ;;  %v723_v61 = vunpack.c.l.bf16 %v895_v48  ;;  %v465_v63 = vadd.f32 %v843_v37, %v273_v54  ;;  %v275_v2 = vadd.f32 %v976_v7, %v204_v56 }
  0x51   :  { %v528_v62 = vmax.f32 %v464_v53, 0.0  ;;  %v466_v0 = vadd.f32 %v844_v43, %v274_v55  ;;  %591 = vst [vmem:[%s1482_s4 + $0x180] sm:$0xff] %v527_v58  ;;  %v851_v6 = vunpack.c.l.bf16 %v926_v57  ;;  %v724_v8 = vunpack.c.h.bf16 %v895_v48 }
  0x52   :  { %v276_v4 = vadd.f32 %v976_v7, %v205_v59  ;;  %v206_v5 = vmul.f32 %v723_v61, %v962_v1  ;;  %v529_v10 = vmax.f32 %v465_v63, 0.0  ;;  %v467_v12 = vadd.f32 %v847_v51, %v275_v2  ;;  %v930_v51 = vld [vmem:[%s1479_s1 + $0xf8] sm:$0xff]  }
  0x53   :  { %592 = vst [vmem:[%s1482_s4 + $0x188] sm:$0xff] %v528_v62  ;;  %v530_v11 = vmax.f32 %v466_v0, 0.0  ;;  %v852_v13 = vunpack.c.h.bf16 %v926_v57  ;;  %v207_v16 = vmul.f32 %v724_v8, %v962_v1  ;;  %v727_v17 = vunpack.c.l.bf16 %v896_v3 }
  0x54   :  { %v468_v14 = vadd.f32 %v848_v60, %v276_v4  ;;  %v277_v15 = vadd.f32 %v976_v7, %v206_v5  ;;  %593 = vst [vmem:[%s1482_s4 + $0x190] sm:$0xff] %v529_v10  ;;  %v531_v20 = vmax.f32 %v467_v12, 0.0  ;;  %v855_v21 = vunpack.c.l.bf16 %v927_v9 }
  0x55   :  { %594 = vst [vmem:[%s1482_s4 + $0x198] sm:$0xff] %v530_v11  ;;  %v728_v22 = vunpack.c.h.bf16 %v896_v3  ;;  %v856_v23 = vunpack.c.h.bf16 %v927_v9  ;;  %v278_v26 = vadd.f32 %v976_v7, %v207_v16  ;;  %v208_v27 = vmul.f32 %v727_v17, %v962_v1 }
  0x56   :  { %v532_v24 = vmax.f32 %v468_v14, 0.0  ;;  %v469_v25 = vadd.f32 %v851_v6, %v277_v15  ;;  %595 = vst [vmem:[%s1482_s4 + $0x1a0] sm:$0xff] %v531_v20  ;;  %v731_v30 = vunpack.c.l.bf16 %v897_v18  ;;  %v859_v31 = vunpack.c.l.bf16 %v928_v19 }
  0x57   :  { %v209_v29 = vmul.f32 %v728_v22, %v962_v1  ;;  %v732_v32 = vunpack.c.h.bf16 %v897_v18  ;;  %v470_v35 = vadd.f32 %v852_v13, %v278_v26  ;;  %v279_v36 = vadd.f32 %v976_v7, %v208_v27 }
  0x58   :  { %596 = vst [vmem:[%s1482_s4 + $0x1a8] sm:$0xff] %v532_v24  ;;  %v533_v34 = vmax.f32 %v469_v25, 0.0  ;;  %v860_v37 = vunpack.c.h.bf16 %v928_v19  ;;  %v210_v39 = vmul.f32 %v731_v30, %v962_v1  ;;  %v735_v41 = vunpack.c.l.bf16 %v898_v28 }
  0x59   :  { %v280_v38 = vadd.f32 %v976_v7, %v209_v29  ;;  %v211_v40 = vmul.f32 %v732_v32, %v962_v1  ;;  %v534_v43 = vmax.f32 %v470_v35, 0.0  ;;  %v471_v44 = vadd.f32 %v855_v21, %v279_v36 }
  0x5a   :  { %597 = vst [vmem:[%s1482_s4 + $0x1b0] sm:$0xff] %v533_v34  ;;  %v863_v45 = vunpack.c.l.bf16 %v929_v33  ;;  %v736_v46 = vunpack.c.h.bf16 %v898_v28  ;;  %v281_v48 = vadd.f32 %v976_v7, %v210_v39  ;;  %v212_v50 = vmul.f32 %v735_v41, %v962_v1 }
  0x5b   :  { %v472_v47 = vadd.f32 %v856_v23, %v280_v38  ;;  %v282_v49 = vadd.f32 %v976_v7, %v211_v40  ;;  %598 = vst [vmem:[%s1482_s4 + $0x1b8] sm:$0xff] %v534_v43  ;;  %v535_v52 = vmax.f32 %v471_v44, 0.0  ;;  %v864_v54 = vunpack.c.h.bf16 %v929_v33 }
  0x5c   :  { %v213_v53 = vmul.f32 %v736_v46, %v962_v1  ;;  %v739_v55 = vunpack.c.l.bf16 %v899_v42  ;;  %v473_v57 = vadd.f32 %v859_v31, %v281_v48  ;;  %v283_v59 = vadd.f32 %v976_v7, %v212_v50 }
  0x5d   :  { %v536_v56 = vmax.f32 %v472_v47, 0.0  ;;  %v474_v58 = vadd.f32 %v860_v37, %v282_v49  ;;  %599 = vst [vmem:[%s1482_s4 + $0x1c0] sm:$0xff] %v535_v52  ;;  %v867_v62 = vunpack.c.l.bf16 %v930_v51  ;;  %v740_v63 = vunpack.c.h.bf16 %v899_v42 }
  0x5e   :  { %v284_v60 = vadd.f32 %v976_v7, %v213_v53  ;;  %v214_v61 = vmul.f32 %v739_v55, %v962_v1  ;;  %v537_v0 = vmax.f32 %v473_v57, 0.0  ;;  %v475_v3 = vadd.f32 %v863_v45, %v283_v59 }
  0x5f   :  { %600 = vst [vmem:[%s1482_s4 + $0x1c8] sm:$0xff] %v536_v56  ;;  %v538_v2 = vmax.f32 %v474_v58, 0.0  ;;  %v215_v6 = vmul.f32 %v740_v63, %v962_v1  ;;  %v868_v8 = vunpack.c.h.bf16 %v930_v51 }
  0x60   :  { %v476_v4 = vadd.f32 %v864_v54, %v284_v60  ;;  %v285_v5 = vadd.f32 %v976_v7, %v214_v61  ;;  %601 = vst [vmem:[%s1482_s4 + $0x1d0] sm:$0xff] %v537_v0  ;;  %v539_v9 = vmax.f32 %v475_v3, 0.0 }
  0x61   :  { %602 = vst [vmem:[%s1482_s4 + $0x1d8] sm:$0xff] %v538_v2  ;;  %v286_v12 = vadd.f32 %v976_v7, %v215_v6 }
  0x62   :  { %v540_v10 = vmax.f32 %v476_v4, 0.0  ;;  %v477_v11 = vadd.f32 %v867_v62, %v285_v5  ;;  %603 = vst [vmem:[%s1482_s4 + $0x1e0] sm:$0xff] %v539_v9 }
  0x63   :  { %v478_v13 = vadd.f32 %v868_v8, %v286_v12 }
  0x64   :  { %604 = vst [vmem:[%s1482_s4 + $0x1e8] sm:$0xff] %v540_v10  ;;  %v541_v1 = vmax.f32 %v477_v11, 0.0 }
  0x65   :  { %v542_v14 = vmax.f32 %v478_v13, 0.0 }
  0x66   :  { %605 = vst [vmem:[%s1482_s4 + $0x1f0] sm:$0xff] %v541_v1 }
  0x67   :  { %606 = vst [vmem:[%s1482_s4 + $0x1f8] sm:$0xff] %v542_v14 }

// kernel: basic_block_forward.3
= control target key start
LH: loop header
LB: loop body
LE: loop exit
PB: predicated region body
PF: predicated region fallthrough
CT: control target
= control target key end

     0   :  { %s4503_s12 = smov 0   ;;  %s6032_s0 = inlined_call_operand.vmem [shape: bf16[2,16,16,128], index: 0, kind: input, shape index: {}]   ;;  %s6033_s1 = inlined_call_operand.vmem [shape: bf16[3,384,128], index: 1, kind: input, shape index: {}]   ;;  %s6034_s2 = inlined_call_operand.vmem [shape: bf16[2,16,16,128], index: 2, kind: output, shape index: {0}]   ;;  %s6035_s3 = inlined_call_operand.vmem [shape: f32[2,2,128], index: 3, kind: output, shape index: {1}]  }
   0x1 LB: > { %s3354_s13 = sadd.s32 4294967295, %s4480_s12   ;;  %p3358_p0 = scmp.ge.s32.totalorder %s4480_s12, 1  ;;  %s4480_s12 = sphi %s4503_s12, %s14_s12  }
   0x2   : > { %p140_p1 = scmp.lt.s32.totalorder %s4480_s12, 3 }
   0x4   : > { %p141_p2 = pnand %p3358_p0, %p140_p1 }
   0x6   : > { %144 = sbr.rel (%p141_p2) target bundleno = 684 (0x2ac), region = 28 }
   0xb   : > { %v4326_v0 = vld [vmem:[%s6033_s1 + $0x138] sm:$0xff]   ;;  %v4328_v2 = vld [vmem:[%s6033_s1 + $0x130] sm:$0xff]   ;;  %p168_p3 = scmp.lt.s32.totalorder %s3354_s13, 1  ;;  %v4330_v4 = vld [vmem:[%s6033_s1 + $0x128] sm:$0xff]   ;;  %v4482_v5 = vmov 0   ;;  %vm225_vm0 = vcmask 1040384  }
   0xc   : > { %v4327_v1 = vld [vmem:[%s6033_s1 + $0xf8] sm:$0xff]   ;;  %3749 = vmatprep.subr.bf16.mxu0 %v4326_v0  ;;  %4301 = vmatprep.subr.bf16.mxu1 %v4326_v0  ;;  %v4329_v3 = vld [vmem:[%s6033_s1 + $0xf0] sm:$0xff]   ;;  %215 = vst [vmem:[#allocation2] sm:$0xf] %v4482_v5  ;;  %216 = vst [vmem:[#allocation2 + $0x4] sm:$0xf] %v4482_v5 }
   0xd   : > { %3750 = vmatpush3.bf16.msra.mxu0 %v4327_v1  ;;  %4309 = vmatpush3.bf16.msra.mxu1 %v4327_v1  ;;  %s6097_s13 = smov (!%p168_p3, %s3354_s13), 1  ;;  %217 = vst [vmem:[#allocation2 + $0x8] sm:$0xf] %v4482_v5  ;;  %220 = vst [vmem:[#allocation2 + $0x110] sm:$0xf] %v4482_v5  ;;  %v4331_v6 = vld [vmem:[%s6033_s1 + $0xe8] sm:$0xff]  }
   0xe   : > { %3751 = vmatprep.subr.bf16.mxu0 %v4328_v2  ;;  %4302 = vmatprep.subr.bf16.mxu1 %v4328_v2  ;;  %221 = vst [vmem:[#allocation2 + $0x114] sm:$0xf] %v4482_v5  ;;  %222 = vst [vmem:[#allocation2 + $0x118] sm:$0xf] %v4482_v5  ;;  %v4332_v7 = vld [vmem:[%s6033_s1 + $0x120] sm:$0xff]   ;;  %s3620_s28 = sshll.u32 %s6097_s13, 7 }
   0xf   : > { %v4333_v8 = vld [vmem:[%s6033_s1 + $0xe0] sm:$0xff]   ;;  %v4334_v9 = vld [vmem:[%s6033_s1 + $0x118] sm:$0xff]   ;;  %s4546_s8 = scalar_lea.vmem %s6032_s0, %s3620_s28  ;;  %v4336_v11 = vld [vmem:[%s6033_s1 + $0x110] sm:$0xff]   ;;  %vm226_vm1 = vsmask.f32 256  ;;  %vm648_vm5 = vcmask 1043456   ;;  %s5645_s21 = scalar_lea.vmem %s6034_s2, %s3620_s28 }
  0x10   : > { %v4335_v10 = vld [vmem:[%s6033_s1 + $0xd8] sm:$0xff]   ;;  %v183_v12 = vld [vmem:[%s4546_s8] sm:$0xf]  ;;  %v184_v13 = vld [vmem:[%s4546_s8 + $0x4] sm:$0xf]  ;;  %vm2314_vm10 = vcmask 1046528  }
  0x11   : > { %3752 = vmatpush3.bf16.msra.mxu0 %v4329_v3  ;;  %4310 = vmatpush3.bf16.msra.mxu1 %v4329_v3  ;;  %vm4558_vm2 = vmand %vm225_vm0, %vm226_vm1  ;;  %v228_v15 = vld [vmem:[#allocation2 + $0x10] sm:$0x1]  ;;  %vm276_vm3 = vsmask.f32 7938  ;;  %v278_v16 = vld [vmem:[#allocation2 + $0x18] sm:$0x1] }
  0x12   : > { %3753 = vmatprep.subr.bf16.mxu0 %v4330_v4  ;;  %4303 = vmatprep.subr.bf16.mxu1 %v4330_v4  ;;  %v229_v17 = vsel %vm4558_vm2, 0, %v228_v15  ;;  %vm4566_vm4 = vmand %vm225_vm0, %vm276_vm3  ;;  %v329_v19 = vshrl.u32 %v183_v12, 16  ;;  %v332_v20 = vshll.u32 %v183_v12, 16  ;;  %v4337_v21 = vld [vmem:[%s6033_s1 + $0xd0] sm:$0xff]   ;;  %vm326_vm6 = vsmask.f32 4368 }
  0x13   : > { %230 = vst [vmem:[#allocation2 + $0x10] sm:$0x1] %v229_v17  ;;  %v279_v22 = vsel %vm4566_vm4, 0, %v278_v16  ;;  %v337_v23 = vshrl.u32 %v184_v13, 16  ;;  %v340_v24 = vshll.u32 %v184_v13, 16  ;;  %v4338_v25 = vld [vmem:[%s6033_s1 + $0x108] sm:$0xff]   ;;  %vm4585_vm7 = vmor %vm226_vm1, %vm326_vm6 }
  0x14   : > { %280 = vst [vmem:[#allocation2 + $0x18] sm:$0x1] %v279_v22  ;;  %v331_v26 = vrot.slane %v329_v19, 7  ;;  %v207_v27 = vld [vmem:[%s4546_s8 + $0x60] sm:$0xf]  ;;  %v4339_v33 = vld [vmem:[%s6033_s1 + $0xc8] sm:$0xff]   ;;  %vm4598_vm8 = vmand %vm648_vm5, %vm276_vm3 }
  0x15   : > { %3754 = vmatpush3.bf16.msra.mxu0 %v4331_v6  ;;  %4311 = vmatpush3.bf16.msra.mxu1 %v4331_v6  ;;  %v208_v28 = vld [vmem:[%s4546_s8 + $0x64] sm:$0xf]  ;;  %v339_v29 = vrot.slane %v337_v23, 7  ;;  %v264_v30 = vld [vmem:[#allocation2 + $0xd0] sm:$0x1]  ;;  %v533_v32 = vshrl.u32 %v207_v27, 16 }
  0x16   : > { %3755 = vmatprep.subr.bf16.mxu0 %v4332_v7  ;;  %4304 = vmatprep.subr.bf16.mxu1 %v4332_v7  ;;  %v314_v31 = vld [vmem:[#allocation2 + $0xd8] sm:$0x1]  ;;  %v334_v35 = vor.u32 %v332_v20, %v331_v26  ;;  %v335_v36 = vrot.slane %v331_v26, 4  ;;  %v265_v37 = vsel %vm4558_vm2, 0, %v264_v30  ;;  %v762_v39 = vld [vmem:[#allocation2] sm:$0xf] }
  0x17   : > { %v315_v38 = vsel %vm4566_vm4, 0, %v314_v31  ;;  %v4340_v40 = vld [vmem:[%s6033_s1 + $0x100] sm:$0xff]   ;;  %v342_v41 = vor.u32 %v340_v24, %v339_v29  ;;  %v344_v42 = vrot.slane %v339_v29, 4  ;;  %266 = vst [vmem:[#allocation2 + $0xd0] sm:$0x1] %v265_v37  ;;  %v535_v43 = vrot.slane %v533_v32, 7 }
  0x18   : > { %316 = vst [vmem:[#allocation2 + $0xd8] sm:$0x1] %v315_v38  ;;  %v536_v44 = vshll.u32 %v207_v27, 16  ;;  %v763_v45 = vld [vmem:[#allocation2 + $0x4] sm:$0xf]  ;;  %v541_v47 = vshrl.u32 %v208_v28, 16 }
  0x19   : > { %3756 = vmatpush3.bf16.msra.mxu0 %v4333_v8  ;;  %4312 = vmatpush3.bf16.msra.mxu1 %v4333_v8  ;;  %v544_v48 = vshll.u32 %v208_v28, 16  ;;  %v4602_v49 = vcombine.low %v762_v39, %v763_v45  ;;  %v205_v50 = vld [vmem:[%s4546_s8 + $0x58] sm:$0xf]  ;;  %v4341_v51 = vld [vmem:[%s6033_s1 + $0xc0] sm:$0xff]   ;;  %v343_v52 = vsel %vm4585_vm7, %v335_v36, %v342_v41  ;;  %v539_v53 = vrot.slane %v535_v43, 4  ;;  %s3363_s28 = sshll.u32 %s6097_s13, 1 }
  0x1a   : > { %3757 = vmatprep.subr.bf16.mxu0 %v4334_v9  ;;  %4305 = vmatprep.subr.bf16.mxu1 %v4334_v9  ;;  %v4347_v54 = vld [vmem:[#allocation2 + $0x8] ss:$0 sps:$4 sm:$0x11]   ;;  %v650_v55 = vld [vmem:[#allocation2 + $0x10] sm:$0xf]  ;;  %v543_v56 = vrot.slane %v541_v47, 7  ;;  %v538_v63 = vor.u32 %v536_v44, %v535_v43  ;;  %s181_s24 = scalar_lea.vmem %s6035_s3, %s3363_s28 }
  0x1b   : > { %653 = vst [vmem:[#allocation2 + $0x14] sm:$0xf] %v343_v52  ;;  %v206_v57 = vld [vmem:[%s4546_s8 + $0x5c] sm:$0xf]  ;;  %v516_v58 = vshrl.u32 %v205_v50, 16  ;;  %v651_v61 = vsel %vm4598_vm8, %v334_v35, %v650_v55  ;;  %v1030_v0 = vshll.u32 %v4602_v49, 16 }
  0x1c   : > { %v4614_v59 = vld [vmem:[%s6033_s1 + $0x178] sm:$0xff]   ;;  %v1035_v1 = vshll.u32 %v4347_v54, 16  ;;  %v261_v2 = vld [vmem:[#allocation2 + $0xc0] sm:$0x1]  ;;  %652 = vst [vmem:[#allocation2 + $0x10] sm:$0xf] %v651_v61  ;;  %v546_v4 = vor.u32 %v544_v48, %v543_v56 }
  0x1d   : > { %3758 = vmatpush3.bf16.msra.mxu0 %v4335_v10  ;;  %4313 = vmatpush3.bf16.msra.mxu1 %v4335_v10  ;;  %v4619_v60 = vld [vmem:[%s6033_s1 + $0xb8] sm:$0xff]   ;;  %v548_v5 = vrot.slane %v543_v56, 4  ;;  %v1028_v6 = vshrl.u32 %v4602_v49, 16  ;;  %v311_v7 = vld [vmem:[#allocation2 + $0xc8] sm:$0x1]  ;;  %v262_v8 = vsel %vm4558_vm2, 0, %v261_v2 }
  0x1e   : > { %3759 = vmatprep.subr.bf16.mxu0 %v4336_v11  ;;  %4306 = vmatprep.subr.bf16.mxu1 %v4336_v11  ;;  %v654_v62 = vld [vmem:[#allocation2 + $0x18] sm:$0x1]  ;;  %v312_v9 = vsel %vm4566_vm4, 0, %v311_v7  ;;  %v518_v10 = vrot.slane %v516_v58, 7  ;;  %v519_v11 = vshll.u32 %v205_v50, 16  ;;  %v547_v12 = vsel %vm4585_vm7, %v539_v53, %v546_v4 }
  0x1f   : > { %v655_v3 = vsel %vm4558_vm2, %v344_v42, %v654_v62  ;;  %v734_v13 = vld [vmem:[#allocation2 + $0xd0] sm:$0xf]  ;;  %v738_v15 = vld [vmem:[#allocation2 + $0xd8] sm:$0x1]  ;;  %263 = vst [vmem:[#allocation2 + $0xc0] sm:$0x1] %v262_v8 }
  0x20   : > { %656 = vst [vmem:[#allocation2 + $0x18] sm:$0x1] %v655_v3  ;;  %313 = vst [vmem:[#allocation2 + $0xc8] sm:$0x1] %v312_v9  ;;  %v524_v16 = vshrl.u32 %v206_v57, 16  ;;  %v527_v17 = vshll.u32 %v206_v57, 16  ;;  %v735_v19 = vsel %vm4598_vm8, %v538_v63, %v734_v13  ;;  %v739_v20 = vsel %vm4558_vm2, %v548_v5, %v738_v15 }
  0x21   : > { %3760 = vmatpush3.bf16.msra.mxu0 %v4337_v21  ;;  %4314 = vmatpush3.bf16.msra.mxu1 %v4337_v21  ;;  %737 = vst [vmem:[#allocation2 + $0xd4] sm:$0xf] %v547_v12  ;;  %v1032_v21 = vrot.slane %v1030_v0, 1  ;;  %v4637_v22 = vrot.slane %v1035_v1, 1  ;;  %vm1026_vm9 = vsmask.f32 7424  ;;  %v521_v28 = vor.u32 %v519_v11, %v518_v10 }
  0x22   : > { %3761 = vmatprep.subr.bf16.mxu0 %v4338_v25  ;;  %4307 = vmatprep.subr.bf16.mxu1 %v4338_v25  ;;  %736 = vst [vmem:[#allocation2 + $0xd0] sm:$0xf] %v735_v19  ;;  %740 = vst [vmem:[#allocation2 + $0xd8] sm:$0x1] %v739_v20  ;;  %v522_v23 = vrot.slane %v518_v10, 4  ;;  %v526_v24 = vrot.slane %v524_v16, 7 }
  0x23   : > { %v765_v25 = vld [vmem:[#allocation2 + $0x14] sm:$0xf]  ;;  %v185_v26 = vld [vmem:[%s4546_s8 + $0x8] sm:$0xf]  ;;  %v186_v27 = vld [vmem:[%s4546_s8 + $0xc] sm:$0xf]  ;;  %v1033_v44 = vor.u32 %v1032_v21, %v1028_v6 }
  0x24   : > { %v529_v29 = vor.u32 %v527_v17, %v526_v24  ;;  %v531_v30 = vrot.slane %v526_v24, 4  ;;  %v231_v31 = vld [vmem:[#allocation2 + $0x20] sm:$0x1]  ;;  %v281_v32 = vld [vmem:[#allocation2 + $0x28] sm:$0x1]  ;;  %v349_v38 = vshll.u32 %v185_v26, 16 }
  0x25   : > { %3762 = vmatpush3.bf16.msra.mxu0 %v4339_v33  ;;  %4315 = vmatpush3.bf16.msra.mxu1 %v4339_v33  ;;  %v346_v33 = vshrl.u32 %v185_v26, 16  ;;  %v764_v35 = vld [vmem:[#allocation2 + $0x10] sm:$0xf]  ;;  %v232_v36 = vsel %vm4558_vm2, 0, %v231_v31  ;;  %v282_v37 = vsel %vm4566_vm4, 0, %v281_v32  ;;  %v354_v39 = vshrl.u32 %v186_v27, 16 }
  0x26   : > { %3763 = vmatprep.subr.bf16.mxu0 %v4340_v40  ;;  %4308 = vmatprep.subr.bf16.mxu1 %v4340_v40  ;;  %v4647_v40 = vcombine.low %v764_v35, %v765_v25  ;;  %v530_v42 = vsel %vm4585_vm7, %v522_v23, %v529_v29  ;;  %233 = vst [vmem:[#allocation2 + $0x20] sm:$0x1] %v232_v36  ;;  %283 = vst [vmem:[#allocation2 + $0x28] sm:$0x1] %v282_v37  ;;  %v727_v45 = vld [vmem:[#allocation2 + $0xc0] sm:$0xf] }
  0x27   : > { %v4343_v41 = vld [vmem:[#allocation2 + $0x18] ss:$0 sps:$4 sm:$0x11]   ;;  %v348_v43 = vrot.slane %v346_v33, 7  ;;  %730 = vst [vmem:[#allocation2 + $0xc4] sm:$0xf] %v530_v42  ;;  %v728_v55 = vsel %vm4598_vm8, %v521_v28, %v727_v45  ;;  %v1038_v15 = vsel %vm1026_vm9, %v1033_v44, %v4637_v22 }
  0x28   : > { %v731_v47 = vld [vmem:[#allocation2 + $0xc8] sm:$0x1]  ;;  %v356_v48 = vrot.slane %v354_v39, 7  ;;  %v357_v50 = vshll.u32 %v186_v27, 16  ;;  %v1042_v52 = vshll.u32 %v4647_v40, 16  ;;  %v1047_v53 = vshll.u32 %v4343_v41, 16 }
  0x29   : > { %3764 = vmatpush3.bf16.msra.mxu0 %v4341_v51  ;;  %4316 = vmatpush3.bf16.msra.mxu1 %v4341_v51  ;;  %v1040_v51 = vshrl.u32 %v4647_v40, 16  ;;  %v789_v54 = vld [vmem:[#allocation2 + $0xd4] sm:$0xf]  ;;  %v788_v56 = vld [vmem:[#allocation2 + $0xd0] sm:$0xf]  ;;  %v732_v57 = vsel %vm4558_vm2, %v531_v30, %v731_v47  ;;  %v351_v58 = vor.u32 %v349_v38, %v348_v43  ;;  %v352_v61 = vrot.slane %v348_v43, 4 }
  0x2a   : > { %4157 = vmatprep.subr.bf16.mxu1 %v4614_v59  ;;  %4205 = vmatprep.subr.bf16.mxu0 %v4619_v60  ;;  %729 = vst [vmem:[#allocation2 + $0xc0] sm:$0xf] %v728_v55  ;;  %v359_v62 = vor.u32 %v357_v50, %v356_v48  ;;  %v1044_v63 = vrot.slane %v1042_v52, 1  ;;  %v1049_v0 = vrot.slane %v1047_v53, 1  ;;  %v4657_v1 = vcombine.low %v788_v56, %v789_v54  ;;  %v209_v5 = vld [vmem:[%s4546_s8 + $0x68] sm:$0xf] }
  0x2b   : > { %v4345_v2 = vld [vmem:[#allocation2 + $0xd8] ss:$0 sps:$4 sm:$0x11]   ;;  %733 = vst [vmem:[#allocation2 + $0xc8] sm:$0x1] %v732_v57  ;;  %v361_v3 = vrot.slane %v356_v48, 4 }
  0x2c   : > { %v360_v4 = vsel %vm4585_vm7, %v352_v61, %v359_v62  ;;  %v210_v6 = vld [vmem:[%s4546_s8 + $0x6c] sm:$0xf]  ;;  %v267_v7 = vld [vmem:[#allocation2 + $0xe0] sm:$0x1]  ;;  %v1045_v8 = vor.u32 %v1044_v63, %v1040_v51  ;;  %v1184_v9 = vshrl.u32 %v4657_v1, 16  ;;  %v1186_v10 = vshll.u32 %v4657_v1, 16 }
  0x2d   : > { %v1191_v11 = vshll.u32 %v4345_v2, 16  ;;  %660 = vst [vmem:[#allocation2 + $0x24] sm:$0xf] %v360_v4  ;;  %v317_v12 = vld [vmem:[#allocation2 + $0xe8] sm:$0x1]  ;;  %v4359_v13 = vld [vmem:[%s6033_s1 + $0xb0] sm:$0xff]  }
  0x2e   : > { %v657_v16 = vld [vmem:[#allocation2 + $0x20] sm:$0xf]  ;;  %v661_v17 = vld [vmem:[#allocation2 + $0x28] sm:$0x1]  ;;  %v268_v19 = vsel %vm4558_vm2, 0, %v267_v7  ;;  %v318_v20 = vsel %vm4566_vm4, 0, %v317_v12  ;;  %v4675_v21 = vsel %vm1026_vm9, %v1045_v8, %v1049_v0 }
  0x2f   : > { %v1188_v23 = vrot.slane %v1186_v10, 1  ;;  %v1193_v24 = vrot.slane %v1191_v11, 1  ;;  %v787_v25 = vld [vmem:[#allocation2 + $0xc4] sm:$0xf]  ;;  %v658_v26 = vsel %vm4598_vm8, %v351_v58, %v657_v16  ;;  %269 = vst [vmem:[#allocation2 + $0xe0] sm:$0x1] %v268_v19  ;;  %1486 = vmatprep.mubr.bf16.mxu0 %v4675_v21  ;;  %v662_v22 = vsel %vm4558_vm2, %v361_v3, %v661_v17 }
  0x30   : > { %319 = vst [vmem:[#allocation2 + $0xe8] sm:$0x1] %v318_v20  ;;  %659 = vst [vmem:[#allocation2 + $0x20] sm:$0xf] %v658_v26  ;;  %v550_v27 = vshrl.u32 %v209_v5, 16  ;;  %v553_v28 = vshll.u32 %v209_v5, 16  ;;  %1487 = vmatmul.mubr.bf16.vlgmr.msra.gmra.mxu0 %v1038_v15 }
  0x31   : > { %v558_v29 = vshrl.u32 %v210_v6, 16  ;;  %v1189_v30 = vor.u32 %v1188_v23, %v1184_v9  ;;  %v786_v31 = vld [vmem:[#allocation2 + $0xc0] sm:$0xf]  ;;  %663 = vst [vmem:[#allocation2 + $0x28] sm:$0x1] %v662_v22  ;;  %v561_v32 = vshll.u32 %v210_v6, 16  ;;  %4206 = vmatpush3.bf16.msra.mxu0 %v4619_v60 }
  0x32   : > { %v4682_v33 = vcombine.low %v786_v31, %v787_v25  ;;  %v4349_v35 = vld [vmem:[#allocation2 + $0xc8] ss:$0 sps:$4 sm:$0x11]   ;;  %v552_v36 = vrot.slane %v550_v27, 7  ;;  %4207 = vmatprep.subr.bf16.mxu0 %v4359_v13  ;;  %v187_v50 = vld [vmem:[%s4546_s8 + $0x10] sm:$0xf] }
  0x33   : > { %v4686_v37 = vsel %vm1026_vm9, %v1189_v30, %v1193_v24  ;;  %v560_v38 = vrot.slane %v558_v29, 7  ;;  %v4371_v39 = vld [vmem:[%s6033_s1 + $0xa8] sm:$0xff]   ;;  %v1179_v43 = vshll.u32 %v4349_v35, 16  ;;  %v4352_v55 = vld [vmem:[%s6033_s1 + $0x170] sm:$0xff]   ;;  %v284_v5 = vld [vmem:[#allocation2 + $0x38] sm:$0x1] }
  0x34   : > { %1582 = vmatprep.mubr.bf16.mxu1 %v4686_v37  ;;  %v1172_v41 = vshrl.u32 %v4682_v33, 16  ;;  %v1174_v42 = vshll.u32 %v4682_v33, 16  ;;  %v767_v44 = vld [vmem:[#allocation2 + $0x24] sm:$0xf]  ;;  %v555_v60 = vor.u32 %v553_v28, %v552_v36  ;;  %v556_v45 = vrot.slane %v552_v36, 4  ;;  %v4357_v17 = vld [vmem:[%s6033_s1 + $0x168] sm:$0xff]  }
  0x35   : > { %v563_v47 = vor.u32 %v561_v32, %v560_v38  ;;  %v565_v48 = vrot.slane %v560_v38, 4  ;;  %v1181_v52 = vrot.slane %v1179_v43, 1  ;;  %4208 = vmatpush3.bf16.msra.mxu0 %v4359_v13  ;;  %v188_v62 = vld [vmem:[%s4546_s8 + $0x14] sm:$0xf]  ;;  %v234_v63 = vld [vmem:[#allocation2 + $0x30] sm:$0x1] }
  0x36   : > { %v1176_v51 = vrot.slane %v1174_v42, 1  ;;  %v741_v53 = vld [vmem:[#allocation2 + $0xe0] sm:$0xf]  ;;  %4209 = vmatprep.subr.bf16.mxu0 %v4371_v39  ;;  %v235_v4 = vsel %vm4558_vm2, 0, %v234_v63  ;;  %v363_v6 = vshrl.u32 %v187_v50, 16  ;;  %v366_v7 = vshll.u32 %v187_v50, 16 }
  0x37   : > { %v745_v54 = vld [vmem:[#allocation2 + $0xe8] sm:$0x1]  ;;  %v766_v56 = vld [vmem:[#allocation2 + $0x20] sm:$0xf]  ;;  %v564_v57 = vsel %vm4585_vm7, %v556_v45, %v563_v47  ;;  %v742_v58 = vsel %vm4598_vm8, %v555_v60, %v741_v53  ;;  %236 = vst [vmem:[#allocation2 + $0x30] sm:$0x1] %v235_v4 }
  0x38   : > { %v746_v61 = vsel %vm4558_vm2, %v565_v48, %v745_v54  ;;  %v1177_v0 = vor.u32 %v1176_v51, %v1172_v41  ;;  %v4705_v2 = vcombine.low %v766_v56, %v767_v44  ;;  %v4354_v3 = vld [vmem:[#allocation2 + $0x28] ss:$0 sps:$4 sm:$0x11]   ;;  %743 = vst [vmem:[#allocation2 + $0xe0] sm:$0xf] %v742_v58  ;;  %v371_v8 = vshrl.u32 %v188_v62, 16 }
  0x39   : > { %744 = vst [vmem:[#allocation2 + $0xe4] sm:$0xf] %v564_v57  ;;  %747 = vst [vmem:[#allocation2 + $0xe8] sm:$0x1] %v746_v61  ;;  %v374_v9 = vshll.u32 %v188_v62, 16  ;;  %v1059_v13 = vshll.u32 %v4354_v3, 16  ;;  %4210 = vmatpush3.bf16.msra.mxu0 %v4371_v39 }
  0x3a   : > { %v4710_v10 = vsel %vm1026_vm9, %v1177_v0, %v1181_v52  ;;  %v1052_v11 = vshrl.u32 %v4705_v2, 16  ;;  %v1054_v12 = vshll.u32 %v4705_v2, 16  ;;  %v211_v15 = vld [vmem:[%s4546_s8 + $0x70] sm:$0xf]  ;;  %v4377_v16 = vld [vmem:[%s6033_s1 + $0xa0] sm:$0xff]   ;;  %v285_v19 = vsel %vm4566_vm4, 0, %v284_v5 }
  0x3b   : > { %1583 = vmatmul.mubr.bf16.vlgmr.msra.gmra.mxu1 %v4710_v10  ;;  %v365_v20 = vrot.slane %v363_v6, 7  ;;  %v373_v23 = vrot.slane %v371_v8, 7  ;;  %v567_v24 = vshrl.u32 %v211_v15, 16  ;;  %v1061_v26 = vrot.slane %v1059_v13, 1  ;;  %286 = vst [vmem:[#allocation2 + $0x38] sm:$0x1] %v285_v19  ;;  %4211 = vmatprep.subr.bf16.mxu0 %v4377_v16 }
  0x3c   : > { %4158 = vmatpush3.bf16.msra.mxu1 %v4614_v59  ;;  %v1056_v25 = vrot.slane %v1054_v12, 1  ;;  %v212_v22 = vld [vmem:[%s4546_s8 + $0x74] sm:$0xf]  ;;  %v270_v27 = vld [vmem:[#allocation2 + $0xf0] sm:$0x1]  ;;  %v570_v47 = vshll.u32 %v211_v15, 16 }
  0x3d   : > { %v320_v28 = vld [vmem:[#allocation2 + $0xf8] sm:$0x1]  ;;  %4159 = vmatprep.subr.bf16.mxu1 %v4352_v55  ;;  %v368_v29 = vor.u32 %v366_v7, %v365_v20  ;;  %v369_v30 = vrot.slane %v365_v20, 4  ;;  %v376_v31 = vor.u32 %v374_v9, %v373_v23  ;;  %v378_v32 = vrot.slane %v373_v23, 4  ;;  %4212 = vmatpush3.bf16.msra.mxu0 %v4377_v16  ;;  %v4358_v48 = vld [vmem:[%s6033_s1 + $0x160] sm:$0xff]  }
  0x3e   : > { %v1057_v35 = vor.u32 %v1056_v25, %v1052_v11  ;;  %v271_v36 = vsel %vm4558_vm2, 0, %v270_v27  ;;  %v321_v38 = vsel %vm4566_vm4, 0, %v320_v28  ;;  %v569_v59 = vrot.slane %v567_v24, 7  ;;  %v664_v45 = vld [vmem:[#allocation2 + $0x30] sm:$0xf]  ;;  %v4364_v9 = vld [vmem:[%s6033_s1 + $0x158] sm:$0xff]  }
  0x3f   : > { %v790_v39 = vld [vmem:[#allocation2 + $0xe0] sm:$0xf]  ;;  %v377_v42 = vsel %vm4585_vm7, %v369_v30, %v376_v31  ;;  %272 = vst [vmem:[#allocation2 + $0xf0] sm:$0x1] %v271_v36  ;;  %322 = vst [vmem:[#allocation2 + $0xf8] sm:$0x1] %v321_v38  ;;  %v665_v50 = vsel %vm4598_vm8, %v368_v29, %v664_v45 }
  0x40   : > { %v791_v41 = vld [vmem:[#allocation2 + $0xe4] sm:$0xf]  ;;  %4160 = vmatpush3.bf16.msra.mxu1 %v4352_v55  ;;  %v4733_v43 = vsel %vm1026_vm9, %v1057_v35, %v1061_v26  ;;  %v4356_v60 = vld [vmem:[#allocation2 + $0xe8] ss:$0 sps:$4 sm:$0x11]   ;;  %v575_v51 = vshrl.u32 %v212_v22, 16  ;;  %v572_v61 = vor.u32 %v570_v47, %v569_v59 }
  0x41   : > { %v4735_v44 = vcombine.low %v790_v39, %v791_v41  ;;  %667 = vst [vmem:[#allocation2 + $0x34] sm:$0xf] %v377_v42  ;;  %1494 = vmatprep.mubr.bf16.mxu0 %v4733_v43  ;;  %4161 = vmatprep.subr.bf16.mxu1 %v4357_v17  ;;  %v578_v52 = vshll.u32 %v212_v22, 16  ;;  %v1203_v55 = vshll.u32 %v4356_v60, 16  ;;  %666 = vst [vmem:[#allocation2 + $0x30] sm:$0xf] %v665_v50 }
  0x42   : > { %1495 = vmatmul.mubr.bf16.gmra.mxu0 %v4675_v21  ;;  %v573_v56 = vrot.slane %v569_v59, 4  ;;  %v189_v57 = vld [vmem:[%s4546_s8 + $0x18] sm:$0xf]  ;;  %v577_v62 = vrot.slane %v575_v51, 7  ;;  %v190_v63 = vld [vmem:[%s4546_s8 + $0x1c] sm:$0xf] }
  0x43   : > { %v1196_v53 = vshrl.u32 %v4735_v44, 16  ;;  %v1198_v54 = vshll.u32 %v4735_v44, 16  ;;  %v668_v58 = vld [vmem:[#allocation2 + $0x38] sm:$0x1]  ;;  %v380_v0 = vshrl.u32 %v189_v57, 16  ;;  %v1205_v4 = vrot.slane %v1203_v55, 1 }
  0x44   : > { %4162 = vmatpush3.bf16.msra.mxu1 %v4357_v17  ;;  %v669_v5 = vsel %vm4558_vm2, %v378_v32, %v668_v58  ;;  %v237_v6 = vld [vmem:[#allocation2 + $0x40] sm:$0x1]  ;;  %v287_v7 = vld [vmem:[#allocation2 + $0x48] sm:$0x1]  ;;  %v580_v21 = vor.u32 %v578_v52, %v577_v62  ;;  %v582_v8 = vrot.slane %v577_v62, 4  ;;  %v383_v20 = vshll.u32 %v189_v57, 16 }
  0x45   : > { %v1200_v3 = vrot.slane %v1198_v54, 1  ;;  %4163 = vmatprep.subr.bf16.mxu1 %v4358_v48  ;;  %670 = vst [vmem:[#allocation2 + $0x38] sm:$0x1] %v669_v5  ;;  %v238_v11 = vsel %vm4558_vm2, 0, %v237_v6  ;;  %v288_v12 = vsel %vm4566_vm4, 0, %v287_v7  ;;  %v382_v19 = vrot.slane %v380_v0, 7 }
  0x46   : > { %v4758_v13 = vld [vmem:[%s4546_s8 + $0x78] sm:$0xf]  ;;  %v748_v16 = vld [vmem:[#allocation2 + $0xf0] sm:$0xf]  ;;  %239 = vst [vmem:[#allocation2 + $0x40] sm:$0x1] %v238_v11  ;;  %v581_v24 = vsel %vm4585_vm7, %v573_v56, %v580_v21 }
  0x47   : > { %v1201_v15 = vor.u32 %v1200_v3, %v1196_v53  ;;  %v752_v17 = vld [vmem:[#allocation2 + $0xf8] sm:$0x1]  ;;  %289 = vst [vmem:[#allocation2 + $0x48] sm:$0x1] %v288_v12  ;;  %v749_v25 = vsel %vm4598_vm8, %v572_v61, %v748_v16  ;;  %v4365_v22 = vld [vmem:[%s6033_s1 + $0x150] sm:$0xff]   ;;  %v388_v27 = vshrl.u32 %v190_v63, 16  ;;  %v385_v31 = vor.u32 %v383_v20, %v382_v19 }
  0x48   : > { %v769_v23 = vld [vmem:[#allocation2 + $0x34] sm:$0xf]  ;;  %v753_v26 = vsel %vm4558_vm2, %v582_v8, %v752_v17  ;;  %v214_v28 = vld [vmem:[%s4546_s8 + $0x7c] sm:$0xf]  ;;  %4164 = vmatpush3.bf16.msra.mxu1 %v4358_v48  ;;  %750 = vst [vmem:[#allocation2 + $0xf0] sm:$0xf] %v749_v25 }
  0x49   : > { %v4386_v29 = vld [vmem:[%s6033_s1 + $0x98] sm:$0xff]   ;;  %v4774_v30 = vsel %vm1026_vm9, %v1201_v15, %v1205_v4  ;;  %751 = vst [vmem:[#allocation2 + $0xf4] sm:$0xf] %v581_v24  ;;  %754 = vst [vmem:[#allocation2 + $0xf8] sm:$0x1] %v753_v26  ;;  %v386_v32 = vrot.slane %v382_v19, 4  ;;  %4165 = vmatprep.subr.bf16.mxu1 %v4364_v9 }
  0x4a   : > { %v391_v35 = vshll.u32 %v190_v63, 16  ;;  %v273_v36 = vld [vmem:[#allocation2 + $0x100] sm:$0x1]  ;;  %v323_v38 = vld [vmem:[#allocation2 + $0x108] sm:$0x1]  ;;  %1590 = vmatprep.mubr.bf16.mxu1 %v4774_v30  ;;  %v390_v39 = vrot.slane %v388_v27, 7  ;;  %4213 = vmatprep.subr.bf16.mxu0 %v4386_v29 }
  0x4b   : > { %v768_v59 = vld [vmem:[#allocation2 + $0x30] sm:$0xf]  ;;  %v274_v41 = vsel %vm4558_vm2, 0, %v273_v36  ;;  %v324_v42 = vsel %vm4566_vm4, 0, %v323_v38  ;;  %v584_v60 = vshrl.u32 %v4758_v13, 16  ;;  %1591 = vmatmul.mubr.bf16.gmra.mxu1 %v4686_v37  ;;  %v587_v47 = vshll.u32 %v4758_v13, 16  ;;  %4214 = vmatpush3.bf16.msra.mxu0 %v4386_v29 }
  0x4c   : > { %v4783_v45 = vcombine.low %v768_v59, %v769_v23  ;;  %275 = vst [vmem:[#allocation2 + $0x100] sm:$0x1] %v274_v41  ;;  %325 = vst [vmem:[#allocation2 + $0x108] sm:$0x1] %v324_v42  ;;  %v592_v48 = vshrl.u32 %v214_v28, 16  ;;  %v595_v50 = vshll.u32 %v214_v28, 16  ;;  %v393_v51 = vor.u32 %v391_v35, %v390_v39  ;;  %4166 = vmatpush3.bf16.msra.mxu1 %v4364_v9 }
  0x4d   : > { %v395_v52 = vrot.slane %v390_v39, 4  ;;  %v586_v53 = vrot.slane %v584_v60, 7  ;;  %v4370_v54 = vld [vmem:[%s6033_s1 + $0x148] sm:$0xff]   ;;  %v4361_v55 = vld [vmem:[#allocation2 + $0x38] ss:$0 sps:$4 sm:$0x11]   ;;  %4167 = vmatprep.subr.bf16.mxu1 %v4365_v22 }
  0x4e   : > { %v1064_v56 = vshrl.u32 %v4783_v45, 16  ;;  %v1066_v57 = vshll.u32 %v4783_v45, 16  ;;  %v394_v58 = vsel %vm4585_vm7, %v386_v32, %v393_v51  ;;  %v671_v61 = vld [vmem:[#allocation2 + $0x40] sm:$0xf]  ;;  %v675_v62 = vld [vmem:[#allocation2 + $0x48] sm:$0x1] }
  0x4f   : > { %v590_v63 = vrot.slane %v586_v53, 4  ;;  %v1071_v0 = vshll.u32 %v4361_v55, 16  ;;  %v672_v3 = vsel %vm4598_vm8, %v385_v31, %v671_v61  ;;  %674 = vst [vmem:[#allocation2 + $0x44] sm:$0xf] %v394_v58  ;;  %v676_v4 = vsel %vm4558_vm2, %v395_v52, %v675_v62  ;;  %v792_v7 = vld [vmem:[#allocation2 + $0xf0] sm:$0xf] }
  0x50   : > { %v594_v5 = vrot.slane %v592_v48, 7  ;;  %v1068_v6 = vrot.slane %v1066_v57, 1  ;;  %v793_v21 = vld [vmem:[#allocation2 + $0xf4] sm:$0xf]  ;;  %673 = vst [vmem:[#allocation2 + $0x40] sm:$0xf] %v672_v3  ;;  %v589_v8 = vor.u32 %v587_v47, %v586_v53  ;;  %4168 = vmatpush3.bf16.msra.mxu1 %v4365_v22 }
  0x51   : > { %677 = vst [vmem:[#allocation2 + $0x48] sm:$0x1] %v676_v4  ;;  %v4372_v9 = vld [vmem:[%s6033_s1 + $0x140] sm:$0xff]   ;;  %v1073_v11 = vrot.slane %v1071_v0, 1  ;;  %v4800_v12 = vcombine.low %v792_v7, %v793_v21  ;;  %4169 = vmatprep.subr.bf16.mxu1 %v4370_v54  ;;  %v4393_v23 = vld [vmem:[%s6033_s1 + $0x90] sm:$0xff]   ;;  %v4375_v36 = vld [vmem:[%s6033_s1 + $0x78] sm:$0xff]  }
  0x52   : > { %v4363_v13 = vld [vmem:[#allocation2 + $0xf8] ss:$0 sps:$4 sm:$0x11]   ;;  %v597_v15 = vor.u32 %v595_v50, %v594_v5  ;;  %v1069_v16 = vor.u32 %v1068_v6, %v1064_v56  ;;  %v599_v17 = vrot.slane %v594_v5, 4  ;;  %v191_v31 = vld [vmem:[%s4546_s8 + $0x20] sm:$0xf]  ;;  %4215 = vmatprep.subr.bf16.mxu0 %v4393_v23 }
  0x53   : > { %v755_v19 = vld [vmem:[#allocation2 + $0x100] sm:$0xf]  ;;  %v759_v20 = vld [vmem:[#allocation2 + $0x108] sm:$0x1]  ;;  %v1208_v24 = vshrl.u32 %v4800_v12, 16  ;;  %v1210_v25 = vshll.u32 %v4800_v12, 16  ;;  %4216 = vmatpush3.bf16.msra.mxu0 %v4393_v23 }
  0x54   : > { %v1215_v26 = vshll.u32 %v4363_v13, 16  ;;  %v598_v22 = vsel %vm4585_vm7, %v590_v63, %v597_v15  ;;  %v4810_v27 = vsel %vm1026_vm9, %v1069_v16, %v1073_v11  ;;  %v756_v28 = vsel %vm4598_vm8, %v589_v8, %v755_v19  ;;  %v192_v32 = vld [vmem:[%s4546_s8 + $0x24] sm:$0xf]  ;;  %v240_v35 = vld [vmem:[#allocation2 + $0x50] sm:$0x1]  ;;  %4170 = vmatpush3.bf16.msra.mxu1 %v4370_v54  ;;  %v4402_v7 = vld [vmem:[%s6033_s1 + $0x88] sm:$0xff]  }
  0x55   : > { %758 = vst [vmem:[#allocation2 + $0x104] sm:$0xf] %v598_v22  ;;  %v760_v29 = vsel %vm4558_vm2, %v599_v17, %v759_v20  ;;  %1502 = vmatprep.mubr.bf16.mxu0 %v4810_v27  ;;  %v1212_v38 = vrot.slane %v1210_v25, 1  ;;  %757 = vst [vmem:[#allocation2 + $0x100] sm:$0xf] %v756_v28  ;;  %v241_v39 = vsel %vm4558_vm2, 0, %v240_v35  ;;  %4171 = vmatprep.subr.bf16.mxu1 %v4372_v9 }
  0x56   : > { %v1217_v59 = vrot.slane %v1215_v26, 1  ;;  %761 = vst [vmem:[#allocation2 + $0x108] sm:$0x1] %v760_v29  ;;  %v290_v41 = vld [vmem:[#allocation2 + $0x58] sm:$0x1]  ;;  %v397_v42 = vshrl.u32 %v191_v31, 16  ;;  %1503 = vmatmul.mubr.bf16.gmra.mxu0 %v4733_v43  ;;  %4217 = vmatprep.subr.bf16.mxu0 %v4402_v7 }
  0x57   : > { %v771_v60 = vld [vmem:[#allocation2 + $0x44] sm:$0xf]  ;;  %242 = vst [vmem:[#allocation2 + $0x50] sm:$0x1] %v241_v39  ;;  %v291_v47 = vsel %vm4566_vm4, 0, %v290_v41  ;;  %v400_v48 = vshll.u32 %v191_v31, 16  ;;  %v1213_v52 = vor.u32 %v1212_v38, %v1208_v24  ;;  %4218 = vmatpush3.bf16.msra.mxu0 %v4402_v7 }
  0x58   : > { %v405_v50 = vshrl.u32 %v192_v32, 16  ;;  %v408_v51 = vshll.u32 %v192_v32, 16  ;;  %v770_v53 = vld [vmem:[#allocation2 + $0x40] sm:$0xf]  ;;  %292 = vst [vmem:[#allocation2 + $0x58] sm:$0x1] %v291_v47  ;;  %4172 = vmatpush3.bf16.msra.mxu1 %v4372_v9 }
  0x59   : > { %v399_v54 = vrot.slane %v397_v42, 7  ;;  %v4827_v55 = vcombine.low %v770_v53, %v771_v60  ;;  %v4367_v56 = vld [vmem:[#allocation2 + $0x48] ss:$0 sps:$4 sm:$0x11]   ;;  %v4830_v58 = vsel %vm1026_vm9, %v1213_v52, %v1217_v59  ;;  %3885 = vmatprep.subr.bf16.mxu1 %v4375_v36  ;;  %v194_v28 = vld [vmem:[%s4546_s8 + $0x2c] sm:$0xf] }
  0x5a   : > { %v407_v57 = vrot.slane %v405_v50, 7  ;;  %1598 = vmatprep.mubr.bf16.mxu1 %v4830_v58  ;;  %v1083_v3 = vshll.u32 %v4367_v56, 16  ;;  %v193_v23 = vld [vmem:[%s4546_s8 + $0x28] sm:$0xf]  ;;  %v243_v31 = vld [vmem:[#allocation2 + $0x60] sm:$0x1] }
  0x5b   : > { %v402_v61 = vor.u32 %v400_v48, %v399_v54  ;;  %v403_v62 = vrot.slane %v399_v54, 4  ;;  %v1076_v63 = vshrl.u32 %v4827_v55, 16  ;;  %v1078_v0 = vshll.u32 %v4827_v55, 16  ;;  %1599 = vmatmul.mubr.bf16.gmra.mxu1 %v4774_v30  ;;  %v293_v32 = vld [vmem:[#allocation2 + $0x68] sm:$0x1]  ;;  %v4405_v48 = vld [vmem:[%s6033_s1 + $0x80] sm:$0xff]  }
  0x5c   : > { %v410_v4 = vor.u32 %v408_v51, %v407_v57  ;;  %v795_v5 = vld [vmem:[#allocation2 + $0x104] sm:$0xf]  ;;  %v412_v6 = vrot.slane %v407_v57, 4  ;;  %v1085_v8 = vrot.slane %v1083_v3, 1  ;;  %v794_v9 = vld [vmem:[#allocation2 + $0x100] sm:$0xf]  ;;  %4219 = vmatprep.subr.bf16.mxu0 %v4405_v48 }
  0x5d   : > { %v1080_v21 = vrot.slane %v1078_v0, 1  ;;  %v4841_v13 = vcombine.low %v794_v9, %v795_v5  ;;  %v4369_v15 = vld [vmem:[#allocation2 + $0x108] ss:$0 sps:$4 sm:$0x11]   ;;  %v414_v35 = vshrl.u32 %v193_v23, 16  ;;  %v417_v36 = vshll.u32 %v193_v23, 16  ;;  %4220 = vmatpush3.bf16.msra.mxu0 %v4405_v48 }
  0x5e   : > { %v411_v11 = vsel %vm4585_vm7, %v403_v62, %v410_v4  ;;  %v678_v16 = vld [vmem:[#allocation2 + $0x50] sm:$0xf]  ;;  %v1227_v26 = vshll.u32 %v4369_v15, 16  ;;  %v244_v39 = vsel %vm4558_vm2, 0, %v243_v31  ;;  %v294_v41 = vsel %vm4566_vm4, 0, %v293_v32 }
  0x5f   : > { %681 = vst [vmem:[#allocation2 + $0x54] sm:$0xf] %v411_v11  ;;  %v1081_v17 = vor.u32 %v1080_v21, %v1076_v63  ;;  %v679_v19 = vsel %vm4598_vm8, %v402_v61, %v678_v16  ;;  %v682_v20 = vld [vmem:[#allocation2 + $0x58] sm:$0x1]  ;;  %v1220_v24 = vshrl.u32 %v4841_v13, 16  ;;  %v1222_v25 = vshll.u32 %v4841_v13, 16 }
  0x60   : > { %680 = vst [vmem:[#allocation2 + $0x50] sm:$0xf] %v679_v19  ;;  %v683_v22 = vsel %vm4558_vm2, %v412_v6, %v682_v20  ;;  %v1229_v59 = vrot.slane %v1227_v26, 1  ;;  %245 = vst [vmem:[#allocation2 + $0x60] sm:$0x1] %v244_v39  ;;  %v416_v42 = vrot.slane %v414_v35, 7 }
  0x61   : > { %v4852_v29 = vsel %vm1026_vm9, %v1081_v17, %v1085_v8  ;;  %684 = vst [vmem:[#allocation2 + $0x58] sm:$0x1] %v683_v22  ;;  %v1224_v38 = vrot.slane %v1222_v25, 1  ;;  %295 = vst [vmem:[#allocation2 + $0x68] sm:$0x1] %v294_v41  ;;  %v422_v60 = vshrl.u32 %v194_v28, 16 }
  0x62   : > { %1510 = vmatprep.mubr.bf16.mxu0 %v4852_v29  ;;  %v425_v47 = vshll.u32 %v194_v28, 16  ;;  %v195_v51 = vld [vmem:[%s4546_s8 + $0x30] sm:$0xf]  ;;  %v420_v53 = vrot.slane %v416_v42, 4  ;;  %v196_v56 = vld [vmem:[%s4546_s8 + $0x34] sm:$0xf]  ;;  %v419_v61 = vor.u32 %v417_v36, %v416_v42 }
  0x63   : > { %1511 = vmatmul.mubr.bf16.gmra.mxu0 %v4810_v27  ;;  %v1225_v50 = vor.u32 %v1224_v38, %v1220_v24  ;;  %v424_v54 = vrot.slane %v422_v60, 7  ;;  %v246_v62 = vld [vmem:[#allocation2 + $0x70] sm:$0x1]  ;;  %v296_v63 = vld [vmem:[#allocation2 + $0x78] sm:$0x1]  ;;  %v431_v0 = vshrl.u32 %v195_v51, 16 }
  0x64   : > { %v434_v3 = vshll.u32 %v195_v51, 16  ;;  %v247_v7 = vsel %vm4558_vm2, 0, %v246_v62  ;;  %v297_v21 = vsel %vm4566_vm4, 0, %v296_v63  ;;  %v439_v16 = vshrl.u32 %v196_v56, 16  ;;  %v4376_v25 = vld [vmem:[%s6033_s1 + $0x38] sm:$0xff]   ;;  %v4380_v38 = vld [vmem:[%s6033_s1 + $0x70] sm:$0xff]  }
  0x65   : > { %v4866_v57 = vsel %vm1026_vm9, %v1225_v50, %v1229_v59  ;;  %v427_v5 = vor.u32 %v425_v47, %v424_v54  ;;  %v429_v6 = vrot.slane %v424_v54, 4  ;;  %248 = vst [vmem:[#allocation2 + $0x70] sm:$0x1] %v247_v7  ;;  %298 = vst [vmem:[#allocation2 + $0x78] sm:$0x1] %v297_v21  ;;  %v433_v11 = vrot.slane %v431_v0, 7 }
  0x66   : > { %v773_v52 = vld [vmem:[#allocation2 + $0x54] sm:$0xf]  ;;  %1606 = vmatprep.mubr.bf16.mxu1 %v4866_v57  ;;  %v442_v17 = vshll.u32 %v196_v56, 16  ;;  %v441_v28 = vrot.slane %v439_v16, 7  ;;  %v197_v41 = vld [vmem:[%s4546_s8 + $0x38] sm:$0xf] }
  0x67   : > { %v772_v4 = vld [vmem:[#allocation2 + $0x50] sm:$0xf]  ;;  %1607 = vmatmul.mubr.bf16.gmra.mxu1 %v4830_v58  ;;  %v428_v15 = vsel %vm4585_vm7, %v420_v53, %v427_v5  ;;  %v685_v24 = vld [vmem:[#allocation2 + $0x60] sm:$0xf]  ;;  %v437_v22 = vrot.slane %v433_v11, 4  ;;  %v436_v36 = vor.u32 %v434_v3, %v433_v11  ;;  %v4384_v0 = vld [vmem:[%s6033_s1 + $0x68] sm:$0xff]  }
  0x68   : > { %v4874_v8 = vcombine.low %v772_v4, %v773_v52  ;;  %v4374_v9 = vld [vmem:[#allocation2 + $0x58] ss:$0 sps:$4 sm:$0x11]   ;;  %4173 = vmatprep.mubr.bf16.mxu1 %v4733_v43  ;;  %688 = vst [vmem:[#allocation2 + $0x64] sm:$0xf] %v428_v15  ;;  %v686_v43 = vsel %vm4598_vm8, %v419_v61, %v685_v24  ;;  %v444_v59 = vor.u32 %v442_v17, %v441_v28  ;;  %v446_v39 = vrot.slane %v441_v28, 4 }
  0x69   : > { %v1095_v23 = vshll.u32 %v4374_v9, 16  ;;  %v689_v26 = vld [vmem:[#allocation2 + $0x68] sm:$0x1]  ;;  %687 = vst [vmem:[#allocation2 + $0x60] sm:$0xf] %v686_v43  ;;  %v4381_v50 = vld [vmem:[%s6033_s1 + $0x30] sm:$0xff]  }
  0x6a   : > { %v1088_v19 = vshrl.u32 %v4874_v8, 16  ;;  %v1090_v20 = vshll.u32 %v4874_v8, 16  ;;  %v690_v35 = vsel %vm4558_vm2, %v429_v6, %v689_v26  ;;  %v198_v60 = vld [vmem:[%s4546_s8 + $0x3c] sm:$0xf]  ;;  %v249_v47 = vld [vmem:[#allocation2 + $0x80] sm:$0x1]  ;;  %v445_v51 = vsel %vm4585_vm7, %v437_v22, %v444_v59 }
  0x6b   : > { %v1097_v32 = vrot.slane %v1095_v23, 1  ;;  %691 = vst [vmem:[#allocation2 + $0x68] sm:$0x1] %v690_v35  ;;  %v299_v48 = vld [vmem:[#allocation2 + $0x88] sm:$0x1]  ;;  %v250_v54 = vsel %vm4558_vm2, 0, %v249_v47 }
  0x6c   : > { %v1092_v31 = vrot.slane %v1090_v20, 1  ;;  %v692_v52 = vld [vmem:[#allocation2 + $0x70] sm:$0xf]  ;;  %v696_v53 = vld [vmem:[#allocation2 + $0x78] sm:$0x1]  ;;  %v300_v56 = vsel %vm4566_vm4, 0, %v299_v48 }
  0x6d   : > { %v693_v62 = vsel %vm4598_vm8, %v436_v36, %v692_v52  ;;  %695 = vst [vmem:[#allocation2 + $0x74] sm:$0xf] %v445_v51  ;;  %v697_v63 = vsel %vm4558_vm2, %v446_v39, %v696_v53  ;;  %251 = vst [vmem:[#allocation2 + $0x80] sm:$0x1] %v250_v54  ;;  %v448_v3 = vshrl.u32 %v197_v41, 16  ;;  %v451_v6 = vshll.u32 %v197_v41, 16 }
  0x6e   : > { %v1093_v42 = vor.u32 %v1092_v31, %v1088_v19  ;;  %301 = vst [vmem:[#allocation2 + $0x88] sm:$0x1] %v300_v56  ;;  %v199_v4 = vld [vmem:[%s4546_s8 + $0x40] sm:$0xf]  ;;  %694 = vst [vmem:[#allocation2 + $0x70] sm:$0xf] %v693_v62 }
  0x6f   : > { %4174 = vmatmul.mubr.bf16.vlgmr.msra.gmra.mxu1 %v4810_v27  ;;  %v4411_v27 = vld [vmem:[%s6033_s1 + $0x1f8] sm:$0xff]   ;;  %v4918_v5 = vld [vmem:[#allocation2 + $0x64] sm:$0xf]  ;;  %698 = vst [vmem:[#allocation2 + $0x78] sm:$0x1] %v697_v63  ;;  %v456_v7 = vshrl.u32 %v198_v60, 16 }
  0x70   : > { %v4903_v61 = vsel %vm1026_vm9, %v1093_v42, %v1097_v32  ;;  %3886 = vmatpush3.bf16.msra.mxu1 %v4376_v25  ;;  %v459_v21 = vshll.u32 %v198_v60, 16  ;;  %v200_v9 = vld [vmem:[%s4546_s8 + $0x44] sm:$0xf]  ;;  %v465_v11 = vshrl.u32 %v199_v4, 16  ;;  %4177 = vmatprep.mubr.bf16.mxu1 %v4852_v29  ;;  %v450_v15 = vrot.slane %v448_v3, 7  ;;  %v4385_v23 = vld [vmem:[%s6033_s1 + $0x28] sm:$0xff]  }
  0x71   : > { %1518 = vmatprep.mubr.bf16.mxu0 %v4903_v61  ;;  %v252_v16 = vld [vmem:[#allocation2 + $0x90] sm:$0x1]  ;;  %v302_v17 = vld [vmem:[#allocation2 + $0x98] sm:$0x1]  ;;  %v468_v19 = vshll.u32 %v199_v4, 16  ;;  %3887 = vmatprep.subr.bf16.mxu1 %v4380_v38  ;;  %v458_v24 = vrot.slane %v456_v7, 7 }
  0x72   : > { %1519 = vmatmul.mubr.bf16.gmra.mxu0 %v4852_v29  ;;  %v774_v20 = vld [vmem:[#allocation2 + $0x60] sm:$0xf]  ;;  %v253_v25 = vsel %vm4558_vm2, 0, %v252_v16  ;;  %v303_v43 = vsel %vm4566_vm4, 0, %v302_v17  ;;  %v467_v26 = vrot.slane %v465_v11, 7  ;;  %4021 = vmatprep.subr.bf16.mxu0 %v4411_v27  ;;  %v453_v28 = vor.u32 %v451_v6, %v450_v15  ;;  %v4398_v17 = vld [vmem:[%s6033_s1 + $0x58] sm:$0xff]  }
  0x73   : > { %v4931_v29 = vcombine.low %v774_v20, %v4918_v5  ;;  %v4933_v22 = vld [vmem:[#allocation2 + $0x68] ss:$0 sps:$4 sm:$0x11]   ;;  %v454_v31 = vrot.slane %v450_v15, 4  ;;  %254 = vst [vmem:[#allocation2 + $0x90] sm:$0x1] %v253_v25  ;;  %v461_v32 = vor.u32 %v459_v21, %v458_v24 }
  0x74   : > { %304 = vst [vmem:[#allocation2 + $0x98] sm:$0x1] %v303_v43  ;;  %3888 = vmatpush3.bf16.msra.mxu1 %v4381_v50  ;;  %v463_v35 = vrot.slane %v458_v24, 4  ;;  %v4391_v36 = vld [vmem:[%s6033_s1 + $0x60] sm:$0xff]   ;;  %v1107_v39 = vshll.u32 %v4933_v22, 16  ;;  %v473_v41 = vshrl.u32 %v200_v9, 16  ;;  %v470_v50 = vor.u32 %v468_v19, %v467_v26 }
  0x75   : > { %v1100_v38 = vshrl.u32 %v4931_v29, 16  ;;  %v1102_v59 = vshll.u32 %v4931_v29, 16  ;;  %3889 = vmatprep.subr.bf16.mxu1 %v4384_v0  ;;  %v4941_v42 = vld [vmem:[#allocation2 + $0x74] sm:$0xf]  ;;  %v462_v60 = vsel %vm4585_vm7, %v454_v31, %v461_v32  ;;  %v699_v47 = vld [vmem:[#allocation2 + $0x80] sm:$0xf] }
  0x76   : > { %v703_v48 = vld [vmem:[#allocation2 + $0x88] sm:$0x1]  ;;  %v1109_v52 = vrot.slane %v1107_v39, 1  ;;  %v776_v53 = vld [vmem:[#allocation2 + $0x70] sm:$0xf]  ;;  %v700_v54 = vsel %vm4598_vm8, %v453_v28, %v699_v47  ;;  %v4392_v62 = vld [vmem:[%s6033_s1 + $0x20] sm:$0xff]  }
  0x77   : > { %v1104_v51 = vrot.slane %v1102_v59, 1  ;;  %4178 = vmatmul.mubr.bf16.gmra.mxu1 %v4903_v61  ;;  %702 = vst [vmem:[#allocation2 + $0x84] sm:$0xf] %v462_v60  ;;  %v704_v56 = vsel %vm4558_vm2, %v463_v35, %v703_v48  ;;  %v4954_v63 = vcombine.low %v776_v53, %v4941_v42  ;;  %v4956_v0 = vld [vmem:[#allocation2 + $0x78] ss:$0 sps:$4 sm:$0x11]  }
  0x78   : > { %3890 = vmatpush3.bf16.msra.mxu1 %v4385_v23  ;;  %701 = vst [vmem:[#allocation2 + $0x80] sm:$0xf] %v700_v54  ;;  %705 = vst [vmem:[#allocation2 + $0x88] sm:$0x1] %v704_v56  ;;  %v471_v3 = vrot.slane %v467_v26, 4  ;;  %v475_v4 = vrot.slane %v473_v41, 7 }
  0x79   : > { %v476_v27 = vshll.u32 %v200_v9, 16  ;;  %v1105_v6 = vor.u32 %v1104_v51, %v1100_v38  ;;  %3891 = vmatprep.subr.bf16.mxu1 %v4391_v36  ;;  %v1112_v7 = vshrl.u32 %v4954_v63, 16  ;;  %v1114_v21 = vshll.u32 %v4954_v63, 16  ;;  %v201_v24 = vld [vmem:[%s4546_s8 + $0x48] sm:$0xf]  ;;  %v4399_v48 = vld [vmem:[%s6033_s1 + $0x18] sm:$0xff]  }
  0x7a   : > { %v1119_v11 = vshll.u32 %v4956_v0, 16  ;;  %v706_v16 = vld [vmem:[#allocation2 + $0x90] sm:$0xf]  ;;  %v480_v20 = vrot.slane %v475_v4, 4  ;;  %v202_v28 = vld [vmem:[%s4546_s8 + $0x4c] sm:$0xf] }
  0x7b   : > { %v478_v15 = vor.u32 %v476_v27, %v475_v4  ;;  %v4965_v19 = vsel %vm1026_vm9, %v1105_v6, %v1109_v52  ;;  %v707_v9 = vsel %vm4598_vm8, %v470_v50, %v706_v16  ;;  %v710_v23 = vld [vmem:[#allocation2 + $0x98] sm:$0x1]  ;;  %v1116_v25 = vrot.slane %v1114_v21, 1  ;;  %v255_v31 = vld [vmem:[#allocation2 + $0xa0] sm:$0x1]  ;;  %v4400_v52 = vld [vmem:[%s6033_s1 + $0x50] sm:$0xff]  }
  0x7c   : > { %1526 = vmatprep.mubr.bf16.mxu0 %v4965_v19  ;;  %v1121_v43 = vrot.slane %v1119_v11, 1  ;;  %4181 = vmatprep.mubr.bf16.mxu1 %v4965_v19  ;;  %708 = vst [vmem:[#allocation2 + $0x90] sm:$0xf] %v707_v9  ;;  %v711_v32 = vsel %vm4558_vm2, %v480_v20, %v710_v23  ;;  %v256_v35 = vsel %vm4558_vm2, 0, %v255_v31  ;;  %v305_v36 = vld [vmem:[#allocation2 + $0xa8] sm:$0x1] }
  0x7d   : > { %v479_v26 = vsel %vm4585_vm7, %v471_v3, %v478_v15  ;;  %1527 = vmatmul.mubr.bf16.gmra.mxu0 %v4903_v61  ;;  %3892 = vmatpush3.bf16.msra.mxu1 %v4392_v62  ;;  %v482_v38 = vshrl.u32 %v201_v24, 16  ;;  %v485_v59 = vshll.u32 %v201_v24, 16  ;;  %v1117_v39 = vor.u32 %v1116_v25, %v1112_v7  ;;  %712 = vst [vmem:[#allocation2 + $0x98] sm:$0x1] %v711_v32  ;;  %v203_v3 = vld [vmem:[%s4546_s8 + $0x50] sm:$0xf] }
  0x7e   : > { %709 = vst [vmem:[#allocation2 + $0x94] sm:$0xf] %v479_v26  ;;  %v4980_v41 = vld [vmem:[#allocation2 + $0x84] sm:$0xf]  ;;  %257 = vst [vmem:[#allocation2 + $0xa0] sm:$0x1] %v256_v35  ;;  %3893 = vmatprep.subr.bf16.mxu1 %v4398_v17 }
  0x7f   : > { %v306_v61 = vsel %vm4566_vm4, 0, %v305_v36  ;;  %v490_v60 = vshrl.u32 %v202_v28, 16  ;;  %v493_v47 = vshll.u32 %v202_v28, 16  ;;  %v778_v50 = vld [vmem:[#allocation2 + $0x80] sm:$0xf]  ;;  %v484_v51 = vrot.slane %v482_v38, 7 }
  0x80   : > { %307 = vst [vmem:[#allocation2 + $0xa8] sm:$0x1] %v306_v61  ;;  %v4991_v53 = vsel %vm1026_vm9, %v1117_v39, %v1121_v43  ;;  %v4994_v54 = vcombine.low %v778_v50, %v4980_v41  ;;  %v4996_v56 = vld [vmem:[#allocation2 + $0x88] ss:$0 sps:$4 sm:$0x11]   ;;  %v4401_v4 = vld [vmem:[%s6033_s1 + $0x10] sm:$0xff]  }
  0x81   : > { %v492_v62 = vrot.slane %v490_v60, 7  ;;  %1534 = vmatprep.mubr.bf16.mxu0 %v4991_v53  ;;  %4182 = vmatmul.mubr.bf16.gmra.mxu1 %v4991_v53  ;;  %v487_v27 = vor.u32 %v485_v59, %v484_v51  ;;  %v488_v6 = vrot.slane %v484_v51, 4  ;;  %v204_v7 = vld [vmem:[%s4546_s8 + $0x54] sm:$0xf]  ;;  %v258_v21 = vld [vmem:[#allocation2 + $0xb0] sm:$0x1] }
  0x82   : > { %v499_v11 = vshrl.u32 %v203_v3, 16  ;;  %v1124_v15 = vshrl.u32 %v4994_v54, 16  ;;  %v1126_v16 = vshll.u32 %v4994_v54, 16  ;;  %v1131_v17 = vshll.u32 %v4996_v56, 16  ;;  %v308_v9 = vld [vmem:[#allocation2 + $0xb8] sm:$0x1]  ;;  %3894 = vmatpush3.bf16.msra.mxu1 %v4399_v48 }
  0x83   : > { %v495_v20 = vor.u32 %v493_v47, %v492_v62  ;;  %v4403_v23 = vld [vmem:[%s6033_s1 + $0x48] sm:$0xff]   ;;  %v780_v24 = vld [vmem:[#allocation2 + $0x90] sm:$0xf]  ;;  %v497_v25 = vrot.slane %v492_v62, 4  ;;  %v259_v43 = vsel %vm4558_vm2, 0, %v258_v21  ;;  %v309_v26 = vsel %vm4566_vm4, 0, %v308_v9  ;;  %3895 = vmatprep.subr.bf16.mxu1 %v4400_v52 }
  0x84   : > { %v501_v28 = vrot.slane %v499_v11, 7  ;;  %v1128_v31 = vrot.slane %v1126_v16, 1  ;;  %v1133_v32 = vrot.slane %v1131_v17, 1  ;;  %260 = vst [vmem:[#allocation2 + $0xb0] sm:$0x1] %v259_v43  ;;  %v502_v38 = vshll.u32 %v203_v3, 16 }
  0x85   : > { %v5015_v35 = vld [vmem:[#allocation2 + $0x94] sm:$0xf]  ;;  %v496_v36 = vsel %vm4585_vm7, %v488_v6, %v495_v20  ;;  %310 = vst [vmem:[#allocation2 + $0xb8] sm:$0x1] %v309_v26  ;;  %v4404_v59 = vld [vmem:[%s6033_s1 + $0x8] sm:$0xff]   ;;  %1535 = vmatmul.mubr.bf16.gmra.mxu0 %v4965_v19  ;;  %v507_v50 = vshrl.u32 %v204_v7, 16 }
  0x86   : > { %v5024_v18 = vcombine.low %v780_v24, %v5015_v35  ;;  %v5026_v39 = vld [vmem:[#allocation2 + $0x98] ss:$0 sps:$4 sm:$0x11]   ;;  %716 = vst [vmem:[#allocation2 + $0xa4] sm:$0xf] %v496_v36  ;;  %v505_v61 = vrot.slane %v501_v28, 4  ;;  %v1129_v60 = vor.u32 %v1128_v31, %v1124_v15  ;;  %3896 = vmatpush3.bf16.msra.mxu1 %v4401_v4 }
  0x87   : > { %v713_v47 = vld [vmem:[#allocation2 + $0xa0] sm:$0xf]  ;;  %v717_v48 = vld [vmem:[#allocation2 + $0xa8] sm:$0x1]  ;;  %v510_v51 = vshll.u32 %v204_v7, 16  ;;  %v1143_v3 = vshll.u32 %v5026_v39, 16  ;;  %3897 = vmatprep.subr.bf16.mxu1 %v4403_v23  ;;  %v504_v7 = vor.u32 %v502_v38, %v501_v28 }
  0x88   : > { %v1136_v52 = vshrl.u32 %v5024_v18, 16  ;;  %v1138_v62 = vshll.u32 %v5024_v18, 16  ;;  %v714_v19 = vsel %vm4598_vm8, %v487_v27, %v713_v47  ;;  %v4408_v6 = vld [vmem:[%s6033_s1 + $0x40] sm:$0xff]   ;;  %v1134_v21 = vsel %vm1026_vm9, %v1129_v60, %v1133_v32  ;;  %v5045_v9 = vld [vmem:[%s6033_s1 + $0x238] sm:$0xff]  }
  0x89   : > { %715 = vst [vmem:[#allocation2 + $0xa0] sm:$0xf] %v714_v19  ;;  %v718_v4 = vsel %vm4558_vm2, %v497_v25, %v717_v48  ;;  %v509_v11 = vrot.slane %v507_v50, 7  ;;  %1542 = vmatprep.mubr.bf16.mxu0 %v1134_v21  ;;  %4185 = vmatprep.mubr.bf16.mxu1 %v1134_v21  ;;  %v1145_v16 = vrot.slane %v1143_v3, 1  ;;  %v4409_v27 = vld [vmem:[%s6033_s1] sm:$0xff]  }
  0x8a   : > { %v1140_v15 = vrot.slane %v1138_v62, 1  ;;  %719 = vst [vmem:[#allocation2 + $0xa8] sm:$0x1] %v718_v4  ;;  %3898 = vmatpush3.bf16.msra.mxu1 %v4404_v59 }
  0x8b   : > { %v512_v17 = vor.u32 %v510_v51, %v509_v11  ;;  %v514_v20 = vrot.slane %v509_v11, 4  ;;  %v720_v24 = vld [vmem:[#allocation2 + $0xb0] sm:$0xf]  ;;  %3899 = vmatprep.subr.bf16.mxu1 %v4408_v6 }
  0x8c   : > { %v1141_v23 = vor.u32 %v1140_v15, %v1136_v52  ;;  %v724_v25 = vld [vmem:[#allocation2 + $0xb8] sm:$0x1]  ;;  %v721_v28 = vsel %vm4598_vm8, %v504_v7, %v720_v24  ;;  %v796_v11 = vld [vmem:[#allocation2 + $0x110] sm:$0xf]  ;;  %v5078_v15 = vld [vmem:[#allocation2 + $0x114] sm:$0xf] }
  0x8d   : > { %v5047_v43 = vld [vmem:[#allocation2 + $0xa4] sm:$0xf]  ;;  %v513_v26 = vsel %vm4585_vm7, %v505_v61, %v512_v17  ;;  %v725_v31 = vsel %vm4558_vm2, %v514_v20, %v724_v25  ;;  %1543 = vmatmul.mubr.bf16.gmra.mxu0 %v4991_v53  ;;  %722 = vst [vmem:[#allocation2 + $0xb0] sm:$0xf] %v721_v28  ;;  %v2248_v25 = vld [vmem:[#allocation2 + $0x60] sm:$0xe] }
  0x8e   : > { %v1146_v32 = vsel %vm1026_vm9, %v1141_v23, %v1145_v16  ;;  %723 = vst [vmem:[#allocation2 + $0xb4] sm:$0xf] %v513_v26  ;;  %726 = vst [vmem:[#allocation2 + $0xb8] sm:$0x1] %v725_v31  ;;  %3900 = vmatpush3.bf16.msra.mxu1 %v4409_v27  ;;  %v5082_v16 = vcombine.low %v796_v11, %v5078_v15  ;;  %v2249_v26 = vld [vmem:[#allocation2 + $0x70] sm:$0xe]  ;;  %v3502_v28 = vcombine.low %v2248_v25, %v4918_v5 }
  0x8f   : > { %4186 = vmatmul.mubr.bf16.gmra.mxu1 %v1146_v32  ;;  %1550 = vmatprep.mubr.bf16.mxu0 %v1146_v32  ;;  %v5087_v27 = vld [vmem:[#allocation2 + $0x118] ss:$0 sps:$4 sm:$0x11]  }
  0x90   : > { %v782_v36 = vld [vmem:[#allocation2 + $0xa0] sm:$0xf]  ;;  %4253 = vmatprep.subr.bf16.mxu1 %v5045_v9  ;;  %v1234_v17 = vshll.u32 %v5082_v16, 16  ;;  %v1232_v20 = vshrl.u32 %v5082_v16, 16  ;;  %v1239_v24 = vshll.u32 %v5087_v27, 16 }
  0x91   : > { %v5058_v34 = vcombine.low %v782_v36, %v5047_v43  ;;  %v5060_v38 = vld [vmem:[#allocation2 + $0xa8] ss:$0 sps:$4 sm:$0x11]   ;;  %v2333_v36 = vrot.slane %v3502_v28, 1 }
  0x92   : > { %v1155_v53 = vshll.u32 %v5060_v38, 16  ;;  %v1236_v23 = vrot.slane %v1234_v17, 1  ;;  %v4425_v17 = vld [vmem:[%s6033_s1 + $0x220] sm:$0xff]   ;;  %v4426_v28 = vld [vmem:[%s6033_s1 + $0x1c8] sm:$0xff]  }
  0x93   : > { %v1148_v14 = vshrl.u32 %v5058_v34, 16  ;;  %v1150_v46 = vshll.u32 %v5058_v34, 16 }
  0x94   : > { %v1157_v61 = vrot.slane %v1155_v53, 1  ;;  %v784_v60 = vld [vmem:[#allocation2 + $0xb0] sm:$0xf]  ;;  %v1237_v31 = vor.u32 %v1236_v23, %v1232_v20 }
  0x95   : > { %v1152_v59 = vrot.slane %v1150_v46, 1  ;;  %v5066_v47 = vld [vmem:[#allocation2 + $0xb4] sm:$0xf]  ;;  %1551 = vmatmul.mubr.bf16.gmra.mxu0 %v1134_v21  ;;  %v5071_v50 = vld [vmem:[#allocation2 + $0xb8] ss:$0 sps:$4 sm:$0x11]  }
  0x96   : > { %v5069_v48 = vcombine.low %v784_v60, %v5066_v47  ;;  %v1167_v3 = vshll.u32 %v5071_v50, 16  ;;  %v2250_v46 = vld [vmem:[#allocation2 + $0x80] sm:$0xe]  ;;  %v4416_v60 = vld [vmem:[%s6033_s1 + $0x1e8] sm:$0xff]   ;;  %v4423_v20 = vld [vmem:[%s6033_s1 + $0x1d0] sm:$0xff]   ;;  %v2349_v25 = vrot.slane %v5071_v50, 1 }
  0x97   : > { %v1153_v51 = vor.u32 %v1152_v59, %v1148_v14  ;;  %v3504_v5 = vcombine.low %v2250_v46, %v4980_v41  ;;  %v4413_v59 = vld [vmem:[%s6033_s1 + $0x1f0] sm:$0xff]   ;;  %v4427_v50 = vld [vmem:[%s6033_s1 + $0x188] sm:$0xff]  }
  0x98   : > { %v1160_v52 = vshrl.u32 %v5069_v48, 16  ;;  %v1162_v62 = vshll.u32 %v5069_v48, 16  ;;  %v1169_v4 = vrot.slane %v1167_v3, 1  ;;  %v2253_v23 = vld [vmem:[#allocation2 + $0xb0] sm:$0xe] }
  0x99   : > { %v1158_v19 = vsel %vm1026_vm9, %v1153_v51, %v1157_v61  ;;  %v2251_v61 = vld [vmem:[#allocation2 + $0x90] sm:$0xe] }
  0x9a   : > { %4189 = vmatprep.mubr.bf16.mxu1 %v1158_v19  ;;  %v1164_v6 = vrot.slane %v1162_v62, 1  ;;  %1558 = vmatprep.mubr.bf16.mxu0 %v1158_v19  ;;  %v3505_v51 = vcombine.low %v2251_v61, %v5015_v35  ;;  %v4418_v35 = vld [vmem:[%s6033_s1 + $0x1e0] sm:$0xff]  }
  0x9c   : > { %v1165_v7 = vor.u32 %v1164_v6, %v1160_v52  ;;  %v2343_v52 = vrot.slane %v5026_v39, 1  ;;  %v2342_v62 = vrot.slane %v3505_v51, 1  ;;  %v4417_v6 = vld [vmem:[%s6033_s1 + $0x1a8] sm:$0xff]   ;;  %v2252_v39 = vld [vmem:[#allocation2 + $0xa0] sm:$0xe] }
  0x9d   : > { %1559 = vmatmul.mubr.bf16.gmra.mxu0 %v1146_v32  ;;  %v1241_v32 = vrot.slane %v1239_v24, 1  ;;  %v3507_v24 = vcombine.low %v2253_v23, %v5066_v47 }
  0x9e   : > { %v1170_v21 = vsel %vm1026_vm9, %v1165_v7, %v1169_v4  ;;  %v5129_v3 = vsel %vm2314_vm10, %v2342_v62, %v2343_v52  ;;  %v3506_v4 = vcombine.low %v2252_v39, %v5047_v43  ;;  %v2346_v7 = vrot.slane %v5060_v38, 1  ;;  %v4422_v38 = vld [vmem:[%s6033_s1 + $0x198] sm:$0xff]   ;;  %v4457_v62 = vld [vmem:[#allocation2 + $0x28] ss:$0 sps:$4 sm:$0x11]  }
  0x9f   : > { %4190 = vmatmul.mubr.bf16.gmra.mxu1 %v1170_v21  ;;  %1566 = vmatprep.mubr.bf16.mxu0 %v1170_v21  ;;  %v1242_v53 = vsel %vm1026_vm9, %v1237_v31, %v1241_v32  ;;  %v4429_v31 = vld [vmem:[%s6033_s1 + $0x180] sm:$0xff]   ;;  %v4438_v32 = vld [vmem:[%s6033_s1 + $0x208] sm:$0xff]  }
  0xa0   : > { %4193 = vmatprep.mubr.bf16.mxu1 %v4710_v10  ;;  %v2345_v11 = vrot.slane %v3506_v4, 1 }
  0xa2   : > { %v5157_v43 = vsel %vm2314_vm10, %v2345_v11, %v2346_v7  ;;  %v4458_v7 = vld [vmem:[#allocation2 + $0x34] sm:$0xf]  ;;  %v4459_v11 = vld [vmem:[#allocation2 + $0x38] ss:$0 sps:$4 sm:$0x11]  }
  0xa5   : > { %1567 = vmatmul.mubr.bf16.gmra.mxu0 %v1158_v19  ;;  %v4415_v19 = vld [vmem:[%s6033_s1 + $0x230] sm:$0xff]  }
  0xa6   : > { %1574 = vmatprep.mubr.bf16.mxu0 %v4710_v10  ;;  %v3503_v10 = vcombine.low %v2249_v26, %v4941_v42  ;;  %v4424_v26 = vld [vmem:[%s6033_s1 + $0x190] sm:$0xff]  }
  0xa7   : > { %4194 = vmatmul.mubr.bf16.gmra.mxu1 %v4686_v37  ;;  %v2334_v37 = vrot.slane %v4933_v22, 1  ;;  %v2340_v22 = vrot.slane %v4996_v56, 1  ;;  %v4414_v56 = vld [vmem:[%s6033_s1 + $0x1b0] sm:$0xff]  }
  0xa8   : > { %4197 = vmatprep.mubr.bf16.mxu1 %v4774_v30  ;;  %v2337_v30 = vrot.slane %v4956_v0, 1  ;;  %v2336_v14 = vrot.slane %v3503_v10, 1  ;;  %v2339_v0 = vrot.slane %v3504_v5, 1  ;;  %v4435_v10 = vld [vmem:[%s6033_s1 + $0x210] sm:$0xff]  }
  0xa9   : > { %v5102_v42 = vsel %vm2314_vm10, %v2333_v36, %v2334_v37  ;;  %v2348_v37 = vrot.slane %v3507_v24, 1  ;;  %v2243_v36 = vld [vmem:[#allocation2 + $0x10] sm:$0xe]  ;;  %v4453_v5 = vld [vmem:[#allocation2 + $0x18] ss:$0 sps:$4 sm:$0x11]  }
  0xaa   : > { %v5115_v41 = vsel %vm2314_vm10, %v2339_v0, %v2340_v22  ;;  %v2319_v22 = vrot.slane %v4453_v5, 1  ;;  %v4454_v0 = vld [vmem:[#allocation2 + $0x4] sm:$0xf] }
  0xab   : > { %v5184_v47 = vsel %vm2314_vm10, %v2348_v37, %v2349_v25  ;;  %v4460_v25 = vld [vmem:[#allocation2 + $0x44] sm:$0xf]  ;;  %v4461_v37 = vld [vmem:[#allocation2 + $0x48] ss:$0 sps:$4 sm:$0x11]  }
  0xad   : > { %1575 = vmatmul.mubr.bf16.gmra.mxu0 %v1170_v21  ;;  %v4419_v21 = vld [vmem:[%s6033_s1 + $0x1a0] sm:$0xff]  }
  0xae   : > { %4221 = vmatprep.mubr.bf16.mxu0 %v4705_v2 }
  0xaf   : > { %4198 = vmatmul.mubr.bf16.gmra.mxu1 %v4830_v58  ;;  %v5105_v58 = vsel %vm2314_vm10, %v2336_v14, %v2337_v30  ;;  %v4428_v30 = vld [vmem:[%s6033_s1 + $0x1c0] sm:$0xff]   ;;  %v4452_v14 = vld [vmem:[#allocation2 + $0x14] sm:$0xf] }
  0xb0   : > { %4201 = vmatprep.mubr.bf16.mxu1 %v4866_v57  ;;  %v4412_v57 = vld [vmem:[%s6033_s1 + $0x1b8] sm:$0xff]   ;;  %v3497_v46 = vcombine.low %v2243_v36, %v4452_v14  ;;  %v4462_v36 = vld [vmem:[#allocation2 + $0x54] sm:$0xf] }
  0xb5   : > { %4222 = vmatmul.mubr.bf16.vlgmr.msra.gmra.mxu0 %v4783_v45 }
  0xb6   : > { %4022 = vmatpush3.bf16.msra.mxu0 %v4412_v57  ;;  %4225 = vmatprep.mubr.bf16.mxu0 %v4827_v55  ;;  %v2242_v57 = vld [vmem:[#allocation2] sm:$0xe] }
  0xb7   : > { %4202 = vmatmul.mubr.bf16.gmra.mxu1 %v1242_v53  ;;  %4023 = vmatprep.subr.bf16.mxu0 %v4413_v59  ;;  %v3496_v53 = vcombine.low %v2242_v57, %v4454_v0  ;;  %v4463_v57 = vld [vmem:[#allocation2 + $0x58] ss:$0 sps:$4 sm:$0x11]  }
  0xb8   : > { %1952 = vmatprep.mubr.bf16.mxu1 %v4647_v40 }
  0xba   : > { %4024 = vmatpush3.bf16.msra.mxu0 %v4414_v56  ;;  %v4455_v56 = vld [vmem:[#allocation2 + $0x24] sm:$0xf] }
  0xbb   : > { %4025 = vmatprep.subr.bf16.mxu0 %v4416_v60  ;;  %v4456_v60 = vld [vmem:[#allocation2 + $0x8] ss:$0 sps:$4 sm:$0x11]  }
  0xbc   : > { %v2316_v51 = vrot.slane %v4456_v60, 1 }
  0xbd   : > { %4226 = vmatmul.mubr.bf16.gmra.mxu0 %v4874_v8 }
  0xbe   : > { %4229 = vmatprep.mubr.bf16.mxu0 %v4931_v29  ;;  %4026 = vmatpush3.bf16.msra.mxu0 %v4417_v6  ;;  %v2245_v6 = vld [vmem:[#allocation2 + $0x30] sm:$0xe] }
  0xbf   : > { %1953 = vmatmul.mubr.bf16.vlgmr.msra.gmra.mxu1 %v4602_v49  ;;  %v4420_v49 = vld [vmem:[%s6033_s1 + $0x228] sm:$0xff]   ;;  %4027 = vmatprep.subr.bf16.mxu0 %v4418_v35 }
  0xc0   : > { %4254 = vmatpush3.bf16.msra.mxu1 %v5045_v9  ;;  %1960 = vmatprep.mubr.bf16.mxu1 %v4705_v2  ;;  %v4421_v9 = vld [vmem:[%s6033_s1 + $0x1d8] sm:$0xff]  }
  0xc1   : > { %4255 = vmatprep.subr.bf16.mxu1 %v4415_v19 }
  0xc2   : > { %4028 = vmatpush3.bf16.msra.mxu0 %v4419_v21 }
  0xc3   : > { %4029 = vmatprep.subr.bf16.mxu0 %v4421_v9 }
  0xc4   : > { %4256 = vmatpush3.bf16.msra.mxu1 %v4415_v19  ;;  %v2322_v19 = vrot.slane %v4457_v62, 1 }
  0xc5   : > { %4257 = vmatprep.subr.bf16.mxu1 %v4420_v49  ;;  %4230 = vmatmul.mubr.bf16.gmra.mxu0 %v4954_v63 }
  0xc6   : > { %4233 = vmatprep.mubr.bf16.mxu0 %v4994_v54  ;;  %4030 = vmatpush3.bf16.msra.mxu0 %v4422_v38  ;;  %v2325_v38 = vrot.slane %v4459_v11, 1 }
  0xc7   : > { %1961 = vmatmul.mubr.bf16.gmra.mxu1 %v4647_v40  ;;  %v4432_v40 = vld [vmem:[%s6033_s1 + $0x218] sm:$0xff]   ;;  %4031 = vmatprep.subr.bf16.mxu0 %v4423_v20 }
  0xc8   : > { %1968 = vmatprep.mubr.bf16.mxu1 %v4783_v45  ;;  %4258 = vmatpush3.bf16.msra.mxu1 %v4420_v49 }
  0xc9   : > { %4259 = vmatprep.subr.bf16.mxu1 %v4425_v17 }
  0xca   : > { %4032 = vmatpush3.bf16.msra.mxu0 %v4424_v26 }
  0xcb   : > { %4033 = vmatprep.subr.bf16.mxu0 %v4426_v28 }
  0xcc   : > { %4260 = vmatpush3.bf16.msra.mxu1 %v4425_v17  ;;  %v2246_v17 = vld [vmem:[#allocation2 + $0x40] sm:$0xe] }
  0xcd   : > { %4261 = vmatprep.subr.bf16.mxu1 %v4432_v40  ;;  %4234 = vmatmul.mubr.bf16.gmra.mxu0 %v5024_v18  ;;  %v3500_v26 = vcombine.low %v2246_v17, %v4460_v25 }
  0xce   : > { %4237 = vmatprep.mubr.bf16.mxu0 %v5058_v34  ;;  %4034 = vmatpush3.bf16.msra.mxu0 %v4427_v50  ;;  %v2328_v50 = vrot.slane %v4461_v37, 1 }
  0xcf   : > { %1969 = vmatmul.mubr.bf16.gmra.mxu1 %v4705_v2  ;;  %4035 = vmatprep.subr.bf16.mxu0 %v4428_v30  ;;  %v4441_v2 = vld [vmem:[%s6033_s1 + $0x200] sm:$0xff]   ;;  %v2327_v28 = vrot.slane %v3500_v26, 1  ;;  %v2247_v30 = vld [vmem:[#allocation2 + $0x50] sm:$0xe] }
  0xd0   : > { %1976 = vmatprep.mubr.bf16.mxu1 %v4827_v55  ;;  %4262 = vmatpush3.bf16.msra.mxu1 %v4432_v40  ;;  %v3501_v14 = vcombine.low %v2247_v30, %v4462_v36 }
  0xd1   : > { %4263 = vmatprep.subr.bf16.mxu1 %v4435_v10 }
  0xd2   : > { %4036 = vmatpush3.bf16.msra.mxu0 %v4429_v31 }
  0xd4   : > { %4264 = vmatpush3.bf16.msra.mxu1 %v4435_v10 }
  0xd5   : > { %4265 = vmatprep.subr.bf16.mxu1 %v4438_v32  ;;  %4238 = vmatmul.mubr.bf16.gmra.mxu0 %v5069_v48 }
  0xd6   : > { %4241 = vmatprep.mubr.bf16.mxu0 %v4682_v33 }
  0xd7   : > { %1977 = vmatmul.mubr.bf16.gmra.mxu1 %v4783_v45  ;;  %v2318_v45 = vrot.slane %v3497_v46, 1 }
  0xd8   : > { %1984 = vmatprep.mubr.bf16.mxu1 %v4874_v8  ;;  %4266 = vmatpush3.bf16.msra.mxu1 %v4438_v32 }
  0xd9   : > { %4267 = vmatprep.subr.bf16.mxu1 %v4441_v2  ;;  %v2320_v59 = vsel %vm2314_vm10, %v2318_v45, %v2319_v22  ;;  %v2330_v22 = vrot.slane %v3501_v14, 1 }
  0xdc   : > { %4268 = vmatpush3.bf16.msra.mxu1 %v4441_v2  ;;  %v5244_v2 = vsel %vm2314_vm10, %v2327_v28, %v2328_v50 }
  0xdd   : > { %4242 = vmatmul.mubr.bf16.gmra.mxu0 %v4657_v1 }
  0xde   : > { %4245 = vmatprep.mubr.bf16.mxu0 %v4735_v44 }
  0xdf   : > { %1985 = vmatmul.mubr.bf16.gmra.mxu1 %v4827_v55  ;;  %v2244_v55 = vld [vmem:[#allocation2 + $0x20] sm:$0xe] }
  0xe0   : > { %1992 = vmatprep.mubr.bf16.mxu1 %v4931_v29  ;;  %v3498_v61 = vcombine.low %v2244_v55, %v4455_v56  ;;  %v2331_v55 = vrot.slane %v4463_v57, 1 }
  0xe2   : > { %v2321_v52 = vrot.slane %v3498_v61, 1  ;;  %v5253_v56 = vsel %vm2314_vm10, %v2330_v22, %v2331_v55 }
  0xe4   : > { %v5226_v4 = vsel %vm2314_vm10, %v2321_v52, %v2322_v19 }
  0xe5   : > { %4246 = vmatmul.mubr.bf16.gmra.mxu0 %v4800_v12 }
  0xe6   : > { %4249 = vmatprep.mubr.bf16.mxu0 %v4841_v13 }
  0xe7   : > { %1993 = vmatmul.mubr.bf16.gmra.mxu1 %v4874_v8  ;;  %v2315_v8 = vrot.slane %v3496_v53, 1 }
  0xe8   : > { %2000 = vmatprep.mubr.bf16.mxu1 %v4954_v63 }
  0xe9   : > { %v2317_v35 = vsel %vm2314_vm10, %v2315_v8, %v2316_v51 }
  0xed   : > { %4250 = vmatmul.mubr.bf16.gmra.mxu0 %v5082_v16  ;;  %v3499_v16 = vcombine.low %v2245_v6, %v4458_v7 }
  0xee   : > { %2612 = vmatprep.mubr.bf16.mxu0 %v2320_v59 }
  0xef   : > { %2001 = vmatmul.mubr.bf16.gmra.mxu1 %v4931_v29  ;;  %v2324_v9 = vrot.slane %v3499_v16, 1 }
  0xf0   : > { %2008 = vmatprep.mubr.bf16.mxu1 %v4994_v54  ;;  %v3765_v39 = vpop.f32.mrf.mxu0 }
  0xf1   : > { %v5236_v24 = vsel %vm2314_vm10, %v2324_v9, %v2325_v38 }
  0xf2   : > { %v3766_v21 = vpop.f32.mrf.mxu0 }
  0xf3   : > { %v5228_v29 = vadd.f32 %v3766_v21, %v3765_v39 }
  0xf4   : > { %v3768_v49 = vpop.f32.mrf.mxu0 }
  0xf5   : > { %2613 = vmatmul.mubr.bf16.vlgmr.msra.gmra.mxu0 %v2317_v35 }
  0xf6   : > { %2620 = vmatprep.mubr.bf16.mxu0 %v5226_v4  ;;  %v3769_v20 = vpop.f32.mrf.mxu0 }
  0xf7   : > { %2009 = vmatmul.mubr.bf16.gmra.mxu1 %v4954_v63  ;;  %v5233_v23 = vadd.f32 %v3769_v20, %v3768_v49 }
  0xf8   : > { %2016 = vmatprep.mubr.bf16.mxu1 %v5024_v18 }
  0xfb   : > { %v3837_v40 = vpop.f32.mrf.mxu1 }
  0xfd   : > { %2621 = vmatmul.mubr.bf16.gmra.mxu0 %v2320_v59  ;;  %v3838_v63 = vpop.f32.mrf.mxu1 }
  0xfe   : > { %2628 = vmatprep.mubr.bf16.mxu0 %v5236_v24  ;;  %v5241_v10 = vadd.f32 %v3838_v63, %v3837_v40 }
  0xff   : > { %2017 = vmatmul.mubr.bf16.gmra.mxu1 %v4994_v54  ;;  %v3840_v31 = vpop.f32.mrf.mxu1 }
 0x100   : > { %2024 = vmatprep.mubr.bf16.mxu1 %v5058_v34 }
 0x101   : > { %v3841_v32 = vpop.f32.mrf.mxu1 }
 0x102   : > { %v5246_v46 = vadd.f32 %v3841_v32, %v3840_v31  ;;  %v3771_v54 = vpop.f32.mrf.mxu0 }
 0x104   : > { %v3772_v45 = vpop.f32.mrf.mxu0 }
 0x105   : > { %2629 = vmatmul.mubr.bf16.gmra.mxu0 %v5226_v4  ;;  %v3773_v5 = vadd.f32 %v3772_v45, %v3771_v54 }
 0x106   : > { %2636 = vmatprep.mubr.bf16.mxu0 %v5244_v2  ;;  %v3774_v0 = vpop.f32.mrf.mxu0 }
 0x107   : > { %2025 = vmatmul.mubr.bf16.gmra.mxu1 %v5024_v18 }
 0x108   : > { %2032 = vmatprep.mubr.bf16.mxu1 %v5069_v48  ;;  %v3775_v53 = vpop.f32.mrf.mxu0 }
 0x109   : > { %v3776_v59 = vadd.f32 %v3775_v53, %v3774_v0  ;;  %v2254_v53 = vld [vmem:[#allocation2 + $0xc0] sm:$0xe] }
 0x10b   : > { %v3843_v61 = vpop.f32.mrf.mxu1 }
 0x10d   : > { %2637 = vmatmul.mubr.bf16.gmra.mxu0 %v5236_v24  ;;  %v3844_v8 = vpop.f32.mrf.mxu1 }
 0x10e   : > { %2644 = vmatprep.mubr.bf16.mxu0 %v5253_v56  ;;  %v5258_v18 = vadd.f32 %v3844_v8, %v3843_v61 }
 0x10f   : > { %2033 = vmatmul.mubr.bf16.gmra.mxu1 %v5058_v34  ;;  %v3846_v60 = vpop.f32.mrf.mxu1 }
 0x110   : > { %2040 = vmatprep.mubr.bf16.mxu1 %v4682_v33 }
 0x111   : > { %v3847_v51 = vpop.f32.mrf.mxu1 }
 0x112   : > { %v5261_v52 = vadd.f32 %v3847_v51, %v3846_v60  ;;  %v4464_v60 = vld [vmem:[#allocation2 + $0xc4] sm:$0xf] }
 0x113   : > { %v3508_v51 = vcombine.low %v2254_v53, %v4464_v60  ;;  %v4469_v60 = vld [vmem:[#allocation2 + $0xe8] ss:$0 sps:$4 sm:$0x11]  }
 0x115   : > { %2645 = vmatmul.mubr.bf16.gmra.mxu0 %v5244_v2 }
 0x116   : > { %2652 = vmatprep.mubr.bf16.mxu0 %v5102_v42  ;;  %v3777_v62 = vpop.f32.mrf.mxu0 }
 0x117   : > { %2041 = vmatmul.mubr.bf16.gmra.mxu1 %v5069_v48 }
 0x118   : > { %2048 = vmatprep.mubr.bf16.mxu1 %v4657_v1  ;;  %v3778_v34 = vpop.f32.mrf.mxu0 }
 0x119   : > { %v3779_v19 = vadd.f32 %v3778_v34, %v3777_v62 }
 0x11a   : > { %v3780_v6 = vpop.f32.mrf.mxu0 }
 0x11b   : > { %v3849_v35 = vpop.f32.mrf.mxu1 }
 0x11c   : > { %v3781_v39 = vpop.f32.mrf.mxu0 }
 0x11d   : > { %2653 = vmatmul.mubr.bf16.gmra.mxu0 %v5253_v56  ;;  %v3850_v7 = vpop.f32.mrf.mxu1  ;;  %v3782_v16 = vadd.f32 %v3781_v39, %v3780_v6  ;;  %v4465_v6 = vld [vmem:[#allocation2 + $0xc8] ss:$0 sps:$4 sm:$0x11]  }
 0x11e   : > { %2660 = vmatprep.mubr.bf16.mxu0 %v5105_v58  ;;  %v5270_v21 = vadd.f32 %v3850_v7, %v3849_v35  ;;  %v2352_v35 = vrot.slane %v4465_v6, 1  ;;  %v2255_v7 = vld [vmem:[#allocation2 + $0xd0] sm:$0xe] }
 0x11f   : > { %2049 = vmatmul.mubr.bf16.gmra.mxu1 %v4682_v33  ;;  %v3852_v48 = vpop.f32.mrf.mxu1 }
 0x120   : > { %2056 = vmatprep.mubr.bf16.mxu1 %v4735_v44 }
 0x121   : > { %v3853_v49 = vpop.f32.mrf.mxu1 }
 0x122   : > { %v5273_v9 = vadd.f32 %v3853_v49, %v3852_v48 }
 0x123   : > { %v3783_v11 = vpop.f32.mrf.mxu0 }
 0x125   : > { %v3784_v38 = vpop.f32.mrf.mxu0  ;;  %2661 = vmatmul.mubr.bf16.gmra.mxu0 %v5102_v42 }
 0x126   : > { %v3785_v17 = vadd.f32 %v3784_v38, %v3783_v11  ;;  %2668 = vmatprep.mubr.bf16.mxu0 %v5115_v41 }
 0x127   : > { %2057 = vmatmul.mubr.bf16.gmra.mxu1 %v4657_v1  ;;  %v3786_v33 = vpop.f32.mrf.mxu0  ;;  %v3855_v20 = vpop.f32.mrf.mxu1 }
 0x128   : > { %2064 = vmatprep.mubr.bf16.mxu1 %v4800_v12 }
 0x129   : > { %v3787_v25 = vpop.f32.mrf.mxu0  ;;  %v3856_v26 = vpop.f32.mrf.mxu1 }
 0x12a   : > { %v3788_v40 = vadd.f32 %v3787_v25, %v3786_v33  ;;  %v5279_v63 = vadd.f32 %v3856_v26, %v3855_v20 }
 0x12b   : > { %v3858_v28 = vpop.f32.mrf.mxu1 }
 0x12d   : > { %2669 = vmatmul.mubr.bf16.gmra.mxu0 %v5105_v58  ;;  %v3859_v37 = vpop.f32.mrf.mxu1 }
 0x12e   : > { %v5283_v50 = vadd.f32 %v3859_v37, %v3858_v28  ;;  %2676 = vmatprep.mubr.bf16.mxu0 %v5129_v3 }
 0x12f   : > { %2065 = vmatmul.mubr.bf16.gmra.mxu1 %v4735_v44  ;;  %v4175_v1 = vpop.f32.mrf.mxu1 }
 0x130   : > { %2072 = vmatprep.mubr.bf16.mxu1 %v4841_v13  ;;  %v5287_v30 = vadd.f32 %v4175_v1, %v3773_v5 }
 0x131   : > { %v1649_v32 = vpop.f32.mrf.mxu1 }
 0x132   : > { %v3789_v31 = vpop.f32.mrf.mxu0  ;;  %v5290_v36 = vadd.f32 %v5228_v29, %v1649_v32 }
 0x133   : > { %v4176_v54 = vpop.f32.mrf.mxu1 }
 0x134   : > { %v3790_v14 = vpop.f32.mrf.mxu0  ;;  %v5292_v22 = vadd.f32 %v4176_v54, %v3776_v59 }
 0x135   : > { %v3791_v45 = vadd.f32 %v3790_v14, %v3789_v31  ;;  %2677 = vmatmul.mubr.bf16.gmra.mxu0 %v5115_v41  ;;  %v1652_v57 = vpop.f32.mrf.mxu1  ;;  %v4467_v31 = vld [vmem:[#allocation2 + $0xd8] ss:$0 sps:$4 sm:$0x11]  }
 0x136   : > { %v3792_v44 = vpop.f32.mrf.mxu0  ;;  %v5297_v13 = vadd.f32 %v5233_v23, %v1652_v57  ;;  %2684 = vmatprep.mubr.bf16.mxu0 %v5157_v43  ;;  %v2355_v32 = vrot.slane %v4467_v31, 1 }
 0x137   : > { %2073 = vmatmul.mubr.bf16.gmra.mxu1 %v4800_v12  ;;  %v4179_v5 = vpop.f32.mrf.mxu1 }
 0x138   : > { %4269 = vmatprep.mubr.bf16.mxu1 %v5226_v4  ;;  %v3793_v29 = vpop.f32.mrf.mxu0  ;;  %v5301_v0 = vadd.f32 %v4179_v5, %v3785_v17 }
 0x139   : > { %v3794_v55 = vadd.f32 %v3793_v29, %v3792_v44  ;;  %v1665_v59 = vpop.f32.mrf.mxu1 }
 0x13a   : > { %v5303_v61 = vadd.f32 %v3779_v19, %v1665_v59  ;;  %v2351_v19 = vrot.slane %v3508_v51, 1  ;;  %v2358_v51 = vrot.slane %v4469_v60, 1 }
 0x13b   : > { %v4180_v8 = vpop.f32.mrf.mxu1 }
 0x13c   : > { %v5305_v12 = vadd.f32 %v4180_v8, %v3788_v40 }
 0x13d   : > { %v3795_v23 = vpop.f32.mrf.mxu0  ;;  %2685 = vmatmul.mubr.bf16.gmra.mxu0 %v5129_v3  ;;  %v1668_v62 = vpop.f32.mrf.mxu1 }
 0x13e   : > { %v5309_v4 = vadd.f32 %v3782_v16, %v1668_v62  ;;  %2692 = vmatprep.mubr.bf16.mxu0 %v5184_v47  ;;  %v4466_v16 = vld [vmem:[#allocation2 + $0xd4] sm:$0xf] }
 0x13f   : > { %4270 = vmatmul.mubr.bf16.vlgmr.msra.gmra.mxu1 %v5236_v24  ;;  %v3796_v34 = vpop.f32.mrf.mxu0  ;;  %v5316_v24 = vsel %vm2314_vm10, %v2351_v19, %v2352_v35  ;;  %v3509_v33 = vcombine.low %v2255_v7, %v4466_v16 }
 0x140   : > { %4273 = vmatprep.mubr.bf16.mxu1 %v5244_v2  ;;  %v3797_v39 = vadd.f32 %v3796_v34, %v3795_v23  ;;  %v2257_v34 = vld [vmem:[#allocation2 + $0xf0] sm:$0xe] }
 0x141   : > { %v3798_v48 = vpop.f32.mrf.mxu0  ;;  %v4183_v49 = vpop.f32.mrf.mxu1  ;;  %v2354_v1 = vrot.slane %v3509_v33, 1 }
 0x142   : > { %v5313_v11 = vadd.f32 %v4183_v49, %v3797_v39 }
 0x143   : > { %v3799_v38 = vpop.f32.mrf.mxu0  ;;  %v1681_v17 = vpop.f32.mrf.mxu1  ;;  %v5329_v29 = vsel %vm2314_vm10, %v2354_v1, %v2355_v32  ;;  %v2258_v1 = vld [vmem:[#allocation2 + $0x100] sm:$0xe] }
 0x144   : > { %v3800_v20 = vadd.f32 %v3799_v38, %v3798_v48  ;;  %v5318_v25 = vadd.f32 %v3791_v45, %v1681_v17  ;;  %v2256_v45 = vld [vmem:[#allocation2 + $0xe0] sm:$0xe]  ;;  %v4470_v48 = vld [vmem:[#allocation2 + $0xf4] sm:$0xf] }
 0x145   : > { %v3801_v2 = vpop.f32.mrf.mxu0  ;;  %2693 = vmatmul.mubr.bf16.gmra.mxu0 %v5157_v43  ;;  %v4184_v26 = vpop.f32.mrf.mxu1  ;;  %v3511_v49 = vcombine.low %v2257_v34, %v4470_v48 }
 0x146   : > { %v5322_v40 = vadd.f32 %v4184_v26, %v3800_v20  ;;  %2700 = vmatprep.mubr.bf16.mxu0 %v5316_v24  ;;  %v4471_v26 = vld [vmem:[#allocation2 + $0xf8] ss:$0 sps:$4 sm:$0x11]  }
 0x147   : > { %4274 = vmatmul.mubr.bf16.gmra.mxu1 %v5253_v56  ;;  %v3802_v28 = vpop.f32.mrf.mxu0  ;;  %v1684_v37 = vpop.f32.mrf.mxu1  ;;  %v4468_v56 = vld [vmem:[#allocation2 + $0xe4] sm:$0xf] }
 0x148   : > { %4277 = vmatprep.mubr.bf16.mxu1 %v5102_v42  ;;  %v3803_v14 = vadd.f32 %v3802_v28, %v3801_v2  ;;  %v5326_v54 = vadd.f32 %v3794_v55, %v1684_v37  ;;  %v3510_v5 = vcombine.low %v2256_v45, %v4468_v56  ;;  %v2360_v2 = vrot.slane %v3511_v49, 1  ;;  %v4472_v45 = vld [vmem:[#allocation2 + $0x104] sm:$0xf] }
 0x149   : > { %v3804_v44 = vpop.f32.mrf.mxu0  ;;  %v2361_v28 = vrot.slane %v4471_v26, 1 }
 0x14a   : > { %v2357_v8 = vrot.slane %v3510_v5, 1 }
 0x14b   : > { %v3805_v57 = vpop.f32.mrf.mxu0 }
 0x14c   : > { %v3806_v53 = vadd.f32 %v3805_v57, %v3804_v44  ;;  %v3512_v44 = vcombine.low %v2258_v1, %v4472_v45 }
 0x14d   : > { %v3807_v59 = vpop.f32.mrf.mxu0  ;;  %2701 = vmatmul.mubr.bf16.gmra.mxu0 %v5184_v47 }
 0x14e   : > { %2708 = vmatprep.mubr.bf16.mxu0 %v5329_v29  ;;  %v2363_v5 = vrot.slane %v3512_v44, 1 }
 0x14f   : > { %4278 = vmatmul.mubr.bf16.gmra.mxu1 %v5105_v58  ;;  %v4187_v42 = vpop.f32.mrf.mxu1  ;;  %v3808_v55 = vpop.f32.mrf.mxu0  ;;  %v2359_v58 = vsel %vm2314_vm10, %v2357_v8, %v2358_v51 }
 0x150   : > { %4281 = vmatprep.mubr.bf16.mxu1 %v5115_v41  ;;  %v3809_v23 = vadd.f32 %v3808_v55, %v3807_v59 }
 0x151   : > { %v1697_v62 = vpop.f32.mrf.mxu1  ;;  %v3810_v6 = vpop.f32.mrf.mxu0 }
 0x152   : > { %v5335_v19 = vadd.f32 %v3803_v14, %v1697_v62  ;;  %v5337_v35 = vadd.f32 %v4187_v42, %v3809_v23  ;;  %v2362_v14 = vsel %vm2314_vm10, %v2360_v2, %v2361_v28 }
 0x153   : > { %v4188_v39 = vpop.f32.mrf.mxu1  ;;  %v3811_v7 = vpop.f32.mrf.mxu0 }
 0x154   : > { %v3812_v38 = vadd.f32 %v3811_v7, %v3810_v6 }
 0x155   : > { %v1700_v41 = vpop.f32.mrf.mxu1  ;;  %v3813_v16 = vpop.f32.mrf.mxu0  ;;  %2709 = vmatmul.mubr.bf16.gmra.mxu0 %v5316_v24 }
 0x156   : > { %v5340_v17 = vadd.f32 %v3806_v53, %v1700_v41  ;;  %v5344_v33 = vadd.f32 %v4188_v39, %v3812_v38  ;;  %2716 = vmatprep.mubr.bf16.mxu0 %v2359_v58  ;;  %v4473_v53 = vld [vmem:[#allocation2 + $0x108] ss:$0 sps:$4 sm:$0x11]  }
 0x157   : > { %4282 = vmatmul.mubr.bf16.gmra.mxu1 %v5129_v3  ;;  %v3814_v20 = vpop.f32.mrf.mxu0  ;;  %v2364_v59 = vrot.slane %v4473_v53, 1 }
 0x158   : > { %4285 = vmatprep.mubr.bf16.mxu1 %v5157_v43  ;;  %v3815_v37 = vadd.f32 %v3814_v20, %v3813_v16  ;;  %v2259_v16 = vld [vmem:[#allocation2 + $0x110] sm:$0xe] }
 0x159   : > { %v3816_v31 = vpop.f32.mrf.mxu0  ;;  %v2365_v34 = vsel %vm2314_vm10, %v2363_v5, %v2364_v59 }
 0x15b   : > { %v3817_v32 = vpop.f32.mrf.mxu0 }
 0x15c   : > { %v3818_v57 = vadd.f32 %v3817_v32, %v3816_v31 }
 0x15d   : > { %v3819_v56 = vpop.f32.mrf.mxu0  ;;  %2717 = vmatmul.mubr.bf16.gmra.mxu0 %v5329_v29 }
 0x15e   : > { %2724 = vmatprep.mubr.bf16.mxu0 %v2362_v14 }
 0x15f   : > { %v4191_v3 = vpop.f32.mrf.mxu1  ;;  %4286 = vmatmul.mubr.bf16.gmra.mxu1 %v5184_v47  ;;  %v3820_v43 = vpop.f32.mrf.mxu0 }
 0x160   : > { %4289 = vmatprep.mubr.bf16.mxu1 %v5316_v24  ;;  %v3821_v55 = vadd.f32 %v3820_v43, %v3819_v56 }
 0x161   : > { %v1713_v42 = vpop.f32.mrf.mxu1  ;;  %v3822_v60 = vpop.f32.mrf.mxu0 }
 0x162   : > { %v5351_v8 = vadd.f32 %v3815_v37, %v1713_v42  ;;  %v5353_v23 = vadd.f32 %v4191_v3, %v3821_v55  ;;  %v3513_v37 = vcombine.low %v2259_v16, %v5078_v15 }
 0x163   : > { %v4192_v51 = vpop.f32.mrf.mxu1  ;;  %v3823_v62 = vpop.f32.mrf.mxu0 }
 0x164   : > { %v3824_v47 = vadd.f32 %v3823_v62, %v3822_v60  ;;  %v2366_v44 = vrot.slane %v3513_v37, 1 }
 0x165   : > { %v1716_v6 = vpop.f32.mrf.mxu1  ;;  %v3825_v24 = vpop.f32.mrf.mxu0  ;;  %2725 = vmatmul.mubr.bf16.gmra.mxu0 %v2359_v58 }
 0x166   : > { %v5356_v39 = vadd.f32 %v3818_v57, %v1716_v6  ;;  %v5359_v48 = vadd.f32 %v4192_v51, %v3824_v47  ;;  %2732 = vmatprep.mubr.bf16.mxu0 %v2365_v34  ;;  %v2367_v57 = vrot.slane %v5087_v27, 1 }
 0x167   : > { %v4195_v7 = vpop.f32.mrf.mxu1  ;;  %4290 = vmatmul.mubr.bf16.gmra.mxu1 %v5329_v29  ;;  %v3826_v49 = vpop.f32.mrf.mxu0 }
 0x168   : > { %4293 = vmatprep.mubr.bf16.mxu1 %v2359_v58  ;;  %v3827_v41 = vadd.f32 %v3826_v49, %v3825_v24 }
 0x169   : > { %v1729_v38 = vpop.f32.mrf.mxu1  ;;  %v3828_v20 = vpop.f32.mrf.mxu0 }
 0x16a   : > { %v5361_v26 = vadd.f32 %v3827_v41, %v1729_v38 }
 0x16b   : > { %v4196_v2 = vpop.f32.mrf.mxu1  ;;  %v3829_v28 = vpop.f32.mrf.mxu0 }
 0x16c   : > { %v3830_v31 = vadd.f32 %v3829_v28, %v3828_v20 }
 0x16d   : > { %v1732_v1 = vpop.f32.mrf.mxu1  ;;  %v3831_v32 = vpop.f32.mrf.mxu0  ;;  %2733 = vmatmul.mubr.bf16.gmra.mxu0 %v2362_v14 }
 0x16e   : > { %v5364_v45 = vadd.f32 %v3830_v31, %v1732_v1 }
 0x16f   : > { %v4199_v29 = vpop.f32.mrf.mxu1  ;;  %4294 = vmatmul.mubr.bf16.gmra.mxu1 %v2362_v14  ;;  %v3832_v56 = vpop.f32.mrf.mxu0 }
 0x170   : > { %v5367_v58 = vadd.f32 %v4199_v29, %v5258_v18  ;;  %4297 = vmatprep.mubr.bf16.mxu1 %v2365_v34  ;;  %v3833_v43 = vadd.f32 %v3832_v56, %v3831_v32  ;;  %v2368_v18 = vsel %vm2314_vm10, %v2366_v44, %v2367_v57 }
 0x171   : > { %v1745_v3 = vpop.f32.mrf.mxu1  ;;  %v3834_v5 = vpop.f32.mrf.mxu0 }
 0x172   : > { %v5371_v15 = vadd.f32 %v5241_v10, %v1745_v3  ;;  %v5373_v59 = vadd.f32 %v4195_v7, %v3833_v43 }
 0x173   : > { %v4200_v53 = vpop.f32.mrf.mxu1  ;;  %v3835_v42 = vpop.f32.mrf.mxu0 }
 0x174   : > { %v5376_v14 = vadd.f32 %v4200_v53, %v5261_v52  ;;  %v3836_v60 = vadd.f32 %v3835_v42, %v3834_v5 }
 0x175   : > { %v1748_v55 = vpop.f32.mrf.mxu1  ;;  %v4223_v51 = vpop.f32.mrf.mxu0 }
 0x176   : > { %v5380_v27 = vadd.f32 %v5246_v46, %v1748_v55  ;;  %v5382_v10 = vadd.f32 %v4196_v2, %v3836_v60 }
 0x177   : > { %v4203_v62 = vpop.f32.mrf.mxu1  ;;  %4298 = vmatmul.mubr.bf16.gmra.mxu1 %v2368_v18  ;;  %v2115_v6 = vpop.f32.mrf.mxu0 }
 0x178   : > { %v5385_v34 = vadd.f32 %v4203_v62, %v5279_v63 }
 0x179   : > { %v1761_v47 = vpop.f32.mrf.mxu1  ;;  %v4224_v24 = vpop.f32.mrf.mxu0 }
 0x17a   : > { %v5388_v52 = vadd.f32 %v5270_v21, %v1761_v47 }
 0x17b   : > { %v4204_v7 = vpop.f32.mrf.mxu1  ;;  %v2118_v46 = vpop.f32.mrf.mxu0 }
 0x17c   : > { %v5391_v49 = vadd.f32 %v4204_v7, %v5283_v50 }
 0x17d   : > { %v1764_v38 = vpop.f32.mrf.mxu1  ;;  %v4227_v16 = vpop.f32.mrf.mxu0 }
 0x17e   : > { %6044 = vst [vmem:[#allocation3_spill] sm:$0xff] %v5391_v49  ;;  %v5394_v41 = vadd.f32 %v5273_v9, %v1764_v38 }
 0x17f   : > { %v3901_v20 = vpop.f32.mrf.mxu1  ;;  %v2131_v2 = vpop.f32.mrf.mxu0 }
 0x181   : > { %v3902_v63 = vpop.f32.mrf.mxu1  ;;  %v4228_v37 = vpop.f32.mrf.mxu0 }
 0x182   : > { %v3903_v28 = vadd.f32 %v3902_v63, %v3901_v20 }
 0x183   : > { %v3904_v1 = vpop.f32.mrf.mxu1  ;;  %v2134_v31 = vpop.f32.mrf.mxu0 }
 0x184   : > { %v1955_v21 = vadd.f32 %v3903_v28, %v5290_v36 }
 0x185   : > { %v3905_v32 = vpop.f32.mrf.mxu1  ;;  %v5399_v44 = vpop.f32.mrf.mxu0 }
 0x186   : > { %v5397_v29 = vadd.f32 %v2115_v6, %v1955_v21  ;;  %v3906_v50 = vadd.f32 %v3905_v32, %v3904_v1 }
 0x187   : > { %v3907_v57 = vpop.f32.mrf.mxu1  ;;  %v2147_v56 = vpop.f32.mrf.mxu0 }
 0x188   : > { %v1958_v9 = vadd.f32 %v3906_v50, %v5297_v13 }
 0x189   : > { %v3908_v3 = vpop.f32.mrf.mxu1  ;;  %v5404_v53 = vpop.f32.mrf.mxu0 }
 0x18a   : > { %v5402_v43 = vadd.f32 %v2118_v46, %v1958_v9  ;;  %v3909_v5 = vadd.f32 %v3908_v3, %v3907_v57 }
 0x18b   : > { %v3910_v18 = vpop.f32.mrf.mxu1  ;;  %v2150_v42 = vpop.f32.mrf.mxu0 }
 0x18c   : > { %v1963_v36 = vadd.f32 %v3909_v5, %v5287_v30 }
 0x18d   : > { %v3911_v55 = vpop.f32.mrf.mxu1  ;;  %v5407_v62 = vpop.f32.mrf.mxu0 }
 0x18e   : > { %v3912_v60 = vadd.f32 %v3911_v55, %v3910_v18  ;;  %v5409_v6 = vadd.f32 %v4223_v51, %v1963_v36 }
 0x18f   : > { %v3913_v47 = vpop.f32.mrf.mxu1  ;;  %v5412_v7 = vpop.f32.mrf.mxu0 }
 0x190   : > { %v1966_v13 = vadd.f32 %v3912_v60, %v5292_v22 }
 0x191   : > { %v3914_v46 = vpop.f32.mrf.mxu1  ;;  %v5414_v20 = vpop.f32.mrf.mxu0 }
 0x192   : > { %v3915_v38 = vadd.f32 %v3914_v46, %v3913_v47  ;;  %v5416_v63 = vadd.f32 %v4224_v24, %v1966_v13 }
 0x193   : > { %v3916_v28 = vpop.f32.mrf.mxu1  ;;  %v5419_v1 = vpop.f32.mrf.mxu0 }
 0x194   : > { %v1971_v30 = vadd.f32 %v3915_v38, %v5303_v61 }
 0x195   : > { %v3917_v21 = vpop.f32.mrf.mxu1  ;;  %v5421_v51 = vpop.f32.mrf.mxu0 }
 0x196   : > { %v3918_v32 = vadd.f32 %v3917_v21, %v3916_v28  ;;  %v5423_v50 = vadd.f32 %v2131_v2, %v1971_v30 }
 0x197   : > { %v3919_v22 = vpop.f32.mrf.mxu1  ;;  %v5426_v9 = vpop.f32.mrf.mxu0 }
 0x198   : > { %v1974_v57 = vadd.f32 %v3918_v32, %v5309_v4 }
 0x199   : > { %v3920_v3 = vpop.f32.mrf.mxu1  ;;  %v5428_v24 = vpop.f32.mrf.mxu0 }
 0x19a   : > { %v3921_v5 = vadd.f32 %v3920_v3, %v3919_v22  ;;  %v5430_v18 = vadd.f32 %v2134_v31, %v1974_v57 }
 0x19b   : > { %v3922_v61 = vpop.f32.mrf.mxu1  ;;  %v5433_v55 = vpop.f32.mrf.mxu0 }
 0x19c   : > { %v1979_v36 = vadd.f32 %v3921_v5, %v5301_v0 }
 0x19d   : > { %v3923_v60 = vpop.f32.mrf.mxu1  ;;  %v5435_v2 = vpop.f32.mrf.mxu0 }
 0x19e   : > { %v3924_v47 = vadd.f32 %v3923_v60, %v3922_v61  ;;  %v5437_v13 = vadd.f32 %v4227_v16, %v1979_v36 }
 0x19f   : > { %v3925_v4 = vpop.f32.mrf.mxu1  ;;  %v5440_v38 = vpop.f32.mrf.mxu0 }
 0x1a0   : > { %v1982_v46 = vadd.f32 %v3924_v47, %v5305_v12 }
 0x1a1   : > { %v3926_v28 = vpop.f32.mrf.mxu1  ;;  %v5442_v31 = vpop.f32.mrf.mxu0 }
 0x1a2   : > { %v3927_v30 = vadd.f32 %v3926_v28, %v3925_v4  ;;  %v5444_v21 = vadd.f32 %v4228_v37, %v1982_v46 }
 0x1a3   : > { %v3928_v0 = vpop.f32.mrf.mxu1  ;;  %v5447_v22 = vpop.f32.mrf.mxu0 }
 0x1a4   : > { %v1987_v32 = vadd.f32 %v3927_v30, %v5318_v25 }
 0x1a5   : > { %v3929_v57 = vpop.f32.mrf.mxu1  ;;  %v5449_v16 = vpop.f32.mrf.mxu0 }
 0x1a6   : > { %v3930_v3 = vadd.f32 %v3929_v57, %v3928_v0  ;;  %6045 = vst [vmem:[#allocation4_spill] sm:$0xff] %v5449_v16  ;;  %v5451_v5 = vadd.f32 %v2147_v56, %v1987_v32 }
 0x1a7   : > { %v3931_v12 = vpop.f32.mrf.mxu1  ;;  %v5454_v36 = vpop.f32.mrf.mxu0 }
 0x1a8   : > { %v1990_v61 = vadd.f32 %v3930_v3, %v5326_v54 }
 0x1a9   : > { %v3932_v60 = vpop.f32.mrf.mxu1  ;;  %v5456_v37 = vpop.f32.mrf.mxu0 }
 0x1aa   : > { %v3933_v47 = vadd.f32 %v3932_v60, %v3931_v12  ;;  %6046 = vst [vmem:[#allocation5_spill] sm:$0xff] %v5456_v37  ;;  %v5458_v4 = vadd.f32 %v2150_v42, %v1990_v61 }
 0x1ab   : > { %v3934_v25 = vpop.f32.mrf.mxu1  ;;  %v5461_v28 = vpop.f32.mrf.mxu0 }
 0x1ac   : > { %v1995_v46 = vadd.f32 %v3933_v47, %v5313_v11 }
 0x1ad   : > { %v3935_v30 = vpop.f32.mrf.mxu1  ;;  %v5463_v56 = vpop.f32.mrf.mxu0 }
 0x1ae   : > { %v3936_v0 = vadd.f32 %v3935_v30, %v3934_v25  ;;  %6047 = vst [vmem:[#allocation6_spill] sm:$0xff] %v5463_v56  ;;  %v5466_v32 = vadd.f32 %v5399_v44, %v1995_v46 }
 0x1af   : > { %v3937_v54 = vpop.f32.mrf.mxu1  ;;  %v5469_v3 = vpop.f32.mrf.mxu0 }
 0x1b0   : > { %v1998_v57 = vadd.f32 %v3936_v0, %v5322_v40  ;;  %6048 = vst [vmem:[#allocation7_spill] sm:$0xff] %v5469_v3 }
 0x1b1   : > { %v3938_v12 = vpop.f32.mrf.mxu1  ;;  %v5471_v61 = vpop.f32.mrf.mxu0 }
 0x1b2   : > { %v3939_v42 = vadd.f32 %v3938_v12, %v3937_v54  ;;  %6049 = vst [vmem:[#allocation8_spill] sm:$0xff] %v5471_v61  ;;  %v5474_v11 = vadd.f32 %v5404_v53, %v1998_v57 }
 0x1b3   : > { %v3940_v60 = vpop.f32.mrf.mxu1  ;;  %v5477_v25 = vpop.f32.mrf.mxu0 }
 0x1b4   : > { %v2003_v47 = vadd.f32 %v3939_v42, %v5335_v19  ;;  %6050 = vst [vmem:[#allocation9_spill] sm:$0xff] %v5477_v25 }
 0x1b5   : > { %v3941_v30 = vpop.f32.mrf.mxu1  ;;  %v4037_v46 = vpop.f32.mrf.mxu0 }
 0x1b6   : > { %v3942_v44 = vadd.f32 %v3941_v30, %v3940_v60  ;;  %v5480_v56 = vadd.f32 %v5412_v7, %v2003_v47 }
 0x1b7   : > { %v3943_v40 = vpop.f32.mrf.mxu1  ;;  %v4038_v54 = vpop.f32.mrf.mxu0 }
 0x1b8   : > { %v2006_v0 = vadd.f32 %v3942_v44, %v5340_v17  ;;  %v5483_v3 = vadd.f32 %v4038_v54, %v4037_v46 }
 0x1b9   : > { %v3944_v12 = vpop.f32.mrf.mxu1  ;;  %v4040_v57 = vpop.f32.mrf.mxu0 }
 0x1ba   : > { %v3945_v53 = vadd.f32 %v3944_v12, %v3943_v40  ;;  %v5486_v61 = vadd.f32 %v5419_v1, %v2006_v0 }
 0x1bb   : > { %v3946_v19 = vpop.f32.mrf.mxu1  ;;  %v4041_v60 = vpop.f32.mrf.mxu0 }
 0x1bc   : > { %v2011_v42 = vadd.f32 %v3945_v53, %v5337_v35  ;;  %v5489_v25 = vadd.f32 %v4041_v60, %v4040_v57 }
 0x1bd   : > { %v3947_v30 = vpop.f32.mrf.mxu1  ;;  %v5491_v47 = vpop.f32.mrf.mxu0 }
 0x1be   : > { %v3948_v7 = vadd.f32 %v3947_v30, %v3946_v19  ;;  %v5494_v17 = vadd.f32 %v5407_v62, %v2011_v42 }
 0x1bf   : > { %v3949_v44 = vpop.f32.mrf.mxu1  ;;  %v5497_v40 = vpop.f32.mrf.mxu0 }
 0x1c0   : > { %v2014_v46 = vadd.f32 %v3948_v7, %v5344_v33 }
 0x1c1   : > { %v3950_v1 = vpop.f32.mrf.mxu1  ;;  %v5499_v54 = vpop.f32.mrf.mxu0 }
 0x1c2   : > { %v3951_v0 = vadd.f32 %v3950_v1, %v3949_v44  ;;  %v5502_v35 = vadd.f32 %v5414_v20, %v2014_v46 }
 0x1c3   : > { %v3952_v12 = vpop.f32.mrf.mxu1  ;;  %v5505_v57 = vpop.f32.mrf.mxu0 }
 0x1c4   : > { %v2019_v53 = vadd.f32 %v3951_v0, %v5351_v8 }
 0x1c5   : > { %v3953_v19 = vpop.f32.mrf.mxu1  ;;  %v5507_v42 = vpop.f32.mrf.mxu0 }
 0x1c6   : > { %v3954_v62 = vadd.f32 %v3953_v19, %v3952_v12  ;;  %v5510_v33 = vadd.f32 %v5426_v9, %v2019_v53 }
 0x1c7   : > { %v3955_v60 = vpop.f32.mrf.mxu1  ;;  %v5513_v7 = vpop.f32.mrf.mxu0 }
 0x1c8   : > { %6051 = vst [vmem:[#allocation10_spill] sm:$0xff] %v5510_v33  ;;  %v2022_v30 = vadd.f32 %v3954_v62, %v5356_v39 }
 0x1c9   : > { %v3956_v44 = vpop.f32.mrf.mxu1  ;;  %v5515_v46 = vpop.f32.mrf.mxu0 }
 0x1ca   : > { %v3957_v20 = vadd.f32 %v3956_v44, %v3955_v60  ;;  %v5518_v8 = vadd.f32 %v5433_v55, %v2022_v30 }
 0x1cb   : > { %v3958_v1 = vpop.f32.mrf.mxu1  ;;  %v5521_v12 = vpop.f32.mrf.mxu0 }
 0x1cc   : > { %6052 = vst [vmem:[#allocation11_spill] sm:$0xff] %v5518_v8  ;;  %v2027_v0 = vadd.f32 %v3957_v20, %v5353_v23 }
 0x1cd   : > { %v3959_v19 = vpop.f32.mrf.mxu1  ;;  %v5523_v53 = vpop.f32.mrf.mxu0 }
 0x1ce   : > { %v3960_v9 = vadd.f32 %v3959_v19, %v3958_v1  ;;  %v5526_v39 = vadd.f32 %v5421_v51, %v2027_v0 }
 0x1cf   : > { %v3961_v62 = vpop.f32.mrf.mxu1  ;;  %v5529_v44 = vpop.f32.mrf.mxu0 }
 0x1d0   : > { %6053 = vst [vmem:[#allocation12_spill] sm:$0xff] %v5526_v39  ;;  %v2030_v60 = vadd.f32 %v3960_v9, %v5359_v48 }
 0x1d1   : > { %v3962_v49 = vpop.f32.mrf.mxu1  ;;  %v5531_v30 = vpop.f32.mrf.mxu0 }
 0x1d2   : > { %v3963_v55 = vadd.f32 %v3962_v49, %v3961_v62  ;;  %v5534_v23 = vadd.f32 %v5428_v24, %v2030_v60 }
 0x1d3   : > { %v3964_v20 = vpop.f32.mrf.mxu1  ;;  %v5537_v19 = vpop.f32.mrf.mxu0 }
 0x1d4   : > { %6054 = vst [vmem:[#allocation13_spill] sm:$0xff] %v5534_v23  ;;  %v2035_v1 = vadd.f32 %v3963_v55, %v5361_v26 }
 0x1d5   : > { %v3965_v37 = vpop.f32.mrf.mxu1  ;;  %v5539_v0 = vpop.f32.mrf.mxu0 }
 0x1d6   : > { %v3966_v51 = vadd.f32 %v3965_v37, %v3964_v20  ;;  %v5542_v48 = vadd.f32 %v5440_v38, %v2035_v1 }
 0x1d7   : > { %v3967_v9 = vpop.f32.mrf.mxu1  ;;  %v5545_v62 = vpop.f32.mrf.mxu0 }
 0x1d8   : > { %6055 = vst [vmem:[#allocation14_spill] sm:$0xff] %v5542_v48  ;;  %v2038_v49 = vadd.f32 %v3966_v51, %v5364_v45 }
 0x1d9   : > { %v3968_v16 = vpop.f32.mrf.mxu1  ;;  %v5547_v60 = vpop.f32.mrf.mxu0 }
 0x1da   : > { %v3969_v24 = vadd.f32 %v3968_v16, %v3967_v9  ;;  %v5550_v26 = vadd.f32 %v5447_v22, %v2038_v49 }
 0x1db   : > { %v3970_v55 = vpop.f32.mrf.mxu1  ;;  %v5553_v20 = vpop.f32.mrf.mxu0 }
 0x1dc   : > { %6056 = vst [vmem:[#allocation15_spill] sm:$0xff] %v5550_v26  ;;  %v2043_v37 = vadd.f32 %v3969_v24, %v5373_v59 }
 0x1dd   : > { %v3971_v8 = vpop.f32.mrf.mxu1  ;;  %v5555_v1 = vpop.f32.mrf.mxu0 }
 0x1de   : > { %v3972_v38 = vadd.f32 %v3971_v8, %v3970_v55  ;;  %v5558_v45 = vadd.f32 %v5435_v2, %v2043_v37 }
 0x1df   : > { %v3973_v51 = vpop.f32.mrf.mxu1  ;;  %v5561_v9 = vpop.f32.mrf.mxu0 }
 0x1e0   : > { %6057 = vst [vmem:[#allocation16_spill] sm:$0xff] %v5558_v45  ;;  %v2046_v16 = vadd.f32 %v3972_v38, %v5382_v10 }
 0x1e1   : > { %v3974_v48 = vpop.f32.mrf.mxu1  ;;  %v5563_v49 = vpop.f32.mrf.mxu0 }
 0x1e2   : > { %v3975_v22 = vadd.f32 %v3974_v48, %v3973_v51  ;;  %v5566_v59 = vadd.f32 %v5442_v31, %v2046_v16 }
 0x1e3   : > { %v3976_v24 = vpop.f32.mrf.mxu1  ;;  %v5569_v55 = vpop.f32.mrf.mxu0 }
 0x1e4   : > { %6058 = vst [vmem:[#allocation17_spill] sm:$0xff] %v5566_v59  ;;  %v2051_v8 = vadd.f32 %v3975_v22, %v5371_v15 }
 0x1e5   : > { %v3977_v26 = vpop.f32.mrf.mxu1  ;;  %v5571_v37 = vpop.f32.mrf.mxu0 }
 0x1e6   : > { %v3978_v2 = vadd.f32 %v3977_v26, %v3976_v24  ;;  %v5574_v10 = vadd.f32 %v5454_v36, %v2051_v8 }
 0x1e7   : > { %v3979_v38 = vpop.f32.mrf.mxu1  ;;  %v5577_v51 = vpop.f32.mrf.mxu0 }
 0x1e8   : > { %6059 = vst [vmem:[#allocation18_spill] sm:$0xff] %v5574_v10  ;;  %v2054_v48 = vadd.f32 %v3978_v2, %v5380_v27 }
 0x1e9   : > { %v3980_v45 = vpop.f32.mrf.mxu1  ;;  %v5579_v16 = vpop.f32.mrf.mxu0 }
 0x1ea   : > { %v3981_v31 = vadd.f32 %v3980_v45, %v3979_v38  ;;  %v5582_v15 = vadd.f32 %v5461_v28, %v2054_v48 }
 0x1eb   : > { %v3982_v22 = vpop.f32.mrf.mxu1  ;;  %v5587_v24 = vpop.f32.mrf.mxu0 }
 0x1ec   : > { %6060 = vst [vmem:[#allocation19_spill] sm:$0xff] %v5582_v15  ;;  %v5585_v26 = vadd.f32 %v3981_v31, %v5367_v58 }
 0x1ed   : > { %v3983_v36 = vpop.f32.mrf.mxu1  ;;  %v5589_v10 = vpop.f32.mrf.mxu0 }
 0x1ee   : > { %6061 = vst [vmem:[#allocation20_spill] sm:$0xff] %v5585_v26  ;;  %v3984_v8 = vadd.f32 %v3983_v36, %v3982_v22 }
 0x1ef   : > { %v3985_v27 = vpop.f32.mrf.mxu1  ;;  %v5594_v45 = vpop.f32.mrf.mxu0 }
 0x1f0   : > { %v5592_v2 = vadd.f32 %v3984_v8, %v5376_v14 }
 0x1f1   : > { %v3986_v38 = vpop.f32.mrf.mxu1  ;;  %v5596_v28 = vpop.f32.mrf.mxu0 }
 0x1f2   : > { %6062 = vst [vmem:[#allocation21_spill] sm:$0xff] %v5592_v2  ;;  %v3987_v59 = vadd.f32 %v3986_v38, %v3985_v27 }
 0x1f3   : > { %v3988_v48 = vpop.f32.mrf.mxu1  ;;  %v5601_v31 = vpop.f32.mrf.mxu0 }
 0x1f4   : > { %v5599_v58 = vadd.f32 %v3987_v59, %v5388_v52 }
 0x1f5   : > { %v3989_v15 = vpop.f32.mrf.mxu1  ;;  %v5603_v36 = vpop.f32.mrf.mxu0 }
 0x1f6   : > { %6063 = vst [vmem:[#allocation22_spill] sm:$0xff] %v5599_v58  ;;  %v3990_v22 = vadd.f32 %v3989_v15, %v3988_v48 }
 0x1f7   : > { %v3991_v26 = vpop.f32.mrf.mxu1  ;;  %v5608_v8 = vpop.f32.mrf.mxu0 }
 0x1f8   : > { %v5606_v14 = vadd.f32 %v3990_v22, %v5394_v41  ;;  %v4045_v41 = vadd.f32 %v5497_v40, %v5491_v47 }
 0x1f9   : > { %v3992_v2 = vpop.f32.mrf.mxu1  ;;  %v5610_v38 = vpop.f32.mrf.mxu0 }
 0x1fa   : > { %6064 = vst [vmem:[#allocation23_spill] sm:$0xff] %v5606_v14  ;;  %v3993_v27 = vadd.f32 %v3992_v2, %v3991_v26  ;;  %6065 = vst [vmem:[#allocation24_spill] sm:$0xff] %v5610_v38  ;;  %v4048_v2 = vadd.f32 %v5505_v57, %v5499_v54 }
 0x1fb   : > { %v5612_v33 = vpop.f32.mrf.mxu1  ;;  %v5617_v59 = vpop.f32.mrf.mxu0 }
 0x1fc   : > { %6066 = vst [vmem:[#allocation25_spill] sm:$0xff] %v5612_v33  ;;  %v5615_v52 = vadd.f32 %v3993_v27, %v5385_v34  ;;  %6068 = vst [vmem:[#allocation27_spill] sm:$0xff] %v5617_v59 }
 0x1fd   : > { %v5619_v15 = vpop.f32.mrf.mxu1  ;;  %v5621_v48 = vpop.f32.mrf.mxu0 }
 0x1fe   : > { %6067 = vst [vmem:[#allocation26_spill] sm:$0xff] %v5615_v52  ;;  %6069 = vst [vmem:[#allocation28_spill] sm:$0xff] %v5619_v15 }
 0x1ff   : > { %v4271_v58 = vpop.f32.mrf.mxu1  ;;  %v5625_v22 = vpop.f32.mrf.mxu0 }
 0x200   : > { %v2784_v14 = vadd.f32 %v4271_v58, %v4045_v41 }
 0x201   : > { %v2775_v26 = vpop.f32.mrf.mxu1  ;;  %v5630_v27 = vpop.f32.mrf.mxu0 }
 0x202   : > { %v2776_v34 = vadd.f32 %v5483_v3, %v2775_v26  ;;  %v2904_v47 = vadd.f32 %v2784_v14, %v5409_v6  ;;  %v4057_v3 = vadd.f32 %v5529_v44, %v5523_v53 }
 0x203   : > { %v4272_v52 = vpop.f32.mrf.mxu1  ;;  %v5633_v23 = vpop.f32.mrf.mxu0 }
 0x204   : > { %v2902_v15 = vadd.f32 %v2776_v34, %v5397_v29  ;;  %v2787_v33 = vadd.f32 %v4272_v52, %v4048_v2  ;;  %v4069_v34 = vadd.f32 %v5561_v9, %v5555_v1 }
 0x205   : > { %v2778_v39 = vpop.f32.mrf.mxu1  ;;  %v5638_v38 = vpop.f32.mrf.mxu0 }
 0x206   : > { %v2905_v40 = vadd.f32 %v2787_v33, %v5416_v63  ;;  %v2779_v59 = vadd.f32 %v5489_v25, %v2778_v39  ;;  %v4051_v25 = vadd.f32 %v5513_v7, %v5507_v42  ;;  %v4060_v33 = vadd.f32 %v5537_v19, %v5531_v30 }
 0x207   : > { %v4275_v29 = vpop.f32.mrf.mxu1  ;;  %v5652_v63 = vpop.f32.mrf.mxu0 }
 0x208   : > { %v5649_v54 = vpack.c.bf16 %v2905_v40, %v2904_v47  ;;  %v2903_v6 = vadd.f32 %v2779_v59, %v5402_v43  ;;  %v2800_v58 = vadd.f32 %v4275_v29, %v4057_v3  ;;  %v4054_v43 = vadd.f32 %v5521_v12, %v5515_v46 }
 0x209   : > { %v2791_v57 = vpop.f32.mrf.mxu1  ;;  %v5662_v14 = vpop.f32.mrf.mxu0 }
 0x20a   : > { %3734 = vst [vmem:[%s5645_s21 + $0x8] sm:$0xff] %v5649_v54   ;;  %v5660_v39 = vpack.c.bf16 %v2903_v6, %v2902_v15  ;;  %v2792_v53 = vadd.f32 %v4051_v25, %v2791_v57  ;;  %v3096_v19 = vunpack.c.l.bf16 %v5649_v54  ;;  %v2908_v46 = vadd.f32 %v2800_v58, %v5437_v13 }
 0x20b   : > { %v4276_v44 = vpop.f32.mrf.mxu1  ;;  %v5670_v30 = vpop.f32.mrf.mxu0  ;;  %v4072_v25 = vadd.f32 %v5569_v55, %v5563_v49  ;;  %v3097_v1 = vunpack.c.h.bf16 %v5649_v54 }
 0x20c   : > { %3658 = vst [vmem:[%s5645_s21] sm:$0xff] %v5660_v39   ;;  %v3094_v42 = vunpack.c.l.bf16 %v5660_v39  ;;  %v3095_v7 = vunpack.c.h.bf16 %v5660_v39  ;;  %v2803_v52 = vadd.f32 %v4276_v44, %v4060_v33  ;;  %v2906_v59 = vadd.f32 %v2792_v53, %v5423_v50 }
 0x20d   : > { %v2794_v15 = vpop.f32.mrf.mxu1  ;;  %v5680_v2 = vpop.f32.mrf.mxu0 }
 0x20e   : > { %v3126_v41 = vadd.f32 %v3095_v7, %v3094_v42  ;;  %v2909_v12 = vadd.f32 %v2803_v52, %v5444_v21  ;;  %v2795_v26 = vadd.f32 %v4054_v43, %v2794_v15  ;;  %v4063_v21 = vadd.f32 %v5545_v62, %v5539_v0 }
 0x20f   : > { %v4279_v47 = vpop.f32.mrf.mxu1  ;;  %v5689_v3 = vpop.f32.mrf.mxu0  ;;  %v4081_v15 = vadd.f32 %v5594_v45, %v5589_v10  ;;  %v4084_v45 = vadd.f32 %v5601_v31, %v5596_v28 }
 0x210   : > { %v3127_v50 = vadd.f32 %v3126_v41, %v3096_v19  ;;  %v5686_v40 = vpack.c.bf16 %v2909_v12, %v2908_v46  ;;  %v2907_v29 = vadd.f32 %v2795_v26, %v5430_v18  ;;  %v2816_v13 = vadd.f32 %v4279_v47, %v4069_v34 }
 0x211   : > { %v2807_v6 = vpop.f32.mrf.mxu1  ;;  %v5700_v57 = vpop.f32.mrf.mxu0  ;;  %v4066_v18 = vadd.f32 %v5553_v20, %v5547_v60  ;;  %v4075_v47 = vadd.f32 %v5577_v51, %v5571_v37 }
 0x212   : > { %3736 = vst [vmem:[%s5645_s21 + $0x18] sm:$0xff] %v5686_v40   ;;  %v5698_v9 = vpack.c.bf16 %v2907_v29, %v2906_v59  ;;  %v3128_v0 = vadd.f32 %v3127_v50, %v3097_v1  ;;  %v2808_v62 = vadd.f32 %v4063_v21, %v2807_v6  ;;  %v2912_v53 = vadd.f32 %v2816_v13, %v5466_v32 }
 0x213   : > { %v4280_v33 = vpop.f32.mrf.mxu1  ;;  %v5709_v55 = vpop.f32.mrf.mxu0  ;;  %v3100_v41 = vunpack.c.l.bf16 %v5686_v40  ;;  %v3101_v29 = vunpack.c.h.bf16 %v5686_v40  ;;  %v4078_v6 = vadd.f32 %v5587_v24, %v5579_v16 }
 0x214   : > { %3735 = vst [vmem:[%s5645_s21 + $0x10] sm:$0xff] %v5698_v9   ;;  %v3098_v58 = vunpack.c.l.bf16 %v5698_v9  ;;  %v2819_v49 = vadd.f32 %v4280_v33, %v4072_v25  ;;  %v3099_v43 = vunpack.c.h.bf16 %v5698_v9  ;;  %v2910_v12 = vadd.f32 %v2808_v62, %v5451_v5 }
 0x215   : > { %v2810_v44 = vpop.f32.mrf.mxu1  ;;  %v5716_v59 = vpop.f32.mrf.mxu0 }
 0x216   : > { %v3129_v60 = vadd.f32 %v3128_v0, %v3098_v58  ;;  %v2913_v20 = vadd.f32 %v2819_v49, %v5474_v11  ;;  %v2811_v52 = vadd.f32 %v4066_v18, %v2810_v44 }
 0x217   : > { %v4283_v46 = vpop.f32.mrf.mxu1  ;;  %v5727_v34 = vpop.f32.mrf.mxu0 }
 0x218   : > { %v3130_v32 = vadd.f32 %v3129_v60, %v3099_v43  ;;  %v5724_v26 = vpack.c.bf16 %v2913_v20, %v2912_v53  ;;  %v2911_v11 = vadd.f32 %v2811_v52, %v5458_v4  ;;  %v2832_v50 = vadd.f32 %v4283_v46, %v4081_v15 }
 0x219   : > { %v2823_v10 = vpop.f32.mrf.mxu1  ;;  %v5740_v4 = vpop.f32.mrf.mxu0  ;;  %v4093_v53 = vadd.f32 %v5625_v22, %v5621_v48  ;;  %v4087_v46 = vadd.f32 %v5608_v8, %v5603_v36  ;;  %v4096_v48 = vadd.f32 %v5633_v23, %v5630_v27 }
 0x21a   : > { %v3131_v13 = vadd.f32 %v3130_v32, %v3100_v41  ;;  %3738 = vst [vmem:[%s5645_s21 + $0x28] sm:$0xff] %v5724_v26   ;;  %v5738_v5 = vpack.c.bf16 %v2911_v11, %v2910_v12  ;;  %v2824_v31 = vadd.f32 %v4075_v47, %v2823_v10  ;;  %v2916_v18 = vadd.f32 %v2832_v50, %v5494_v17  ;;  %v6071_v50 = vld [vmem:[#allocation27_spill] sm:$0xff] }
 0x21b   : > { %v4284_v37 = vpop.f32.mrf.mxu1  ;;  %v5749_v25 = vpop.f32.mrf.mxu0  ;;  %v3104_v44 = vunpack.c.l.bf16 %v5724_v26  ;;  %v3105_v22 = vunpack.c.h.bf16 %v5724_v26 }
 0x21c   : > { %3737 = vst [vmem:[%s5645_s21 + $0x20] sm:$0xff] %v5738_v5   ;;  %v3102_v51 = vunpack.c.l.bf16 %v5738_v5  ;;  %v3132_v28 = vadd.f32 %v3131_v13, %v3101_v29  ;;  %v2835_v21 = vadd.f32 %v4284_v37, %v4084_v45  ;;  %v3103_v0 = vunpack.c.h.bf16 %v5738_v5 }
 0x21d   : > { %v2826_v33 = vpop.f32.mrf.mxu1  ;;  %v5756_v49 = vpop.f32.mrf.mxu0  ;;  %v2914_v20 = vadd.f32 %v2824_v31, %v5480_v56 }
 0x21e   : > { %v3133_v16 = vadd.f32 %v3132_v28, %v3102_v51  ;;  %v2917_v24 = vadd.f32 %v2835_v21, %v5502_v35  ;;  %v2827_v62 = vadd.f32 %v4078_v6, %v2826_v33  ;;  %v6072_v6 = vld [vmem:[#allocation12_spill] sm:$0xff] }
 0x21f   : > { %v4287_v60 = vpop.f32.mrf.mxu1  ;;  %v4116_v15 = vpop.f32.mrf.mxu0 }
 0x220   : > { %v3134_v17 = vadd.f32 %v3133_v16, %v3103_v0  ;;  %v5764_v52 = vpack.c.bf16 %v2917_v24, %v2916_v18  ;;  %v2915_v35 = vadd.f32 %v2827_v62, %v5486_v61  ;;  %v2848_v32 = vadd.f32 %v4287_v60, %v4093_v53  ;;  %v6070_v61 = vld [vmem:[#allocation24_spill] sm:$0xff]  ;;  %v6073_v18 = vld [vmem:[#allocation13_spill] sm:$0xff] }
 0x221   : > { %v2839_v12 = vpop.f32.mrf.mxu1  ;;  %v4118_v47 = vpop.f32.mrf.mxu0  ;;  %v4090_v10 = vadd.f32 %v6071_v50, %v6070_v61  ;;  %v4105_v62 = vadd.f32 %v5689_v3, %v5680_v2  ;;  %v4108_v50 = vadd.f32 %v5709_v55, %v5700_v57 }
 0x222   : > { %v3135_v11 = vadd.f32 %v3134_v17, %v3104_v44  ;;  %3740 = vst [vmem:[%s5645_s21 + $0x38] sm:$0xff] %v5764_v52   ;;  %v5776_v56 = vpack.c.bf16 %v2915_v35, %v2914_v20  ;;  %v2840_v8 = vadd.f32 %v4087_v46, %v2839_v12  ;;  %v2920_v37 = vadd.f32 %v2848_v32, %v6072_v6  ;;  %v6074_v20 = vld [vmem:[#allocation10_spill] sm:$0xff]  ;;  %v6075_v32 = vld [vmem:[#allocation11_spill] sm:$0xff] }
 0x223   : > { %v4288_v45 = vpop.f32.mrf.mxu1  ;;  %v4119_v13 = vpop.f32.mrf.mxu0  ;;  %v3108_v53 = vunpack.c.l.bf16 %v5764_v52  ;;  %v3109_v3 = vunpack.c.h.bf16 %v5764_v52 }
 0x224   : > { %3739 = vst [vmem:[%s5645_s21 + $0x30] sm:$0xff] %v5776_v56   ;;  %v3106_v36 = vunpack.c.l.bf16 %v5776_v56  ;;  %v3136_v23 = vadd.f32 %v3135_v11, %v3105_v22  ;;  %v2851_v27 = vadd.f32 %v4288_v45, %v4096_v48  ;;  %v3107_v31 = vunpack.c.h.bf16 %v5776_v56 }
 0x225   : > { %v2842_v28 = vpop.f32.mrf.mxu1  ;;  %v5790_v24 = vpop.f32.mrf.mxu0  ;;  %v2918_v35 = vadd.f32 %v2840_v8, %v6074_v20  ;;  %v4099_v11 = vadd.f32 %v5652_v63, %v5638_v38  ;;  %v4102_v8 = vadd.f32 %v5670_v30, %v5662_v14  ;;  %v6077_v14 = vld [vmem:[#allocation17_spill] sm:$0xff] }
 0x226   : > { %v3137_v21 = vadd.f32 %v3136_v23, %v3106_v36  ;;  %v2921_v33 = vadd.f32 %v2851_v27, %v6073_v18  ;;  %v2843_v16 = vadd.f32 %v4090_v10, %v2842_v28 }
 0x227   : > { %v4291_v60 = vpop.f32.mrf.mxu1  ;;  %v5801_v48 = vpop.f32.mrf.mxu0 }
 0x228   : > { %v3138_v17 = vadd.f32 %v3137_v21, %v3107_v31  ;;  %v5798_v46 = vpack.c.bf16 %v2921_v33, %v2920_v37  ;;  %v2919_v12 = vadd.f32 %v2843_v16, %v6075_v32  ;;  %v2864_v61 = vadd.f32 %v4291_v60, %v4105_v62  ;;  %v6076_v37 = vld [vmem:[#allocation16_spill] sm:$0xff]  ;;  %v6078_v32 = vld [vmem:[#allocation14_spill] sm:$0xff] }
 0x229   : > { %v2855_v2 = vpop.f32.mrf.mxu1  ;;  %v5814_v23 = vpop.f32.mrf.mxu0 }
 0x22a   : > { %v3139_v10 = vadd.f32 %v3138_v17, %v3108_v53  ;;  %3742 = vst [vmem:[%s5645_s21 + $0x48] sm:$0xff] %v5798_v46   ;;  %v5812_v45 = vpack.c.bf16 %v2919_v12, %v2918_v35  ;;  %v2856_v55 = vadd.f32 %v4099_v11, %v2855_v2  ;;  %v2924_v28 = vadd.f32 %v2864_v61, %v6076_v37  ;;  %v6079_v61 = vld [vmem:[#allocation15_spill] sm:$0xff]  ;;  %v6080_v37 = vld [vmem:[#allocation25_spill] sm:$0xff] }
 0x22b   : > { %v4292_v38 = vpop.f32.mrf.mxu1  ;;  %v4125_v6 = vpop.f32.mrf.mxu0  ;;  %v3112_v60 = vunpack.c.l.bf16 %v5798_v46  ;;  %v4117_v17 = vadd.f32 %v4116_v15, %v5756_v49  ;;  %v4120_v15 = vadd.f32 %v4119_v13, %v4118_v47 }
 0x22c   : > { %3741 = vst [vmem:[%s5645_s21 + $0x40] sm:$0xff] %v5812_v45   ;;  %v3110_v63 = vunpack.c.l.bf16 %v5812_v45  ;;  %v3140_v57 = vadd.f32 %v3139_v10, %v3109_v3  ;;  %v2867_v27 = vadd.f32 %v4292_v38, %v4108_v50  ;;  %v3111_v18 = vunpack.c.h.bf16 %v5812_v45 }
 0x22d   : > { %v2858_v21 = vpop.f32.mrf.mxu1  ;;  %v4127_v62 = vpop.f32.mrf.mxu0  ;;  %v2922_v12 = vadd.f32 %v2856_v55, %v6078_v32  ;;  %v4111_v10 = vadd.f32 %v5727_v34, %v5716_v59  ;;  %v6084_v34 = vld [vmem:[#allocation21_spill] sm:$0xff] }
 0x22e   : > { %v3141_v33 = vadd.f32 %v3140_v57, %v3110_v63  ;;  %v2925_v30 = vadd.f32 %v2867_v27, %v6077_v14  ;;  %v2859_v16 = vadd.f32 %v4102_v8, %v2858_v21  ;;  %v3113_v57 = vunpack.c.h.bf16 %v5798_v46  ;;  %v6083_v14 = vld [vmem:[#allocation4_spill] sm:$0xff] }
 0x22f   : > { %v4295_v20 = vpop.f32.mrf.mxu1  ;;  %v4128_v50 = vpop.f32.mrf.mxu0 }
 0x230   : > { %v3142_v35 = vadd.f32 %v3141_v33, %v3111_v18  ;;  %v5833_v11 = vpack.c.bf16 %v2925_v30, %v2924_v28  ;;  %v2923_v2 = vadd.f32 %v2859_v16, %v6079_v61  ;;  %v2880_v8 = vadd.f32 %v4295_v20, %v4117_v17  ;;  %v6081_v28 = vld [vmem:[#allocation28_spill] sm:$0xff]  ;;  %v6085_v16 = vld [vmem:[#allocation5_spill] sm:$0xff] }
 0x231   : > { %v2871_v38 = vpop.f32.mrf.mxu1  ;;  %v4130_v27 = vpop.f32.mrf.mxu0  ;;  %v3996_v21 = vadd.f32 %v6081_v28, %v6080_v37  ;;  %v6082_v33 = vld [vmem:[#allocation20_spill] sm:$0xff]  ;;  %v2223_v17 = vadd.f32 %v6085_v16, %v6084_v34  ;;  %v6087_v34 = vld [vmem:[#allocation18_spill] sm:$0xff] }
 0x232   : > { %v3143_v49 = vadd.f32 %v3142_v35, %v3112_v60  ;;  %3744 = vst [vmem:[%s5645_s21 + $0x58] sm:$0xff] %v5833_v11   ;;  %v5843_v55 = vpack.c.bf16 %v2923_v2, %v2922_v12  ;;  %v2220_v30 = vadd.f32 %v6083_v14, %v6082_v33  ;;  %v2872_v59 = vadd.f32 %v4111_v10, %v2871_v38 }
 0x233   : > { %v4296_v20 = vpop.f32.mrf.mxu1  ;;  %v4114_v35 = vadd.f32 %v5749_v25, %v5740_v4  ;;  %v4129_v2 = vadd.f32 %v4128_v50, %v4127_v62  ;;  %v4131_v37 = vpop.f32.mrf.mxu0  ;;  %v6086_v25 = vld [vmem:[#allocation3_spill] sm:$0xff]  ;;  %v3116_v14 = vunpack.c.l.bf16 %v5833_v11 }
 0x234   : > { %3743 = vst [vmem:[%s5645_s21 + $0x50] sm:$0xff] %v5843_v55   ;;  %v3114_v47 = vunpack.c.l.bf16 %v5843_v55  ;;  %v3144_v13 = vadd.f32 %v3143_v49, %v3113_v57  ;;  %v2883_v32 = vadd.f32 %v4296_v20, %v4120_v15  ;;  %v2928_v12 = vadd.f32 %v2880_v8, %v2220_v30  ;;  %v6088_v8 = vld [vmem:[#allocation19_spill] sm:$0xff] }
 0x235   : > { %v2874_v61 = vpop.f32.mrf.mxu1  ;;  %v3115_v10 = vunpack.c.h.bf16 %v5843_v55  ;;  %v2078_v33 = vadd.f32 %v3996_v21, %v6086_v25  ;;  %v2926_v16 = vadd.f32 %v2872_v59, %v6087_v34  ;;  %v4132_v30 = vadd.f32 %v4131_v37, %v4130_v27  ;;  %v6092_v34 = vld [vmem:[#allocation22_spill] sm:$0xff] }
 0x236   : > { %v3145_v38 = vadd.f32 %v3144_v13, %v3114_v47  ;;  %v2929_v28 = vadd.f32 %v2883_v32, %v2223_v17  ;;  %v2875_v4 = vadd.f32 %v4114_v35, %v2874_v61  ;;  %v3117_v17 = vunpack.c.h.bf16 %v5833_v11  ;;  %v6089_v32 = vld [vmem:[#allocation26_spill] sm:$0xff] }
 0x237   : > { %v4299_v49 = vpop.f32.mrf.mxu1  ;;  %v4123_v59 = vadd.f32 %v5801_v48, %v5790_v24  ;;  %v4126_v27 = vadd.f32 %v4125_v6, %v5814_v23 }
 0x238   : > { %v3146_v62 = vadd.f32 %v3145_v38, %v3115_v10  ;;  %v5866_v50 = vpack.c.bf16 %v2929_v28, %v2928_v12  ;;  %v2927_v15 = vadd.f32 %v2875_v4, %v6088_v8  ;;  %v2896_v20 = vadd.f32 %v4299_v49, %v4129_v2  ;;  %v6090_v12 = vld [vmem:[#allocation6_spill] sm:$0xff]  ;;  %v6091_v38 = vld [vmem:[#allocation8_spill] sm:$0xff]  ;;  %v6095_v8 = vld [vmem:[#allocation9_spill] sm:$0xff] }
 0x239   : > { %v2887_v13 = vpop.f32.mrf.mxu1  ;;  %v2236_v61 = vadd.f32 %v6090_v12, %v6089_v32  ;;  %v2239_v28 = vadd.f32 %v6091_v38, %v2078_v33 }
 0x23a   : > { %v3147_v21 = vadd.f32 %v3146_v62, %v3116_v14  ;;  %3746 = vst [vmem:[%s5645_s21 + $0x68] sm:$0xff] %v5866_v50   ;;  %v5876_v35 = vpack.c.bf16 %v2927_v15, %v2926_v16  ;;  %v2888_v24 = vadd.f32 %v4123_v59, %v2887_v13  ;;  %v6093_v16 = vld [vmem:[#allocation7_spill] sm:$0xff]  ;;  %v3120_v13 = vunpack.c.l.bf16 %v5866_v50 }
 0x23b   : > { %v4300_v2 = vpop.f32.mrf.mxu1  ;;  %v2932_v25 = vadd.f32 %v2896_v20, %v2236_v61  ;;  %v2228_v49 = vadd.f32 %v6093_v16, %v6092_v34  ;;  %v6094_v62 = vld [vmem:[#allocation23_spill] sm:$0xff]  ;;  %v3121_v61 = vunpack.c.h.bf16 %v5866_v50 }
 0x23c   : > { %3745 = vst [vmem:[%s5645_s21 + $0x60] sm:$0xff] %v5876_v35   ;;  %v3118_v37 = vunpack.c.l.bf16 %v5876_v35  ;;  %v3148_v4 = vadd.f32 %v3147_v21, %v3117_v17  ;;  %v2899_v48 = vadd.f32 %v4300_v2, %v4132_v30  ;;  %v2231_v33 = vadd.f32 %v6095_v8, %v6094_v62 }
 0x23d   : > { %v2890_v23 = vpop.f32.mrf.mxu1  ;;  %v3119_v6 = vunpack.c.h.bf16 %v5876_v35  ;;  %v2930_v20 = vadd.f32 %v2888_v24, %v2228_v49 }
 0x23e   : > { %v3149_v15 = vadd.f32 %v3148_v4, %v3118_v37  ;;  %v2933_v32 = vadd.f32 %v2899_v48, %v2239_v28  ;;  %v2891_v12 = vadd.f32 %v4126_v27, %v2890_v23 }
 0x240   : > { %v3150_v30 = vadd.f32 %v3149_v15, %v3119_v6  ;;  %v5897_v21 = vpack.c.bf16 %v2933_v32, %v2932_v25  ;;  %v2931_v59 = vadd.f32 %v2891_v12, %v2231_v33 }
 0x242   : > { %v3151_v38 = vadd.f32 %v3150_v30, %v3120_v13  ;;  %3748 = vst [vmem:[%s5645_s21 + $0x78] sm:$0xff] %v5897_v21   ;;  %v5904_v2 = vpack.c.bf16 %v2931_v59, %v2930_v20  ;;  %v3124_v48 = vunpack.c.l.bf16 %v5897_v21  ;;  %v3125_v34 = vunpack.c.h.bf16 %v5897_v21 }
 0x244   : > { %3747 = vst [vmem:[%s5645_s21 + $0x70] sm:$0xff] %v5904_v2   ;;  %v3122_v28 = vunpack.c.l.bf16 %v5904_v2  ;;  %v3152_v27 = vadd.f32 %v3151_v38, %v3121_v61  ;;  %v3123_v4 = vunpack.c.h.bf16 %v5904_v2 }
 0x246   : > { %v3153_v24 = vadd.f32 %v3152_v27, %v3122_v28 }
 0x248   : > { %v3154_v25 = vadd.f32 %v3153_v24, %v3123_v4 }
 0x24a   : > { %v3155_v16 = vadd.f32 %v3154_v25, %v3124_v48 }
 0x24c   : > { %v3156_v49 = vadd.f32 %v3155_v16, %v3125_v34 }
 0x24e   : > { %v3157_v62 = vrot.slane %v3156_v49, 4 }
 0x250   : > { %v3158_v8 = vadd.f32 %v3157_v62, %v3156_v49 }
 0x252   : > { %v3159_v33 = vrot.slane %v3158_v8, 2 }
 0x254   : > { %v3160_v23 = vadd.f32 %v3159_v33, %v3158_v8 }
 0x256   : > { %v3161_v15 = vrot.slane %v3160_v23, 1 }
 0x258   : > { %v5922_v32 = vadd.f32 %v3161_v15, %v3160_v23 }
 0x25a   : > { %v5925_v12 = vmul.f32 0.00390625, %v5922_v32 }
 0x25c   : > { %v3164_v30 = vsub.f32 %v3094_v42, %v5925_v12  ;;  %v3165_v20 = vsub.f32 %v3095_v7, %v5925_v12  ;;  %v3166_v59 = vsub.f32 %v3096_v19, %v5925_v12  ;;  %v3167_v24 = vsub.f32 %v3097_v1, %v5925_v12 }
 0x25d   : > { %v3168_v25 = vsub.f32 %v3098_v58, %v5925_v12  ;;  %v3169_v39 = vsub.f32 %v3099_v43, %v5925_v12  ;;  %v3170_v19 = vsub.f32 %v3100_v41, %v5925_v12  ;;  %v3171_v54 = vsub.f32 %v3101_v29, %v5925_v12 }
 0x25e   : > { %v3196_v38 = vmul.f32 %v3164_v30, %v3164_v30  ;;  %v3197_v27 = vmul.f32 %v3165_v20, %v3165_v20  ;;  %v3198_v16 = vmul.f32 %v3166_v59, %v3166_v59  ;;  %v3199_v7 = vmul.f32 %v3167_v24, %v3167_v24 }
 0x25f   : > { %v3200_v62 = vmul.f32 %v3168_v25, %v3168_v25  ;;  %v3201_v1 = vmul.f32 %v3169_v39, %v3169_v39  ;;  %v3172_v33 = vsub.f32 %v3102_v51, %v5925_v12  ;;  %v3202_v9 = vmul.f32 %v3170_v19, %v3170_v19 }
 0x260   : > { %v3228_v42 = vadd.f32 %v3197_v27, %v3196_v38  ;;  %v3173_v23 = vsub.f32 %v3103_v0, %v5925_v12  ;;  %v3203_v15 = vmul.f32 %v3171_v54, %v3171_v54  ;;  %v3174_v30 = vsub.f32 %v3104_v44, %v5925_v12 }
 0x261   : > { %v3204_v40 = vmul.f32 %v3172_v33, %v3172_v33  ;;  %v3175_v20 = vsub.f32 %v3105_v22, %v5925_v12  ;;  %v3176_v38 = vsub.f32 %v3106_v36, %v5925_v12  ;;  %v3177_v27 = vsub.f32 %v3107_v31, %v5925_v12 }
 0x262   : > { %v3229_v49 = vadd.f32 %v3228_v42, %v3198_v16  ;;  %v3205_v59 = vmul.f32 %v3173_v23, %v3173_v23  ;;  %v3206_v5 = vmul.f32 %v3174_v30, %v3174_v30  ;;  %v3178_v25 = vsub.f32 %v3108_v53, %v5925_v12 }
 0x263   : > { %v3207_v24 = vmul.f32 %v3175_v20, %v3175_v20  ;;  %v3208_v26 = vmul.f32 %v3176_v38, %v3176_v38  ;;  %v3179_v16 = vsub.f32 %v3109_v3, %v5925_v12  ;;  %v3209_v42 = vmul.f32 %v3177_v27, %v3177_v27 }
 0x264   : > { %v3230_v8 = vadd.f32 %v3229_v49, %v3199_v7  ;;  %v3180_v39 = vsub.f32 %v3110_v63, %v5925_v12  ;;  %v3210_v56 = vmul.f32 %v3178_v25, %v3178_v25  ;;  %v3181_v7 = vsub.f32 %v3111_v18, %v5925_v12 }
 0x265   : > { %v3211_v49 = vmul.f32 %v3179_v16, %v3179_v16  ;;  %v3182_v19 = vsub.f32 %v3112_v60, %v5925_v12  ;;  %v3184_v54 = vsub.f32 %v3114_v47, %v5925_v12  ;;  %v3186_v33 = vsub.f32 %v3116_v14, %v5925_v12 }
 0x266   : > { %v3231_v58 = vadd.f32 %v3230_v8, %v3200_v62  ;;  %v3212_v52 = vmul.f32 %v3180_v39, %v3180_v39  ;;  %v3183_v62 = vsub.f32 %v3113_v57, %v5925_v12  ;;  %v3213_v8 = vmul.f32 %v3181_v7, %v3181_v7 }
 0x267   : > { %v3214_v45 = vmul.f32 %v3182_v19, %v3182_v19  ;;  %v3216_v46 = vmul.f32 %v3184_v54, %v3184_v54  ;;  %v3188_v23 = vsub.f32 %v3118_v37, %v5925_v12  ;;  %v3218_v55 = vmul.f32 %v3186_v33, %v3186_v33 }
 0x268   : > { %v3232_v43 = vadd.f32 %v3231_v58, %v3201_v1  ;;  %v3185_v1 = vsub.f32 %v3115_v10, %v5925_v12  ;;  %v3215_v58 = vmul.f32 %v3183_v62, %v3183_v62  ;;  %v3190_v30 = vsub.f32 %v3120_v13, %v5925_v12 }
 0x269   : > { %v3220_v11 = vmul.f32 %v3188_v23, %v3188_v23  ;;  %v3192_v20 = vsub.f32 %v3122_v28, %v5925_v12  ;;  %v3194_v50 = vsub.f32 %v3124_v48, %v5925_v12 }
 0x26a   : > { %v3233_v41 = vadd.f32 %v3232_v43, %v3202_v9  ;;  %v3187_v9 = vsub.f32 %v3117_v17, %v5925_v12  ;;  %v3217_v43 = vmul.f32 %v3185_v1, %v3185_v1  ;;  %v3222_v35 = vmul.f32 %v3190_v30, %v3190_v30 }
 0x26b   : > { %v3226_v27 = vmul.f32 %v3194_v50, %v3194_v50 }
 0x26c   : > { %v3234_v29 = vadd.f32 %v3233_v41, %v3203_v15  ;;  %v3189_v15 = vsub.f32 %v3119_v6, %v5925_v12  ;;  %v3219_v41 = vmul.f32 %v3187_v9, %v3187_v9 }
 0x26e   : > { %v3235_v51 = vadd.f32 %v3234_v29, %v3204_v40  ;;  %v3191_v40 = vsub.f32 %v3121_v61, %v5925_v12  ;;  %v3221_v29 = vmul.f32 %v3189_v15, %v3189_v15  ;;  %v3224_v61 = vmul.f32 %v3192_v20, %v3192_v20 }
 0x270   : > { %v3236_v0 = vadd.f32 %v3235_v51, %v3205_v59  ;;  %v3193_v59 = vsub.f32 %v3123_v4, %v5925_v12  ;;  %v3223_v51 = vmul.f32 %v3191_v40, %v3191_v40 }
 0x272   : > { %v3237_v44 = vadd.f32 %v3236_v0, %v3206_v5  ;;  %v3195_v5 = vsub.f32 %v3125_v34, %v5925_v12  ;;  %v3225_v28 = vmul.f32 %v3193_v59, %v3193_v59 }
 0x274   : > { %v3238_v22 = vadd.f32 %v3237_v44, %v3207_v24  ;;  %v3227_v44 = vmul.f32 %v3195_v5, %v3195_v5 }
 0x276   : > { %v3239_v36 = vadd.f32 %v3238_v22, %v3208_v26 }
 0x278   : > { %v3240_v31 = vadd.f32 %v3239_v36, %v3209_v42 }
 0x27a   : > { %v3241_v53 = vadd.f32 %v3240_v31, %v3210_v56 }
 0x27c   : > { %v3242_v3 = vadd.f32 %v3241_v53, %v3211_v49 }
 0x27e   : > { %v3243_v63 = vadd.f32 %v3242_v3, %v3212_v52 }
 0x280   : > { %v3244_v18 = vadd.f32 %v3243_v63, %v3213_v8 }
 0x282   : > { %v3245_v60 = vadd.f32 %v3244_v18, %v3214_v45 }
 0x284   : > { %v3246_v57 = vadd.f32 %v3245_v60, %v3215_v58 }
 0x286   : > { %v3247_v47 = vadd.f32 %v3246_v57, %v3216_v46 }
 0x288   : > { %v3248_v10 = vadd.f32 %v3247_v47, %v3217_v43 }
 0x28a   : > { %v3249_v14 = vadd.f32 %v3248_v10, %v3218_v55 }
 0x28c   : > { %v3250_v17 = vadd.f32 %v3249_v14, %v3219_v41 }
 0x28e   : > { %v3251_v37 = vadd.f32 %v3250_v17, %v3220_v11 }
 0x290   : > { %v3252_v6 = vadd.f32 %v3251_v37, %v3221_v29 }
 0x292   : > { %v3253_v13 = vadd.f32 %v3252_v6, %v3222_v35 }
 0x294   : > { %v3254_v38 = vadd.f32 %v3253_v13, %v3223_v51 }
 0x296   : > { %v3255_v0 = vadd.f32 %v3254_v38, %v3224_v61 }
 0x298   : > { %v3256_v24 = vadd.f32 %v3255_v0, %v3225_v28 }
 0x29a   : > { %v3257_v2 = vadd.f32 %v3256_v24, %v3226_v27 }
 0x29c   : > { %v3258_v4 = vadd.f32 %v3257_v2, %v3227_v44 }
 0x29e   : > { %v3259_v25 = vrot.slane %v3258_v4, 4 }
 0x2a0   : > { %v3260_v26 = vadd.f32 %v3259_v25, %v3258_v4 }
 0x2a2   : > { %v3261_v22 = vrot.slane %v3260_v26, 2 }
 0x2a4   : > { %v3262_v16 = vadd.f32 %v3261_v22, %v3260_v26 }
 0x2a6   : > { %v3263_v42 = vrot.slane %v3262_v16, 1 }
 0x2a8   : > { %v3264_v48 = vadd.f32 %v3263_v42, %v3262_v16 }
 0x2aa   : > { %v3266_v21 = vsel %vm225_vm0, %v5922_v32, %v3264_v48 }
 0x2ab   : > { %3267 = vst [vmem:[%s181_s24] sm:$0x3] %v3266_v21 }
 0x2ac PF: > { %s14_s12 = sadd.s32 1, %s4480_s12  }
 0x2ad   : > { %p11_p4 = scmp.ge.s32.totalorder %s14_s12, 4  }
 0x2af   :  { %13 = sbr.rel (!%p11_p4) target bundleno = 1 (0x1), region = 74 }

// kernel: basic_block_forward.4
= control target key start
LH: loop header
LB: loop body
LE: loop exit
PB: predicated region body
PF: predicated region fallthrough
CT: control target
= control target key end

     0   :  { %s4950_s18 = smov 0   ;;  %s6592_s0 = inlined_call_operand.vmem [shape: bf16[2,16,16,128], index: 0, kind: input, shape index: {}]   ;;  %s6593_s1 = inlined_call_operand.vmem [shape: bf16[3,384,128], index: 1, kind: input, shape index: {}]   ;;  %s6594_s2 = inlined_call_operand.vmem [shape: f32[1,128], index: 2, kind: input, shape index: {}]   ;;  %s6595_s3 = inlined_call_operand.vmem [shape: f32[1,128], index: 3, kind: input, shape index: {}]   ;;  %s6596_s4 = inlined_call_operand.vmem [shape: bf16[2,16,16,128], index: 4, kind: output, shape index: {0}]   ;;  %s6597_s5 = inlined_call_operand.vmem [shape: f32[2,2,128], index: 5, kind: output, shape index: {1}]  }
   0x1 LB: > { %s3646_s19 = sadd.s32 4294967295, %s4917_s18   ;;  %p3650_p0 = scmp.ge.s32.totalorder %s4917_s18, 1  ;;  %s4917_s18 = sphi %s4950_s18, %s16_s18  }
   0x2   : > { %p190_p1 = scmp.lt.s32.totalorder %s4917_s18, 3 }
   0x4   : > { %p191_p2 = pnand %p3650_p0, %p190_p1 }
   0x6   : > { %194 = sbr.rel (%p191_p2) target bundleno = 700 (0x2bc), region = 36 }
   0xb   : > { %v4763_v0 = vld [vmem:[%s6593_s1 + $0x138] sm:$0xff]   ;;  %v4765_v2 = vld [vmem:[%s6593_s1 + $0x130] sm:$0xff]   ;;  %p222_p3 = scmp.lt.s32.totalorder %s3646_s19, 1  ;;  %v4767_v4 = vld [vmem:[%s6593_s1 + $0x128] sm:$0xff]   ;;  %v4919_v5 = vmov 0   ;;  %vm437_vm0 = vcmask 1040384  }
   0xc   : > { %v4764_v1 = vld [vmem:[%s6593_s1 + $0xf8] sm:$0xff]   ;;  %4738 = vmatprep.subr.bf16.mxu1 %v4763_v0  ;;  %4186 = vmatprep.subr.bf16.mxu0 %v4763_v0  ;;  %v4766_v3 = vld [vmem:[%s6593_s1 + $0xf0] sm:$0xff]   ;;  %427 = vst [vmem:[#allocation2] sm:$0xf] %v4919_v5  ;;  %428 = vst [vmem:[#allocation2 + $0x4] sm:$0xf] %v4919_v5 }
   0xd   : > { %4746 = vmatpush3.bf16.msra.mxu1 %v4764_v1  ;;  %4187 = vmatpush3.bf16.msra.mxu0 %v4764_v1  ;;  %s6675_s19 = smov (!%p222_p3, %s3646_s19), 1  ;;  %429 = vst [vmem:[#allocation2 + $0x8] sm:$0xf] %v4919_v5  ;;  %432 = vst [vmem:[#allocation2 + $0x110] sm:$0xf] %v4919_v5  ;;  %v4768_v6 = vld [vmem:[%s6593_s1 + $0xe8] sm:$0xff]  }
   0xe   : > { %4739 = vmatprep.subr.bf16.mxu1 %v4765_v2  ;;  %4188 = vmatprep.subr.bf16.mxu0 %v4765_v2  ;;  %433 = vst [vmem:[#allocation2 + $0x114] sm:$0xf] %v4919_v5  ;;  %434 = vst [vmem:[#allocation2 + $0x118] sm:$0xf] %v4919_v5  ;;  %v4769_v7 = vld [vmem:[%s6593_s1 + $0x120] sm:$0xff]   ;;  %s3946_s9 = sshll.u32 %s6675_s19, 7 }
   0xf   : > { %v4770_v8 = vld [vmem:[%s6593_s1 + $0xe0] sm:$0xff]   ;;  %v4771_v9 = vld [vmem:[%s6593_s1 + $0x118] sm:$0xff]   ;;  %s4993_s16 = scalar_lea.vmem %s6592_s0, %s3946_s9  ;;  %v4773_v11 = vld [vmem:[%s6593_s1 + $0x110] sm:$0xff]   ;;  %vm438_vm1 = vsmask.f32 256  ;;  %vm940_vm5 = vcmask 1043456   ;;  %s6193_s26 = scalar_lea.vmem %s6596_s4, %s3946_s9 }
  0x10   : > { %v4772_v10 = vld [vmem:[%s6593_s1 + $0xd8] sm:$0xff]   ;;  %v4013_v12 = vld [vmem:[%s4993_s16] sm:$0xff]   ;;  %v4774_v14 = vld [vmem:[%s6593_s1 + $0xd0] sm:$0xff]   ;;  %vm488_vm2 = vsmask.f32 7938  ;;  %vm2606_vm10 = vcmask 1046528  }
  0x11   : > { %4747 = vmatpush3.bf16.msra.mxu1 %v4766_v3  ;;  %4189 = vmatpush3.bf16.msra.mxu0 %v4766_v3  ;;  %v5005_v13 = vld [vmem:[%s6594_s2] ss:$0 sm:$0xff]  ;;  %v4014_v15 = vunpack.c.l.bf16 %v4013_v12  ;;  %v4015_v16 = vunpack.c.h.bf16 %v4013_v12  ;;  %v440_v17 = vld [vmem:[#allocation2 + $0x10] sm:$0x1]  ;;  %v4775_v18 = vld [vmem:[%s6593_s1 + $0x108] sm:$0xff]   ;;  %s3655_s9 = sshll.u32 %s6675_s19, 1 }
  0x12   : > { %4740 = vmatprep.subr.bf16.mxu1 %v4767_v4  ;;  %4190 = vmatprep.subr.bf16.mxu0 %v4767_v4  ;;  %v5016_v19 = vld [vmem:[%s6595_s3] ss:$0 sm:$0xff]  ;;  %vm5020_vm3 = vmand %vm437_vm0, %vm438_vm1  ;;  %v490_v21 = vld [vmem:[#allocation2 + $0x18] sm:$0x1]  ;;  %vm618_vm6 = vsmask.f32 4368  ;;  %s235_s28 = scalar_lea.vmem %s6597_s5, %s3655_s9 }
  0x13   : > { %v308_v22 = vmul.f32 %v4014_v15, %v5005_v13  ;;  %v309_v23 = vmul.f32 %v4015_v16, %v5005_v13  ;;  %v441_v24 = vsel %vm5020_vm3, 0, %v440_v17  ;;  %vm5030_vm4 = vmand %vm437_vm0, %vm488_vm2  ;;  %v4167_v26 = vld [vmem:[%s4993_s16 + $0x60] sm:$0xff]   ;;  %v476_v27 = vld [vmem:[#allocation2 + $0xd0] sm:$0x1]  ;;  %vm1318_vm7 = vsmask.f32 7424 }
  0x14   : > { %442 = vst [vmem:[#allocation2 + $0x10] sm:$0x1] %v441_v24  ;;  %v491_v28 = vsel %vm5030_vm4, 0, %v490_v21  ;;  %v4062_v29 = vunpack.c.l.bf16 %v4167_v26  ;;  %v4063_v30 = vunpack.c.h.bf16 %v4167_v26  ;;  %v477_v31 = vsel %vm5020_vm3, 0, %v476_v27  ;;  %v526_v32 = vld [vmem:[#allocation2 + $0xd8] sm:$0x1]  ;;  %vm5074_vm8 = vmor %vm438_vm1, %vm618_vm6 }
  0x15   : > { %4748 = vmatpush3.bf16.msra.mxu1 %v4768_v6  ;;  %4191 = vmatpush3.bf16.msra.mxu0 %v4768_v6  ;;  %v4776_v33 = vld [vmem:[%s6593_s1 + $0xc8] sm:$0xff]   ;;  %v347_v34 = vadd.f32 %v5016_v19, %v308_v22  ;;  %v348_v35 = vadd.f32 %v5016_v19, %v309_v23  ;;  %492 = vst [vmem:[#allocation2 + $0x18] sm:$0x1] %v491_v28  ;;  %478 = vst [vmem:[#allocation2 + $0xd0] sm:$0x1] %v477_v31  ;;  %v527_v36 = vsel %vm5030_vm4, 0, %v526_v32 }
  0x16   : > { %4741 = vmatprep.subr.bf16.mxu1 %v4769_v7  ;;  %4192 = vmatprep.subr.bf16.mxu0 %v4769_v7  ;;  %v332_v37 = vmul.f32 %v4062_v29, %v5005_v13  ;;  %v333_v38 = vmul.f32 %v4063_v30, %v5005_v13  ;;  %528 = vst [vmem:[#allocation2 + $0xd8] sm:$0x1] %v527_v36  ;;  %v1054_v39 = vld [vmem:[#allocation2] sm:$0xf]  ;;  %v1055_v40 = vld [vmem:[#allocation2 + $0x4] sm:$0xf]  ;;  %vm5082_vm9 = vmand %vm940_vm5, %vm488_vm2 }
  0x17   : > { %v379_v41 = vmax.f32 %v347_v34, 0.0  ;;  %v380_v42 = vmax.f32 %v348_v35, 0.0  ;;  %v5048_v43 = vcombine.low %v1054_v39, %v1055_v40  ;;  %v4785_v44 = vld [vmem:[#allocation2 + $0x8] ss:$0 sps:$4 sm:$0x11]   ;;  %v4166_v45 = vld [vmem:[%s4993_s16 + $0x58] sm:$0xff]  }
  0x18   : > { %v4777_v46 = vld [vmem:[%s6593_s1 + $0x100] sm:$0xff]   ;;  %v371_v47 = vadd.f32 %v5016_v19, %v332_v37  ;;  %v372_v48 = vadd.f32 %v5016_v19, %v333_v38  ;;  %v4058_v49 = vunpack.c.l.bf16 %v4166_v45  ;;  %v4059_v50 = vunpack.c.h.bf16 %v4166_v45  ;;  %v5065_v2 = vld [vmem:[%s6593_s1 + $0x178] sm:$0xff]   ;;  %v523_v28 = vld [vmem:[#allocation2 + $0xc8] sm:$0x1] }
  0x19   : > { %4749 = vmatpush3.bf16.msra.mxu1 %v4770_v8  ;;  %4193 = vmatpush3.bf16.msra.mxu0 %v4770_v8  ;;  %v3948_v51 = vpack.c.bf16 %v379_v41, %v379_v41  ;;  %v3949_v52 = vpack.c.bf16 %v380_v42, %v380_v42  ;;  %v1320_v53 = vshrl.u32 %v5048_v43, 16  ;;  %v1322_v54 = vshll.u32 %v5048_v43, 16  ;;  %v4778_v59 = vld [vmem:[%s6593_s1 + $0xc0] sm:$0xff]   ;;  %v5070_v5 = vld [vmem:[%s6593_s1 + $0xb8] sm:$0xff]   ;;  %v4156_v39 = vld [vmem:[%s4993_s16 + $0x8] sm:$0xff]  }
  0x1a   : > { %4742 = vmatprep.subr.bf16.mxu1 %v4771_v9  ;;  %4194 = vmatprep.subr.bf16.mxu0 %v4771_v9  ;;  %v403_v55 = vmax.f32 %v371_v47, 0.0  ;;  %v404_v56 = vmax.f32 %v372_v48, 0.0  ;;  %v1327_v57 = vshll.u32 %v4785_v44, 16  ;;  %v330_v58 = vmul.f32 %v4058_v49, %v5005_v13  ;;  %v473_v21 = vld [vmem:[#allocation2 + $0xc0] sm:$0x1] }
  0x1b   : > { %v621_v60 = vshrl.u32 %v3948_v51, 16  ;;  %v624_v61 = vshll.u32 %v3948_v51, 16  ;;  %v629_v62 = vshrl.u32 %v3949_v52, 16  ;;  %v632_v63 = vshll.u32 %v3949_v52, 16  ;;  %v942_v9 = vld [vmem:[#allocation2 + $0x10] sm:$0xf] }
  0x1c   : > { %v3972_v0 = vpack.c.bf16 %v403_v55, %v403_v55  ;;  %v3973_v1 = vpack.c.bf16 %v404_v56, %v404_v56  ;;  %v1324_v3 = vrot.slane %v1322_v54, 1  ;;  %v1329_v4 = vrot.slane %v1327_v57, 1  ;;  %v1026_v27 = vld [vmem:[#allocation2 + $0xd0] sm:$0xf]  ;;  %v443_v34 = vld [vmem:[#allocation2 + $0x20] sm:$0x1] }
  0x1d   : > { %4750 = vmatpush3.bf16.msra.mxu1 %v4772_v10  ;;  %4195 = vmatpush3.bf16.msra.mxu0 %v4772_v10  ;;  %v623_v7 = vrot.slane %v621_v60, 7  ;;  %v631_v8 = vrot.slane %v629_v62, 7  ;;  %v331_v10 = vmul.f32 %v4059_v50, %v5005_v13  ;;  %v1030_v31 = vld [vmem:[#allocation2 + $0xd8] sm:$0x1]  ;;  %v493_v40 = vld [vmem:[#allocation2 + $0x28] sm:$0x1]  ;;  %v4018_v56 = vunpack.c.l.bf16 %v4156_v39 }
  0x1e   : > { %4743 = vmatprep.subr.bf16.mxu1 %v4773_v11  ;;  %4196 = vmatprep.subr.bf16.mxu0 %v4773_v11  ;;  %v369_v11 = vadd.f32 %v5016_v19, %v330_v58  ;;  %v825_v15 = vshrl.u32 %v3972_v0, 16  ;;  %v828_v16 = vshll.u32 %v3972_v0, 16  ;;  %v833_v17 = vshrl.u32 %v3973_v1, 16  ;;  %v4168_v50 = vld [vmem:[%s4993_s16 + $0x68] sm:$0xff]   ;;  %v5115_v0 = vld [vmem:[%s4993_s16 + $0x10] sm:$0xff]  }
  0x1f   : > { %v626_v22 = vor.u32 %v624_v61, %v623_v7  ;;  %v627_v23 = vrot.slane %v623_v7, 4  ;;  %v634_v24 = vor.u32 %v632_v63, %v631_v8  ;;  %v636_v26 = vrot.slane %v631_v8, 4 }
  0x20   : > { %v827_v29 = vrot.slane %v825_v15, 7  ;;  %v835_v30 = vrot.slane %v833_v17, 7  ;;  %v1325_v32 = vor.u32 %v1324_v3, %v1320_v53  ;;  %v401_v38 = vmax.f32 %v369_v11, 0.0 }
  0x21   : > { %4751 = vmatpush3.bf16.msra.mxu1 %v4774_v14  ;;  %4197 = vmatpush3.bf16.msra.mxu0 %v4774_v14  ;;  %v946_v14 = vld [vmem:[#allocation2 + $0x18] sm:$0x1]  ;;  %v635_v35 = vsel %vm5074_vm8, %v627_v23, %v634_v24  ;;  %v943_v36 = vsel %vm5082_vm9, %v626_v22, %v942_v9  ;;  %v474_v48 = vsel %vm5020_vm3, 0, %v473_v21  ;;  %v524_v49 = vsel %vm5030_vm4, 0, %v523_v28 }
  0x22   : > { %4744 = vmatprep.subr.bf16.mxu1 %v4775_v18  ;;  %4198 = vmatprep.subr.bf16.mxu0 %v4775_v18  ;;  %v836_v18 = vshll.u32 %v3973_v1, 16  ;;  %v947_v37 = vsel %vm5020_vm3, %v636_v26, %v946_v14  ;;  %944 = vst [vmem:[#allocation2 + $0x10] sm:$0xf] %v943_v36  ;;  %945 = vst [vmem:[#allocation2 + $0x14] sm:$0xf] %v635_v35  ;;  %v830_v41 = vor.u32 %v828_v16, %v827_v29 }
  0x23   : > { %948 = vst [vmem:[#allocation2 + $0x18] sm:$0x1] %v947_v37  ;;  %v831_v42 = vrot.slane %v827_v29, 4  ;;  %v840_v45 = vrot.slane %v835_v30, 4  ;;  %475 = vst [vmem:[#allocation2 + $0xc0] sm:$0x1] %v474_v48  ;;  %v3970_v54 = vpack.c.bf16 %v401_v38, %v401_v38  ;;  %v4019_v57 = vunpack.c.h.bf16 %v4156_v39 }
  0x24   : > { %v838_v44 = vor.u32 %v836_v18, %v835_v30  ;;  %v1027_v52 = vsel %vm5082_vm9, %v830_v41, %v1026_v27  ;;  %525 = vst [vmem:[#allocation2 + $0xc8] sm:$0x1] %v524_v49  ;;  %v444_v58 = vsel %vm5020_vm3, 0, %v443_v34  ;;  %v494_v62 = vsel %vm5030_vm4, 0, %v493_v40 }
  0x25   : > { %4752 = vmatpush3.bf16.msra.mxu1 %v4776_v33  ;;  %4199 = vmatpush3.bf16.msra.mxu0 %v4776_v33  ;;  %v370_v33 = vadd.f32 %v5016_v19, %v331_v10  ;;  %v1031_v53 = vsel %vm5020_vm3, %v840_v45, %v1030_v31  ;;  %1028 = vst [vmem:[#allocation2 + $0xd0] sm:$0xf] %v1027_v52  ;;  %v808_v60 = vshrl.u32 %v3970_v54, 16  ;;  %v811_v61 = vshll.u32 %v3970_v54, 16 }
  0x26   : > { %4745 = vmatprep.subr.bf16.mxu1 %v4777_v46  ;;  %4200 = vmatprep.subr.bf16.mxu0 %v4777_v46  ;;  %v5097_v46 = vsel %vm1318_vm7, %v1325_v32, %v1329_v4  ;;  %v839_v51 = vsel %vm5074_vm8, %v831_v42, %v838_v44  ;;  %1032 = vst [vmem:[#allocation2 + $0xd8] sm:$0x1] %v1031_v53  ;;  %445 = vst [vmem:[#allocation2 + $0x20] sm:$0x1] %v444_v58  ;;  %v4066_v63 = vunpack.c.l.bf16 %v4168_v50 }
  0x27   : > { %v402_v47 = vmax.f32 %v370_v33, 0.0  ;;  %1029 = vst [vmem:[#allocation2 + $0xd4] sm:$0xf] %v839_v51  ;;  %v310_v4 = vmul.f32 %v4018_v56, %v5005_v13  ;;  %v311_v7 = vmul.f32 %v4019_v57, %v5005_v13  ;;  %495 = vst [vmem:[#allocation2 + $0x28] sm:$0x1] %v494_v62  ;;  %v810_v8 = vrot.slane %v808_v60, 7 }
  0x28   : > { %v4067_v9 = vunpack.c.h.bf16 %v4168_v50  ;;  %v334_v10 = vmul.f32 %v4066_v63, %v5005_v13  ;;  %v4022_v18 = vunpack.c.l.bf16 %v5115_v0  ;;  %v4023_v21 = vunpack.c.h.bf16 %v5115_v0 }
  0x29   : > { %4753 = vmatpush3.bf16.msra.mxu1 %v4778_v59  ;;  %4201 = vmatpush3.bf16.msra.mxu0 %v4778_v59  ;;  %v3971_v55 = vpack.c.bf16 %v402_v47, %v402_v47  ;;  %v479_v59 = vld [vmem:[#allocation2 + $0xe0] sm:$0x1]  ;;  %v1056_v14 = vld [vmem:[#allocation2 + $0x10] sm:$0xf]  ;;  %v1057_v15 = vld [vmem:[#allocation2 + $0x14] sm:$0xf]  ;;  %v349_v16 = vadd.f32 %v5016_v19, %v310_v4  ;;  %v350_v17 = vadd.f32 %v5016_v19, %v311_v7 }
  0x2a   : > { %4594 = vmatprep.subr.bf16.mxu1 %v5065_v2  ;;  %4642 = vmatprep.subr.bf16.mxu0 %v5070_v5  ;;  %v480_v11 = vsel %vm5020_vm3, 0, %v479_v59  ;;  %v5126_v22 = vcombine.low %v1056_v14, %v1057_v15  ;;  %v4780_v23 = vld [vmem:[#allocation2 + $0x18] ss:$0 sps:$4 sm:$0x11]   ;;  %v813_v24 = vor.u32 %v811_v61, %v810_v8  ;;  %v814_v26 = vrot.slane %v810_v8, 4 }
  0x2b   : > { %v816_v1 = vshrl.u32 %v3971_v55, 16  ;;  %v819_v3 = vshll.u32 %v3971_v55, 16  ;;  %481 = vst [vmem:[#allocation2 + $0xe0] sm:$0x1] %v480_v11  ;;  %v1019_v28 = vld [vmem:[#allocation2 + $0xc0] sm:$0xf]  ;;  %v335_v32 = vmul.f32 %v4067_v9, %v5005_v13  ;;  %v373_v33 = vadd.f32 %v5016_v19, %v334_v10 }
  0x2c   : > { %v1023_v29 = vld [vmem:[#allocation2 + $0xc8] sm:$0x1]  ;;  %v381_v30 = vmax.f32 %v349_v16, 0.0  ;;  %v382_v31 = vmax.f32 %v350_v17, 0.0  ;;  %v1332_v34 = vshrl.u32 %v5126_v22, 16  ;;  %v1334_v35 = vshll.u32 %v5126_v22, 16 }
  0x2d   : > { %v818_v27 = vrot.slane %v816_v1, 7  ;;  %v1339_v36 = vshll.u32 %v4780_v23, 16  ;;  %v1080_v37 = vld [vmem:[#allocation2 + $0xd0] sm:$0xf]  ;;  %v1020_v41 = vsel %vm5082_vm9, %v813_v24, %v1019_v28  ;;  %v529_v59 = vld [vmem:[#allocation2 + $0xe8] sm:$0x1]  ;;  %v374_v1 = vadd.f32 %v5016_v19, %v335_v32 }
  0x2e   : > { %v1081_v39 = vld [vmem:[#allocation2 + $0xd4] sm:$0xf]  ;;  %v3950_v42 = vpack.c.bf16 %v381_v30, %v381_v30  ;;  %v3951_v44 = vpack.c.bf16 %v382_v31, %v382_v31  ;;  %v1336_v45 = vrot.slane %v1334_v35, 1  ;;  %v4782_v49 = vld [vmem:[#allocation2 + $0xd8] ss:$0 sps:$4 sm:$0x11]  }
  0x2f   : > { %v821_v38 = vor.u32 %v819_v3, %v818_v27  ;;  %v823_v40 = vrot.slane %v818_v27, 4  ;;  %v1341_v47 = vrot.slane %v1339_v36, 1  ;;  %v5134_v48 = vcombine.low %v1080_v37, %v1081_v39  ;;  %1021 = vst [vmem:[#allocation2 + $0xc0] sm:$0xf] %v1020_v41  ;;  %v949_v63 = vld [vmem:[#allocation2 + $0x20] sm:$0xf] }
  0x30   : > { %v638_v52 = vshrl.u32 %v3950_v42, 16  ;;  %v641_v53 = vshll.u32 %v3950_v42, 16  ;;  %v646_v54 = vshrl.u32 %v3951_v44, 16  ;;  %v1337_v55 = vor.u32 %v1336_v45, %v1332_v34  ;;  %v953_v8 = vld [vmem:[#allocation2 + $0x28] sm:$0x1]  ;;  %v4796_v10 = vld [vmem:[%s6593_s1 + $0xb0] sm:$0xff]  }
  0x31   : > { %v822_v50 = vsel %vm5074_vm8, %v814_v26, %v821_v38  ;;  %v1024_v51 = vsel %vm5020_vm3, %v823_v40, %v1023_v29  ;;  %v1476_v56 = vshrl.u32 %v5134_v48, 16  ;;  %v1478_v57 = vshll.u32 %v5134_v48, 16  ;;  %v446_v17 = vld [vmem:[#allocation2 + $0x30] sm:$0x1]  ;;  %v496_v23 = vld [vmem:[#allocation2 + $0x38] sm:$0x1] }
  0x32   : > { %1022 = vst [vmem:[#allocation2 + $0xc4] sm:$0xf] %v822_v50  ;;  %v1483_v58 = vshll.u32 %v4782_v49, 16  ;;  %1025 = vst [vmem:[#allocation2 + $0xc8] sm:$0x1] %v1024_v51  ;;  %v640_v60 = vrot.slane %v638_v52, 7  ;;  %v5144_v3 = vsel %vm1318_vm7, %v1337_v55, %v1341_v47 }
  0x33   : > { %v648_v61 = vrot.slane %v646_v54, 7  ;;  %v649_v62 = vshll.u32 %v3951_v44, 16  ;;  %v1480_v4 = vrot.slane %v1478_v57, 1  ;;  %v405_v9 = vmax.f32 %v373_v33, 0.0  ;;  %1778 = vmatprep.mubr.bf16.mxu0 %v5144_v3  ;;  %v4808_v29 = vld [vmem:[%s6593_s1 + $0xa8] sm:$0xff]   ;;  %v5170_v38 = vld [vmem:[%s4993_s16 + $0x70] sm:$0xff]  }
  0x34   : > { %v1485_v7 = vrot.slane %v1483_v58, 1  ;;  %v643_v11 = vor.u32 %v641_v53, %v640_v60  ;;  %v644_v14 = vrot.slane %v640_v60, 4  ;;  %1779 = vmatmul.mubr.bf16.vlgmr.msra.gmra.mxu0 %v5097_v46  ;;  %v406_v26 = vmax.f32 %v374_v1, 0.0  ;;  %v1033_v41 = vld [vmem:[#allocation2 + $0xe0] sm:$0xf] }
  0x35   : > { %v651_v15 = vor.u32 %v649_v62, %v648_v61  ;;  %v653_v16 = vrot.slane %v648_v61, 4  ;;  %v1481_v24 = vor.u32 %v1480_v4, %v1476_v56  ;;  %v530_v27 = vsel %vm5030_vm4, 0, %v529_v59  ;;  %4643 = vmatpush3.bf16.msra.mxu0 %v5070_v5  ;;  %v4814_v57 = vld [vmem:[%s6593_s1 + $0xa0] sm:$0xff]   ;;  %v4789_v62 = vld [vmem:[%s6593_s1 + $0x170] sm:$0xff]  }
  0x36   : > { %v3974_v28 = vpack.c.bf16 %v405_v9, %v405_v9  ;;  %v1078_v30 = vld [vmem:[#allocation2 + $0xc0] sm:$0xf]  ;;  %v950_v32 = vsel %vm5082_vm9, %v643_v11, %v949_v63  ;;  %531 = vst [vmem:[#allocation2 + $0xe8] sm:$0x1] %v530_v27  ;;  %v312_v33 = vmul.f32 %v4022_v18, %v5005_v13  ;;  %v3975_v5 = vpack.c.bf16 %v406_v26, %v406_v26  ;;  %v482_v9 = vld [vmem:[#allocation2 + $0xf0] sm:$0x1] }
  0x37   : > { %v652_v31 = vsel %vm5074_vm8, %v644_v14, %v651_v15  ;;  %v954_v46 = vsel %vm5020_vm3, %v653_v16, %v953_v8  ;;  %v5167_v34 = vsel %vm1318_vm7, %v1481_v24, %v1485_v7  ;;  %951 = vst [vmem:[#allocation2 + $0x20] sm:$0xf] %v950_v32  ;;  %4644 = vmatprep.subr.bf16.mxu0 %v4796_v10  ;;  %v447_v44 = vsel %vm5020_vm3, 0, %v446_v17 }
  0x38   : > { %952 = vst [vmem:[#allocation2 + $0x24] sm:$0xf] %v652_v31  ;;  %955 = vst [vmem:[#allocation2 + $0x28] sm:$0x1] %v954_v46  ;;  %v842_v36 = vshrl.u32 %v3974_v28, 16  ;;  %v845_v37 = vshll.u32 %v3974_v28, 16  ;;  %1874 = vmatprep.mubr.bf16.mxu1 %v5167_v34  ;;  %v313_v18 = vmul.f32 %v4023_v21, %v5005_v13  ;;  %v351_v42 = vadd.f32 %v5016_v19, %v312_v33 }
  0x39   : > { %v1079_v35 = vld [vmem:[#allocation2 + $0xc4] sm:$0xf]  ;;  %v4787_v40 = vld [vmem:[#allocation2 + $0xc8] ss:$0 sps:$4 sm:$0x11]   ;;  %v850_v47 = vshrl.u32 %v3975_v5, 16  ;;  %4645 = vmatpush3.bf16.msra.mxu0 %v4796_v10  ;;  %v4070_v61 = vunpack.c.l.bf16 %v5170_v38  ;;  %v4071_v16 = vunpack.c.h.bf16 %v5170_v38 }
  0x3a   : > { %v5173_v39 = vcombine.low %v1078_v30, %v1079_v35  ;;  %v844_v45 = vrot.slane %v842_v36, 7  ;;  %v853_v49 = vshll.u32 %v3975_v5, 16  ;;  %448 = vst [vmem:[#allocation2 + $0x30] sm:$0x1] %v447_v44  ;;  %v497_v50 = vsel %vm5030_vm4, 0, %v496_v23  ;;  %4646 = vmatprep.subr.bf16.mxu0 %v4808_v29  ;;  %v4158_v35 = vld [vmem:[%s4993_s16 + $0x18] sm:$0xff]  }
  0x3b   : > { %v1471_v53 = vshll.u32 %v4787_v40, 16  ;;  %v352_v0 = vadd.f32 %v5016_v19, %v313_v18  ;;  %498 = vst [vmem:[#allocation2 + $0x38] sm:$0x1] %v497_v50  ;;  %v852_v55 = vrot.slane %v850_v47, 7  ;;  %v383_v56 = vmax.f32 %v351_v42, 0.0 }
  0x3c   : > { %v1464_v51 = vshrl.u32 %v5173_v39, 16  ;;  %v1466_v52 = vshll.u32 %v5173_v39, 16  ;;  %v847_v21 = vor.u32 %v845_v37, %v844_v45  ;;  %v848_v54 = vrot.slane %v844_v45, 4  ;;  %v532_v33 = vld [vmem:[#allocation2 + $0xf8] sm:$0x1] }
  0x3d   : > { %v1473_v59 = vrot.slane %v1471_v53, 1  ;;  %v384_v60 = vmax.f32 %v352_v0, 0.0  ;;  %v855_v63 = vor.u32 %v853_v49, %v852_v55  ;;  %v857_v1 = vrot.slane %v852_v55, 4  ;;  %v1037_v7 = vld [vmem:[#allocation2 + $0xe8] sm:$0x1]  ;;  %4647 = vmatpush3.bf16.msra.mxu0 %v4808_v29 }
  0x3e   : > { %v1468_v58 = vrot.slane %v1466_v52, 1  ;;  %v1034_v4 = vsel %vm5082_vm9, %v847_v21, %v1033_v41  ;;  %v3952_v8 = vpack.c.bf16 %v383_v56, %v383_v56  ;;  %v1058_v11 = vld [vmem:[#allocation2 + $0x20] sm:$0xf]  ;;  %v336_v17 = vmul.f32 %v4070_v61, %v5005_v13  ;;  %4648 = vmatprep.subr.bf16.mxu0 %v4814_v57  ;;  %v4794_v49 = vld [vmem:[%s6593_s1 + $0x168] sm:$0xff]  }
  0x3f   : > { %v1059_v14 = vld [vmem:[#allocation2 + $0x24] sm:$0xf]  ;;  %1035 = vst [vmem:[#allocation2 + $0xe0] sm:$0xf] %v1034_v4  ;;  %v3953_v15 = vpack.c.bf16 %v384_v60, %v384_v60  ;;  %v856_v26 = vsel %vm5074_vm8, %v848_v54, %v855_v63  ;;  %v1038_v27 = vsel %vm5020_vm3, %v857_v1, %v1037_v7  ;;  %v337_v18 = vmul.f32 %v4071_v16, %v5005_v13  ;;  %v449_v21 = vld [vmem:[#allocation2 + $0x40] sm:$0x1] }
  0x40   : > { %v1469_v10 = vor.u32 %v1468_v58, %v1464_v51  ;;  %v5197_v23 = vcombine.low %v1058_v11, %v1059_v14  ;;  %v4791_v24 = vld [vmem:[#allocation2 + $0x28] ss:$0 sps:$4 sm:$0x11]   ;;  %v655_v28 = vshrl.u32 %v3952_v8, 16  ;;  %1036 = vst [vmem:[#allocation2 + $0xe4] sm:$0xf] %v856_v26  ;;  %v375_v42 = vadd.f32 %v5016_v19, %v336_v17 }
  0x41   : > { %1039 = vst [vmem:[#allocation2 + $0xe8] sm:$0x1] %v1038_v27  ;;  %v658_v31 = vshll.u32 %v3952_v8, 16  ;;  %v663_v32 = vshrl.u32 %v3953_v15, 16  ;;  %v666_v46 = vshll.u32 %v3953_v15, 16  ;;  %v1351_v37 = vshll.u32 %v4791_v24, 16  ;;  %4649 = vmatpush3.bf16.msra.mxu0 %v4814_v57 }
  0x42   : > { %v5204_v30 = vsel %vm1318_vm7, %v1469_v10, %v1473_v59  ;;  %v956_v29 = vld [vmem:[#allocation2 + $0x30] sm:$0xf]  ;;  %v1344_v5 = vshrl.u32 %v5197_v23, 16  ;;  %v1346_v36 = vshll.u32 %v5197_v23, 16  ;;  %v657_v38 = vrot.slane %v655_v28, 7  ;;  %v4795_v56 = vld [vmem:[%s6593_s1 + $0x160] sm:$0xff]  }
  0x43   : > { %1875 = vmatmul.mubr.bf16.vlgmr.msra.gmra.mxu1 %v5204_v30  ;;  %v960_v40 = vld [vmem:[#allocation2 + $0x38] sm:$0x1]  ;;  %v665_v41 = vrot.slane %v663_v32, 7  ;;  %v483_v44 = vsel %vm5020_vm3, 0, %v482_v9  ;;  %v1353_v47 = vrot.slane %v1351_v37, 1  ;;  %v376_v53 = vadd.f32 %v5016_v19, %v337_v18 }
  0x44   : > { %4595 = vmatpush3.bf16.msra.mxu1 %v5065_v2  ;;  %v1348_v45 = vrot.slane %v1346_v36, 1  ;;  %v660_v50 = vor.u32 %v658_v31, %v657_v38  ;;  %v661_v51 = vrot.slane %v657_v38, 4  ;;  %484 = vst [vmem:[#allocation2 + $0xf0] sm:$0x1] %v483_v44  ;;  %v407_v0 = vmax.f32 %v375_v42, 0.0  ;;  %v5231_v7 = vld [vmem:[%s4993_s16 + $0x78] sm:$0xff]  }
  0x45   : > { %4596 = vmatprep.subr.bf16.mxu1 %v4789_v62  ;;  %v668_v2 = vor.u32 %v666_v46, %v665_v41  ;;  %v670_v52 = vrot.slane %v665_v41, 4  ;;  %v533_v58 = vsel %vm5030_vm4, 0, %v532_v33  ;;  %v4026_v59 = vunpack.c.l.bf16 %v4158_v35  ;;  %v499_v60 = vld [vmem:[#allocation2 + $0x48] sm:$0x1]  ;;  %v4823_v14 = vld [vmem:[%s6593_s1 + $0x98] sm:$0xff]  }
  0x46   : > { %v1349_v54 = vor.u32 %v1348_v45, %v1344_v5  ;;  %v1082_v55 = vld [vmem:[#allocation2 + $0xe0] sm:$0xf]  ;;  %v957_v57 = vsel %vm5082_vm9, %v660_v50, %v956_v29  ;;  %v408_v1 = vmax.f32 %v376_v53, 0.0  ;;  %534 = vst [vmem:[#allocation2 + $0xf8] sm:$0x1] %v533_v58  ;;  %v3976_v4 = vpack.c.bf16 %v407_v0, %v407_v0  ;;  %4650 = vmatprep.subr.bf16.mxu0 %v4823_v14  ;;  %v4801_v38 = vld [vmem:[%s6593_s1 + $0x158] sm:$0xff]  }
  0x47   : > { %v669_v61 = vsel %vm5074_vm8, %v661_v51, %v668_v2  ;;  %958 = vst [vmem:[#allocation2 + $0x30] sm:$0xf] %v957_v57  ;;  %v961_v63 = vsel %vm5020_vm3, %v670_v52, %v960_v40  ;;  %v1083_v9 = vld [vmem:[#allocation2 + $0xe4] sm:$0xf]  ;;  %v314_v10 = vmul.f32 %v4026_v59, %v5005_v13  ;;  %v450_v11 = vsel %vm5020_vm3, 0, %v449_v21  ;;  %4651 = vmatpush3.bf16.msra.mxu0 %v4823_v14  ;;  %v4802_v21 = vld [vmem:[%s6593_s1 + $0x150] sm:$0xff]  }
  0x48   : > { %4597 = vmatpush3.bf16.msra.mxu1 %v4789_v62  ;;  %v5234_v8 = vsel %vm1318_vm7, %v1349_v54, %v1353_v47  ;;  %959 = vst [vmem:[#allocation2 + $0x34] sm:$0xf] %v669_v61  ;;  %962 = vst [vmem:[#allocation2 + $0x38] sm:$0x1] %v961_v63  ;;  %v4027_v62 = vunpack.c.h.bf16 %v4158_v35  ;;  %v5243_v15 = vcombine.low %v1082_v55, %v1083_v9  ;;  %v859_v24 = vshrl.u32 %v3976_v4, 16  ;;  %v4830_v57 = vld [vmem:[%s6593_s1 + $0x90] sm:$0xff]  }
  0x49   : > { %4598 = vmatprep.subr.bf16.mxu1 %v4794_v49  ;;  %1786 = vmatprep.mubr.bf16.mxu0 %v5234_v8  ;;  %v4793_v16 = vld [vmem:[#allocation2 + $0xe8] ss:$0 sps:$4 sm:$0x11]   ;;  %v3977_v17 = vpack.c.bf16 %v408_v1, %v408_v1  ;;  %v862_v26 = vshll.u32 %v3976_v4, 16  ;;  %451 = vst [vmem:[#allocation2 + $0x40] sm:$0x1] %v450_v11  ;;  %v353_v28 = vadd.f32 %v5016_v19, %v314_v10  ;;  %v4074_v32 = vunpack.c.l.bf16 %v5231_v7 }
  0x4a   : > { %1787 = vmatmul.mubr.bf16.gmra.mxu0 %v5144_v3  ;;  %v315_v27 = vmul.f32 %v4027_v62, %v5005_v13  ;;  %v500_v31 = vsel %vm5030_vm4, 0, %v499_v60  ;;  %v1488_v46 = vshrl.u32 %v5243_v15, 16  ;;  %v1490_v29 = vshll.u32 %v5243_v15, 16  ;;  %v485_v5 = vld [vmem:[#allocation2 + $0x100] sm:$0x1]  ;;  %4652 = vmatprep.subr.bf16.mxu0 %v4830_v57 }
  0x4b   : > { %v1495_v33 = vshll.u32 %v4793_v16, 16  ;;  %v861_v35 = vrot.slane %v859_v24, 7  ;;  %501 = vst [vmem:[#allocation2 + $0x48] sm:$0x1] %v500_v31  ;;  %v867_v3 = vshrl.u32 %v3977_v17, 16  ;;  %v870_v36 = vshll.u32 %v3977_v17, 16  ;;  %4653 = vmatpush3.bf16.msra.mxu0 %v4830_v57 }
  0x4c   : > { %4599 = vmatpush3.bf16.msra.mxu1 %v4794_v49  ;;  %v1040_v37 = vld [vmem:[#allocation2 + $0xf0] sm:$0xf]  ;;  %v354_v40 = vadd.f32 %v5016_v19, %v315_v27  ;;  %v385_v41 = vmax.f32 %v353_v28, 0.0  ;;  %v1492_v18 = vrot.slane %v1490_v29, 1  ;;  %v4075_v2 = vunpack.c.h.bf16 %v5231_v7  ;;  %v535_v1 = vld [vmem:[#allocation2 + $0x108] sm:$0x1] }
  0x4d   : > { %4600 = vmatprep.subr.bf16.mxu1 %v4795_v56  ;;  %v1497_v42 = vrot.slane %v1495_v33, 1  ;;  %v864_v44 = vor.u32 %v862_v26, %v861_v35  ;;  %v865_v45 = vrot.slane %v861_v35, 4  ;;  %v869_v49 = vrot.slane %v867_v3, 7  ;;  %v1044_v61 = vld [vmem:[#allocation2 + $0xf8] sm:$0x1]  ;;  %v4159_v31 = vld [vmem:[%s4993_s16 + $0x20] sm:$0xff]  }
  0x4e   : > { %v1060_v47 = vld [vmem:[#allocation2 + $0x30] sm:$0xf]  ;;  %v386_v50 = vmax.f32 %v354_v40, 0.0  ;;  %v3954_v51 = vpack.c.bf16 %v385_v41, %v385_v41  ;;  %v1493_v52 = vor.u32 %v1492_v18, %v1488_v46  ;;  %v338_v54 = vmul.f32 %v4074_v32, %v5005_v13  ;;  %v4809_v57 = vld [vmem:[%s6593_s1 + $0x140] sm:$0xff]  }
  0x4f   : > { %v1061_v53 = vld [vmem:[#allocation2 + $0x34] sm:$0xf]  ;;  %v1041_v0 = vsel %vm5082_vm9, %v864_v44, %v1040_v37  ;;  %v486_v55 = vsel %vm5020_vm3, 0, %v485_v5  ;;  %v872_v59 = vor.u32 %v870_v36, %v869_v49  ;;  %v874_v60 = vrot.slane %v869_v49, 4  ;;  %v4807_v37 = vld [vmem:[%s6593_s1 + $0x148] sm:$0xff]  }
  0x50   : > { %4601 = vmatpush3.bf16.msra.mxu1 %v4795_v56  ;;  %v5269_v58 = vcombine.low %v1060_v47, %v1061_v53  ;;  %v4798_v56 = vld [vmem:[#allocation2 + $0x38] ss:$0 sps:$4 sm:$0x11]   ;;  %1042 = vst [vmem:[#allocation2 + $0xf0] sm:$0xf] %v1041_v0  ;;  %v3955_v63 = vpack.c.bf16 %v386_v50, %v386_v50  ;;  %v5272_v4 = vsel %vm1318_vm7, %v1493_v52, %v1497_v42  ;;  %v672_v7 = vshrl.u32 %v3954_v51, 16 }
  0x51   : > { %4602 = vmatprep.subr.bf16.mxu1 %v4801_v38  ;;  %487 = vst [vmem:[#allocation2 + $0x100] sm:$0x1] %v486_v55  ;;  %v675_v9 = vshll.u32 %v3954_v51, 16  ;;  %v339_v62 = vmul.f32 %v4075_v2, %v5005_v13  ;;  %1882 = vmatprep.mubr.bf16.mxu1 %v5272_v4  ;;  %v1363_v14 = vshll.u32 %v4798_v56, 16  ;;  %v873_v16 = vsel %vm5074_vm8, %v865_v45, %v872_v59  ;;  %v963_v17 = vld [vmem:[#allocation2 + $0x40] sm:$0xf] }
  0x52   : > { %v1356_v10 = vshrl.u32 %v5269_v58, 16  ;;  %v1358_v11 = vshll.u32 %v5269_v58, 16  ;;  %1883 = vmatmul.mubr.bf16.gmra.mxu1 %v5167_v34  ;;  %1043 = vst [vmem:[#allocation2 + $0xf4] sm:$0xf] %v873_v16  ;;  %v1045_v24 = vsel %vm5020_vm3, %v874_v60, %v1044_v61  ;;  %v674_v26 = vrot.slane %v672_v7, 7  ;;  %v4160_v59 = vld [vmem:[%s4993_s16 + $0x28] sm:$0xff]  }
  0x53   : > { %v680_v27 = vshrl.u32 %v3955_v63, 16  ;;  %v683_v28 = vshll.u32 %v3955_v63, 16  ;;  %v1365_v46 = vrot.slane %v1363_v14, 1  ;;  %1046 = vst [vmem:[#allocation2 + $0xf8] sm:$0x1] %v1045_v24  ;;  %v377_v29 = vadd.f32 %v5016_v19, %v338_v54 }
  0x54   : > { %v1360_v32 = vrot.slane %v1358_v11, 1  ;;  %4603 = vmatpush3.bf16.msra.mxu1 %v4801_v38  ;;  %v378_v33 = vadd.f32 %v5016_v19, %v339_v62  ;;  %v677_v35 = vor.u32 %v675_v9, %v674_v26  ;;  %v678_v5 = vrot.slane %v674_v26, 4  ;;  %v967_v41 = vld [vmem:[#allocation2 + $0x48] sm:$0x1]  ;;  %v452_v44 = vld [vmem:[#allocation2 + $0x50] sm:$0x1] }
  0x55   : > { %4604 = vmatprep.subr.bf16.mxu1 %v4802_v21  ;;  %v682_v3 = vrot.slane %v680_v27, 7  ;;  %v536_v36 = vsel %vm5030_vm4, 0, %v535_v1  ;;  %v409_v18 = vmax.f32 %v377_v29, 0.0  ;;  %v4030_v38 = vunpack.c.l.bf16 %v4159_v31  ;;  %v502_v50 = vld [vmem:[#allocation2 + $0x58] sm:$0x1] }
  0x56   : > { %v1361_v40 = vor.u32 %v1360_v32, %v1356_v10  ;;  %v410_v42 = vmax.f32 %v378_v33, 0.0  ;;  %537 = vst [vmem:[#allocation2 + $0x108] sm:$0x1] %v536_v36  ;;  %v964_v47 = vsel %vm5082_vm9, %v677_v35, %v963_v17  ;;  %v4031_v49 = vunpack.c.h.bf16 %v4159_v31  ;;  %v4812_v17 = vld [vmem:[%s6593_s1 + $0x78] sm:$0xff]  }
  0x57   : > { %v685_v45 = vor.u32 %v683_v28, %v682_v3  ;;  %v687_v19 = vrot.slane %v682_v3, 4  ;;  %v1084_v2 = vld [vmem:[#allocation2 + $0xf0] sm:$0xf]  ;;  %965 = vst [vmem:[#allocation2 + $0x40] sm:$0xf] %v964_v47  ;;  %v3978_v52 = vpack.c.bf16 %v409_v18, %v409_v18  ;;  %v316_v0 = vmul.f32 %v4030_v38, %v5005_v13 }
  0x58   : > { %v5294_v51 = vsel %vm1318_vm7, %v1361_v40, %v1365_v46  ;;  %4605 = vmatpush3.bf16.msra.mxu1 %v4802_v21  ;;  %v3979_v53 = vpack.c.bf16 %v410_v42, %v410_v42  ;;  %v317_v21 = vmul.f32 %v4031_v49, %v5005_v13  ;;  %v453_v56 = vsel %vm5020_vm3, 0, %v452_v44  ;;  %v1047_v10 = vld [vmem:[#allocation2 + $0x100] sm:$0xf] }
  0x59   : > { %1794 = vmatprep.mubr.bf16.mxu0 %v5294_v51  ;;  %v686_v54 = vsel %vm5074_vm8, %v678_v5, %v685_v45  ;;  %v968_v55 = vsel %vm5020_vm3, %v687_v19, %v967_v41  ;;  %4606 = vmatprep.subr.bf16.mxu1 %v4807_v37  ;;  %v1085_v60 = vld [vmem:[#allocation2 + $0xf4] sm:$0xf]  ;;  %v876_v61 = vshrl.u32 %v3978_v52, 16  ;;  %v879_v63 = vshll.u32 %v3978_v52, 16  ;;  %454 = vst [vmem:[#allocation2 + $0x50] sm:$0x1] %v453_v56 }
  0x5a   : > { %1795 = vmatmul.mubr.bf16.gmra.mxu0 %v5234_v8  ;;  %966 = vst [vmem:[#allocation2 + $0x44] sm:$0xf] %v686_v54  ;;  %969 = vst [vmem:[#allocation2 + $0x48] sm:$0x1] %v968_v55  ;;  %v884_v1 = vshrl.u32 %v3979_v53, 16  ;;  %v887_v7 = vshll.u32 %v3979_v53, 16  ;;  %v5310_v9 = vcombine.low %v1084_v2, %v1085_v60  ;;  %v4034_v27 = vunpack.c.l.bf16 %v4160_v59 }
  0x5b   : > { %v4800_v62 = vld [vmem:[#allocation2 + $0xf8] ss:$0 sps:$4 sm:$0x11]   ;;  %v5315_v13 = vld [vmem:[%s6595_s3] ss:$0 sm:$0xff]  ;;  %v503_v16 = vsel %vm5030_vm4, 0, %v502_v50  ;;  %v4035_v28 = vunpack.c.h.bf16 %v4160_v59 }
  0x5c   : > { %v355_v11 = vadd.f32 %v5315_v13, %v316_v0  ;;  %v356_v14 = vadd.f32 %v5315_v13, %v317_v21  ;;  %v878_v24 = vrot.slane %v876_v61, 7  ;;  %v886_v26 = vrot.slane %v884_v1, 7  ;;  %4607 = vmatpush3.bf16.msra.mxu1 %v4807_v37  ;;  %504 = vst [vmem:[#allocation2 + $0x58] sm:$0x1] %v503_v16  ;;  %v455_v40 = vld [vmem:[#allocation2 + $0x60] sm:$0x1] }
  0x5d   : > { %v1500_v31 = vshrl.u32 %v5310_v9, 16  ;;  %v1502_v32 = vshll.u32 %v5310_v9, 16  ;;  %v1507_v46 = vshll.u32 %v4800_v62, 16  ;;  %v1051_v29 = vld [vmem:[#allocation2 + $0x108] sm:$0x1]  ;;  %4608 = vmatprep.subr.bf16.mxu1 %v4809_v57  ;;  %v456_v56 = vsel %vm5020_vm3, 0, %v455_v40 }
  0x5e   : > { %v387_v33 = vmax.f32 %v355_v11, 0.0  ;;  %v881_v35 = vor.u32 %v879_v63, %v878_v24  ;;  %v882_v5 = vrot.slane %v878_v24, 4  ;;  %v889_v3 = vor.u32 %v887_v7, %v886_v26  ;;  %v1062_v42 = vld [vmem:[#allocation2 + $0x40] sm:$0xf]  ;;  %457 = vst [vmem:[#allocation2 + $0x60] sm:$0x1] %v456_v56 }
  0x5f   : > { %v891_v36 = vrot.slane %v886_v26, 4  ;;  %v1504_v41 = vrot.slane %v1502_v32, 1  ;;  %v1509_v18 = vrot.slane %v1507_v46, 1  ;;  %v388_v37 = vmax.f32 %v356_v14, 0.0  ;;  %v5335_v47 = vld [vmem:[%s6594_s2] ss:$0 sm:$0xff] }
  0x60   : > { %v3956_v38 = vpack.c.bf16 %v387_v33, %v387_v33  ;;  %v890_v44 = vsel %vm5074_vm8, %v882_v5, %v889_v3  ;;  %v1048_v45 = vsel %vm5082_vm9, %v881_v35, %v1047_v10  ;;  %4609 = vmatpush3.bf16.msra.mxu1 %v4809_v57  ;;  %v318_v49 = vmul.f32 %v5335_v47, %v4034_v27  ;;  %v505_v1 = vld [vmem:[#allocation2 + $0x68] sm:$0x1]  ;;  %v970_v14 = vld [vmem:[#allocation2 + $0x50] sm:$0xf]  ;;  %v508_v56 = vld [vmem:[#allocation2 + $0x78] sm:$0x1] }
  0x61   : > { %v1052_v19 = vsel %vm5020_vm3, %v891_v36, %v1051_v29  ;;  %v1505_v50 = vor.u32 %v1504_v41, %v1500_v31  ;;  %v1063_v2 = vld [vmem:[#allocation2 + $0x44] sm:$0xf]  ;;  %1049 = vst [vmem:[#allocation2 + $0x100] sm:$0xf] %v1048_v45  ;;  %1050 = vst [vmem:[#allocation2 + $0x104] sm:$0xf] %v890_v44  ;;  %v3957_v52 = vpack.c.bf16 %v388_v37, %v388_v37  ;;  %4322 = vmatprep.subr.bf16.mxu1 %v4812_v17 }
  0x62   : > { %1053 = vst [vmem:[#allocation2 + $0x108] sm:$0x1] %v1052_v19  ;;  %v689_v53 = vshrl.u32 %v3956_v38, 16  ;;  %v692_v0 = vshll.u32 %v3956_v38, 16  ;;  %v5338_v54 = vcombine.low %v1062_v42, %v1063_v2  ;;  %v319_v57 = vmul.f32 %v5335_v47, %v4035_v28  ;;  %v4839_v7 = vld [vmem:[%s6593_s1 + $0x88] sm:$0xff]   ;;  %v4161_v31 = vld [vmem:[%s4993_s16 + $0x30] sm:$0xff]  }
  0x63   : > { %v4804_v55 = vld [vmem:[#allocation2 + $0x48] ss:$0 sps:$4 sm:$0x11]   ;;  %v357_v21 = vadd.f32 %v5315_v13, %v318_v49  ;;  %v5345_v59 = vsel %vm1318_vm7, %v1505_v50, %v1509_v18  ;;  %v697_v61 = vshrl.u32 %v3957_v52, 16  ;;  %v700_v63 = vshll.u32 %v3957_v52, 16  ;;  %4654 = vmatprep.subr.bf16.mxu0 %v4839_v7  ;;  %v4842_v41 = vld [vmem:[%s6593_s1 + $0x80] sm:$0xff]  }
  0x64   : > { %v691_v60 = vrot.slane %v689_v53, 7  ;;  %1890 = vmatprep.mubr.bf16.mxu1 %v5345_v59  ;;  %v1368_v62 = vshrl.u32 %v5338_v54, 16  ;;  %v1370_v10 = vshll.u32 %v5338_v54, 16  ;;  %v1375_v11 = vshll.u32 %v4804_v55, 16  ;;  %v974_v27 = vld [vmem:[#allocation2 + $0x58] sm:$0x1]  ;;  %4655 = vmatpush3.bf16.msra.mxu0 %v4839_v7 }
  0x65   : > { %v358_v16 = vadd.f32 %v5315_v13, %v319_v57  ;;  %1891 = vmatmul.mubr.bf16.gmra.mxu1 %v5272_v4  ;;  %v699_v26 = vrot.slane %v697_v61, 7  ;;  %v389_v28 = vmax.f32 %v357_v21, 0.0  ;;  %v506_v33 = vsel %vm5030_vm4, 0, %v505_v1  ;;  %v458_v40 = vld [vmem:[#allocation2 + $0x70] sm:$0x1]  ;;  %4656 = vmatprep.subr.bf16.mxu0 %v4842_v41 }
  0x66   : > { %v694_v17 = vor.u32 %v692_v0, %v691_v60  ;;  %v695_v24 = vrot.slane %v691_v60, 4  ;;  %v1372_v32 = vrot.slane %v1370_v10, 1  ;;  %v1377_v46 = vrot.slane %v1375_v11, 1  ;;  %507 = vst [vmem:[#allocation2 + $0x68] sm:$0x1] %v506_v33  ;;  %v4162_v60 = vld [vmem:[%s4993_s16 + $0x38] sm:$0xff]  }
  0x67   : > { %v390_v29 = vmax.f32 %v358_v16, 0.0  ;;  %v702_v35 = vor.u32 %v700_v63, %v699_v26  ;;  %v704_v5 = vrot.slane %v699_v26, 4  ;;  %v3958_v36 = vpack.c.bf16 %v389_v28, %v389_v28  ;;  %v977_v21 = vld [vmem:[#allocation2 + $0x60] sm:$0xf]  ;;  %v511_v28 = vld [vmem:[#allocation2 + $0x88] sm:$0x1] }
  0x68   : > { %v971_v3 = vsel %vm5082_vm9, %v694_v17, %v970_v14  ;;  %v1373_v18 = vor.u32 %v1372_v32, %v1368_v62  ;;  %v1086_v42 = vld [vmem:[#allocation2 + $0x100] sm:$0xf]  ;;  %v1087_v37 = vld [vmem:[#allocation2 + $0x104] sm:$0xf]  ;;  %v4038_v44 = vunpack.c.l.bf16 %v4161_v31  ;;  %v4039_v45 = vunpack.c.h.bf16 %v4161_v31  ;;  %4657 = vmatpush3.bf16.msra.mxu0 %v4842_v41 }
  0x69   : > { %972 = vst [vmem:[#allocation2 + $0x50] sm:$0xf] %v971_v3  ;;  %v3959_v38 = vpack.c.bf16 %v390_v29, %v390_v29  ;;  %v5363_v19 = vcombine.low %v1086_v42, %v1087_v37  ;;  %v4806_v49 = vld [vmem:[#allocation2 + $0x108] ss:$0 sps:$4 sm:$0x11]   ;;  %v703_v50 = vsel %vm5074_vm8, %v695_v24, %v702_v35  ;;  %v975_v2 = vsel %vm5020_vm3, %v704_v5, %v974_v27  ;;  %v4163_v35 = vld [vmem:[%s4993_s16 + $0x40] sm:$0xff]  }
  0x6a   : > { %v706_v52 = vshrl.u32 %v3958_v36, 16  ;;  %v5370_v53 = vsel %vm1318_vm7, %v1373_v18, %v1377_v46  ;;  %973 = vst [vmem:[#allocation2 + $0x54] sm:$0xf] %v703_v50  ;;  %976 = vst [vmem:[#allocation2 + $0x58] sm:$0x1] %v975_v2  ;;  %v709_v0 = vshll.u32 %v3958_v36, 16  ;;  %v320_v10 = vmul.f32 %v5335_v47, %v4038_v44 }
  0x6b   : > { %v714_v55 = vshrl.u32 %v3959_v38, 16  ;;  %v717_v57 = vshll.u32 %v3959_v38, 16  ;;  %1802 = vmatprep.mubr.bf16.mxu0 %v5370_v53  ;;  %v1512_v61 = vshrl.u32 %v5363_v19, 16  ;;  %v1514_v63 = vshll.u32 %v5363_v19, 16  ;;  %v461_v16 = vld [vmem:[#allocation2 + $0x80] sm:$0x1] }
  0x6c   : > { %v1519_v1 = vshll.u32 %v4806_v49, 16  ;;  %v708_v7 = vrot.slane %v706_v52, 7  ;;  %1803 = vmatmul.mubr.bf16.gmra.mxu0 %v5294_v51  ;;  %v321_v11 = vmul.f32 %v5335_v47, %v4039_v45  ;;  %v459_v14 = vsel %vm5020_vm3, 0, %v458_v40  ;;  %v4848_v18 = vld [vmem:[%s6593_s1 + $0x1f8] sm:$0xff]  }
  0x6d   : > { %v716_v62 = vrot.slane %v714_v55, 7  ;;  %v1516_v17 = vrot.slane %v1514_v63, 1  ;;  %460 = vst [vmem:[#allocation2 + $0x70] sm:$0x1] %v459_v14  ;;  %v981_v46 = vld [vmem:[#allocation2 + $0x68] sm:$0x1]  ;;  %v359_v29 = vadd.f32 %v5315_v13, %v320_v10  ;;  %v4042_v41 = vunpack.c.l.bf16 %v4162_v60  ;;  %4458 = vmatprep.subr.bf16.mxu0 %v4848_v18 }
  0x6e   : > { %v1521_v24 = vrot.slane %v1519_v1, 1  ;;  %v711_v26 = vor.u32 %v709_v0, %v708_v7  ;;  %v712_v27 = vrot.slane %v708_v7, 4  ;;  %v360_v33 = vadd.f32 %v5315_v13, %v321_v11 }
  0x6f   : > { %v719_v31 = vor.u32 %v717_v57, %v716_v62  ;;  %v721_v32 = vrot.slane %v716_v62, 4  ;;  %v1517_v5 = vor.u32 %v1516_v17, %v1512_v61  ;;  %v509_v40 = vsel %vm5030_vm4, 0, %v508_v56 }
  0x70   : > { %v1064_v3 = vld [vmem:[#allocation2 + $0x50] sm:$0xf]  ;;  %v978_v36 = vsel %vm5082_vm9, %v711_v26, %v977_v21  ;;  %v391_v38 = vmax.f32 %v359_v29, 0.0  ;;  %v392_v44 = vmax.f32 %v360_v33, 0.0  ;;  %510 = vst [vmem:[#allocation2 + $0x78] sm:$0x1] %v509_v40  ;;  %v4043_v50 = vunpack.c.h.bf16 %v4162_v60 }
  0x71   : > { %v720_v42 = vsel %vm5074_vm8, %v712_v27, %v719_v31  ;;  %979 = vst [vmem:[#allocation2 + $0x60] sm:$0xf] %v978_v36  ;;  %v982_v37 = vsel %vm5020_vm3, %v721_v32, %v981_v46  ;;  %v5396_v45 = vsel %vm1318_vm7, %v1517_v5, %v1521_v24  ;;  %v5398_v49 = vld [vmem:[#allocation2 + $0x54] sm:$0xf]  ;;  %v322_v2 = vmul.f32 %v5335_v47, %v4042_v41 }
  0x72   : > { %980 = vst [vmem:[#allocation2 + $0x64] sm:$0xf] %v720_v42  ;;  %983 = vst [vmem:[#allocation2 + $0x68] sm:$0x1] %v982_v37  ;;  %v462_v52 = vsel %vm5020_vm3, 0, %v461_v16  ;;  %1898 = vmatprep.mubr.bf16.mxu1 %v5396_v45  ;;  %v5405_v0 = vcombine.low %v1064_v3, %v5398_v49  ;;  %v3960_v57 = vpack.c.bf16 %v391_v38, %v391_v38  ;;  %v512_v56 = vsel %vm5030_vm4, 0, %v511_v28 }
  0x73   : > { %v5407_v55 = vld [vmem:[#allocation2 + $0x58] ss:$0 sps:$4 sm:$0x11]   ;;  %v3961_v21 = vpack.c.bf16 %v392_v44, %v392_v44  ;;  %463 = vst [vmem:[#allocation2 + $0x80] sm:$0x1] %v462_v52  ;;  %1899 = vmatmul.mubr.bf16.gmra.mxu1 %v5345_v59  ;;  %v323_v60 = vmul.f32 %v5335_v47, %v4043_v50  ;;  %v361_v61 = vadd.f32 %v5315_v13, %v322_v2  ;;  %v4046_v63 = vunpack.c.l.bf16 %v4163_v35  ;;  %v4817_v40 = vld [vmem:[%s6593_s1 + $0x70] sm:$0xff]  }
  0x74   : > { %513 = vst [vmem:[#allocation2 + $0x88] sm:$0x1] %v512_v56  ;;  %v4047_v1 = vunpack.c.h.bf16 %v4163_v35  ;;  %v1380_v7 = vshrl.u32 %v5405_v0, 16  ;;  %v1382_v62 = vshll.u32 %v5405_v0, 16  ;;  %v1387_v10 = vshll.u32 %v5407_v55, 16  ;;  %4610 = vmatprep.mubr.bf16.mxu1 %v5234_v8  ;;  %v4813_v28 = vld [vmem:[%s6593_s1 + $0x38] sm:$0xff]  }
  0x75   : > { %v723_v11 = vshrl.u32 %v3960_v57, 16  ;;  %v726_v14 = vshll.u32 %v3960_v57, 16  ;;  %v731_v16 = vshrl.u32 %v3961_v21, 16  ;;  %v734_v17 = vshll.u32 %v3961_v21, 16  ;;  %v984_v33 = vld [vmem:[#allocation2 + $0x70] sm:$0xf] }
  0x76   : > { %v362_v24 = vadd.f32 %v5315_v13, %v323_v60  ;;  %v1384_v26 = vrot.slane %v1382_v62, 1  ;;  %v1389_v27 = vrot.slane %v1387_v10, 1  ;;  %v393_v32 = vmax.f32 %v361_v61, 0.0  ;;  %v464_v57 = vld [vmem:[#allocation2 + $0x90] sm:$0x1] }
  0x77   : > { %v725_v31 = vrot.slane %v723_v11, 7  ;;  %v733_v29 = vrot.slane %v731_v16, 7  ;;  %v324_v8 = vmul.f32 %v5335_v47, %v4046_v63  ;;  %v325_v5 = vmul.f32 %v5335_v47, %v4047_v1  ;;  %v988_v2 = vld [vmem:[#allocation2 + $0x78] sm:$0x1]  ;;  %v4818_v56 = vld [vmem:[%s6593_s1 + $0x30] sm:$0xff]  }
  0x78   : > { %v1066_v46 = vld [vmem:[#allocation2 + $0x60] sm:$0xf]  ;;  %v394_v35 = vmax.f32 %v362_v24, 0.0  ;;  %v1385_v3 = vor.u32 %v1384_v26, %v1380_v7  ;;  %v3962_v42 = vpack.c.bf16 %v393_v32, %v393_v32  ;;  %v514_v1 = vld [vmem:[#allocation2 + $0x98] sm:$0x1] }
  0x79   : > { %v5424_v36 = vld [vmem:[#allocation2 + $0x64] sm:$0xf]  ;;  %v728_v41 = vor.u32 %v726_v14, %v725_v31  ;;  %v729_v18 = vrot.slane %v725_v31, 4  ;;  %v5432_v38 = vld [vmem:[#allocation2 + $0x68] ss:$0 sps:$4 sm:$0x11]   ;;  %v736_v44 = vor.u32 %v734_v17, %v733_v29 }
  0x7a   : > { %v5430_v37 = vcombine.low %v1066_v46, %v5424_v36  ;;  %v738_v50 = vrot.slane %v733_v29, 4  ;;  %v3963_v52 = vpack.c.bf16 %v394_v35, %v394_v35  ;;  %v5435_v21 = vsel %vm1318_vm7, %v1385_v3, %v1389_v27  ;;  %v4821_v14 = vld [vmem:[%s6593_s1 + $0x68] sm:$0xff]   ;;  %v991_v16 = vld [vmem:[#allocation2 + $0x80] sm:$0xf] }
  0x7b   : > { %v985_v60 = vsel %vm5082_vm9, %v728_v41, %v984_v33  ;;  %v740_v61 = vshrl.u32 %v3962_v42, 16  ;;  %v743_v63 = vshll.u32 %v3962_v42, 16  ;;  %1810 = vmatprep.mubr.bf16.mxu0 %v5435_v21  ;;  %4611 = vmatmul.mubr.bf16.vlgmr.msra.gmra.mxu1 %v5294_v51  ;;  %v1399_v10 = vshll.u32 %v5432_v38, 16  ;;  %v4164_v27 = vld [vmem:[%s4993_s16 + $0x48] sm:$0xff]  }
  0x7c   : > { %v1392_v7 = vshrl.u32 %v5430_v37, 16  ;;  %v1394_v62 = vshll.u32 %v5430_v37, 16  ;;  %v737_v11 = vsel %vm5074_vm8, %v729_v18, %v736_v44  ;;  %986 = vst [vmem:[#allocation2 + $0x70] sm:$0xf] %v985_v60  ;;  %1811 = vmatmul.mubr.bf16.gmra.mxu0 %v5370_v53  ;;  %4323 = vmatpush3.bf16.msra.mxu1 %v4813_v28  ;;  %v989_v51 = vsel %vm5020_vm3, %v738_v50, %v988_v2  ;;  %v995_v46 = vld [vmem:[#allocation2 + $0x88] sm:$0x1] }
  0x7d   : > { %987 = vst [vmem:[#allocation2 + $0x74] sm:$0xf] %v737_v11  ;;  %v742_v17 = vrot.slane %v740_v61, 7  ;;  %v748_v24 = vshrl.u32 %v3963_v52, 16  ;;  %v751_v26 = vshll.u32 %v3963_v52, 16  ;;  %v1401_v32 = vrot.slane %v1399_v10, 1  ;;  %4614 = vmatprep.mubr.bf16.mxu1 %v5370_v53  ;;  %4324 = vmatprep.subr.bf16.mxu1 %v4817_v40 }
  0x7e   : > { %v1396_v31 = vrot.slane %v1394_v62, 1  ;;  %990 = vst [vmem:[#allocation2 + $0x78] sm:$0x1] %v989_v51  ;;  %v363_v29 = vadd.f32 %v5315_v13, %v324_v8  ;;  %v364_v33 = vadd.f32 %v5315_v13, %v325_v5  ;;  %v467_v28 = vld [vmem:[#allocation2 + $0xa0] sm:$0x1]  ;;  %v465_v18 = vsel %vm5020_vm3, 0, %v464_v57 }
  0x7f   : > { %v745_v35 = vor.u32 %v743_v63, %v742_v17  ;;  %v746_v3 = vrot.slane %v742_v17, 4  ;;  %v750_v41 = vrot.slane %v748_v24, 7  ;;  %v4822_v44 = vld [vmem:[%s6593_s1 + $0x28] sm:$0xff]   ;;  %466 = vst [vmem:[#allocation2 + $0x90] sm:$0x1] %v465_v18  ;;  %v515_v8 = vsel %vm5030_vm4, 0, %v514_v1 }
  0x80   : > { %v1397_v42 = vor.u32 %v1396_v31, %v1392_v7  ;;  %v395_v53 = vmax.f32 %v363_v29, 0.0  ;;  %v396_v40 = vmax.f32 %v364_v33, 0.0  ;;  %v517_v50 = vld [vmem:[#allocation2 + $0xa8] sm:$0x1]  ;;  %4325 = vmatpush3.bf16.msra.mxu1 %v4818_v56  ;;  %v4826_v57 = vld [vmem:[%s6593_s1 + $0x60] sm:$0xff]   ;;  %v4050_v60 = vunpack.c.l.bf16 %v4164_v27  ;;  %v4165_v51 = vld [vmem:[%s4993_s16 + $0x50] sm:$0xff]  }
  0x81   : > { %v753_v5 = vor.u32 %v751_v26, %v750_v41  ;;  %v755_v2 = vrot.slane %v750_v41, 4  ;;  %v992_v52 = vsel %vm5082_vm9, %v745_v35, %v991_v16  ;;  %516 = vst [vmem:[#allocation2 + $0x98] sm:$0x1] %v515_v8  ;;  %4326 = vmatprep.subr.bf16.mxu1 %v4821_v14  ;;  %v4051_v56 = vunpack.c.h.bf16 %v4164_v27  ;;  %v4829_v31 = vld [vmem:[%s6593_s1 + $0x20] sm:$0xff]  }
  0x82   : > { %v5472_v61 = vsel %vm1318_vm7, %v1397_v42, %v1401_v32  ;;  %993 = vst [vmem:[#allocation2 + $0x80] sm:$0xf] %v992_v52  ;;  %v3964_v63 = vpack.c.bf16 %v395_v53, %v395_v53  ;;  %v3965_v1 = vpack.c.bf16 %v396_v40, %v396_v40  ;;  %v326_v11 = vmul.f32 %v5335_v47, %v4050_v60 }
  0x83   : > { %1818 = vmatprep.mubr.bf16.mxu0 %v5472_v61  ;;  %v1068_v7 = vld [vmem:[#allocation2 + $0x70] sm:$0xf]  ;;  %v754_v62 = vsel %vm5074_vm8, %v746_v3, %v753_v5  ;;  %v996_v10 = vsel %vm5020_vm3, %v755_v2, %v995_v46  ;;  %v468_v16 = vsel %vm5020_vm3, 0, %v467_v28  ;;  %4615 = vmatmul.mubr.bf16.gmra.mxu1 %v5435_v21  ;;  %v327_v29 = vmul.f32 %v5335_v47, %v4051_v56  ;;  %v520_v5 = vld [vmem:[#allocation2 + $0xb8] sm:$0x1] }
  0x84   : > { %v5484_v14 = vld [vmem:[#allocation2 + $0x74] sm:$0xf]  ;;  %994 = vst [vmem:[#allocation2 + $0x84] sm:$0xf] %v754_v62  ;;  %997 = vst [vmem:[#allocation2 + $0x88] sm:$0x1] %v996_v10  ;;  %1819 = vmatmul.mubr.bf16.gmra.mxu0 %v5435_v21  ;;  %4618 = vmatprep.mubr.bf16.mxu1 %v5472_v61  ;;  %v365_v33 = vadd.f32 %v5315_v13, %v326_v11  ;;  %v4054_v41 = vunpack.c.l.bf16 %v4165_v51  ;;  %v4055_v21 = vunpack.c.h.bf16 %v4165_v51 }
  0x85   : > { %v757_v17 = vshrl.u32 %v3964_v63, 16  ;;  %v760_v24 = vshll.u32 %v3964_v63, 16  ;;  %v765_v26 = vshrl.u32 %v3965_v1, 16  ;;  %v768_v27 = vshll.u32 %v3965_v1, 16  ;;  %469 = vst [vmem:[#allocation2 + $0xa0] sm:$0x1] %v468_v16  ;;  %4327 = vmatpush3.bf16.msra.mxu1 %v4822_v44 }
  0x86   : > { %v5491_v32 = vcombine.low %v1068_v7, %v5484_v14  ;;  %v5493_v46 = vld [vmem:[#allocation2 + $0x78] ss:$0 sps:$4 sm:$0x11]   ;;  %v518_v28 = vsel %vm5030_vm4, 0, %v517_v50  ;;  %4328 = vmatprep.subr.bf16.mxu1 %v4826_v57  ;;  %v998_v40 = vld [vmem:[#allocation2 + $0x90] sm:$0xf]  ;;  %v366_v8 = vadd.f32 %v5315_v13, %v327_v29 }
  0x87   : > { %v759_v35 = vrot.slane %v757_v17, 7  ;;  %v767_v3 = vrot.slane %v765_v26, 7  ;;  %519 = vst [vmem:[#allocation2 + $0xa8] sm:$0x1] %v518_v28  ;;  %v1411_v53 = vshll.u32 %v5493_v46, 16  ;;  %v4833_v50 = vld [vmem:[%s6593_s1 + $0x58] sm:$0xff]   ;;  %v328_v17 = vmul.f32 %v5335_v47, %v4054_v41 }
  0x88   : > { %v1404_v18 = vshrl.u32 %v5491_v32, 16  ;;  %v1406_v42 = vshll.u32 %v5491_v32, 16  ;;  %v470_v44 = vld [vmem:[#allocation2 + $0xb0] sm:$0x1]  ;;  %v1002_v1 = vld [vmem:[#allocation2 + $0x98] sm:$0x1] }
  0x89   : > { %v762_v2 = vor.u32 %v760_v24, %v759_v35  ;;  %v763_v52 = vrot.slane %v759_v35, 4  ;;  %v770_v60 = vor.u32 %v768_v27, %v767_v3  ;;  %v772_v63 = vrot.slane %v767_v3, 4  ;;  %v1070_v62 = vld [vmem:[#allocation2 + $0x80] sm:$0xf]  ;;  %4329 = vmatpush3.bf16.msra.mxu1 %v4829_v31  ;;  %v4836_v28 = vld [vmem:[%s6593_s1 + $0x18] sm:$0xff]  }
  0x8a   : > { %v1408_v56 = vrot.slane %v1406_v42, 1  ;;  %v1413_v7 = vrot.slane %v1411_v53, 1  ;;  %v397_v10 = vmax.f32 %v365_v33, 0.0  ;;  %v398_v11 = vmax.f32 %v366_v8, 0.0  ;;  %4330 = vmatprep.subr.bf16.mxu1 %v4833_v50  ;;  %v4838_v8 = vld [vmem:[%s6593_s1 + $0x10] sm:$0xff]  }
  0x8b   : > { %v771_v57 = vsel %vm5074_vm8, %v763_v52, %v770_v60  ;;  %v999_v16 = vsel %vm5082_vm9, %v762_v2, %v998_v40  ;;  %v1003_v51 = vsel %vm5020_vm3, %v772_v63, %v1002_v1  ;;  %v5514_v26 = vld [vmem:[#allocation2 + $0x84] sm:$0xf]  ;;  %v329_v33 = vmul.f32 %v5335_v47, %v4055_v21  ;;  %v5523_v31 = vld [vmem:[#allocation2 + $0x88] ss:$0 sps:$4 sm:$0x11]   ;;  %v4837_v47 = vld [vmem:[%s6593_s1 + $0x50] sm:$0xff]  }
  0x8c   : > { %v1409_v24 = vor.u32 %v1408_v56, %v1404_v18  ;;  %1000 = vst [vmem:[#allocation2 + $0x90] sm:$0xf] %v999_v16  ;;  %1001 = vst [vmem:[#allocation2 + $0x94] sm:$0xf] %v771_v57  ;;  %v3966_v27 = vpack.c.bf16 %v397_v10, %v397_v10  ;;  %v3967_v29 = vpack.c.bf16 %v398_v11, %v398_v11  ;;  %v471_v41 = vsel %vm5020_vm3, 0, %v470_v44  ;;  %v4840_v1 = vld [vmem:[%s6593_s1 + $0x48] sm:$0xff]  }
  0x8d   : > { %1004 = vst [vmem:[#allocation2 + $0x98] sm:$0x1] %v1003_v51  ;;  %v5521_v35 = vcombine.low %v1070_v62, %v5514_v26  ;;  %v367_v3 = vadd.f32 %v5315_v13, %v328_v17  ;;  %v521_v18 = vsel %vm5030_vm4, 0, %v520_v5  ;;  %472 = vst [vmem:[#allocation2 + $0xb0] sm:$0x1] %v471_v41  ;;  %v1423_v44 = vshll.u32 %v5523_v31, 16  ;;  %4331 = vmatpush3.bf16.msra.mxu1 %v4836_v28 }
  0x8e   : > { %v1414_v21 = vsel %vm1318_vm7, %v1409_v24, %v1413_v7  ;;  %v774_v42 = vshrl.u32 %v3966_v27, 16  ;;  %v777_v53 = vshll.u32 %v3966_v27, 16  ;;  %v782_v40 = vshrl.u32 %v3967_v29, 16  ;;  %522 = vst [vmem:[#allocation2 + $0xb8] sm:$0x1] %v521_v18  ;;  %4332 = vmatprep.subr.bf16.mxu1 %v4837_v47  ;;  %v4841_v41 = vld [vmem:[%s6593_s1 + $0x8] sm:$0xff]  }
  0x8f   : > { %1826 = vmatprep.mubr.bf16.mxu0 %v1414_v21  ;;  %4619 = vmatmul.mubr.bf16.gmra.mxu1 %v1414_v21  ;;  %v1416_v25 = vshrl.u32 %v5521_v35, 16  ;;  %v1418_v50 = vshll.u32 %v5521_v35, 16  ;;  %v785_v5 = vshll.u32 %v3967_v29, 16  ;;  %v1005_v2 = vld [vmem:[#allocation2 + $0xa0] sm:$0xf]  ;;  %v399_v63 = vmax.f32 %v367_v3, 0.0 }
  0x90   : > { %1827 = vmatmul.mubr.bf16.gmra.mxu0 %v5472_v61  ;;  %v776_v52 = vrot.slane %v774_v42, 7  ;;  %v784_v60 = vrot.slane %v782_v40, 7  ;;  %v1425_v7 = vrot.slane %v1423_v44, 1  ;;  %v1009_v62 = vld [vmem:[#allocation2 + $0xa8] sm:$0x1]  ;;  %v368_v10 = vadd.f32 %v5315_v13, %v329_v33  ;;  %v4843_v40 = vld [vmem:[%s6593_s1 + $0x40] sm:$0xff]  }
  0x91   : > { %v1420_v56 = vrot.slane %v1418_v50, 1  ;;  %v3968_v27 = vpack.c.bf16 %v399_v63, %v399_v63  ;;  %4333 = vmatpush3.bf16.msra.mxu1 %v4838_v8 }
  0x92   : > { %v779_v11 = vor.u32 %v777_v53, %v776_v52  ;;  %v780_v57 = vrot.slane %v776_v52, 4  ;;  %v787_v16 = vor.u32 %v785_v5, %v784_v60  ;;  %v789_v51 = vrot.slane %v784_v60, 4  ;;  %4334 = vmatprep.subr.bf16.mxu1 %v4840_v1  ;;  %v4846_v52 = vld [vmem:[%s6593_s1] sm:$0xff]  }
  0x93   : > { %v1421_v17 = vor.u32 %v1420_v56, %v1416_v25  ;;  %v1072_v61 = vld [vmem:[#allocation2 + $0x90] sm:$0xf]  ;;  %v5545_v24 = vld [vmem:[#allocation2 + $0x94] sm:$0xf]  ;;  %v400_v47 = vmax.f32 %v368_v10, 0.0  ;;  %v791_v42 = vshrl.u32 %v3968_v27, 16 }
  0x94   : > { %v5548_v29 = vcombine.low %v1072_v61, %v5545_v24  ;;  %v5550_v28 = vld [vmem:[#allocation2 + $0x98] ss:$0 sps:$4 sm:$0x11]   ;;  %v788_v3 = vsel %vm5074_vm8, %v780_v57, %v787_v16  ;;  %v1006_v13 = vsel %vm5082_vm9, %v779_v11, %v1005_v2  ;;  %v1010_v33 = vsel %vm5020_vm3, %v789_v51, %v1009_v62  ;;  %v1012_v2 = vld [vmem:[#allocation2 + $0xb0] sm:$0xf] }
  0x95   : > { %v1426_v18 = vsel %vm1318_vm7, %v1421_v17, %v1425_v7  ;;  %1007 = vst [vmem:[#allocation2 + $0xa0] sm:$0xf] %v1006_v13  ;;  %1008 = vst [vmem:[#allocation2 + $0xa4] sm:$0xf] %v788_v3  ;;  %v794_v53 = vshll.u32 %v3968_v27, 16  ;;  %v1435_v50 = vshll.u32 %v5550_v28, 16  ;;  %v3969_v44 = vpack.c.bf16 %v400_v47, %v400_v47  ;;  %4335 = vmatpush3.bf16.msra.mxu1 %v4841_v41 }
  0x96   : > { %1011 = vst [vmem:[#allocation2 + $0xa8] sm:$0x1] %v1010_v33  ;;  %1834 = vmatprep.mubr.bf16.mxu0 %v1426_v18  ;;  %4622 = vmatprep.mubr.bf16.mxu1 %v1426_v18  ;;  %v1428_v8 = vshrl.u32 %v5548_v29, 16  ;;  %v1430_v25 = vshll.u32 %v5548_v29, 16  ;;  %v793_v5 = vrot.slane %v791_v42, 7  ;;  %v5574_v10 = vld [vmem:[%s6593_s1 + $0x238] sm:$0xff]  }
  0x97   : > { %v1437_v63 = vrot.slane %v1435_v50, 1  ;;  %v799_v56 = vshrl.u32 %v3969_v44, 16  ;;  %v802_v7 = vshll.u32 %v3969_v44, 16  ;;  %4336 = vmatprep.subr.bf16.mxu1 %v4843_v40  ;;  %v1016_v51 = vld [vmem:[#allocation2 + $0xb8] sm:$0x1] }
  0x98   : > { %1835 = vmatmul.mubr.bf16.gmra.mxu0 %v1414_v21  ;;  %v1432_v60 = vrot.slane %v1430_v25, 1  ;;  %v796_v1 = vor.u32 %v794_v53, %v793_v5  ;;  %v797_v11 = vrot.slane %v793_v5, 4 }
  0x99   : > { %v801_v57 = vrot.slane %v799_v56, 7  ;;  %4337 = vmatpush3.bf16.msra.mxu1 %v4846_v52 }
  0x9a   : > { %v1433_v62 = vor.u32 %v1432_v60, %v1428_v8  ;;  %v1013_v16 = vsel %vm5082_vm9, %v796_v1, %v1012_v2  ;;  %4690 = vmatprep.subr.bf16.mxu1 %v5574_v10  ;;  %v2539_v60 = vld [vmem:[#allocation2 + $0x50] sm:$0xe]  ;;  %v2623_v1 = vrot.slane %v5407_v55, 1  ;;  %v5613_v55 = vld [vmem:[#allocation2 + $0x114] sm:$0xf] }
  0x9b   : > { %1014 = vst [vmem:[#allocation2 + $0xb0] sm:$0xf] %v1013_v16  ;;  %v804_v13 = vor.u32 %v802_v7, %v801_v57  ;;  %v806_v33 = vrot.slane %v801_v57, 4 }
  0x9c   : > { %v1438_v21 = vsel %vm1318_vm7, %v1433_v62, %v1437_v63  ;;  %v1074_v17 = vld [vmem:[#allocation2 + $0xa0] sm:$0xf]  ;;  %v5579_v61 = vld [vmem:[#allocation2 + $0xa4] sm:$0xf]  ;;  %v3827_v63 = vcombine.low %v2539_v60, %v5398_v49  ;;  %v1088_v49 = vld [vmem:[#allocation2 + $0x110] sm:$0xf] }
  0x9d   : > { %4623 = vmatmul.mubr.bf16.gmra.mxu1 %v1438_v21  ;;  %1842 = vmatprep.mubr.bf16.mxu0 %v1438_v21  ;;  %v5582_v27 = vcombine.low %v1074_v17, %v5579_v61  ;;  %v5584_v3 = vld [vmem:[#allocation2 + $0xa8] ss:$0 sps:$4 sm:$0x11]   ;;  %v805_v42 = vsel %vm5074_vm8, %v797_v11, %v804_v13  ;;  %v1017_v53 = vsel %vm5020_vm3, %v806_v33, %v1016_v51  ;;  %v2540_v51 = vld [vmem:[#allocation2 + $0x60] sm:$0xe]  ;;  %v2626_v17 = vrot.slane %v5432_v38, 1 }
  0x9e   : > { %v1447_v47 = vshll.u32 %v5584_v3, 16  ;;  %1015 = vst [vmem:[#allocation2 + $0xb4] sm:$0xf] %v805_v42  ;;  %1018 = vst [vmem:[#allocation2 + $0xb8] sm:$0x1] %v1017_v53  ;;  %v2622_v62 = vrot.slane %v3827_v63, 1  ;;  %v5618_v33 = vcombine.low %v1088_v49, %v5613_v55 }
  0x9f   : > { %v1440_v12 = vshrl.u32 %v5582_v27, 16  ;;  %v1442_v41 = vshll.u32 %v5582_v27, 16  ;;  %v2629_v38 = vrot.slane %v5493_v46, 1  ;;  %v4854_v60 = vld [vmem:[%s6593_s1 + $0x1a8] sm:$0xff]   ;;  %v2544_v49 = vld [vmem:[#allocation2 + $0xa0] sm:$0xe] }
  0xa0   : > { %1843 = vmatmul.mubr.bf16.gmra.mxu0 %v1426_v18  ;;  %v1449_v8 = vrot.slane %v1447_v47, 1  ;;  %v5608_v57 = vsel %vm2606_vm10, %v2622_v62, %v2623_v1  ;;  %v2541_v47 = vld [vmem:[#allocation2 + $0x70] sm:$0xe]  ;;  %v1524_v53 = vshrl.u32 %v5618_v33, 16  ;;  %v4858_v62 = vld [vmem:[%s6593_s1 + $0x1d8] sm:$0xff]  }
  0xa1   : > { %v1444_v40 = vrot.slane %v1442_v41, 1  ;;  %v1526_v41 = vshll.u32 %v5618_v33, 16 }
  0xa2   : > { %v1076_v44 = vld [vmem:[#allocation2 + $0xb0] sm:$0xf] }
  0xa3   : > { %v1445_v25 = vor.u32 %v1444_v40, %v1440_v12  ;;  %v1528_v40 = vrot.slane %v1526_v41, 1  ;;  %v4862_v41 = vld [vmem:[%s6593_s1 + $0x220] sm:$0xff]  }
  0xa5   : > { %v1450_v50 = vsel %vm1318_vm7, %v1445_v25, %v1449_v8  ;;  %v5595_v5 = vld [vmem:[#allocation2 + $0xb4] sm:$0xf]  ;;  %v5600_v6 = vld [vmem:[#allocation2 + $0xb8] ss:$0 sps:$4 sm:$0x11]  }
  0xa6   : > { %4626 = vmatprep.mubr.bf16.mxu1 %v1450_v50  ;;  %1850 = vmatprep.mubr.bf16.mxu0 %v1450_v50  ;;  %v5598_v2 = vcombine.low %v1076_v44, %v5595_v5  ;;  %v1459_v52 = vshll.u32 %v5600_v6, 16  ;;  %v4850_v25 = vld [vmem:[%s6593_s1 + $0x1f0] sm:$0xff]  }
  0xa7   : > { %v4851_v44 = vld [vmem:[%s6593_s1 + $0x1b0] sm:$0xff]  }
  0xa8   : > { %1851 = vmatmul.mubr.bf16.gmra.mxu0 %v1438_v21  ;;  %v1452_v20 = vshrl.u32 %v5598_v2, 16  ;;  %v1454_v18 = vshll.u32 %v5598_v2, 16  ;;  %v1461_v7 = vrot.slane %v1459_v52, 1  ;;  %v3828_v21 = vcombine.low %v2540_v51, %v5424_v36  ;;  %v4860_v51 = vld [vmem:[%s6593_s1 + $0x1d0] sm:$0xff]  }
  0xa9   : > { %v3829_v36 = vcombine.low %v2541_v47, %v5484_v14  ;;  %v1529_v14 = vor.u32 %v1528_v40, %v1524_v53  ;;  %v4864_v47 = vld [vmem:[%s6593_s1 + $0x188] sm:$0xff]   ;;  %v2641_v53 = vrot.slane %v5600_v6, 1  ;;  %v4866_v40 = vld [vmem:[%s6593_s1 + $0x180] sm:$0xff]   ;;  %v4872_v6 = vld [vmem:[%s6593_s1 + $0x210] sm:$0xff]  }
  0xaa   : > { %v1456_v56 = vrot.slane %v1454_v18, 1  ;;  %v2625_v13 = vrot.slane %v3828_v21, 1  ;;  %v2632_v18 = vrot.slane %v5523_v31, 1  ;;  %v2543_v31 = vld [vmem:[#allocation2 + $0x90] sm:$0xe]  ;;  %v3832_v21 = vcombine.low %v2544_v49, %v5579_v61  ;;  %v4863_v61 = vld [vmem:[%s6593_s1 + $0x1c8] sm:$0xff]  }
  0xab   : > { %v2628_v42 = vrot.slane %v3829_v36, 1  ;;  %v3831_v1 = vcombine.low %v2543_v31, %v5545_v24  ;;  %v4852_v24 = vld [vmem:[%s6593_s1 + $0x230] sm:$0xff]   ;;  %v4865_v36 = vld [vmem:[%s6593_s1 + $0x1c0] sm:$0xff]  }
  0xac   : > { %v1457_v11 = vor.u32 %v1456_v56, %v1452_v20  ;;  %v5621_v12 = vsel %vm2606_vm10, %v2625_v13, %v2626_v17  ;;  %v2635_v56 = vrot.slane %v5550_v28, 1  ;;  %v4859_v28 = vld [vmem:[%s6593_s1 + $0x198] sm:$0xff]   ;;  %v2638_v17 = vrot.slane %v5584_v3, 1 }
  0xad   : > { %v5637_v8 = vsel %vm2606_vm10, %v2628_v42, %v2629_v38  ;;  %v2637_v13 = vrot.slane %v3832_v21, 1  ;;  %v2545_v38 = vld [vmem:[#allocation2 + $0xb0] sm:$0xe]  ;;  %v4897_v21 = vld [vmem:[#allocation2 + $0x34] sm:$0xf] }
  0xae   : > { %v1462_v16 = vsel %vm1318_vm7, %v1457_v11, %v1461_v7  ;;  %v4856_v7 = vld [vmem:[%s6593_s1 + $0x1a0] sm:$0xff]   ;;  %v2634_v11 = vrot.slane %v3831_v1, 1  ;;  %v3833_v42 = vcombine.low %v2545_v38, %v5595_v5 }
  0xaf   : > { %4627 = vmatmul.mubr.bf16.gmra.mxu1 %v1462_v16  ;;  %1858 = vmatprep.mubr.bf16.mxu0 %v1462_v16  ;;  %v5704_v3 = vsel %vm2606_vm10, %v2637_v13, %v2638_v17  ;;  %v4898_v13 = vld [vmem:[#allocation2 + $0x38] ss:$0 sps:$4 sm:$0x11]  }
  0xb0   : > { %4630 = vmatprep.mubr.bf16.mxu1 %v5204_v30  ;;  %1859 = vmatmul.mubr.bf16.gmra.mxu0 %v1450_v50  ;;  %v2542_v50 = vld [vmem:[#allocation2 + $0x80] sm:$0xe] }
  0xb1   : > { %1866 = vmatprep.mubr.bf16.mxu0 %v5204_v30  ;;  %v5625_v30 = vld [vmem:[#allocation2 + $0x118] ss:$0 sps:$4 sm:$0x11]   ;;  %v3830_v20 = vcombine.low %v2542_v50, %v5514_v26  ;;  %v4855_v26 = vld [vmem:[%s6593_s1 + $0x1e0] sm:$0xff]  }
  0xb2   : > { %v4892_v50 = vld [vmem:[#allocation2 + $0x18] ss:$0 sps:$4 sm:$0x11]  }
  0xb7   : > { %4631 = vmatmul.mubr.bf16.gmra.mxu1 %v5167_v34  ;;  %v1531_v34 = vshll.u32 %v5625_v30, 16 }
  0xb8   : > { %4634 = vmatprep.mubr.bf16.mxu1 %v5272_v4  ;;  %1867 = vmatmul.mubr.bf16.gmra.mxu0 %v1462_v16  ;;  %v4849_v4 = vld [vmem:[%s6593_s1 + $0x1b8] sm:$0xff]   ;;  %v5676_v16 = vsel %vm2606_vm10, %v2634_v11, %v2635_v56 }
  0xb9   : > { %4658 = vmatprep.mubr.bf16.mxu0 %v5197_v23  ;;  %v1533_v46 = vrot.slane %v1531_v34, 1  ;;  %v2640_v34 = vrot.slane %v3833_v42, 1  ;;  %v4899_v42 = vld [vmem:[#allocation2 + $0x44] sm:$0xf] }
  0xbb   : > { %v1534_v52 = vsel %vm1318_vm7, %v1529_v14, %v1533_v46  ;;  %v5728_v5 = vsel %vm2606_vm10, %v2640_v34, %v2641_v53  ;;  %v4891_v14 = vld [vmem:[#allocation2 + $0x14] sm:$0xf]  ;;  %v4900_v34 = vld [vmem:[#allocation2 + $0x48] ss:$0 sps:$4 sm:$0x11]  }
  0xbf   : > { %4635 = vmatmul.mubr.bf16.gmra.mxu1 %v5345_v59  ;;  %v4853_v59 = vld [vmem:[%s6593_s1 + $0x1e8] sm:$0xff]  }
  0xc0   : > { %4638 = vmatprep.mubr.bf16.mxu1 %v5396_v45  ;;  %4659 = vmatmul.mubr.bf16.vlgmr.msra.gmra.mxu0 %v5269_v58  ;;  %v2631_v45 = vrot.slane %v3830_v20, 1  ;;  %v2534_v20 = vld [vmem:[#allocation2] sm:$0xe] }
  0xc1   : > { %4459 = vmatpush3.bf16.msra.mxu0 %v4849_v4  ;;  %4662 = vmatprep.mubr.bf16.mxu0 %v5338_v54  ;;  %v4875_v4 = vld [vmem:[%s6593_s1 + $0x208] sm:$0xff]  }
  0xc2   : > { %4460 = vmatprep.subr.bf16.mxu0 %v4850_v25  ;;  %v5659_v63 = vsel %vm2606_vm10, %v2631_v45, %v2632_v18  ;;  %v4878_v25 = vld [vmem:[%s6593_s1 + $0x200] sm:$0xff]  }
  0xc3   : > { %v2536_v18 = vld [vmem:[#allocation2 + $0x20] sm:$0xe] }
  0xc5   : > { %4461 = vmatpush3.bf16.msra.mxu0 %v4851_v44  ;;  %v2611_v44 = vrot.slane %v4892_v50, 1 }
  0xc6   : > { %4462 = vmatprep.subr.bf16.mxu0 %v4853_v59  ;;  %v4893_v59 = vld [vmem:[#allocation2 + $0x4] sm:$0xf] }
  0xc7   : > { %4639 = vmatmul.mubr.bf16.gmra.mxu1 %v1534_v52  ;;  %v3822_v45 = vcombine.low %v2534_v20, %v4893_v59 }
  0xc8   : > { %2244 = vmatprep.mubr.bf16.mxu1 %v5126_v22  ;;  %4663 = vmatmul.mubr.bf16.gmra.mxu0 %v5405_v0 }
  0xc9   : > { %4666 = vmatprep.mubr.bf16.mxu0 %v5430_v37  ;;  %4463 = vmatpush3.bf16.msra.mxu0 %v4854_v60  ;;  %v4894_v60 = vld [vmem:[#allocation2 + $0x24] sm:$0xf]  ;;  %v2607_v56 = vrot.slane %v3822_v45, 1 }
  0xca   : > { %4464 = vmatprep.subr.bf16.mxu0 %v4855_v26  ;;  %v3824_v26 = vcombine.low %v2536_v18, %v4894_v60 }
  0xcc   : > { %v2613_v11 = vrot.slane %v3824_v26, 1 }
  0xcd   : > { %4465 = vmatpush3.bf16.msra.mxu0 %v4856_v7  ;;  %v4895_v7 = vld [vmem:[#allocation2 + $0x8] ss:$0 sps:$4 sm:$0x11]  }
  0xce   : > { %4466 = vmatprep.subr.bf16.mxu0 %v4858_v62  ;;  %v2608_v62 = vrot.slane %v4895_v7, 1 }
  0xcf   : > { %2245 = vmatmul.mubr.bf16.vlgmr.msra.gmra.mxu1 %v5048_v43  ;;  %v4857_v43 = vld [vmem:[%s6593_s1 + $0x228] sm:$0xff]  }
  0xd0   : > { %4691 = vmatpush3.bf16.msra.mxu1 %v5574_v10  ;;  %2252 = vmatprep.mubr.bf16.mxu1 %v5197_v23  ;;  %v4861_v10 = vld [vmem:[%s6593_s1 + $0x190] sm:$0xff]  }
  0xd1   : > { %4692 = vmatprep.subr.bf16.mxu1 %v4852_v24  ;;  %4667 = vmatmul.mubr.bf16.gmra.mxu0 %v5491_v32 }
  0xd2   : > { %4670 = vmatprep.mubr.bf16.mxu0 %v5521_v35  ;;  %4467 = vmatpush3.bf16.msra.mxu0 %v4859_v28 }
  0xd3   : > { %4468 = vmatprep.subr.bf16.mxu0 %v4860_v51  ;;  %v2537_v51 = vld [vmem:[#allocation2 + $0x30] sm:$0xe] }
  0xd4   : > { %4693 = vmatpush3.bf16.msra.mxu1 %v4852_v24  ;;  %v4896_v24 = vld [vmem:[#allocation2 + $0x28] ss:$0 sps:$4 sm:$0x11]   ;;  %v3825_v17 = vcombine.low %v2537_v51, %v4897_v21 }
  0xd5   : > { %4694 = vmatprep.subr.bf16.mxu1 %v4857_v43  ;;  %v2614_v28 = vrot.slane %v4896_v24, 1 }
  0xd6   : > { %4469 = vmatpush3.bf16.msra.mxu0 %v4861_v10  ;;  %v2616_v10 = vrot.slane %v3825_v17, 1 }
  0xd7   : > { %2253 = vmatmul.mubr.bf16.gmra.mxu1 %v5126_v22  ;;  %4470 = vmatprep.subr.bf16.mxu0 %v4863_v61  ;;  %v4868_v22 = vld [vmem:[%s6593_s1 + $0x218] sm:$0xff]   ;;  %v5760_v49 = vsel %vm2606_vm10, %v2613_v11, %v2614_v28  ;;  %v2617_v61 = vrot.slane %v4898_v13, 1 }
  0xd8   : > { %2260 = vmatprep.mubr.bf16.mxu1 %v5269_v58  ;;  %4695 = vmatpush3.bf16.msra.mxu1 %v4857_v43 }
  0xd9   : > { %4671 = vmatmul.mubr.bf16.gmra.mxu0 %v5548_v29  ;;  %4696 = vmatprep.subr.bf16.mxu1 %v4862_v41  ;;  %v5772_v38 = vsel %vm2606_vm10, %v2616_v10, %v2617_v61 }
  0xda   : > { %4674 = vmatprep.mubr.bf16.mxu0 %v5582_v27  ;;  %4471 = vmatpush3.bf16.msra.mxu0 %v4864_v47 }
  0xdb   : > { %4472 = vmatprep.subr.bf16.mxu0 %v4865_v36 }
  0xdc   : > { %4697 = vmatpush3.bf16.msra.mxu1 %v4862_v41  ;;  %v2538_v41 = vld [vmem:[#allocation2 + $0x40] sm:$0xe] }
  0xdd   : > { %4698 = vmatprep.subr.bf16.mxu1 %v4868_v22  ;;  %v3826_v53 = vcombine.low %v2538_v41, %v4899_v42 }
  0xde   : > { %4473 = vmatpush3.bf16.msra.mxu0 %v4866_v40 }
  0xdf   : > { %2261 = vmatmul.mubr.bf16.gmra.mxu1 %v5197_v23  ;;  %v2535_v23 = vld [vmem:[#allocation2 + $0x10] sm:$0xe]  ;;  %v2619_v40 = vrot.slane %v3826_v53, 1 }
  0xe0   : > { %2268 = vmatprep.mubr.bf16.mxu1 %v5338_v54  ;;  %4699 = vmatpush3.bf16.msra.mxu1 %v4868_v22  ;;  %v3823_v46 = vcombine.low %v2535_v23, %v4891_v14 }
  0xe1   : > { %4675 = vmatmul.mubr.bf16.gmra.mxu0 %v5598_v2  ;;  %4700 = vmatprep.subr.bf16.mxu1 %v4872_v6 }
  0xe2   : > { %4678 = vmatprep.mubr.bf16.mxu0 %v5173_v39 }
  0xe4   : > { %4701 = vmatpush3.bf16.msra.mxu1 %v4872_v6  ;;  %v2620_v6 = vrot.slane %v4900_v34, 1 }
  0xe5   : > { %4702 = vmatprep.subr.bf16.mxu1 %v4875_v4 }
  0xe7   : > { %2269 = vmatmul.mubr.bf16.gmra.mxu1 %v5269_v58  ;;  %v2610_v58 = vrot.slane %v3823_v46, 1 }
  0xe8   : > { %2276 = vmatprep.mubr.bf16.mxu1 %v5405_v0  ;;  %4703 = vmatpush3.bf16.msra.mxu1 %v4875_v4 }
  0xe9   : > { %4679 = vmatmul.mubr.bf16.gmra.mxu0 %v5134_v48  ;;  %4704 = vmatprep.subr.bf16.mxu1 %v4878_v25 }
  0xea   : > { %4682 = vmatprep.mubr.bf16.mxu0 %v5243_v15 }
  0xec   : > { %4705 = vmatpush3.bf16.msra.mxu1 %v4878_v25 }
  0xef   : > { %2277 = vmatmul.mubr.bf16.gmra.mxu1 %v5338_v54  ;;  %v2612_v54 = vsel %vm2606_vm10, %v2610_v58, %v2611_v44 }
  0xf0   : > { %2284 = vmatprep.mubr.bf16.mxu1 %v5430_v37 }
  0xf1   : > { %4683 = vmatmul.mubr.bf16.gmra.mxu0 %v5310_v9 }
  0xf2   : > { %4686 = vmatprep.mubr.bf16.mxu0 %v5363_v19 }
  0xf4   : > { %v4202_v52 = vpop.f32.mrf.mxu0 }
  0xf6   : > { %v4203_v31 = vpop.f32.mrf.mxu0 }
  0xf7   : > { %2285 = vmatmul.mubr.bf16.gmra.mxu1 %v5405_v0  ;;  %v5755_v1 = vadd.f32 %v4203_v31, %v4202_v52  ;;  %v2609_v0 = vsel %vm2606_vm10, %v2607_v56, %v2608_v62 }
  0xf8   : > { %2292 = vmatprep.mubr.bf16.mxu1 %v5491_v32  ;;  %v5764_v43 = vpop.f32.mrf.mxu0 }
  0xf9   : > { %4687 = vmatmul.mubr.bf16.gmra.mxu0 %v5618_v33 }
  0xfa   : > { %2904 = vmatprep.mubr.bf16.mxu0 %v2612_v54 }
  0xff   : > { %2293 = vmatmul.mubr.bf16.gmra.mxu1 %v5430_v37  ;;  %v5768_v37 = vpop.f32.mrf.mxu0 }
 0x100   : > { %2300 = vmatprep.mubr.bf16.mxu1 %v5521_v35 }
 0x101   : > { %2905 = vmatmul.mubr.bf16.vlgmr.msra.gmra.mxu0 %v2609_v0 }
 0x102   : > { %2912 = vmatprep.mubr.bf16.mxu0 %v5760_v49 }
 0x103   : > { %v4274_v33 = vpop.f32.mrf.mxu1 }
 0x105   : > { %v4275_v47 = vpop.f32.mrf.mxu1 }
 0x106   : > { %v5766_v36 = vadd.f32 %v4275_v47, %v4274_v33 }
 0x107   : > { %2301 = vmatmul.mubr.bf16.gmra.mxu1 %v5491_v32  ;;  %v5776_v4 = vpop.f32.mrf.mxu1  ;;  %v5780_v32 = vsel %vm2606_vm10, %v2619_v40, %v2620_v6 }
 0x108   : > { %2308 = vmatprep.mubr.bf16.mxu1 %v5548_v29 }
 0x109   : > { %2913 = vmatmul.mubr.bf16.gmra.mxu0 %v2612_v54  ;;  %v5782_v46 = vpop.f32.mrf.mxu1 }
 0x10a   : > { %2920 = vmatprep.mubr.bf16.mxu0 %v5772_v38  ;;  %v4208_v22 = vpop.f32.mrf.mxu0 }
 0x10c   : > { %v4209_v25 = vpop.f32.mrf.mxu0 }
 0x10d   : > { %v4210_v23 = vadd.f32 %v4209_v25, %v4208_v22  ;;  %v4207_v25 = vadd.f32 %v5768_v37, %v5764_v43  ;;  %v2546_v43 = vld [vmem:[#allocation2 + $0xc0] sm:$0xe] }
 0x10e   : > { %v4211_v14 = vpop.f32.mrf.mxu0 }
 0x10f   : > { %2309 = vmatmul.mubr.bf16.gmra.mxu1 %v5521_v35 }
 0x110   : > { %2316 = vmatprep.mubr.bf16.mxu1 %v5582_v27  ;;  %v4212_v58 = vpop.f32.mrf.mxu0 }
 0x111   : > { %2921 = vmatmul.mubr.bf16.gmra.mxu0 %v5760_v49  ;;  %v5786_v50 = vadd.f32 %v4212_v58, %v4211_v14 }
 0x112   : > { %2928 = vmatprep.mubr.bf16.mxu0 %v5780_v32  ;;  %v4280_v44 = vpop.f32.mrf.mxu1 }
 0x114   : > { %v4281_v20 = vpop.f32.mrf.mxu1 }
 0x115   : > { %v5789_v18 = vadd.f32 %v4281_v20, %v4280_v44 }
 0x116   : > { %v4283_v35 = vpop.f32.mrf.mxu1 }
 0x117   : > { %2317 = vmatmul.mubr.bf16.gmra.mxu1 %v5548_v29 }
 0x118   : > { %2324 = vmatprep.mubr.bf16.mxu1 %v5598_v2  ;;  %v4284_v59 = vpop.f32.mrf.mxu1 }
 0x119   : > { %2929 = vmatmul.mubr.bf16.gmra.mxu0 %v5772_v38  ;;  %v5795_v45 = vadd.f32 %v4284_v59, %v4283_v35 }
 0x11a   : > { %2936 = vmatprep.mubr.bf16.mxu0 %v5608_v57  ;;  %v4214_v52 = vpop.f32.mrf.mxu0 }
 0x11c   : > { %v4215_v54 = vpop.f32.mrf.mxu0 }
 0x11d   : > { %v5797_v60 = vadd.f32 %v4215_v54, %v4214_v52 }
 0x11e   : > { %v4217_v26 = vpop.f32.mrf.mxu0 }
 0x11f   : > { %2325 = vmatmul.mubr.bf16.gmra.mxu1 %v5582_v27 }
 0x120   : > { %2332 = vmatprep.mubr.bf16.mxu1 %v5173_v39  ;;  %v4218_v29 = vpop.f32.mrf.mxu0 }
 0x121   : > { %2937 = vmatmul.mubr.bf16.gmra.mxu0 %v5780_v32  ;;  %v5802_v31 = vadd.f32 %v4218_v29, %v4217_v26  ;;  %v4901_v26 = vld [vmem:[#allocation2 + $0xc4] sm:$0xf] }
 0x122   : > { %2944 = vmatprep.mubr.bf16.mxu0 %v5621_v12  ;;  %v3834_v29 = vcombine.low %v2546_v43, %v4901_v26 }
 0x125   : > { %v4286_v56 = vpop.f32.mrf.mxu1 }
 0x127   : > { %2333 = vmatmul.mubr.bf16.gmra.mxu1 %v5598_v2  ;;  %v4287_v7 = vpop.f32.mrf.mxu1 }
 0x128   : > { %2340 = vmatprep.mubr.bf16.mxu1 %v5134_v48  ;;  %v5807_v62 = vadd.f32 %v4287_v7, %v4286_v56 }
 0x129   : > { %2945 = vmatmul.mubr.bf16.gmra.mxu0 %v5608_v57  ;;  %v4289_v27 = vpop.f32.mrf.mxu1 }
 0x12a   : > { %2952 = vmatprep.mubr.bf16.mxu0 %v5637_v8 }
 0x12b   : > { %v4290_v11 = vpop.f32.mrf.mxu1 }
 0x12c   : > { %v5811_v24 = vadd.f32 %v4290_v11, %v4289_v27  ;;  %v4220_v28 = vpop.f32.mrf.mxu0 }
 0x12e   : > { %v4221_v51 = vpop.f32.mrf.mxu0 }
 0x12f   : > { %2341 = vmatmul.mubr.bf16.gmra.mxu1 %v5173_v39  ;;  %v4222_v0 = vadd.f32 %v4221_v51, %v4220_v28  ;;  %v4902_v51 = vld [vmem:[#allocation2 + $0xc8] ss:$0 sps:$4 sm:$0x11]  }
 0x130   : > { %2348 = vmatprep.mubr.bf16.mxu1 %v5243_v15  ;;  %v4223_v2 = vpop.f32.mrf.mxu0 }
 0x131   : > { %2953 = vmatmul.mubr.bf16.gmra.mxu0 %v5621_v12 }
 0x132   : > { %2960 = vmatprep.mubr.bf16.mxu0 %v5659_v63  ;;  %v4224_v21 = vpop.f32.mrf.mxu0 }
 0x133   : > { %v4292_v17 = vpop.f32.mrf.mxu1  ;;  %v4225_v33 = vadd.f32 %v4224_v21, %v4223_v2  ;;  %v2547_v2 = vld [vmem:[#allocation2 + $0xd0] sm:$0xe] }
 0x135   : > { %v4293_v10 = vpop.f32.mrf.mxu1 }
 0x136   : > { %v5817_v13 = vadd.f32 %v4293_v10, %v4292_v17 }
 0x137   : > { %2349 = vmatmul.mubr.bf16.gmra.mxu1 %v5134_v48  ;;  %v4295_v61 = vpop.f32.mrf.mxu1 }
 0x138   : > { %2356 = vmatprep.mubr.bf16.mxu1 %v5310_v9 }
 0x139   : > { %2961 = vmatmul.mubr.bf16.gmra.mxu0 %v5637_v8  ;;  %v4296_v39 = vpop.f32.mrf.mxu1 }
 0x13a   : > { %v5822_v41 = vadd.f32 %v4296_v39, %v4295_v61  ;;  %2968 = vmatprep.mubr.bf16.mxu0 %v5676_v16  ;;  %v4903_v61 = vld [vmem:[#allocation2 + $0xd4] sm:$0xf] }
 0x13b   : > { %v4612_v47 = vpop.f32.mrf.mxu1 }
 0x13c   : > { %v4226_v42 = vpop.f32.mrf.mxu0  ;;  %v5825_v53 = vadd.f32 %v4612_v47, %v4210_v23 }
 0x13d   : > { %v1941_v22 = vpop.f32.mrf.mxu1 }
 0x13e   : > { %v4227_v40 = vpop.f32.mrf.mxu0  ;;  %v5828_v34 = vadd.f32 %v5755_v1, %v1941_v22 }
 0x13f   : > { %2357 = vmatmul.mubr.bf16.gmra.mxu1 %v5243_v15  ;;  %v4228_v48 = vadd.f32 %v4227_v40, %v4226_v42  ;;  %v4613_v6 = vpop.f32.mrf.mxu1 }
 0x140   : > { %2364 = vmatprep.mubr.bf16.mxu1 %v5363_v19  ;;  %v4229_v14 = vpop.f32.mrf.mxu0  ;;  %v5835_v58 = vadd.f32 %v4613_v6, %v5786_v50 }
 0x141   : > { %2969 = vmatmul.mubr.bf16.gmra.mxu0 %v5659_v63  ;;  %v1944_v23 = vpop.f32.mrf.mxu1 }
 0x142   : > { %v4230_v44 = vpop.f32.mrf.mxu0  ;;  %v5838_v20 = vadd.f32 %v4207_v25, %v1944_v23  ;;  %2976 = vmatprep.mubr.bf16.mxu0 %v5704_v3 }
 0x143   : > { %v4231_v15 = vadd.f32 %v4230_v44, %v4229_v14  ;;  %v4616_v1 = vpop.f32.mrf.mxu1  ;;  %v4904_v14 = vld [vmem:[#allocation2 + $0xd8] ss:$0 sps:$4 sm:$0x11]  }
 0x144   : > { %v4232_v35 = vpop.f32.mrf.mxu0  ;;  %v5841_v59 = vadd.f32 %v4616_v1, %v4222_v0  ;;  %v2644_v0 = vrot.slane %v4902_v51, 1  ;;  %v2647_v23 = vrot.slane %v4904_v14, 1 }
 0x145   : > { %v1957_v37 = vpop.f32.mrf.mxu1 }
 0x146   : > { %v4233_v19 = vpop.f32.mrf.mxu0  ;;  %v5844_v52 = vadd.f32 %v5797_v60, %v1957_v37  ;;  %v4905_v37 = vld [vmem:[#allocation2 + $0xe4] sm:$0xf] }
 0x147   : > { %2365 = vmatmul.mubr.bf16.gmra.mxu1 %v5310_v9  ;;  %v4234_v50 = vadd.f32 %v4233_v19, %v4232_v35  ;;  %v4617_v54 = vpop.f32.mrf.mxu1  ;;  %v2643_v9 = vrot.slane %v3834_v29, 1 }
 0x148   : > { %4706 = vmatprep.mubr.bf16.mxu1 %v5760_v49  ;;  %v4235_v56 = vpop.f32.mrf.mxu0  ;;  %v5848_v7 = vadd.f32 %v4617_v54, %v4225_v33 }
 0x149   : > { %2977 = vmatmul.mubr.bf16.gmra.mxu0 %v5676_v16  ;;  %v1960_v27 = vpop.f32.mrf.mxu1  ;;  %v5859_v10 = vsel %vm2606_vm10, %v2643_v9, %v2644_v0 }
 0x14a   : > { %v4236_v11 = vpop.f32.mrf.mxu0  ;;  %v5852_v28 = vadd.f32 %v5802_v31, %v1960_v27  ;;  %2984 = vmatprep.mubr.bf16.mxu0 %v5728_v5  ;;  %v3835_v31 = vcombine.low %v2547_v2, %v4903_v61 }
 0x14b   : > { %v4237_v60 = vadd.f32 %v4236_v11, %v4235_v56  ;;  %v4906_v56 = vld [vmem:[#allocation2 + $0xe8] ss:$0 sps:$4 sm:$0x11]  }
 0x14c   : > { %v2646_v25 = vrot.slane %v3835_v31, 1  ;;  %v2650_v27 = vrot.slane %v4906_v56, 1 }
 0x14e   : > { %v5872_v43 = vsel %vm2606_vm10, %v2646_v25, %v2647_v23  ;;  %v2550_v23 = vld [vmem:[#allocation2 + $0x100] sm:$0xe] }
 0x14f   : > { %v4620_v21 = vpop.f32.mrf.mxu1  ;;  %4707 = vmatmul.mubr.bf16.vlgmr.msra.gmra.mxu1 %v5772_v38 }
 0x150   : > { %v4238_v17 = vpop.f32.mrf.mxu0  ;;  %v5855_v49 = vadd.f32 %v4620_v21, %v4234_v50  ;;  %4710 = vmatprep.mubr.bf16.mxu1 %v5780_v32  ;;  %v2548_v32 = vld [vmem:[#allocation2 + $0xe0] sm:$0xe] }
 0x151   : > { %v1973_v33 = vpop.f32.mrf.mxu1  ;;  %2985 = vmatmul.mubr.bf16.gmra.mxu0 %v5704_v3  ;;  %v3836_v19 = vcombine.low %v2548_v32, %v4905_v37 }
 0x152   : > { %v4239_v39 = vpop.f32.mrf.mxu0  ;;  %v5862_v47 = vadd.f32 %v4228_v48, %v1973_v33  ;;  %2992 = vmatprep.mubr.bf16.mxu0 %v5859_v10 }
 0x153   : > { %v4240_v42 = vadd.f32 %v4239_v39, %v4238_v17  ;;  %v4621_v22 = vpop.f32.mrf.mxu1  ;;  %v2649_v29 = vrot.slane %v3836_v19, 1  ;;  %v4907_v17 = vld [vmem:[#allocation2 + $0xf4] sm:$0xf] }
 0x154   : > { %v4241_v40 = vpop.f32.mrf.mxu0  ;;  %v5865_v6 = vadd.f32 %v4621_v22, %v4237_v60  ;;  %v2549_v60 = vld [vmem:[#allocation2 + $0xf0] sm:$0xe] }
 0x155   : > { %v1976_v38 = vpop.f32.mrf.mxu1  ;;  %v2651_v21 = vsel %vm2606_vm10, %v2649_v29, %v2650_v27  ;;  %v3837_v33 = vcombine.low %v2549_v60, %v4907_v17 }
 0x156   : > { %v4242_v44 = vpop.f32.mrf.mxu0  ;;  %v5868_v1 = vadd.f32 %v4231_v15, %v1976_v38 }
 0x157   : > { %v4243_v35 = vadd.f32 %v4242_v44, %v4241_v40  ;;  %4711 = vmatmul.mubr.bf16.gmra.mxu1 %v5608_v57  ;;  %v2652_v38 = vrot.slane %v3837_v33, 1 }
 0x158   : > { %v4244_v48 = vpop.f32.mrf.mxu0  ;;  %4714 = vmatprep.mubr.bf16.mxu1 %v5621_v12 }
 0x159   : > { %2993 = vmatmul.mubr.bf16.gmra.mxu0 %v5728_v5 }
 0x15a   : > { %v4245_v50 = vpop.f32.mrf.mxu0  ;;  %3000 = vmatprep.mubr.bf16.mxu0 %v5872_v43 }
 0x15b   : > { %v4246_v54 = vadd.f32 %v4245_v50, %v4244_v48  ;;  %v4909_v48 = vld [vmem:[#allocation2 + $0x104] sm:$0xf] }
 0x15c   : > { %v4247_v26 = vpop.f32.mrf.mxu0  ;;  %v3838_v37 = vcombine.low %v2550_v23, %v4909_v48 }
 0x15d   : > { %v4624_v15 = vpop.f32.mrf.mxu1 }
 0x15e   : > { %v5877_v11 = vadd.f32 %v4624_v15, %v4246_v54  ;;  %v4248_v57 = vpop.f32.mrf.mxu0  ;;  %v2655_v54 = vrot.slane %v3838_v37, 1 }
 0x15f   : > { %v1989_v9 = vpop.f32.mrf.mxu1  ;;  %v4249_v51 = vadd.f32 %v4248_v57, %v4247_v26  ;;  %4715 = vmatmul.mubr.bf16.gmra.mxu1 %v5637_v8  ;;  %v4908_v8 = vld [vmem:[#allocation2 + $0xf8] ss:$0 sps:$4 sm:$0x11]   ;;  %v4910_v26 = vld [vmem:[#allocation2 + $0x108] ss:$0 sps:$4 sm:$0x11]  }
 0x160   : > { %v5879_v0 = vadd.f32 %v4240_v42, %v1989_v9  ;;  %v4250_v12 = vpop.f32.mrf.mxu0  ;;  %4718 = vmatprep.mubr.bf16.mxu1 %v5659_v63  ;;  %v2653_v25 = vrot.slane %v4908_v8, 1  ;;  %v2656_v15 = vrot.slane %v4910_v26, 1 }
 0x161   : > { %v4625_v2 = vpop.f32.mrf.mxu1  ;;  %3001 = vmatmul.mubr.bf16.gmra.mxu0 %v5859_v10 }
 0x162   : > { %v5884_v61 = vadd.f32 %v4625_v2, %v4249_v51  ;;  %v4251_v31 = vpop.f32.mrf.mxu0  ;;  %3008 = vmatprep.mubr.bf16.mxu0 %v2651_v21  ;;  %v2654_v63 = vsel %vm2606_vm10, %v2652_v38, %v2653_v25 }
 0x163   : > { %v1992_v39 = vpop.f32.mrf.mxu1  ;;  %v4252_v22 = vadd.f32 %v4251_v31, %v4250_v12 }
 0x164   : > { %v5887_v40 = vadd.f32 %v4243_v35, %v1992_v39  ;;  %v4253_v42 = vpop.f32.mrf.mxu0 }
 0x166   : > { %v4254_v14 = vpop.f32.mrf.mxu0 }
 0x167   : > { %v4255_v44 = vadd.f32 %v4254_v14, %v4253_v42  ;;  %4719 = vmatmul.mubr.bf16.gmra.mxu1 %v5676_v16  ;;  %v2657_v16 = vsel %vm2606_vm10, %v2655_v54, %v2656_v15  ;;  %v2659_v15 = vrot.slane %v5625_v30, 1 }
 0x168   : > { %v4256_v32 = vpop.f32.mrf.mxu0  ;;  %4722 = vmatprep.mubr.bf16.mxu1 %v5704_v3 }
 0x169   : > { %3009 = vmatmul.mubr.bf16.gmra.mxu0 %v5872_v43 }
 0x16a   : > { %v4257_v19 = vpop.f32.mrf.mxu0  ;;  %3016 = vmatprep.mubr.bf16.mxu0 %v2654_v63 }
 0x16b   : > { %v4258_v35 = vadd.f32 %v4257_v19, %v4256_v32 }
 0x16c   : > { %v4259_v50 = vpop.f32.mrf.mxu0 }
 0x16e   : > { %v4260_v29 = vpop.f32.mrf.mxu0 }
 0x16f   : > { %v4261_v56 = vadd.f32 %v4260_v29, %v4259_v50  ;;  %v4628_v27 = vpop.f32.mrf.mxu1  ;;  %4723 = vmatmul.mubr.bf16.gmra.mxu1 %v5728_v5 }
 0x170   : > { %4726 = vmatprep.mubr.bf16.mxu1 %v5859_v10  ;;  %v5896_v57 = vadd.f32 %v4628_v27, %v4258_v35  ;;  %v4262_v3 = vpop.f32.mrf.mxu0 }
 0x171   : > { %v2005_v60 = vpop.f32.mrf.mxu1  ;;  %3017 = vmatmul.mubr.bf16.gmra.mxu0 %v2651_v21 }
 0x172   : > { %v5898_v9 = vadd.f32 %v4252_v22, %v2005_v60  ;;  %v4263_v51 = vpop.f32.mrf.mxu0  ;;  %3024 = vmatprep.mubr.bf16.mxu0 %v2657_v16  ;;  %v2551_v22 = vld [vmem:[#allocation2 + $0x110] sm:$0xe] }
 0x173   : > { %v4629_v12 = vpop.f32.mrf.mxu1  ;;  %v4264_v2 = vadd.f32 %v4263_v51, %v4262_v3  ;;  %v3839_v48 = vcombine.low %v2551_v22, %v5613_v55 }
 0x174   : > { %v5900_v17 = vadd.f32 %v4629_v12, %v4261_v56  ;;  %v4265_v33 = vpop.f32.mrf.mxu0 }
 0x175   : > { %v2008_v31 = vpop.f32.mrf.mxu1  ;;  %v2658_v26 = vrot.slane %v3839_v48, 1 }
 0x176   : > { %v5902_v5 = vadd.f32 %v4255_v44, %v2008_v31  ;;  %v4266_v39 = vpop.f32.mrf.mxu0 }
 0x177   : > { %v4632_v42 = vpop.f32.mrf.mxu1  ;;  %4727 = vmatmul.mubr.bf16.gmra.mxu1 %v5872_v43  ;;  %v4267_v10 = vadd.f32 %v4266_v39, %v4265_v33 }
 0x178   : > { %4730 = vmatprep.mubr.bf16.mxu1 %v2651_v21  ;;  %v4268_v38 = vpop.f32.mrf.mxu0 }
 0x179   : > { %v2021_v8 = vpop.f32.mrf.mxu1  ;;  %3025 = vmatmul.mubr.bf16.gmra.mxu0 %v2654_v63 }
 0x17a   : > { %v5905_v25 = vadd.f32 %v4264_v2, %v2021_v8  ;;  %v4269_v14 = vpop.f32.mrf.mxu0 }
 0x17b   : > { %v4633_v23 = vpop.f32.mrf.mxu1  ;;  %v4270_v32 = vadd.f32 %v4269_v14, %v4268_v38 }
 0x17c   : > { %v4271_v37 = vpop.f32.mrf.mxu0 }
 0x17d   : > { %v2024_v44 = vpop.f32.mrf.mxu1  ;;  %v5908_v19 = vadd.f32 %v4632_v42, %v4270_v32 }
 0x17e   : > { %v5910_v35 = vadd.f32 %v4267_v10, %v2024_v44  ;;  %v4272_v43 = vpop.f32.mrf.mxu0 }
 0x17f   : > { %v4636_v50 = vpop.f32.mrf.mxu1  ;;  %4731 = vmatmul.mubr.bf16.gmra.mxu1 %v2654_v63  ;;  %v4273_v21 = vadd.f32 %v4272_v43, %v4271_v37  ;;  %v4279_v63 = vadd.f32 %v5782_v46, %v5776_v4 }
 0x180   : > { %v5913_v54 = vadd.f32 %v4636_v50, %v5789_v18  ;;  %4734 = vmatprep.mubr.bf16.mxu1 %v2657_v16  ;;  %v4660_v29 = vpop.f32.mrf.mxu0  ;;  %v2660_v18 = vsel %vm2606_vm10, %v2658_v26, %v2659_v15 }
 0x181   : > { %v2037_v56 = vpop.f32.mrf.mxu1  ;;  %v5916_v55 = vadd.f32 %v4633_v23, %v4273_v21 }
 0x182   : > { %v5919_v27 = vadd.f32 %v5766_v36, %v2037_v56  ;;  %v2407_v3 = vpop.f32.mrf.mxu0 }
 0x183   : > { %v4637_v60 = vpop.f32.mrf.mxu1 }
 0x184   : > { %v5924_v51 = vadd.f32 %v4637_v60, %v5795_v45  ;;  %v4661_v16 = vpop.f32.mrf.mxu0 }
 0x185   : > { %v2040_v12 = vpop.f32.mrf.mxu1 }
 0x186   : > { %v5927_v30 = vadd.f32 %v4279_v63, %v2040_v12  ;;  %v2410_v2 = vpop.f32.mrf.mxu0 }
 0x187   : > { %v4640_v33 = vpop.f32.mrf.mxu1  ;;  %4735 = vmatmul.mubr.bf16.gmra.mxu1 %v2660_v18 }
 0x188   : > { %v5930_v36 = vadd.f32 %v4640_v33, %v5817_v13  ;;  %v4664_v31 = vpop.f32.mrf.mxu0 }
 0x189   : > { %v2053_v39 = vpop.f32.mrf.mxu1 }
 0x18a   : > { %v5933_v42 = vadd.f32 %v5807_v62, %v2053_v39  ;;  %v2423_v4 = vpop.f32.mrf.mxu0 }
 0x18b   : > { %v4641_v46 = vpop.f32.mrf.mxu1 }
 0x18c   : > { %v5936_v45 = vadd.f32 %v4641_v46, %v5822_v41  ;;  %v5938_v10 = vpop.f32.mrf.mxu0 }
 0x18d   : > { %v2056_v38 = vpop.f32.mrf.mxu1 }
 0x18e   : > { %6608 = vst [vmem:[#allocation3_spill] sm:$0xff] %v5936_v45  ;;  %v5941_v8 = vadd.f32 %v5811_v24, %v2056_v38  ;;  %v2426_v22 = vpop.f32.mrf.mxu0 }
 0x18f   : > { %v4338_v14 = vpop.f32.mrf.mxu1 }
 0x191   : > { %v4339_v13 = vpop.f32.mrf.mxu1  ;;  %v5943_v23 = vpop.f32.mrf.mxu0 }
 0x192   : > { %v4340_v32 = vadd.f32 %v4339_v13, %v4338_v14 }
 0x193   : > { %v4341_v48 = vpop.f32.mrf.mxu1  ;;  %v2439_v62 = vpop.f32.mrf.mxu0 }
 0x194   : > { %v2247_v37 = vadd.f32 %v4340_v32, %v5828_v34 }
 0x195   : > { %v4342_v44 = vpop.f32.mrf.mxu1  ;;  %v5946_v43 = vpop.f32.mrf.mxu0 }
 0x196   : > { %v5948_v41 = vadd.f32 %v2407_v3, %v2247_v37  ;;  %v4343_v50 = vadd.f32 %v4342_v44, %v4341_v48 }
 0x197   : > { %v4344_v21 = vpop.f32.mrf.mxu1  ;;  %v2442_v26 = vpop.f32.mrf.mxu0 }
 0x198   : > { %v2250_v24 = vadd.f32 %v4343_v50, %v5838_v20 }
 0x199   : > { %v4345_v15 = vpop.f32.mrf.mxu1  ;;  %v5951_v56 = vpop.f32.mrf.mxu0 }
 0x19a   : > { %v5953_v60 = vadd.f32 %v2410_v2, %v2250_v24  ;;  %v4346_v63 = vadd.f32 %v4345_v15, %v4344_v21 }
 0x19b   : > { %v4347_v18 = vpop.f32.mrf.mxu1  ;;  %v5955_v12 = vpop.f32.mrf.mxu0 }
 0x19c   : > { %v2255_v34 = vadd.f32 %v4346_v63, %v5825_v53 }
 0x19d   : > { %v4348_v33 = vpop.f32.mrf.mxu1  ;;  %v5958_v39 = vpop.f32.mrf.mxu0 }
 0x19e   : > { %v4349_v3 = vadd.f32 %v4348_v33, %v4347_v18  ;;  %v5960_v46 = vadd.f32 %v4660_v29, %v2255_v34 }
 0x19f   : > { %v4350_v38 = vpop.f32.mrf.mxu1  ;;  %v5962_v14 = vpop.f32.mrf.mxu0 }
 0x1a0   : > { %v2258_v20 = vadd.f32 %v4349_v3, %v5835_v58 }
 0x1a1   : > { %v4351_v13 = vpop.f32.mrf.mxu1  ;;  %v5965_v2 = vpop.f32.mrf.mxu0 }
 0x1a2   : > { %v4352_v32 = vadd.f32 %v4351_v13, %v4350_v38  ;;  %v5967_v48 = vadd.f32 %v4661_v16, %v2258_v20 }
 0x1a3   : > { %v4353_v37 = vpop.f32.mrf.mxu1  ;;  %v5969_v44 = vpop.f32.mrf.mxu0 }
 0x1a4   : > { %v2263_v53 = vadd.f32 %v4352_v32, %v5844_v52 }
 0x1a5   : > { %v4354_v50 = vpop.f32.mrf.mxu1  ;;  %v5972_v21 = vpop.f32.mrf.mxu0 }
 0x1a6   : > { %v4355_v29 = vadd.f32 %v4354_v50, %v4353_v37  ;;  %v5974_v24 = vadd.f32 %v2423_v4, %v2263_v53 }
 0x1a7   : > { %v4356_v15 = vpop.f32.mrf.mxu1  ;;  %v5976_v63 = vpop.f32.mrf.mxu0 }
 0x1a8   : > { %v2266_v58 = vadd.f32 %v4355_v29, %v5852_v28 }
 0x1a9   : > { %v4357_v18 = vpop.f32.mrf.mxu1  ;;  %v5979_v34 = vpop.f32.mrf.mxu0 }
 0x1aa   : > { %6609 = vst [vmem:[#allocation4_spill] sm:$0xff] %v5979_v34  ;;  %v4358_v16 = vadd.f32 %v4357_v18, %v4356_v15  ;;  %v5981_v33 = vadd.f32 %v2426_v22, %v2266_v58 }
 0x1ab   : > { %v4359_v3 = vpop.f32.mrf.mxu1  ;;  %v5983_v38 = vpop.f32.mrf.mxu0 }
 0x1ac   : > { %v2271_v52 = vadd.f32 %v4358_v16, %v5841_v59 }
 0x1ad   : > { %v4360_v20 = vpop.f32.mrf.mxu1  ;;  %v5986_v13 = vpop.f32.mrf.mxu0 }
 0x1ae   : > { %6610 = vst [vmem:[#allocation5_spill] sm:$0xff] %v5986_v13  ;;  %v4361_v4 = vadd.f32 %v4360_v20, %v4359_v3  ;;  %v5988_v32 = vadd.f32 %v4664_v31, %v2271_v52 }
 0x1af   : > { %v4362_v37 = vpop.f32.mrf.mxu1  ;;  %v5990_v53 = vpop.f32.mrf.mxu0 }
 0x1b0   : > { %v2274_v28 = vadd.f32 %v4361_v4, %v5848_v7 }
 0x1b1   : > { %v4363_v50 = vpop.f32.mrf.mxu1  ;;  %v5993_v29 = vpop.f32.mrf.mxu0 }
 0x1b2   : > { %6611 = vst [vmem:[#allocation6_spill] sm:$0xff] %v5993_v29  ;;  %v4364_v22 = vadd.f32 %v4363_v50, %v4362_v37  ;;  %v5996_v15 = vadd.f32 %v5938_v10, %v2274_v28 }
 0x1b3   : > { %v4365_v58 = vpop.f32.mrf.mxu1  ;;  %v5998_v59 = vpop.f32.mrf.mxu0 }
 0x1b4   : > { %6612 = vst [vmem:[#allocation7_spill] sm:$0xff] %v5998_v59  ;;  %v2279_v18 = vadd.f32 %v4364_v22, %v5862_v47 }
 0x1b5   : > { %v4366_v16 = vpop.f32.mrf.mxu1  ;;  %v6001_v31 = vpop.f32.mrf.mxu0 }
 0x1b6   : > { %6613 = vst [vmem:[#allocation8_spill] sm:$0xff] %v6001_v31  ;;  %v4367_v3 = vadd.f32 %v4366_v16, %v4365_v58  ;;  %v6003_v52 = vadd.f32 %v2439_v62, %v2279_v18 }
 0x1b7   : > { %v4368_v20 = vpop.f32.mrf.mxu1  ;;  %v6005_v7 = vpop.f32.mrf.mxu0 }
 0x1b8   : > { %6614 = vst [vmem:[#allocation9_spill] sm:$0xff] %v6005_v7  ;;  %v2282_v4 = vadd.f32 %v4367_v3, %v5868_v1 }
 0x1b9   : > { %v4369_v37 = vpop.f32.mrf.mxu1  ;;  %v6008_v50 = vpop.f32.mrf.mxu0 }
 0x1ba   : > { %6615 = vst [vmem:[#allocation10_spill] sm:$0xff] %v6008_v50  ;;  %v4370_v10 = vadd.f32 %v4369_v37, %v4368_v20  ;;  %v6010_v28 = vadd.f32 %v2442_v26, %v2282_v4 }
 0x1bb   : > { %v4371_v45 = vpop.f32.mrf.mxu1  ;;  %v6012_v59 = vpop.f32.mrf.mxu0 }
 0x1bc   : > { %6616 = vst [vmem:[#allocation11_spill] sm:$0xff] %v6012_v59  ;;  %v2287_v47 = vadd.f32 %v4370_v10, %v5855_v49 }
 0x1bd   : > { %v4372_v22 = vpop.f32.mrf.mxu1  ;;  %v6015_v58 = vpop.f32.mrf.mxu0 }
 0x1be   : > { %6617 = vst [vmem:[#allocation12_spill] sm:$0xff] %v6015_v58  ;;  %v4373_v62 = vadd.f32 %v4372_v22, %v4371_v45  ;;  %v6018_v18 = vadd.f32 %v5943_v23, %v2287_v47 }
 0x1bf   : > { %v4374_v16 = vpop.f32.mrf.mxu1  ;;  %v6020_v1 = vpop.f32.mrf.mxu0 }
 0x1c0   : > { %6618 = vst [vmem:[#allocation13_spill] sm:$0xff] %v6020_v1  ;;  %v2290_v3 = vadd.f32 %v4373_v62, %v5865_v6 }
 0x1c1   : > { %v4375_v20 = vpop.f32.mrf.mxu1  ;;  %v4474_v26 = vpop.f32.mrf.mxu0 }
 0x1c2   : > { %v4376_v4 = vadd.f32 %v4375_v20, %v4374_v16  ;;  %v6024_v37 = vadd.f32 %v5946_v43, %v2290_v3 }
 0x1c3   : > { %v4377_v59 = vpop.f32.mrf.mxu1  ;;  %v4475_v49 = vpop.f32.mrf.mxu0 }
 0x1c4   : > { %v2295_v10 = vadd.f32 %v4376_v4, %v5879_v0  ;;  %v6027_v58 = vadd.f32 %v4475_v49, %v4474_v26 }
 0x1c5   : > { %v4378_v45 = vpop.f32.mrf.mxu1  ;;  %v4477_v23 = vpop.f32.mrf.mxu0 }
 0x1c6   : > { %v4379_v47 = vadd.f32 %v4378_v45, %v4377_v59  ;;  %v6030_v22 = vadd.f32 %v5955_v12, %v2295_v10 }
 0x1c7   : > { %v4380_v1 = vpop.f32.mrf.mxu1  ;;  %v4478_v6 = vpop.f32.mrf.mxu0 }
 0x1c8   : > { %v2298_v62 = vadd.f32 %v4379_v47, %v5887_v40  ;;  %v6033_v16 = vadd.f32 %v4478_v6, %v4477_v23 }
 0x1c9   : > { %v4381_v43 = vpop.f32.mrf.mxu1  ;;  %v6035_v3 = vpop.f32.mrf.mxu0 }
 0x1ca   : > { %v4382_v20 = vadd.f32 %v4381_v43, %v4380_v1  ;;  %v6038_v0 = vadd.f32 %v5962_v14, %v2298_v62 }
 0x1cb   : > { %v4383_v26 = vpop.f32.mrf.mxu1  ;;  %v6040_v4 = vpop.f32.mrf.mxu0 }
 0x1cc   : > { %v2303_v59 = vadd.f32 %v4382_v20, %v5877_v11 }
 0x1cd   : > { %v4384_v12 = vpop.f32.mrf.mxu1  ;;  %v6043_v49 = vpop.f32.mrf.mxu0 }
 0x1ce   : > { %v4385_v10 = vadd.f32 %v4384_v12, %v4383_v26  ;;  %v6046_v40 = vadd.f32 %v5951_v56, %v2303_v59 }
 0x1cf   : > { %v4386_v45 = vpop.f32.mrf.mxu1  ;;  %v6048_v23 = vpop.f32.mrf.mxu0 }
 0x1d0   : > { %v2306_v1 = vadd.f32 %v4385_v10, %v5884_v61 }
 0x1d1   : > { %v4387_v47 = vpop.f32.mrf.mxu1  ;;  %v6051_v14 = vpop.f32.mrf.mxu0 }
 0x1d2   : > { %v4388_v6 = vadd.f32 %v4387_v47, %v4386_v45  ;;  %v6054_v62 = vadd.f32 %v5958_v39, %v2306_v1 }
 0x1d3   : > { %v4389_v11 = vpop.f32.mrf.mxu1  ;;  %v6056_v43 = vpop.f32.mrf.mxu0 }
 0x1d4   : > { %v2311_v20 = vadd.f32 %v4388_v6, %v5898_v9 }
 0x1d5   : > { %v4390_v26 = vpop.f32.mrf.mxu1  ;;  %v6059_v56 = vpop.f32.mrf.mxu0 }
 0x1d6   : > { %v4391_v59 = vadd.f32 %v4390_v26, %v4389_v11  ;;  %v6062_v12 = vadd.f32 %v5969_v44, %v2311_v20 }
 0x1d7   : > { %v4392_v61 = vpop.f32.mrf.mxu1  ;;  %v6064_v10 = vpop.f32.mrf.mxu0 }
 0x1d8   : > { %6619 = vst [vmem:[#allocation14_spill] sm:$0xff] %v6062_v12  ;;  %v2314_v45 = vadd.f32 %v4391_v59, %v5902_v5 }
 0x1d9   : > { %v4393_v47 = vpop.f32.mrf.mxu1  ;;  %v6067_v39 = vpop.f32.mrf.mxu0 }
 0x1da   : > { %v4394_v1 = vadd.f32 %v4393_v47, %v4392_v61  ;;  %v6070_v50 = vadd.f32 %v5976_v63, %v2314_v45 }
 0x1db   : > { %v4395_v9 = vpop.f32.mrf.mxu1  ;;  %v6072_v6 = vpop.f32.mrf.mxu0 }
 0x1dc   : > { %6620 = vst [vmem:[#allocation15_spill] sm:$0xff] %v6070_v50  ;;  %v2319_v11 = vadd.f32 %v4394_v1, %v5896_v57 }
 0x1dd   : > { %v4396_v26 = vpop.f32.mrf.mxu1  ;;  %v6075_v44 = vpop.f32.mrf.mxu0 }
 0x1de   : > { %v4397_v20 = vadd.f32 %v4396_v26, %v4395_v9  ;;  %v6078_v7 = vadd.f32 %v5965_v2, %v2319_v11 }
 0x1df   : > { %v4398_v5 = vpop.f32.mrf.mxu1  ;;  %v6080_v59 = vpop.f32.mrf.mxu0 }
 0x1e0   : > { %6621 = vst [vmem:[#allocation16_spill] sm:$0xff] %v6078_v7  ;;  %v2322_v61 = vadd.f32 %v4397_v20, %v5900_v17 }
 0x1e1   : > { %v4399_v47 = vpop.f32.mrf.mxu1  ;;  %v6083_v63 = vpop.f32.mrf.mxu0 }
 0x1e2   : > { %v4400_v45 = vadd.f32 %v4399_v47, %v4398_v5  ;;  %v6086_v31 = vadd.f32 %v5972_v21, %v2322_v61 }
 0x1e3   : > { %v4401_v57 = vpop.f32.mrf.mxu1  ;;  %v6088_v1 = vpop.f32.mrf.mxu0 }
 0x1e4   : > { %6622 = vst [vmem:[#allocation17_spill] sm:$0xff] %v6086_v31  ;;  %v2327_v9 = vadd.f32 %v4400_v45, %v5905_v25 }
 0x1e5   : > { %v4402_v26 = vpop.f32.mrf.mxu1  ;;  %v6091_v2 = vpop.f32.mrf.mxu0 }
 0x1e6   : > { %v4403_v11 = vadd.f32 %v4402_v26, %v4401_v57  ;;  %v6094_v29 = vadd.f32 %v5983_v38, %v2327_v9 }
 0x1e7   : > { %v4404_v17 = vpop.f32.mrf.mxu1  ;;  %v6096_v20 = vpop.f32.mrf.mxu0 }
 0x1e8   : > { %6623 = vst [vmem:[#allocation18_spill] sm:$0xff] %v6094_v29  ;;  %v2330_v5 = vadd.f32 %v4403_v11, %v5910_v35 }
 0x1e9   : > { %v4405_v47 = vpop.f32.mrf.mxu1  ;;  %v6099_v21 = vpop.f32.mrf.mxu0 }
 0x1ea   : > { %v4406_v61 = vadd.f32 %v4405_v47, %v4404_v17  ;;  %v6102_v13 = vadd.f32 %v5990_v53, %v2330_v5 }
 0x1eb   : > { %v4407_v25 = vpop.f32.mrf.mxu1  ;;  %v6104_v45 = vpop.f32.mrf.mxu0 }
 0x1ec   : > { %6624 = vst [vmem:[#allocation19_spill] sm:$0xff] %v6102_v13  ;;  %v6107_v57 = vadd.f32 %v4406_v61, %v5908_v19 }
 0x1ed   : > { %v4408_v38 = vpop.f32.mrf.mxu1  ;;  %v6109_v9 = vpop.f32.mrf.mxu0 }
 0x1ee   : > { %6625 = vst [vmem:[#allocation20_spill] sm:$0xff] %v6107_v57  ;;  %v4409_v26 = vadd.f32 %v4408_v38, %v4407_v25 }
 0x1ef   : > { %v4410_v29 = vpop.f32.mrf.mxu1  ;;  %v6111_v34 = vpop.f32.mrf.mxu0 }
 0x1f0   : > { %v6114_v35 = vadd.f32 %v4409_v26, %v5916_v55 }
 0x1f1   : > { %v4411_v11 = vpop.f32.mrf.mxu1  ;;  %v6116_v17 = vpop.f32.mrf.mxu0 }
 0x1f2   : > { %6626 = vst [vmem:[#allocation21_spill] sm:$0xff] %v6114_v35  ;;  %v4412_v53 = vadd.f32 %v4411_v11, %v4410_v29 }
 0x1f3   : > { %v4413_v5 = vpop.f32.mrf.mxu1  ;;  %v6118_v47 = vpop.f32.mrf.mxu0 }
 0x1f4   : > { %v6121_v19 = vadd.f32 %v4412_v53, %v5919_v27 }
 0x1f5   : > { %v4414_v61 = vpop.f32.mrf.mxu1  ;;  %v6123_v13 = vpop.f32.mrf.mxu0 }
 0x1f6   : > { %6627 = vst [vmem:[#allocation22_spill] sm:$0xff] %v6121_v19  ;;  %v4415_v25 = vadd.f32 %v4414_v61, %v4413_v5 }
 0x1f7   : > { %v4416_v38 = vpop.f32.mrf.mxu1  ;;  %v6125_v57 = vpop.f32.mrf.mxu0 }
 0x1f8   : > { %v6128_v55 = vadd.f32 %v4415_v25, %v5927_v30 }
 0x1f9   : > { %v4417_v26 = vpop.f32.mrf.mxu1  ;;  %v6130_v35 = vpop.f32.mrf.mxu0 }
 0x1fa   : > { %6628 = vst [vmem:[#allocation23_spill] sm:$0xff] %v6128_v55  ;;  %v4418_v29 = vadd.f32 %v4417_v26, %v4416_v38 }
 0x1fb   : > { %v4419_v11 = vpop.f32.mrf.mxu1  ;;  %v6132_v50 = vpop.f32.mrf.mxu0 }
 0x1fc   : > { %v6135_v27 = vadd.f32 %v4418_v29, %v5913_v54 }
 0x1fd   : > { %v4420_v53 = vpop.f32.mrf.mxu1  ;;  %v6137_v19 = vpop.f32.mrf.mxu0 }
 0x1fe   : > { %6629 = vst [vmem:[#allocation24_spill] sm:$0xff] %v6135_v27  ;;  %v4421_v5 = vadd.f32 %v4420_v53, %v4419_v11 }
 0x1ff   : > { %v4422_v61 = vpop.f32.mrf.mxu1  ;;  %v6139_v12 = vpop.f32.mrf.mxu0 }
 0x200   : > { %v6142_v30 = vadd.f32 %v4421_v5, %v5924_v51 }
 0x201   : > { %v4423_v25 = vpop.f32.mrf.mxu1  ;;  %v6144_v55 = vpop.f32.mrf.mxu0 }
 0x202   : > { %6630 = vst [vmem:[#allocation25_spill] sm:$0xff] %v6142_v30  ;;  %v4424_v38 = vadd.f32 %v4423_v25, %v4422_v61 }
 0x203   : > { %v4425_v26 = vpop.f32.mrf.mxu1  ;;  %v6146_v31 = vpop.f32.mrf.mxu0 }
 0x204   : > { %6631 = vst [vmem:[#allocation26_spill] sm:$0xff] %v6146_v31  ;;  %v6149_v54 = vadd.f32 %v4424_v38, %v5933_v42 }
 0x205   : > { %v4426_v29 = vpop.f32.mrf.mxu1  ;;  %v6151_v27 = vpop.f32.mrf.mxu0 }
 0x206   : > { %6632 = vst [vmem:[#allocation27_spill] sm:$0xff] %v6149_v54  ;;  %6633 = vst [vmem:[#allocation28_spill] sm:$0xff] %v6151_v27  ;;  %v4427_v11 = vadd.f32 %v4426_v29, %v4425_v26 }
 0x207   : > { %v4428_v53 = vpop.f32.mrf.mxu1  ;;  %v6153_v7 = vpop.f32.mrf.mxu0 }
 0x208   : > { %6634 = vst [vmem:[#allocation29_spill] sm:$0xff] %v6153_v7  ;;  %v6156_v51 = vadd.f32 %v4427_v11, %v5941_v8  ;;  %v4482_v8 = vadd.f32 %v6040_v4, %v6035_v3 }
 0x209   : > { %v4429_v5 = vpop.f32.mrf.mxu1  ;;  %v6158_v30 = vpop.f32.mrf.mxu0 }
 0x20a   : > { %6635 = vst [vmem:[#allocation30_spill] sm:$0xff] %v6156_v51  ;;  %v4430_v61 = vadd.f32 %v4429_v5, %v4428_v53  ;;  %v4485_v5 = vadd.f32 %v6048_v23, %v6043_v49  ;;  %v4494_v49 = vadd.f32 %v6072_v6, %v6067_v39 }
 0x20b   : > { %v6160_v25 = vpop.f32.mrf.mxu1  ;;  %v6162_v31 = vpop.f32.mrf.mxu0 }
 0x20c   : > { %6636 = vst [vmem:[#allocation31_spill] sm:$0xff] %v6160_v25  ;;  %v6165_v42 = vadd.f32 %v4430_v61, %v5930_v36 }
 0x20d   : > { %v6167_v38 = vpop.f32.mrf.mxu1  ;;  %v6169_v26 = vpop.f32.mrf.mxu0 }
 0x20e   : > { %6637 = vst [vmem:[#allocation32_spill] sm:$0xff] %v6165_v42  ;;  %6638 = vst [vmem:[#allocation33_spill] sm:$0xff] %v6167_v38 }
 0x20f   : > { %v4708_v29 = vpop.f32.mrf.mxu1  ;;  %v6171_v54 = vpop.f32.mrf.mxu0 }
 0x210   : > { %v3076_v51 = vadd.f32 %v4708_v29, %v4482_v8 }
 0x211   : > { %v3067_v11 = vpop.f32.mrf.mxu1  ;;  %v6175_v53 = vpop.f32.mrf.mxu0 }
 0x212   : > { %6639 = vst [vmem:[#allocation34_spill] sm:$0xff] %v6175_v53  ;;  %v3068_v36 = vadd.f32 %v6027_v58, %v3067_v11  ;;  %v3196_v3 = vadd.f32 %v3076_v51, %v5960_v46  ;;  %v4497_v51 = vadd.f32 %v6080_v59, %v6075_v44 }
 0x213   : > { %v4709_v61 = vpop.f32.mrf.mxu1  ;;  %v6180_v42 = vpop.f32.mrf.mxu0 }
 0x214   : > { %v3194_v38 = vadd.f32 %v3068_v36, %v5948_v41  ;;  %v3079_v25 = vadd.f32 %v4709_v61, %v4485_v5  ;;  %v4506_v61 = vadd.f32 %v6104_v45, %v6099_v21  ;;  %v4509_v21 = vadd.f32 %v6111_v34, %v6109_v9 }
 0x215   : > { %v3070_v7 = vpop.f32.mrf.mxu1  ;;  %v6183_v27 = vpop.f32.mrf.mxu0 }
 0x216   : > { %v3197_v4 = vadd.f32 %v3079_v25, %v5967_v48  ;;  %v3071_v53 = vadd.f32 %v6033_v16, %v3070_v7  ;;  %v4488_v48 = vadd.f32 %v6056_v43, %v6051_v14 }
 0x217   : > { %v4712_v58 = vpop.f32.mrf.mxu1  ;;  %v6195_v41 = vpop.f32.mrf.mxu0 }
 0x218   : > { %v6199_v23 = vpack.c.bf16 %v3197_v4, %v3196_v3  ;;  %v3195_v46 = vadd.f32 %v3071_v53, %v5953_v60  ;;  %v3092_v29 = vadd.f32 %v4712_v58, %v4494_v49  ;;  %v4491_v60 = vadd.f32 %v6064_v10, %v6059_v56 }
 0x219   : > { %v3083_v7 = vpop.f32.mrf.mxu1  ;;  %v6204_v16 = vpop.f32.mrf.mxu0 }
 0x21a   : > { %4171 = vst [vmem:[%s6193_s26 + $0x8] sm:$0xff] %v6199_v23   ;;  %v6210_v25 = vpack.c.bf16 %v3195_v46, %v3194_v38  ;;  %v3084_v8 = vadd.f32 %v4488_v48, %v3083_v7  ;;  %v3388_v44 = vunpack.c.l.bf16 %v6199_v23  ;;  %v3200_v56 = vadd.f32 %v3092_v29, %v5988_v32 }
 0x21b   : > { %v4713_v39 = vpop.f32.mrf.mxu1  ;;  %v6212_v6 = vpop.f32.mrf.mxu0  ;;  %v3389_v45 = vunpack.c.h.bf16 %v6199_v23 }
 0x21c   : > { %4080 = vst [vmem:[%s6193_s26] sm:$0xff] %v6210_v25   ;;  %v3386_v14 = vunpack.c.l.bf16 %v6210_v25  ;;  %v3387_v43 = vunpack.c.h.bf16 %v6210_v25  ;;  %v3095_v11 = vadd.f32 %v4713_v39, %v4497_v51  ;;  %v3198_v59 = vadd.f32 %v3084_v8, %v5974_v24 }
 0x21d   : > { %v3086_v38 = vpop.f32.mrf.mxu1  ;;  %v6222_v53 = vpop.f32.mrf.mxu0  ;;  %v4503_v51 = vadd.f32 %v6096_v20, %v6091_v2 }
 0x21e   : > { %v3418_v5 = vadd.f32 %v3387_v43, %v3386_v14  ;;  %v3201_v10 = vadd.f32 %v3095_v11, %v5996_v15  ;;  %v3087_v36 = vadd.f32 %v4491_v60, %v3086_v38  ;;  %v4500_v15 = vadd.f32 %v6088_v1, %v6083_v63 }
 0x21f   : > { %v4716_v3 = vpop.f32.mrf.mxu1  ;;  %v6232_v24 = vpop.f32.mrf.mxu0  ;;  %v4518_v38 = vadd.f32 %v6132_v50, %v6130_v35 }
 0x220   : > { %v3419_v4 = vadd.f32 %v3418_v5, %v3388_v44  ;;  %v6236_v58 = vpack.c.bf16 %v3201_v10, %v3200_v56  ;;  %v3199_v49 = vadd.f32 %v3087_v36, %v5981_v33  ;;  %v3108_v46 = vadd.f32 %v4716_v3, %v4506_v61 }
 0x221   : > { %v3099_v48 = vpop.f32.mrf.mxu1  ;;  %v6239_v32 = vpop.f32.mrf.mxu0  ;;  %v4512_v3 = vadd.f32 %v6118_v47, %v6116_v17 }
 0x222   : > { %4173 = vst [vmem:[%s6193_s26 + $0x18] sm:$0xff] %v6236_v58   ;;  %v6248_v7 = vpack.c.bf16 %v3199_v49, %v3198_v59  ;;  %v3420_v63 = vadd.f32 %v3419_v4, %v3389_v45  ;;  %v3100_v34 = vadd.f32 %v4500_v15, %v3099_v48  ;;  %v3204_v9 = vadd.f32 %v3108_v46, %v6018_v18 }
 0x223   : > { %v4717_v33 = vpop.f32.mrf.mxu1  ;;  %v6252_v29 = vpop.f32.mrf.mxu0  ;;  %v3392_v5 = vunpack.c.l.bf16 %v6236_v58  ;;  %v4521_v49 = vadd.f32 %v6139_v12, %v6137_v19  ;;  %v3393_v46 = vunpack.c.h.bf16 %v6236_v58 }
 0x224   : > { %4172 = vst [vmem:[%s6193_s26 + $0x10] sm:$0xff] %v6248_v7   ;;  %v3390_v8 = vunpack.c.l.bf16 %v6248_v7  ;;  %v3111_v1 = vadd.f32 %v4717_v33, %v4509_v21  ;;  %v3391_v11 = vunpack.c.h.bf16 %v6248_v7  ;;  %v3202_v36 = vadd.f32 %v3100_v34, %v6003_v52 }
 0x225   : > { %v3102_v39 = vpop.f32.mrf.mxu1  ;;  %v6260_v60 = vpop.f32.mrf.mxu0 }
 0x226   : > { %v3421_v2 = vadd.f32 %v3420_v63, %v3390_v8  ;;  %v3205_v20 = vadd.f32 %v3111_v1, %v6024_v37  ;;  %v3103_v59 = vadd.f32 %v4503_v51, %v3102_v39 }
 0x227   : > { %v4720_v56 = vpop.f32.mrf.mxu1  ;;  %v6269_v10 = vpop.f32.mrf.mxu0 }
 0x228   : > { %v3422_v18 = vadd.f32 %v3421_v2, %v3391_v11  ;;  %v6274_v61 = vpack.c.bf16 %v3205_v20, %v3204_v9  ;;  %v3203_v37 = vadd.f32 %v3103_v59, %v6010_v28  ;;  %v3124_v4 = vadd.f32 %v4720_v56, %v4518_v38  ;;  %v6640_v56 = vld [vmem:[#allocation26_spill] sm:$0xff] }
 0x229   : > { %v3115_v50 = vpop.f32.mrf.mxu1  ;;  %v6279_v35 = vpop.f32.mrf.mxu0  ;;  %v4515_v28 = vadd.f32 %v6125_v57, %v6123_v13  ;;  %v4530_v9 = vadd.f32 %v6162_v31, %v6158_v30 }
 0x22a   : > { %v3423_v48 = vadd.f32 %v3422_v18, %v3392_v5  ;;  %4175 = vst [vmem:[%s6193_s26 + $0x28] sm:$0xff] %v6274_v61   ;;  %v6288_v52 = vpack.c.bf16 %v3203_v37, %v3202_v36  ;;  %v3116_v19 = vadd.f32 %v4512_v3, %v3115_v50  ;;  %v3208_v51 = vadd.f32 %v3124_v4, %v6046_v40  ;;  %v6642_v50 = vld [vmem:[#allocation29_spill] sm:$0xff] }
 0x22b   : > { %v4721_v17 = vpop.f32.mrf.mxu1  ;;  %v6292_v47 = vpop.f32.mrf.mxu0  ;;  %v3396_v39 = vunpack.c.l.bf16 %v6274_v61  ;;  %v4524_v18 = vadd.f32 %v6640_v56, %v6144_v55  ;;  %v4533_v37 = vadd.f32 %v6171_v54, %v6169_v26  ;;  %v3397_v3 = vunpack.c.h.bf16 %v6274_v61 }
 0x22c   : > { %4174 = vst [vmem:[%s6193_s26 + $0x20] sm:$0xff] %v6288_v52   ;;  %v3394_v15 = vunpack.c.l.bf16 %v6288_v52  ;;  %v3424_v12 = vadd.f32 %v3423_v48, %v3393_v46  ;;  %v3127_v21 = vadd.f32 %v4721_v17, %v4521_v49  ;;  %v3395_v34 = vunpack.c.h.bf16 %v6288_v52 }
 0x22d   : > { %v3118_v33 = vpop.f32.mrf.mxu1  ;;  %v6300_v63 = vpop.f32.mrf.mxu0  ;;  %v3206_v59 = vadd.f32 %v3116_v19, %v6030_v22 }
 0x22e   : > { %v3425_v13 = vadd.f32 %v3424_v12, %v3394_v15  ;;  %v3209_v57 = vadd.f32 %v3127_v21, %v6054_v62  ;;  %v3119_v1 = vadd.f32 %v4515_v28, %v3118_v33  ;;  %v6643_v12 = vld [vmem:[#allocation16_spill] sm:$0xff] }
 0x22f   : > { %v4724_v2 = vpop.f32.mrf.mxu1  ;;  %v6309_v20 = vpop.f32.mrf.mxu0 }
 0x230   : > { %v3426_v40 = vadd.f32 %v3425_v13, %v3395_v34  ;;  %v6314_v38 = vpack.c.bf16 %v3209_v57, %v3208_v51  ;;  %v3207_v62 = vadd.f32 %v3119_v1, %v6038_v0  ;;  %v3140_v36 = vadd.f32 %v4724_v2, %v4530_v9  ;;  %v6641_v0 = vld [vmem:[#allocation28_spill] sm:$0xff]  ;;  %v6644_v57 = vld [vmem:[#allocation17_spill] sm:$0xff] }
 0x231   : > { %v3131_v31 = vpop.f32.mrf.mxu1  ;;  %v6319_v30 = vpop.f32.mrf.mxu0  ;;  %v4527_v49 = vadd.f32 %v6642_v50, %v6641_v0  ;;  %v4542_v2 = vadd.f32 %v6212_v6, %v6204_v16  ;;  %v6647_v0 = vld [vmem:[#allocation34_spill] sm:$0xff] }
 0x232   : > { %v3427_v4 = vadd.f32 %v3426_v40, %v3396_v39  ;;  %4177 = vst [vmem:[%s6193_s26 + $0x38] sm:$0xff] %v6314_v38   ;;  %v6328_v22 = vpack.c.bf16 %v3207_v62, %v3206_v59  ;;  %v3132_v26 = vadd.f32 %v4524_v18, %v3131_v31  ;;  %v3212_v19 = vadd.f32 %v3140_v36, %v6643_v12  ;;  %v6645_v18 = vld [vmem:[#allocation14_spill] sm:$0xff] }
 0x233   : > { %v4725_v55 = vpop.f32.mrf.mxu1  ;;  %v6332_v48 = vpop.f32.mrf.mxu0  ;;  %v3400_v40 = vunpack.c.l.bf16 %v6314_v38  ;;  %v4536_v50 = vadd.f32 %v6180_v42, %v6647_v0  ;;  %v4539_v12 = vadd.f32 %v6195_v41, %v6183_v27  ;;  %v6649_v42 = vld [vmem:[#allocation4_spill] sm:$0xff] }
 0x234   : > { %4176 = vst [vmem:[%s6193_s26 + $0x30] sm:$0xff] %v6328_v22   ;;  %v3398_v28 = vunpack.c.l.bf16 %v6328_v22  ;;  %v3428_v54 = vadd.f32 %v3427_v4, %v3397_v3  ;;  %v3143_v17 = vadd.f32 %v4725_v55, %v4533_v37  ;;  %v3399_v33 = vunpack.c.h.bf16 %v6328_v22  ;;  %v6646_v37 = vld [vmem:[#allocation15_spill] sm:$0xff] }
 0x235   : > { %v3134_v21 = vpop.f32.mrf.mxu1  ;;  %v6340_v51 = vpop.f32.mrf.mxu0  ;;  %v3210_v36 = vadd.f32 %v3132_v26, %v6645_v18  ;;  %v3401_v55 = vunpack.c.h.bf16 %v6314_v38 }
 0x236   : > { %v3429_v13 = vadd.f32 %v3428_v54, %v3398_v28  ;;  %v3213_v1 = vadd.f32 %v3143_v17, %v6644_v57  ;;  %v3135_v9 = vadd.f32 %v4527_v49, %v3134_v21  ;;  %v4545_v54 = vadd.f32 %v6232_v24, %v6222_v53  ;;  %v6651_v57 = vld [vmem:[#allocation5_spill] sm:$0xff] }
 0x237   : > { %v4728_v59 = vpop.f32.mrf.mxu1  ;;  %v6349_v62 = vpop.f32.mrf.mxu0 }
 0x238   : > { %v3430_v56 = vadd.f32 %v3429_v13, %v3399_v33  ;;  %v6354_v31 = vpack.c.bf16 %v3213_v1, %v3212_v19  ;;  %v3211_v4 = vadd.f32 %v3135_v9, %v6646_v37  ;;  %v3156_v49 = vadd.f32 %v4728_v59, %v4542_v2  ;;  %v6648_v19 = vld [vmem:[#allocation20_spill] sm:$0xff]  ;;  %v6650_v13 = vld [vmem:[#allocation21_spill] sm:$0xff] }
 0x239   : > { %v3147_v16 = vpop.f32.mrf.mxu1  ;;  %v4564_v6 = vpop.f32.mrf.mxu0  ;;  %v2496_v21 = vadd.f32 %v6649_v42, %v6648_v19  ;;  %v2499_v1 = vadd.f32 %v6651_v57, %v6650_v13  ;;  %v4554_v19 = vadd.f32 %v6292_v47, %v6279_v35  ;;  %v4557_v47 = vadd.f32 %v6309_v20, %v6300_v63 }
 0x23a   : > { %v3431_v17 = vadd.f32 %v3430_v56, %v3400_v40  ;;  %4179 = vst [vmem:[%s6193_s26 + $0x48] sm:$0xff] %v6354_v31   ;;  %v6366_v26 = vpack.c.bf16 %v3211_v4, %v3210_v36  ;;  %v3148_v2 = vadd.f32 %v4536_v50, %v3147_v16  ;;  %v6598_v0 = vunpack.c.l.bf16 %v6354_v31  ;;  %v6652_v16 = vld [vmem:[#allocation18_spill] sm:$0xff] }
 0x23b   : > { %v4729_v9 = vpop.f32.mrf.mxu1  ;;  %v4565_v56 = vpop.f32.mrf.mxu0  ;;  %v3216_v18 = vadd.f32 %v3156_v49, %v2496_v21 }
 0x23c   : > { %4178 = vst [vmem:[%s6193_s26 + $0x40] sm:$0xff] %v6366_v26   ;;  %v3402_v53 = vunpack.c.l.bf16 %v6366_v26  ;;  %v3432_v24 = vadd.f32 %v3431_v17, %v3401_v55  ;;  %v3159_v59 = vadd.f32 %v4729_v9, %v4545_v54  ;;  %v6599_v27 = vunpack.c.h.bf16 %v6366_v26  ;;  %v6653_v17 = vld [vmem:[#allocation19_spill] sm:$0xff] }
 0x23d   : > { %v3150_v36 = vpop.f32.mrf.mxu1  ;;  %v3214_v49 = vadd.f32 %v3148_v2, %v6652_v16  ;;  %v4567_v13 = vpop.f32.mrf.mxu0  ;;  %v3405_v9 = vunpack.c.h.bf16 %v6354_v31  ;;  %v6654_v2 = vld [vmem:[#allocation31_spill] sm:$0xff] }
 0x23e   : > { %v3433_v41 = vadd.f32 %v3432_v24, %v3402_v53  ;;  %v3217_v37 = vadd.f32 %v3159_v59, %v2499_v1  ;;  %v3151_v4 = vadd.f32 %v4539_v12, %v3150_v36  ;;  %v4548_v12 = vadd.f32 %v6252_v29, %v6239_v32  ;;  %v6655_v59 = vld [vmem:[#allocation33_spill] sm:$0xff]  ;;  %v6656_v29 = vld [vmem:[#allocation24_spill] sm:$0xff]  ;;  %v6657_v36 = vld [vmem:[#allocation6_spill] sm:$0xff] }
 0x23f   : > { %v4732_v42 = vpop.f32.mrf.mxu1  ;;  %v4551_v32 = vadd.f32 %v6269_v10, %v6260_v60  ;;  %v6661_v60 = vld [vmem:[#allocation7_spill] sm:$0xff] }
 0x240   : > { %v3434_v50 = vadd.f32 %v3433_v41, %v6599_v27  ;;  %v6388_v54 = vpack.c.bf16 %v3217_v37, %v3216_v18  ;;  %v3215_v21 = vadd.f32 %v3151_v4, %v6653_v17  ;;  %v3172_v57 = vadd.f32 %v4732_v42, %v4554_v19  ;;  %v6658_v37 = vld [vmem:[#allocation25_spill] sm:$0xff]  ;;  %v6659_v4 = vld [vmem:[#allocation8_spill] sm:$0xff] }
 0x241   : > { %v3163_v1 = vpop.f32.mrf.mxu1  ;;  %v4433_v18 = vadd.f32 %v6655_v59, %v6654_v2  ;;  %v2512_v41 = vadd.f32 %v6657_v36, %v6656_v29  ;;  %v2515_v19 = vadd.f32 %v6659_v4, %v6658_v37  ;;  %v6662_v2 = vld [vmem:[#allocation23_spill] sm:$0xff]  ;;  %v6663_v59 = vld [vmem:[#allocation9_spill] sm:$0xff]  ;;  %v4566_v37 = vadd.f32 %v4565_v56, %v4564_v6 }
 0x242   : > { %v3435_v35 = vadd.f32 %v3434_v50, %v6598_v0  ;;  %4181 = vst [vmem:[%s6193_s26 + $0x58] sm:$0xff] %v6388_v54   ;;  %v6400_v24 = vpack.c.bf16 %v3215_v21, %v3214_v49  ;;  %v3164_v20 = vadd.f32 %v4548_v12, %v3163_v1  ;;  %v4568_v49 = vpop.f32.mrf.mxu0  ;;  %v6660_v21 = vld [vmem:[#allocation22_spill] sm:$0xff]  ;;  %v2507_v29 = vadd.f32 %v6663_v59, %v6662_v2  ;;  %v6664_v12 = vld [vmem:[#allocation3_spill] sm:$0xff] }
 0x243   : > { %v4733_v42 = vpop.f32.mrf.mxu1  ;;  %v3220_v17 = vadd.f32 %v3172_v57, %v2512_v41  ;;  %v2504_v10 = vadd.f32 %v6661_v60, %v6660_v21  ;;  %v2370_v1 = vadd.f32 %v4433_v18, %v6664_v12  ;;  %v3408_v57 = vunpack.c.l.bf16 %v6388_v54  ;;  %v6670_v12 = vld [vmem:[#allocation30_spill] sm:$0xff] }
 0x244   : > { %4180 = vst [vmem:[%s6193_s26 + $0x50] sm:$0xff] %v6400_v24   ;;  %v3406_v50 = vunpack.c.l.bf16 %v6400_v24  ;;  %v3436_v63 = vadd.f32 %v3435_v35, %v3405_v9  ;;  %v3175_v16 = vadd.f32 %v4733_v42, %v4557_v47  ;;  %v3407_v4 = vunpack.c.h.bf16 %v6400_v24 }
 0x245   : > { %v3166_v36 = vpop.f32.mrf.mxu1  ;;  %v4569_v41 = vadd.f32 %v4568_v49, %v4567_v13  ;;  %v3218_v21 = vadd.f32 %v3164_v20, %v2504_v10  ;;  %v4560_v18 = vadd.f32 %v6332_v48, %v6319_v30  ;;  %v4563_v49 = vadd.f32 %v6349_v62, %v6340_v51 }
 0x246   : > { %v3437_v0 = vadd.f32 %v3436_v63, %v3406_v50  ;;  %v3221_v27 = vadd.f32 %v3175_v16, %v2515_v19  ;;  %v3167_v35 = vadd.f32 %v4551_v32, %v3166_v36  ;;  %v3409_v63 = vunpack.c.h.bf16 %v6388_v54  ;;  %v6665_v19 = vld [vmem:[#allocation32_spill] sm:$0xff]  ;;  %v6668_v36 = vld [vmem:[#allocation27_spill] sm:$0xff] }
 0x247   : > { %v4736_v47 = vpop.f32.mrf.mxu1 }
 0x248   : > { %v3438_v42 = vadd.f32 %v3437_v0, %v3407_v4  ;;  %v6426_v6 = vpack.c.bf16 %v3221_v27, %v3220_v17  ;;  %v3219_v56 = vadd.f32 %v3167_v35, %v2507_v29  ;;  %v3188_v60 = vadd.f32 %v4736_v47, %v4566_v37  ;;  %v6666_v0 = vld [vmem:[#allocation10_spill] sm:$0xff]  ;;  %v6667_v27 = vld [vmem:[#allocation12_spill] sm:$0xff]  ;;  %v6669_v37 = vld [vmem:[#allocation11_spill] sm:$0xff] }
 0x249   : > { %v3179_v2 = vpop.f32.mrf.mxu1  ;;  %v2528_v20 = vadd.f32 %v6666_v0, %v6665_v19  ;;  %v2531_v16 = vadd.f32 %v6667_v27, %v2370_v1  ;;  %v2520_v35 = vadd.f32 %v6669_v37, %v6668_v36  ;;  %v6671_v1 = vld [vmem:[#allocation13_spill] sm:$0xff] }
 0x24a   : > { %v3439_v32 = vadd.f32 %v3438_v42, %v3408_v57  ;;  %4183 = vst [vmem:[%s6193_s26 + $0x68] sm:$0xff] %v6426_v6   ;;  %v6435_v13 = vpack.c.bf16 %v3219_v56, %v3218_v21  ;;  %v3180_v48 = vadd.f32 %v4560_v18, %v3179_v2  ;;  %v2523_v47 = vadd.f32 %v6671_v1, %v6670_v12 }
 0x24b   : > { %v4737_v17 = vpop.f32.mrf.mxu1  ;;  %v3224_v29 = vadd.f32 %v3188_v60, %v2528_v20  ;;  %v3412_v2 = vunpack.c.l.bf16 %v6426_v6  ;;  %v3413_v19 = vunpack.c.h.bf16 %v6426_v6 }
 0x24c   : > { %4182 = vst [vmem:[%s6193_s26 + $0x60] sm:$0xff] %v6435_v13   ;;  %v3410_v10 = vunpack.c.l.bf16 %v6435_v13  ;;  %v3440_v30 = vadd.f32 %v3439_v32, %v3409_v63  ;;  %v3191_v59 = vadd.f32 %v4737_v17, %v4569_v41  ;;  %v3411_v62 = vunpack.c.h.bf16 %v6435_v13 }
 0x24d   : > { %v3182_v51 = vpop.f32.mrf.mxu1  ;;  %v3222_v60 = vadd.f32 %v3180_v48, %v2520_v35 }
 0x24e   : > { %v3441_v42 = vadd.f32 %v3440_v30, %v3410_v10  ;;  %v3225_v21 = vadd.f32 %v3191_v59, %v2531_v16  ;;  %v3183_v56 = vadd.f32 %v4563_v49, %v3182_v51 }
 0x250   : > { %v3442_v41 = vadd.f32 %v3441_v42, %v3411_v62  ;;  %v6457_v32 = vpack.c.bf16 %v3225_v21, %v3224_v29  ;;  %v3223_v18 = vadd.f32 %v3183_v56, %v2523_v47 }
 0x252   : > { %v3443_v0 = vadd.f32 %v3442_v41, %v3412_v2  ;;  %4185 = vst [vmem:[%s6193_s26 + $0x78] sm:$0xff] %v6457_v32   ;;  %v6464_v20 = vpack.c.bf16 %v3223_v18, %v3222_v60  ;;  %v3416_v30 = vunpack.c.l.bf16 %v6457_v32  ;;  %v3417_v59 = vunpack.c.h.bf16 %v6457_v32 }
 0x254   : > { %4184 = vst [vmem:[%s6193_s26 + $0x70] sm:$0xff] %v6464_v20   ;;  %v3414_v27 = vunpack.c.l.bf16 %v6464_v20  ;;  %v3444_v16 = vadd.f32 %v3443_v0, %v3413_v19  ;;  %v3415_v49 = vunpack.c.h.bf16 %v6464_v20 }
 0x256   : > { %v3445_v17 = vadd.f32 %v3444_v16, %v3414_v27 }
 0x258   : > { %v3446_v48 = vadd.f32 %v3445_v17, %v3415_v49 }
 0x25a   : > { %v3447_v29 = vadd.f32 %v3446_v48, %v3416_v30 }
 0x25c   : > { %v3448_v36 = vadd.f32 %v3447_v29, %v3417_v59 }
 0x25e   : > { %v3449_v37 = vrot.slane %v3448_v36, 4 }
 0x260   : > { %v3450_v35 = vadd.f32 %v3449_v37, %v3448_v36 }
 0x262   : > { %v3451_v12 = vrot.slane %v3450_v35, 2 }
 0x264   : > { %v3452_v1 = vadd.f32 %v3451_v12, %v3450_v35 }
 0x266   : > { %v3453_v47 = vrot.slane %v3452_v1, 1 }
 0x268   : > { %v6482_v51 = vadd.f32 %v3453_v47, %v3452_v1 }
 0x26a   : > { %v6485_v42 = vmul.f32 0.00390625, %v6482_v51 }
 0x26c   : > { %v3456_v21 = vsub.f32 %v3386_v14, %v6485_v42  ;;  %v3457_v56 = vsub.f32 %v3387_v43, %v6485_v42  ;;  %v3458_v41 = vsub.f32 %v3388_v44, %v6485_v42  ;;  %v3459_v0 = vsub.f32 %v3389_v45, %v6485_v42 }
 0x26d   : > { %v3460_v16 = vsub.f32 %v3390_v8, %v6485_v42  ;;  %v3461_v25 = vsub.f32 %v3391_v11, %v6485_v42  ;;  %v3462_v44 = vsub.f32 %v3392_v5, %v6485_v42  ;;  %v3463_v23 = vsub.f32 %v3393_v46, %v6485_v42 }
 0x26e   : > { %v3488_v60 = vmul.f32 %v3456_v21, %v3456_v21  ;;  %v3489_v18 = vmul.f32 %v3457_v56, %v3457_v56  ;;  %v3490_v17 = vmul.f32 %v3458_v41, %v3458_v41  ;;  %v3491_v43 = vmul.f32 %v3459_v0, %v3459_v0 }
 0x26f   : > { %v3492_v29 = vmul.f32 %v3460_v16, %v3460_v16  ;;  %v3493_v45 = vmul.f32 %v3461_v25, %v3461_v25  ;;  %v3464_v37 = vsub.f32 %v3394_v15, %v6485_v42  ;;  %v3494_v7 = vmul.f32 %v3462_v44, %v3462_v44 }
 0x270   : > { %v3520_v14 = vadd.f32 %v3489_v18, %v3488_v60  ;;  %v3465_v35 = vsub.f32 %v3395_v34, %v6485_v42  ;;  %v3495_v12 = vmul.f32 %v3463_v23, %v3463_v23  ;;  %v3466_v1 = vsub.f32 %v3396_v39, %v6485_v42 }
 0x271   : > { %v3496_v58 = vmul.f32 %v3464_v37, %v3464_v37  ;;  %v3467_v47 = vsub.f32 %v3397_v3, %v6485_v42  ;;  %v3468_v56 = vsub.f32 %v3398_v28, %v6485_v42  ;;  %v3469_v41 = vsub.f32 %v3399_v33, %v6485_v42 }
 0x272   : > { %v3521_v48 = vadd.f32 %v3520_v14, %v3490_v17  ;;  %v3497_v21 = vmul.f32 %v3465_v35, %v3465_v35  ;;  %v3498_v52 = vmul.f32 %v3466_v1, %v3466_v1  ;;  %v3470_v18 = vsub.f32 %v3400_v40, %v6485_v42 }
 0x273   : > { %v3499_v60 = vmul.f32 %v3467_v47, %v3467_v47  ;;  %v3500_v61 = vmul.f32 %v3468_v56, %v3468_v56  ;;  %v3471_v0 = vsub.f32 %v3401_v55, %v6485_v42  ;;  %v3501_v16 = vmul.f32 %v3469_v41, %v3469_v41 }
 0x274   : > { %v3522_v36 = vadd.f32 %v3521_v48, %v3491_v43  ;;  %v3472_v17 = vsub.f32 %v3402_v53, %v6485_v42  ;;  %v3502_v22 = vmul.f32 %v3470_v18, %v3470_v18  ;;  %v6672_v14 = vunpack.c.h.bf16 %v6366_v26 }
 0x275   : > { %v3503_v43 = vmul.f32 %v3471_v0, %v3471_v0  ;;  %v6673_v48 = vunpack.c.l.bf16 %v6354_v31  ;;  %v3476_v23 = vsub.f32 %v3406_v50, %v6485_v42  ;;  %v3479_v35 = vsub.f32 %v3409_v63, %v6485_v42 }
 0x276   : > { %v3523_v8 = vadd.f32 %v3522_v36, %v3492_v29  ;;  %v3473_v25 = vsub.f32 %v6672_v14, %v6485_v42  ;;  %v3504_v38 = vmul.f32 %v3472_v17, %v3472_v17  ;;  %v3475_v29 = vsub.f32 %v3405_v9, %v6485_v42 }
 0x277   : > { %v3474_v44 = vsub.f32 %v6673_v48, %v6485_v42  ;;  %v3508_v31 = vmul.f32 %v3476_v23, %v3476_v23  ;;  %v3481_v1 = vsub.f32 %v3411_v62, %v6485_v42  ;;  %v3483_v47 = vsub.f32 %v3413_v19, %v6485_v42 }
 0x278   : > { %v3524_v11 = vadd.f32 %v3523_v8, %v3493_v45  ;;  %v3505_v36 = vmul.f32 %v3473_v25, %v3473_v25  ;;  %v3477_v8 = vsub.f32 %v3407_v4, %v6485_v42  ;;  %v3507_v37 = vmul.f32 %v3475_v29, %v3475_v29 }
 0x279   : > { %v3506_v26 = vmul.f32 %v3474_v44, %v3474_v44  ;;  %v3485_v56 = vsub.f32 %v3415_v49, %v6485_v42  ;;  %v3486_v6 = vsub.f32 %v3416_v30, %v6485_v42  ;;  %v3487_v41 = vsub.f32 %v3417_v59, %v6485_v42 }
 0x27a   : > { %v3525_v5 = vadd.f32 %v3524_v11, %v3494_v7  ;;  %v3478_v11 = vsub.f32 %v3408_v57, %v6485_v42 }
 0x27c   : > { %v3526_v46 = vadd.f32 %v3525_v5, %v3495_v12  ;;  %v3509_v12 = vmul.f32 %v3477_v8, %v3477_v8  ;;  %v3480_v5 = vsub.f32 %v3410_v10, %v6485_v42  ;;  %v3510_v24 = vmul.f32 %v3478_v11, %v3478_v11 }
 0x27e   : > { %v3527_v15 = vadd.f32 %v3526_v46, %v3496_v58  ;;  %v3511_v58 = vmul.f32 %v3479_v35, %v3479_v35  ;;  %v3482_v46 = vsub.f32 %v3412_v2, %v6485_v42  ;;  %v3512_v54 = vmul.f32 %v3480_v5, %v3480_v5 }
 0x280   : > { %v3528_v34 = vadd.f32 %v3527_v15, %v3497_v21  ;;  %v3513_v21 = vmul.f32 %v3481_v1, %v3481_v1  ;;  %v3484_v15 = vsub.f32 %v3414_v27, %v6485_v42  ;;  %v3514_v13 = vmul.f32 %v3482_v46, %v3482_v46 }
 0x281   : > { %v3517_v27 = vmul.f32 %v3485_v56, %v3485_v56 }
 0x282   : > { %v3529_v39 = vadd.f32 %v3528_v34, %v3498_v52  ;;  %v3515_v52 = vmul.f32 %v3483_v47, %v3483_v47  ;;  %v3516_v19 = vmul.f32 %v3484_v15, %v3484_v15 }
 0x284   : > { %v3530_v3 = vadd.f32 %v3529_v39, %v3499_v60  ;;  %v3518_v39 = vmul.f32 %v3486_v6, %v3486_v6 }
 0x286   : > { %v3531_v28 = vadd.f32 %v3530_v3, %v3500_v61  ;;  %v3519_v61 = vmul.f32 %v3487_v41, %v3487_v41 }
 0x288   : > { %v3532_v33 = vadd.f32 %v3531_v28, %v3501_v16 }
 0x28a   : > { %v3533_v40 = vadd.f32 %v3532_v33, %v3502_v22 }
 0x28c   : > { %v3534_v55 = vadd.f32 %v3533_v40, %v3503_v43 }
 0x28e   : > { %v3535_v53 = vadd.f32 %v3534_v55, %v3504_v38 }
 0x290   : > { %v3536_v45 = vadd.f32 %v3535_v53, %v3505_v36 }
 0x292   : > { %v3537_v7 = vadd.f32 %v3536_v45, %v3506_v26 }
 0x294   : > { %v3538_v9 = vadd.f32 %v3537_v7, %v3507_v37 }
 0x296   : > { %v3539_v50 = vadd.f32 %v3538_v9, %v3508_v31 }
 0x298   : > { %v3540_v4 = vadd.f32 %v3539_v50, %v3509_v12 }
 0x29a   : > { %v3541_v57 = vadd.f32 %v3540_v4, %v3510_v24 }
 0x29c   : > { %v3542_v63 = vadd.f32 %v3541_v57, %v3511_v58 }
 0x29e   : > { %v3543_v10 = vadd.f32 %v3542_v63, %v3512_v54 }
 0x2a0   : > { %v3544_v62 = vadd.f32 %v3543_v10, %v3513_v21 }
 0x2a2   : > { %v3545_v2 = vadd.f32 %v3544_v62, %v3514_v13 }
 0x2a4   : > { %v3546_v34 = vadd.f32 %v3545_v2, %v3515_v52 }
 0x2a6   : > { %v3547_v60 = vadd.f32 %v3546_v34, %v3516_v19 }
 0x2a8   : > { %v3548_v18 = vadd.f32 %v3547_v60, %v3517_v27 }
 0x2aa   : > { %v3549_v20 = vadd.f32 %v3548_v18, %v3518_v39 }
 0x2ac   : > { %v3550_v49 = vadd.f32 %v3549_v20, %v3519_v61 }
 0x2ae   : > { %v3551_v3 = vrot.slane %v3550_v49, 4 }
 0x2b0   : > { %v3552_v0 = vadd.f32 %v3551_v3, %v3550_v49 }
 0x2b2   : > { %v3553_v16 = vrot.slane %v3552_v0, 2 }
 0x2b4   : > { %v3554_v28 = vadd.f32 %v3553_v16, %v3552_v0 }
 0x2b6   : > { %v3555_v17 = vrot.slane %v3554_v28, 1 }
 0x2b8   : > { %v3556_v30 = vadd.f32 %v3555_v17, %v3554_v28 }
 0x2ba   : > { %v3558_v32 = vsel %vm437_vm0, %v6482_v51, %v3556_v30 }
 0x2bb   : > { %3559 = vst [vmem:[%s235_s28] sm:$0x3] %v3558_v32 }
 0x2bc PF: > { %s16_s18 = sadd.s32 1, %s4917_s18  }
 0x2bd   : > { %p13_p4 = scmp.ge.s32.totalorder %s16_s18, 4  }
 0x2bf   :  { %15 = sbr.rel (!%p13_p4) target bundleno = 1 (0x1), region = 82 }

</bundles_post_ra>
